<compile_context>
chip_gen: v6e
topology: v6e:2x2x1
jax: 0.10.0
libtpu: 0.0.40
codegen_flags: <defaults>
</compile_context>

<pallas_src>
import functools

import jax
import jax.numpy as jnp
import numpy as np
from jax import lax
from jax.experimental import pallas as pl
from jax.experimental.pallas import tpu as pltpu


def _round_up(x, m):
    return (x + m - 1) // m * m


def _vmem_limit():
    # Raise the scoped-VMEM limit where the chip allows it (v5e/v6e: 128 MiB
    # physical), stay conservative on v7x (64 MiB physical).
    try:
        cap = pltpu.get_tpu_info().vmem_capacity_bytes
        return int(max(32 << 20, min(cap * 5 // 8, 96 << 20)))
    except Exception:
        return 32 << 20


_VMEM_LIMIT = _vmem_limit()


# ----------------------------- Pallas kernels ------------------------------

def _matmul_bias_kernel(x_ref, w_ref, b_ref, o_ref):
    # x: (TM, K) any float dtype (cast folded in), w: (K, Cout) compute dtype,
    # b: (1, Cout) f32, o: (TM, Cout) out dtype.
    x = x_ref[...].astype(w_ref.dtype)
    acc = jnp.dot(x, w_ref[...], preferred_element_type=jnp.float32)
    o_ref[...] = (acc + b_ref[...]).astype(o_ref.dtype)


def _lateral_kernel(x_ref, s_ref, w_ref, b_ref, o_ref, *, trh, width):
    # Fused: out = conv1x1(x) + bias + nearest_upsample2x(skip).
    # x: (1, TRH*W, Cin)  (HBM-flattened rows, f32 -> cast in-kernel)
    # s: (1, (TRH//2)*W, Cout) bf16 (width already duplicated, rows duplicated here)
    # w: (Cin, Cout), b: (1, Cout) f32, o: (1, TRH*W, Cout) bf16.
    xv = x_ref[0].astype(w_ref.dtype)
    conv = jnp.dot(xv, w_ref[...], preferred_element_type=jnp.float32)  # (TRH*W, Cout)
    bias = b_ref[...]                                                   # (1, Cout)
    W = width
    for j in range(trh // 2):                      # small static loop, VPU/store only
        s = s_ref[0, pl.ds(j * W, W), :].astype(jnp.float32) + bias     # (W, Cout)
        top = conv[(2 * j) * W:(2 * j + 1) * W, :] + s
        bot = conv[(2 * j + 1) * W:(2 * j + 2) * W, :] + s
        o_ref[0, pl.ds((2 * j) * W, W), :] = top.astype(o_ref.dtype)
        o_ref[0, pl.ds((2 * j + 1) * W, W), :] = bot.astype(o_ref.dtype)


def _conv3x3_s1_kernel(cur_ref, halo_ref, w_ref, b_ref, o_ref, *, wp, cout):
    # stride-1 3x3 conv on an HBM-flattened row block.
    # cur : (1, TR*Wp, Cin)  rows [blk*TR, blk*TR+TR) of the padded image
    # halo: (1, 4*Wp,  Cin)  the next 4 padded rows
    # w   : (Cin, 9*Cout)    taps packed along the output dim (t = 3*ky + kx)
    # b   : (1, Cout) f32,  o: (1, TR*Wp, Cout) f32.
    cur = cur_ref[0]
    halo = halo_ref[0]
    m = cur.shape[0]                                                    # TR*Wp
    res_c = jnp.dot(cur, w_ref[...], preferred_element_type=jnp.float32)   # (m, 9*Cout)
    res_h = jnp.dot(halo, w_ref[...], preferred_element_type=jnp.float32)  # (4*Wp, 9*Cout)

    # tap (0,0) folded into the init write (bias + first contribution)
    o_ref[0, :, :] = (jnp.broadcast_to(b_ref[...], (m, cout))
                      + res_c[:, :cout]).astype(o_ref.dtype)
    for t in range(1, 9):
        ky, kx = divmod(t, 3)
        ofs = ky * wp + kx                       # flat row shift for this tap
        c0 = t * cout
        o_ref[0, pl.ds(0, m - ofs), :] += res_c[ofs:, c0:c0 + cout]
        o_ref[0, pl.ds(m - ofs, ofs), :] += res_h[:ofs, c0:c0 + cout]


# ------------------------------- wrappers ----------------------------------

def _matmul_bias(x2d, w, b, *, out_dtype, compute_dtype, tm_cap=512):
    """(M, K) @ (K, Cout) + bias, tiled over M, auto double-buffered."""
    M, K = x2d.shape
    Cout = w.shape[-1]
    itemsize = jnp.dtype(x2d.dtype).itemsize
    # keep the double-buffered input block within a modest VMEM budget
    tm_fit = max(8, ((8 << 20) // (2 * K * itemsize)) // 8 * 8)
    TM = min(tm_cap, tm_fit, _round_up(M, 8))
    M_pad = _round_up(M, TM)
    if M_pad != M:
        x2d = jnp.pad(x2d, ((0, M_pad - M), (0, 0)))
    out = pl.pallas_call(
        _matmul_bias_kernel,
        out_shape=jax.ShapeDtypeStruct((M_pad, Cout), out_dtype),
        grid=(M_pad // TM,),
        in_specs=[
            pl.BlockSpec((TM, K), lambda i: (i, 0)),
            pl.BlockSpec((K, Cout), lambda i: (0, 0)),
            pl.BlockSpec((1, Cout), lambda i: (0, 0)),
        ],
        out_specs=pl.BlockSpec((TM, Cout), lambda i: (i, 0)),
        compiler_params=pltpu.CompilerParams(
            dimension_semantics=("parallel",),
            vmem_limit_bytes=_VMEM_LIMIT),
    )(x2d, w.astype(compute_dtype), b.reshape(1, Cout).astype(jnp.float32))
    return out[:M] if M_pad != M else out


def conv1x1(x_nhwc, w, b, *, compute_dtype, out_dtype):
    """Plain 1x1 conv as one flat tiled matmul over M = N*H*W (cast fused in)."""
    N, H, W, Cin = x_nhwc.shape
    Cout = w.shape[-1]
    out = _matmul_bias(x_nhwc.reshape(N * H * W, Cin), w, b,
                       out_dtype=out_dtype, compute_dtype=compute_dtype)
    return out.reshape(N, H, W, Cout)


def conv1x1_add_upsample(x_nhwc, skip_lo, w, b, *, compute_dtype, out_dtype):
    """Fused lateral connection: conv1x1(x) + bias + nearest_upsample2x(skip_lo)."""
    N, H, W, Cin = x_nhwc.shape
    Cout = w.shape[-1]
    Ns, Hs, Ws, Cs = skip_lo.shape
    assert (Ns, 2 * Hs, 2 * Ws, Cs) == (N, H, W, Cout), "upsample/add shape mismatch"

    TRH = 8 if H >= 8 else H                     # H = 2*Hs -> even
    assert TRH % 2 == 0
    H_pad = _round_up(H, TRH)

    # Width duplication of the small bf16 low-res skip stays as cheap XLA glue;
    # the row duplication is fused into the kernel via the half-height skip block.
    # TODO(synk): move the width duplication in-kernel once a relayout-safe
    # sublane interleave is available.
    skip_w = jnp.repeat(skip_lo.astype(compute_dtype), 2, axis=2)   # (N, Hs, W, Cout)

    x_flat = x_nhwc.reshape(N, H * W, Cin)
    skip_flat = skip_w.reshape(N, Hs * W, Cout)
    if H_pad != H:
        x_flat = jnp.pad(x_flat, ((0, 0), (0, (H_pad - H) * W), (0, 0)))
        skip_flat = jnp.pad(skip_flat, ((0, 0), (0, (H_pad - H) // 2 * W), (0, 0)))

    out = pl.pallas_call(
        functools.partial(_lateral_kernel, trh=TRH, width=W),
        out_shape=jax.ShapeDtypeStruct((N, H_pad * W, Cout), out_dtype),
        grid=(N, H_pad // TRH),
        in_specs=[
            pl.BlockSpec((1, TRH * W, Cin), lambda n, m: (n, m, 0)),
            pl.BlockSpec((1, (TRH // 2) * W, Cout), lambda n, m: (n, m, 0)),
            pl.BlockSpec((Cin, Cout), lambda n, m: (0, 0)),
            pl.BlockSpec((1, Cout), lambda n, m: (0, 0)),
        ],
        out_specs=pl.BlockSpec((1, TRH * W, Cout), lambda n, m: (n, m, 0)),
        compiler_params=pltpu.CompilerParams(
            dimension_semantics=("parallel", "parallel"),
            vmem_limit_bytes=_VMEM_LIMIT),
    )(x_flat, skip_flat, w.astype(compute_dtype),
      b.reshape(1, Cout).astype(jnp.float32))
    if H_pad != H:
        out = out[:, :H * W]
    return out.reshape(N, H, W, Cout)


def conv3x3_s1(x_nhwc, w, b, *, compute_dtype, out_dtype=jnp.float32):
    """3x3 conv, stride 1, padding 1.  Rows are flattened in HBM so each grid
    block does 2 large MXU matmuls (TR rows + a 4-row halo) against tap-packed
    weights (Cin, 9*Cout); the 9 tap shifts are static f32 slice-adds."""
    assert jnp.dtype(out_dtype) == jnp.float32   # taps accumulate into the out block
    N, H, W, Cin = x_nhwc.shape
    Cout = w.shape[-1]
    Wp = W + 2 + (W % 2)                         # padded width, forced even
    TR = 16 if (H >= 16 and H % 16 == 0) else 8
    while TR > 8 and TR * Wp * 9 * Cout * 4 > (8 << 20):  # cap the f32 9-tap result
        TR //= 2
    HR = 4                                       # halo rows; 4*Wp is a multiple of 8
    assert TR % HR == 0 and TR % 2 == 0
    nb = pl.cdiv(H, TR)
    rows_pad = nb * TR + HR                      # 1 top zero row + H rows + zero fill

    xp = jnp.pad(x_nhwc.astype(compute_dtype),
                 ((0, 0), (1, rows_pad - H - 1), (1, Wp - W - 1), (0, 0)))
    x_flat = xp.reshape(N, rows_pad * Wp, Cin)
    # pack taps along the output dim: w9[:, t*Cout:(t+1)*Cout] = w[ky, kx], t=3*ky+kx
    w9 = jnp.transpose(w, (2, 0, 1, 3)).reshape(Cin, 9 * Cout).astype(compute_dtype)
    b2 = b.reshape(1, Cout).astype(jnp.float32)

    out = pl.pallas_call(
        functools.partial(_conv3x3_s1_kernel, wp=Wp, cout=Cout),
        out_shape=jax.ShapeDtypeStruct((N, nb * TR * Wp, Cout), out_dtype),
        grid=(N, nb),
        in_specs=[
            # current TR padded rows (flattened)
            pl.BlockSpec((1, TR * Wp, Cin), lambda n, m: (n, m, 0)),
            # 4-row halo just below the block
            pl.BlockSpec((1, HR * Wp, Cin), lambda n, m: (n, (m + 1) * (TR // HR), 0)),
            pl.BlockSpec((Cin, 9 * Cout), lambda n, m: (0, 0)),
            pl.BlockSpec((1, Cout), lambda n, m: (0, 0)),
        ],
        out_specs=pl.BlockSpec((1, TR * Wp, Cout), lambda n, m: (n, m, 0)),
        compiler_params=pltpu.CompilerParams(
            dimension_semantics=("parallel", "parallel"),
            vmem_limit_bytes=_VMEM_LIMIT),
    )(x_flat, x_flat, w9, b2)
    out = out.reshape(N, nb * TR, Wp, Cout)
    return out[:, :H, :W, :]


def conv3x3_s2(x_nhwc, w, b, *, compute_dtype, out_dtype=jnp.float32):
    """3x3 conv, stride 2, padding 1 (tiny P6/P7 levels): the 9 taps are folded
    into the K dimension -> one (M, 9*Cin) @ (9*Cin, Cout) matmul."""
    N, H, W, Cin = x_nhwc.shape
    Cout = w.shape[-1]
    Ho = (H + 2 - 3) // 2 + 1
    Wo = (W + 2 - 3) // 2 + 1
    xp = jnp.pad(x_nhwc, ((0, 0), (1, 1), (1, 1), (0, 0))).astype(compute_dtype)
    taps = [xp[:, ky:ky + 2 * (Ho - 1) + 1:2, kx:kx + 2 * (Wo - 1) + 1:2, :]
            for ky in range(3) for kx in range(3)]
    patches = jnp.concatenate(taps, axis=-1).reshape(N * Ho * Wo, 9 * Cin)
    w9 = w.reshape(9 * Cin, Cout)                # (ky, kx, cin) order matches taps
    out = _matmul_bias(patches, w9, b, out_dtype=out_dtype,
                       compute_dtype=compute_dtype, tm_cap=256)
    return out.reshape(N, Ho, Wo, Cout)


# ------------------------------- the module --------------------------------

class PyramidFeaturesPallas:
    def __init__(self, C3_size, C4_size, C5_size, feature_size=256,
                 compute_dtype=jnp.bfloat16, key=None):
        # bf16 activations/weights with f32 MXU accumulation; pass
        # compute_dtype=jnp.float32 for a pure-f32 build (strict v5e numerics).
        self.compute_dtype = compute_dtype
        key = jax.random.PRNGKey(42) if key is None else key
        ks = jax.random.split(key, 8)

        def conv_params(k, cin, cout, ksz):
            kw, kb = jax.random.split(k)
            fan_in = cin * ksz * ksz
            bound = 1.0 / np.sqrt(fan_in)
            if ksz == 1:
                w = jax.random.uniform(kw, (cin, cout), jnp.float32, -bound, bound)
            else:
                w = jax.random.uniform(kw, (ksz, ksz, cin, cout), jnp.float32,
                                       -bound, bound)
            b = jax.random.uniform(kb, (cout,), jnp.float32, -bound, bound)
            return w, b

        self.P5_1 = conv_params(ks[0], C5_size, feature_size, 1)
        self.P5_2 = conv_params(ks[1], feature_size, feature_size, 3)
        self.P4_1 = conv_params(ks[2], C4_size, feature_size, 1)
        self.P4_2 = conv_params(ks[3], feature_size, feature_size, 3)
        self.P3_1 = conv_params(ks[4], C3_size, feature_size, 1)
        self.P3_2 = conv_params(ks[5], feature_size, feature_size, 3)
        self.P6 = conv_params(ks[6], C5_size, feature_size, 3)
        self.P7_2 = conv_params(ks[7], feature_size, feature_size, 3)

    def __call__(self, inputs):
        # inputs: [C3, C4, C5] as NCHW (PyTorch convention)
        C3, C4, C5 = (jnp.transpose(t, (0, 2, 3, 1)) for t in inputs)
        cd = self.compute_dtype
        f32 = jnp.float32

        # intermediates in bf16, final outputs in f32
        P5_x = conv1x1(C5, *self.P5_1, compute_dtype=cd, out_dtype=cd)
        P5_out = conv3x3_s1(P5_x, *self.P5_2, compute_dtype=cd, out_dtype=f32)

        P4_x = conv1x1_add_upsample(C4, P5_x, *self.P4_1,
                                    compute_dtype=cd, out_dtype=cd)
        P4_out = conv3x3_s1(P4_x, *self.P4_2, compute_dtype=cd, out_dtype=f32)

        P3_x = conv1x1_add_upsample(C3, P4_x, *self.P3_1,
                                    compute_dtype=cd, out_dtype=cd)
        P3_out = conv3x3_s1(P3_x, *self.P3_2, compute_dtype=cd, out_dtype=f32)

        P6_out = conv3x3_s2(C5, *self.P6, compute_dtype=cd, out_dtype=f32)
        # ReLU applied once on P6's output (exact), not per im2col tap.
        P7_out = conv3x3_s2(jnp.maximum(P6_out, 0.0), *self.P7_2,
                            compute_dtype=cd, out_dtype=f32)

        outs = [P3_out, P4_out, P5_out, P6_out, P7_out]
        return [jnp.transpose(o, (0, 3, 1, 2)) for o in outs]  # back to NCHW


# --------------------------- pure-JAX reference -----------------------------

def _ref_conv(x_nhwc, w, b, stride, ksz):
    if ksz == 1:
        w = w.reshape(1, 1, *w.shape)
    pad = ksz // 2
    out = lax.conv_general_dilated(
        x_nhwc, w, window_strides=(stride, stride),
        padding=[(pad, pad), (pad, pad)],
        dimension_numbers=('NHWC', 'HWIO', 'NHWC'))
    return out + b.reshape(1, 1, 1, -1)


def _upsample2x(x_nhwc):
    return jnp.repeat(jnp.repeat(x_nhwc, 2, axis=1), 2, axis=2)


def reference_forward(model, inputs):
    C3, C4, C5 = (jnp.transpose(t, (0, 2, 3, 1)) for t in inputs)
    P5 = _ref_conv(C5, *model.P5_1, stride=1, ksz=1)
    P5u = _upsample2x(P5)
    P5o = _ref_conv(P5, *model.P5_2, stride=1, ksz=3)
    P4 = _ref_conv(C4, *model.P4_1, stride=1, ksz=1) + P5u
    P4u = _upsample2x(P4)
    P4o = _ref_conv(P4, *model.P4_2, stride=1, ksz=3)
    P3 = _ref_conv(C3, *model.P3_1, stride=1, ksz=1) + P4u
    P3o = _ref_conv(P3, *model.P3_2, stride=1, ksz=3)
    P6 = _ref_conv(C5, *model.P6, stride=2, ksz=3)
    P7 = _ref_conv(jnp.maximum(P6, 0.0), *model.P7_2, stride=2, ksz=3)
    return [jnp.transpose(o, (0, 3, 1, 2)) for o in (P3o, P4o, P5o, P6, P7)]


# ---------------------------------- main ------------------------------------

if __name__ == "__main__":
    key = jax.random.PRNGKey(0)
    k3, k4, k5 = jax.random.split(key, 3)

    N = 2
    C3_size, C4_size, C5_size, feature_size = 8, 16, 32, 32
    # FPN level spatial sizes: C3 is 2x C4, which is 2x C5.
    C3 = jax.random.normal(k3, (N, C3_size, 16, 16), jnp.float32)
    C4 = jax.random.normal(k4, (N, C4_size, 8, 8), jnp.float32)
    C5 = jax.random.normal(k5, (N, C5_size, 4, 4), jnp.float32)

    model = PyramidFeaturesPallas(C3_size, C4_size, C5_size, feature_size,
                                  compute_dtype=jnp.bfloat16)

    fwd = jax.jit(lambda a, b, c: model([a, b, c]))
    outs = jax.block_until_ready(fwd(C3, C4, C5))

    refs = jax.block_until_ready(reference_forward(model, [C3, C4, C5]))

    expected_shapes = [
        (N, feature_size, 16, 16),  # P3
        (N, feature_size, 8, 8),    # P4
        (N, feature_size, 4, 4),    # P5
        (N, feature_size, 2, 2),    # P6
        (N, feature_size, 1, 1),    # P7
    ]
    # bf16 compute (f32 accumulation) vs an f32 lax.conv reference -> loose tol.
    tol = 4e-2 if model.compute_dtype == jnp.bfloat16 else 2e-4
    for o, r, s in zip(outs, refs, expected_shapes):
        assert o.shape == s, (o.shape, s)
        np.testing.assert_allclose(np.asarray(o, dtype=np.float32),
                                   np.asarray(r, dtype=np.float32),
                                   rtol=tol, atol=tol)

    print("KERNEL_OK")
</pallas_src>

<mosaic_0001>
module attributes {stable_mosaic.version = 11 : i64} {
  func.func @_matmul_bias_kernel(%arg0: i32, %arg1: memref<32x32xf32, #tpu.memory_space<vmem>>, %arg2: memref<32x32xbf16, #tpu.memory_space<vmem>>, %arg3: memref<1x32xf32, #tpu.memory_space<vmem>>, %arg4: memref<32x32xbf16, #tpu.memory_space<vmem>>) attributes {dimension_semantics = [#tpu.dimension_semantics<parallel>], iteration_bounds = array<i64: 1>, scalar_prefetch = 0 : i64, scratch_operands = 0 : i64, tpu.core_type = #tpu.core_type<tc>, window_params = [{transform_indices = @transform_0, window_bounds = array<i64: 32, 32>}, {pipeline_mode = #tpu.pipeline_mode<synchronous>, transform_indices = @transform_1, window_bounds = array<i64: 32, 32>}, {pipeline_mode = #tpu.pipeline_mode<synchronous>, transform_indices = @transform_2, window_bounds = array<i64: 1, 32>}, {transform_indices = @transform_3, window_bounds = array<i64: 32, 32>}]} {
    %c0 = arith.constant 0 : index
    %c0_0 = arith.constant 0 : index
    %0 = vector.load %arg1[%c0, %c0_0] : memref<32x32xf32, #tpu.memory_space<vmem>>, vector<32x32xf32>
    %1 = arith.truncf %0 : vector<32x32xf32> to vector<32x32xbf16>
    %c0_1 = arith.constant 0 : index
    %c0_2 = arith.constant 0 : index
    %2 = vector.load %arg2[%c0_1, %c0_2] : memref<32x32xbf16, #tpu.memory_space<vmem>>, vector<32x32xbf16>
    %cst = arith.constant dense<0.000000e+00> : vector<32x32xf32>
    %3 = tpu.matmul %1, %2, %cst {dimension_numbers = #tpu.dot_dimension_numbers<[1], [0], [0], [1], [0, 0, 1, 1], [], []>} : vector<32x32xbf16>, vector<32x32xbf16>, vector<32x32xf32> -> vector<32x32xf32>
    %c0_3 = arith.constant 0 : index
    %c0_4 = arith.constant 0 : index
    %4 = vector.load %arg3[%c0_3, %c0_4] : memref<1x32xf32, #tpu.memory_space<vmem>>, vector<1x32xf32>
    %5 = vector.broadcast %4 : vector<1x32xf32> to vector<32x32xf32>
    %6 = arith.addf %3, %5 : vector<32x32xf32>
    %7 = arith.truncf %6 : vector<32x32xf32> to vector<32x32xbf16>
    %c0_5 = arith.constant 0 : index
    %c0_6 = arith.constant 0 : index
    %8 = vector.load %arg4[%c0_5, %c0_6] : memref<32x32xbf16, #tpu.memory_space<vmem>>, vector<32x32xbf16>
    tpu.vector_store %arg4[%c0_5, %c0_6], %7 {strides = array<i32>} : memref<32x32xbf16, #tpu.memory_space<vmem>>, vector<32x32xbf16>,
    return
  }
  func.func @transform_0(%arg0: i32) -> (i32, i32) {
    %c0_i32 = arith.constant 0 : i32
    %c0_i32_0 = arith.constant 0 : i32
    return %arg0, %c0_i32 : i32, i32
  }
  func.func @transform_1(%arg0: i32) -> (i32, i32) {
    %c0_i32 = arith.constant 0 : i32
    %c0_i32_0 = arith.constant 0 : i32
    %c0_i32_1 = arith.constant 0 : i32
    return %c0_i32, %c0_i32_0 : i32, i32
  }
  func.func @transform_2(%arg0: i32) -> (i32, i32) {
    %c0_i32 = arith.constant 0 : i32
    %c0_i32_0 = arith.constant 0 : i32
    %c0_i32_1 = arith.constant 0 : i32
    return %c0_i32, %c0_i32_0 : i32, i32
  }
  func.func @transform_3(%arg0: i32) -> (i32, i32) {
    %c0_i32 = arith.constant 0 : i32
    %c0_i32_0 = arith.constant 0 : i32
    return %arg0, %c0_i32 : i32, i32
  }
}

module attributes {stable_mosaic.version = 11 : i64} {
  func.func @_lateral_kernel(%arg0: i32, %arg1: i32, %arg2: memref<1x64x16xf32, #tpu.memory_space<vmem>>, %arg3: memref<1x32x32xbf16, #tpu.memory_space<vmem>>, %arg4: memref<16x32xbf16, #tpu.memory_space<vmem>>, %arg5: memref<1x32xf32, #tpu.memory_space<vmem>>, %arg6: memref<1x64x32xbf16, #tpu.memory_space<vmem>>) attributes {dimension_semantics = [#tpu.dimension_semantics<parallel>, #tpu.dimension_semantics<parallel>], iteration_bounds = array<i64: 2, 1>, scalar_prefetch = 0 : i64, scratch_operands = 0 : i64, tpu.core_type = #tpu.core_type<tc>, window_params = [{transform_indices = @transform_0, window_bounds = array<i64: 1, 64, 16>}, {transform_indices = @transform_1, window_bounds = array<i64: 1, 32, 32>}, {pipeline_mode = #tpu.pipeline_mode<synchronous>, transform_indices = @transform_2, window_bounds = array<i64: 16, 32>}, {pipeline_mode = #tpu.pipeline_mode<synchronous>, transform_indices = @transform_3, window_bounds = array<i64: 1, 32>}, {transform_indices = @transform_4, window_bounds = array<i64: 1, 64, 32>}]} {
    %c0 = arith.constant 0 : index
    %c0_0 = arith.constant 0 : index
    %c0_1 = arith.constant 0 : index
    %0 = vector.load %arg2[%c0, %c0_0, %c0_1] : memref<1x64x16xf32, #tpu.memory_space<vmem>>, vector<1x64x16xf32>
    %1 = vector.shape_cast %0 : vector<1x64x16xf32> to vector<64x16xf32>
    %2 = arith.truncf %1 : vector<64x16xf32> to vector<64x16xbf16>
    %c0_2 = arith.constant 0 : index
    %c0_3 = arith.constant 0 : index
    %3 = vector.load %arg4[%c0_2, %c0_3] : memref<16x32xbf16, #tpu.memory_space<vmem>>, vector<16x32xbf16>
    %cst = arith.constant dense<0.000000e+00> : vector<64x32xf32>
    %4 = tpu.matmul %2, %3, %cst {dimension_numbers = #tpu.dot_dimension_numbers<[1], [0], [0], [1], [0, 0, 1, 1], [], []>} : vector<64x16xbf16>, vector<16x32xbf16>, vector<64x32xf32> -> vector<64x32xf32>
    %c0_4 = arith.constant 0 : index
    %c0_5 = arith.constant 0 : index
    %5 = vector.load %arg5[%c0_4, %c0_5] : memref<1x32xf32, #tpu.memory_space<vmem>>, vector<1x32xf32>
    %c0_6 = arith.constant 0 : index
    %c0_7 = arith.constant 0 : index
    %c0_8 = arith.constant 0 : index
    %6 = vector.load %arg3[%c0_6, %c0_7, %c0_8] : memref<1x32x32xbf16, #tpu.memory_space<vmem>>, vector<1x8x32xbf16>
    %7 = vector.shape_cast %6 : vector<1x8x32xbf16> to vector<8x32xbf16>
    %8 = arith.extf %7 : vector<8x32xbf16> to vector<8x32xf32>
    %9 = vector.broadcast %5 : vector<1x32xf32> to vector<8x32xf32>
    %10 = arith.addf %8, %9 : vector<8x32xf32>
    %11 = vector.extract_strided_slice %4 {offsets = [0, 0], sizes = [8, 32], strides = [1, 1]} : vector<64x32xf32> to vector<8x32xf32>
    %12 = arith.addf %11, %10 : vector<8x32xf32>
    %13 = vector.extract_strided_slice %4 {offsets = [8, 0], sizes = [8, 32], strides = [1, 1]} : vector<64x32xf32> to vector<8x32xf32>
    %14 = arith.addf %13, %10 : vector<8x32xf32>
    %15 = arith.truncf %12 : vector<8x32xf32> to vector<8x32xbf16>
    %c0_9 = arith.constant 0 : index
    %c0_10 = arith.constant 0 : index
    %c0_11 = arith.constant 0 : index
    %16 = vector.load %arg6[%c0_9, %c0_10, %c0_11] : memref<1x64x32xbf16, #tpu.memory_space<vmem>>, vector<1x8x32xbf16>
    %17 = vector.shape_cast %16 : vector<1x8x32xbf16> to vector<8x32xbf16>
    %18 = vector.shape_cast %15 : vector<8x32xbf16> to vector<1x8x32xbf16>
    tpu.vector_store %arg6[%c0_9, %c0_10, %c0_11], %18 {strides = array<i32>} : memref<1x64x32xbf16, #tpu.memory_space<vmem>>, vector<1x8x32xbf16>,
    %19 = arith.truncf %14 : vector<8x32xf32> to vector<8x32xbf16>
    %c0_12 = arith.constant 0 : index
    %c8 = arith.constant 8 : index
    %c0_13 = arith.constant 0 : index
    %20 = vector.load %arg6[%c0_12, %c8, %c0_13] : memref<1x64x32xbf16, #tpu.memory_space<vmem>>, vector<1x8x32xbf16>
    %21 = vector.shape_cast %20 : vector<1x8x32xbf16> to vector<8x32xbf16>
    %22 = vector.shape_cast %19 : vector<8x32xbf16> to vector<1x8x32xbf16>
    tpu.vector_store %arg6[%c0_12, %c8, %c0_13], %22 {strides = array<i32>} : memref<1x64x32xbf16, #tpu.memory_space<vmem>>, vector<1x8x32xbf16>,
    %c0_14 = arith.constant 0 : index
    %c8_15 = arith.constant 8 : index
    %c0_16 = arith.constant 0 : index
    %23 = vector.load %arg3[%c0_14, %c8_15, %c0_16] : memref<1x32x32xbf16, #tpu.memory_space<vmem>>, vector<1x8x32xbf16>
    %24 = vector.shape_cast %23 : vector<1x8x32xbf16> to vector<8x32xbf16>
    %25 = arith.extf %24 : vector<8x32xbf16> to vector<8x32xf32>
    %26 = vector.broadcast %5 : vector<1x32xf32> to vector<8x32xf32>
    %27 = arith.addf %25, %26 : vector<8x32xf32>
    %28 = vector.extract_strided_slice %4 {offsets = [16, 0], sizes = [8, 32], strides = [1, 1]} : vector<64x32xf32> to vector<8x32xf32>
    %29 = arith.addf %28, %27 : vector<8x32xf32>
    %30 = vector.extract_strided_slice %4 {offsets = [24, 0], sizes = [8, 32], strides = [1, 1]} : vector<64x32xf32> to vector<8x32xf32>
    %31 = arith.addf %30, %27 : vector<8x32xf32>
    %32 = arith.truncf %29 : vector<8x32xf32> to vector<8x32xbf16>
    %c0_17 = arith.constant 0 : index
    %c16 = arith.constant 16 : index
    %c0_18 = arith.constant 0 : index
    %33 = vector.load %arg6[%c0_17, %c16, %c0_18] : memref<1x64x32xbf16, #tpu.memory_space<vmem>>, vector<1x8x32xbf16>
    %34 = vector.shape_cast %33 : vector<1x8x32xbf16> to vector<8x32xbf16>
    %35 = vector.shape_cast %32 : vector<8x32xbf16> to vector<1x8x32xbf16>
    tpu.vector_store %arg6[%c0_17, %c16, %c0_18], %35 {strides = array<i32>} : memref<1x64x32xbf16, #tpu.memory_space<vmem>>, vector<1x8x32xbf16>,
    %36 = arith.truncf %31 : vector<8x32xf32> to vector<8x32xbf16>
    %c0_19 = arith.constant 0 : index
    %c24 = arith.constant 24 : index
    %c0_20 = arith.constant 0 : index
    %37 = vector.load %arg6[%c0_19, %c24, %c0_20] : memref<1x64x32xbf16, #tpu.memory_space<vmem>>, vector<1x8x32xbf16>
    %38 = vector.shape_cast %37 : vector<1x8x32xbf16> to vector<8x32xbf16>
    %39 = vector.shape_cast %36 : vector<8x32xbf16> to vector<1x8x32xbf16>
    tpu.vector_store %arg6[%c0_19, %c24, %c0_20], %39 {strides = array<i32>} : memref<1x64x32xbf16, #tpu.memory_space<vmem>>, vector<1x8x32xbf16>,
    %c0_21 = arith.constant 0 : index
    %c16_22 = arith.constant 16 : index
    %c0_23 = arith.constant 0 : index
    %40 = vector.load %arg3[%c0_21, %c16_22, %c0_23] : memref<1x32x32xbf16, #tpu.memory_space<vmem>>, vector<1x8x32xbf16>
    %41 = vector.shape_cast %40 : vector<1x8x32xbf16> to vector<8x32xbf16>
    %42 = arith.extf %41 : vector<8x32xbf16> to vector<8x32xf32>
    %43 = vector.broadcast %5 : vector<1x32xf32> to vector<8x32xf32>
    %44 = arith.addf %42, %43 : vector<8x32xf32>
    %45 = vector.extract_strided_slice %4 {offsets = [32, 0], sizes = [8, 32], strides = [1, 1]} : vector<64x32xf32> to vector<8x32xf32>
    %46 = arith.addf %45, %44 : vector<8x32xf32>
    %47 = vector.extract_strided_slice %4 {offsets = [40, 0], sizes = [8, 32], strides = [1, 1]} : vector<64x32xf32> to vector<8x32xf32>
    %48 = arith.addf %47, %44 : vector<8x32xf32>
    %49 = arith.truncf %46 : vector<8x32xf32> to vector<8x32xbf16>
    %c0_24 = arith.constant 0 : index
    %c32 = arith.constant 32 : index
    %c0_25 = arith.constant 0 : index
    %50 = vector.load %arg6[%c0_24, %c32, %c0_25] : memref<1x64x32xbf16, #tpu.memory_space<vmem>>, vector<1x8x32xbf16>
    %51 = vector.shape_cast %50 : vector<1x8x32xbf16> to vector<8x32xbf16>
    %52 = vector.shape_cast %49 : vector<8x32xbf16> to vector<1x8x32xbf16>
    tpu.vector_store %arg6[%c0_24, %c32, %c0_25], %52 {strides = array<i32>} : memref<1x64x32xbf16, #tpu.memory_space<vmem>>, vector<1x8x32xbf16>,
    %53 = arith.truncf %48 : vector<8x32xf32> to vector<8x32xbf16>
    %c0_26 = arith.constant 0 : index
    %c40 = arith.constant 40 : index
    %c0_27 = arith.constant 0 : index
    %54 = vector.load %arg6[%c0_26, %c40, %c0_27] : memref<1x64x32xbf16, #tpu.memory_space<vmem>>, vector<1x8x32xbf16>
    %55 = vector.shape_cast %54 : vector<1x8x32xbf16> to vector<8x32xbf16>
    %56 = vector.shape_cast %53 : vector<8x32xbf16> to vector<1x8x32xbf16>
    tpu.vector_store %arg6[%c0_26, %c40, %c0_27], %56 {strides = array<i32>} : memref<1x64x32xbf16, #tpu.memory_space<vmem>>, vector<1x8x32xbf16>,
    %c0_28 = arith.constant 0 : index
    %c24_29 = arith.constant 24 : index
    %c0_30 = arith.constant 0 : index
    %57 = vector.load %arg3[%c0_28, %c24_29, %c0_30] : memref<1x32x32xbf16, #tpu.memory_space<vmem>>, vector<1x8x32xbf16>
    %58 = vector.shape_cast %57 : vector<1x8x32xbf16> to vector<8x32xbf16>
    %59 = arith.extf %58 : vector<8x32xbf16> to vector<8x32xf32>
    %60 = vector.broadcast %5 : vector<1x32xf32> to vector<8x32xf32>
    %61 = arith.addf %59, %60 : vector<8x32xf32>
    %62 = vector.extract_strided_slice %4 {offsets = [48, 0], sizes = [8, 32], strides = [1, 1]} : vector<64x32xf32> to vector<8x32xf32>
    %63 = arith.addf %62, %61 : vector<8x32xf32>
    %64 = vector.extract_strided_slice %4 {offsets = [56, 0], sizes = [8, 32], strides = [1, 1]} : vector<64x32xf32> to vector<8x32xf32>
    %65 = arith.addf %64, %61 : vector<8x32xf32>
    %66 = arith.truncf %63 : vector<8x32xf32> to vector<8x32xbf16>
    %c0_31 = arith.constant 0 : index
    %c48 = arith.constant 48 : index
    %c0_32 = arith.constant 0 : index
    %67 = vector.load %arg6[%c0_31, %c48, %c0_32] : memref<1x64x32xbf16, #tpu.memory_space<vmem>>, vector<1x8x32xbf16>
    %68 = vector.shape_cast %67 : vector<1x8x32xbf16> to vector<8x32xbf16>
    %69 = vector.shape_cast %66 : vector<8x32xbf16> to vector<1x8x32xbf16>
    tpu.vector_store %arg6[%c0_31, %c48, %c0_32], %69 {strides = array<i32>} : memref<1x64x32xbf16, #tpu.memory_space<vmem>>, vector<1x8x32xbf16>,
    %70 = arith.truncf %65 : vector<8x32xf32> to vector<8x32xbf16>
    %c0_33 = arith.constant 0 : index
    %c56 = arith.constant 56 : index
    %c0_34 = arith.constant 0 : index
    %71 = vector.load %arg6[%c0_33, %c56, %c0_34] : memref<1x64x32xbf16, #tpu.memory_space<vmem>>, vector<1x8x32xbf16>
    %72 = vector.shape_cast %71 : vector<1x8x32xbf16> to vector<8x32xbf16>
    %73 = vector.shape_cast %70 : vector<8x32xbf16> to vector<1x8x32xbf16>
    tpu.vector_store %arg6[%c0_33, %c56, %c0_34], %73 {strides = array<i32>} : memref<1x64x32xbf16, #tpu.memory_space<vmem>>, vector<1x8x32xbf16>,
    return
  }
  func.func @transform_0(%arg0: i32, %arg1: i32) -> (i32, i32, i32) {
    %c0_i32 = arith.constant 0 : i32
    %c0_i32_0 = arith.constant 0 : i32
    return %arg0, %arg1, %c0_i32 : i32, i32, i32
  }
  func.func @transform_1(%arg0: i32, %arg1: i32) -> (i32, i32, i32) {
    %c0_i32 = arith.constant 0 : i32
    %c0_i32_0 = arith.constant 0 : i32
    return %arg0, %arg1, %c0_i32 : i32, i32, i32
  }
  func.func @transform_2(%arg0: i32, %arg1: i32) -> (i32, i32) {
    %c0_i32 = arith.constant 0 : i32
    %c0_i32_0 = arith.constant 0 : i32
    %c0_i32_1 = arith.constant 0 : i32
    return %c0_i32, %c0_i32_0 : i32, i32
  }
  func.func @transform_3(%arg0: i32, %arg1: i32) -> (i32, i32) {
    %c0_i32 = arith.constant 0 : i32
    %c0_i32_0 = arith.constant 0 : i32
    %c0_i32_1 = arith.constant 0 : i32
    return %c0_i32, %c0_i32_0 : i32, i32
  }
  func.func @transform_4(%arg0: i32, %arg1: i32) -> (i32, i32, i32) {
    %c0_i32 = arith.constant 0 : i32
    %c0_i32_0 = arith.constant 0 : i32
    return %arg0, %arg1, %c0_i32 : i32, i32, i32
  }
}

module attributes {stable_mosaic.version = 11 : i64} {
  func.func @_lateral_kernel(%arg0: i32, %arg1: i32, %arg2: memref<1x128x8xf32, #tpu.memory_space<vmem>>, %arg3: memref<1x64x32xbf16, #tpu.memory_space<vmem>>, %arg4: memref<8x32xbf16, #tpu.memory_space<vmem>>, %arg5: memref<1x32xf32, #tpu.memory_space<vmem>>, %arg6: memref<1x128x32xbf16, #tpu.memory_space<vmem>>) attributes {dimension_semantics = [#tpu.dimension_semantics<parallel>, #tpu.dimension_semantics<parallel>], iteration_bounds = array<i64: 2, 2>, scalar_prefetch = 0 : i64, scratch_operands = 0 : i64, tpu.core_type = #tpu.core_type<tc>, window_params = [{transform_indices = @transform_0, window_bounds = array<i64: 1, 128, 8>}, {transform_indices = @transform_1, window_bounds = array<i64: 1, 64, 32>}, {pipeline_mode = #tpu.pipeline_mode<synchronous>, transform_indices = @transform_2, window_bounds = array<i64: 8, 32>}, {pipeline_mode = #tpu.pipeline_mode<synchronous>, transform_indices = @transform_3, window_bounds = array<i64: 1, 32>}, {transform_indices = @transform_4, window_bounds = array<i64: 1, 128, 32>}]} {
    %c0 = arith.constant 0 : index
    %c0_0 = arith.constant 0 : index
    %c0_1 = arith.constant 0 : index
    %0 = vector.load %arg2[%c0, %c0_0, %c0_1] : memref<1x128x8xf32, #tpu.memory_space<vmem>>, vector<1x128x8xf32>
    %1 = vector.shape_cast %0 : vector<1x128x8xf32> to vector<128x8xf32>
    %2 = arith.truncf %1 : vector<128x8xf32> to vector<128x8xbf16>
    %c0_2 = arith.constant 0 : index
    %c0_3 = arith.constant 0 : index
    %3 = vector.load %arg4[%c0_2, %c0_3] : memref<8x32xbf16, #tpu.memory_space<vmem>>, vector<8x32xbf16>
    %cst = arith.constant dense<0.000000e+00> : vector<128x32xf32>
    %4 = tpu.matmul %2, %3, %cst {dimension_numbers = #tpu.dot_dimension_numbers<[1], [0], [0], [1], [0, 0, 1, 1], [], []>} : vector<128x8xbf16>, vector<8x32xbf16>, vector<128x32xf32> -> vector<128x32xf32>
    %c0_4 = arith.constant 0 : index
    %c0_5 = arith.constant 0 : index
    %5 = vector.load %arg5[%c0_4, %c0_5] : memref<1x32xf32, #tpu.memory_space<vmem>>, vector<1x32xf32>
    %c0_6 = arith.constant 0 : index
    %c0_7 = arith.constant 0 : index
    %c0_8 = arith.constant 0 : index
    %6 = vector.load %arg3[%c0_6, %c0_7, %c0_8] : memref<1x64x32xbf16, #tpu.memory_space<vmem>>, vector<1x16x32xbf16>
    %7 = vector.shape_cast %6 : vector<1x16x32xbf16> to vector<16x32xbf16>
    %8 = arith.extf %7 : vector<16x32xbf16> to vector<16x32xf32>
    %9 = vector.broadcast %5 : vector<1x32xf32> to vector<16x32xf32>
    %10 = arith.addf %8, %9 : vector<16x32xf32>
    %11 = vector.extract_strided_slice %4 {offsets = [0, 0], sizes = [16, 32], strides = [1, 1]} : vector<128x32xf32> to vector<16x32xf32>
    %12 = arith.addf %11, %10 : vector<16x32xf32>
    %13 = vector.extract_strided_slice %4 {offsets = [16, 0], sizes = [16, 32], strides = [1, 1]} : vector<128x32xf32> to vector<16x32xf32>
    %14 = arith.addf %13, %10 : vector<16x32xf32>
    %15 = arith.truncf %12 : vector<16x32xf32> to vector<16x32xbf16>
    %c0_9 = arith.constant 0 : index
    %c0_10 = arith.constant 0 : index
    %c0_11 = arith.constant 0 : index
    %16 = vector.load %arg6[%c0_9, %c0_10, %c0_11] : memref<1x128x32xbf16, #tpu.memory_space<vmem>>, vector<1x16x32xbf16>
    %17 = vector.shape_cast %16 : vector<1x16x32xbf16> to vector<16x32xbf16>
    %18 = vector.shape_cast %15 : vector<16x32xbf16> to vector<1x16x32xbf16>
    tpu.vector_store %arg6[%c0_9, %c0_10, %c0_11], %18 {strides = array<i32>} : memref<1x128x32xbf16, #tpu.memory_space<vmem>>, vector<1x16x32xbf16>,
    %19 = arith.truncf %14 : vector<16x32xf32> to vector<16x32xbf16>
    %c0_12 = arith.constant 0 : index
    %c16 = arith.constant 16 : index
    %c0_13 = arith.constant 0 : index
    %20 = vector.load %arg6[%c0_12, %c16, %c0_13] : memref<1x128x32xbf16, #tpu.memory_space<vmem>>, vector<1x16x32xbf16>
    %21 = vector.shape_cast %20 : vector<1x16x32xbf16> to vector<16x32xbf16>
    %22 = vector.shape_cast %19 : vector<16x32xbf16> to vector<1x16x32xbf16>
    tpu.vector_store %arg6[%c0_12, %c16, %c0_13], %22 {strides = array<i32>} : memref<1x128x32xbf16, #tpu.memory_space<vmem>>, vector<1x16x32xbf16>,
    %c0_14 = arith.constant 0 : index
    %c16_15 = arith.constant 16 : index
    %c0_16 = arith.constant 0 : index
    %23 = vector.load %arg3[%c0_14, %c16_15, %c0_16] : memref<1x64x32xbf16, #tpu.memory_space<vmem>>, vector<1x16x32xbf16>
    %24 = vector.shape_cast %23 : vector<1x16x32xbf16> to vector<16x32xbf16>
    %25 = arith.extf %24 : vector<16x32xbf16> to vector<16x32xf32>
    %26 = vector.broadcast %5 : vector<1x32xf32> to vector<16x32xf32>
    %27 = arith.addf %25, %26 : vector<16x32xf32>
    %28 = vector.extract_strided_slice %4 {offsets = [32, 0], sizes = [16, 32], strides = [1, 1]} : vector<128x32xf32> to vector<16x32xf32>
    %29 = arith.addf %28, %27 : vector<16x32xf32>
    %30 = vector.extract_strided_slice %4 {offsets = [48, 0], sizes = [16, 32], strides = [1, 1]} : vector<128x32xf32> to vector<16x32xf32>
    %31 = arith.addf %30, %27 : vector<16x32xf32>
    %32 = arith.truncf %29 : vector<16x32xf32> to vector<16x32xbf16>
    %c0_17 = arith.constant 0 : index
    %c32 = arith.constant 32 : index
    %c0_18 = arith.constant 0 : index
    %33 = vector.load %arg6[%c0_17, %c32, %c0_18] : memref<1x128x32xbf16, #tpu.memory_space<vmem>>, vector<1x16x32xbf16>
    %34 = vector.shape_cast %33 : vector<1x16x32xbf16> to vector<16x32xbf16>
    %35 = vector.shape_cast %32 : vector<16x32xbf16> to vector<1x16x32xbf16>
    tpu.vector_store %arg6[%c0_17, %c32, %c0_18], %35 {strides = array<i32>} : memref<1x128x32xbf16, #tpu.memory_space<vmem>>, vector<1x16x32xbf16>,
    %36 = arith.truncf %31 : vector<16x32xf32> to vector<16x32xbf16>
    %c0_19 = arith.constant 0 : index
    %c48 = arith.constant 48 : index
    %c0_20 = arith.constant 0 : index
    %37 = vector.load %arg6[%c0_19, %c48, %c0_20] : memref<1x128x32xbf16, #tpu.memory_space<vmem>>, vector<1x16x32xbf16>
    %38 = vector.shape_cast %37 : vector<1x16x32xbf16> to vector<16x32xbf16>
    %39 = vector.shape_cast %36 : vector<16x32xbf16> to vector<1x16x32xbf16>
    tpu.vector_store %arg6[%c0_19, %c48, %c0_20], %39 {strides = array<i32>} : memref<1x128x32xbf16, #tpu.memory_space<vmem>>, vector<1x16x32xbf16>,
    %c0_21 = arith.constant 0 : index
    %c32_22 = arith.constant 32 : index
    %c0_23 = arith.constant 0 : index
    %40 = vector.load %arg3[%c0_21, %c32_22, %c0_23] : memref<1x64x32xbf16, #tpu.memory_space<vmem>>, vector<1x16x32xbf16>
    %41 = vector.shape_cast %40 : vector<1x16x32xbf16> to vector<16x32xbf16>
    %42 = arith.extf %41 : vector<16x32xbf16> to vector<16x32xf32>
    %43 = vector.broadcast %5 : vector<1x32xf32> to vector<16x32xf32>
    %44 = arith.addf %42, %43 : vector<16x32xf32>
    %45 = vector.extract_strided_slice %4 {offsets = [64, 0], sizes = [16, 32], strides = [1, 1]} : vector<128x32xf32> to vector<16x32xf32>
    %46 = arith.addf %45, %44 : vector<16x32xf32>
    %47 = vector.extract_strided_slice %4 {offsets = [80, 0], sizes = [16, 32], strides = [1, 1]} : vector<128x32xf32> to vector<16x32xf32>
    %48 = arith.addf %47, %44 : vector<16x32xf32>
    %49 = arith.truncf %46 : vector<16x32xf32> to vector<16x32xbf16>
    %c0_24 = arith.constant 0 : index
    %c64 = arith.constant 64 : index
    %c0_25 = arith.constant 0 : index
    %50 = vector.load %arg6[%c0_24, %c64, %c0_25] : memref<1x128x32xbf16, #tpu.memory_space<vmem>>, vector<1x16x32xbf16>
    %51 = vector.shape_cast %50 : vector<1x16x32xbf16> to vector<16x32xbf16>
    %52 = vector.shape_cast %49 : vector<16x32xbf16> to vector<1x16x32xbf16>
    tpu.vector_store %arg6[%c0_24, %c64, %c0_25], %52 {strides = array<i32>} : memref<1x128x32xbf16, #tpu.memory_space<vmem>>, vector<1x16x32xbf16>,
    %53 = arith.truncf %48 : vector<16x32xf32> to vector<16x32xbf16>
    %c0_26 = arith.constant 0 : index
    %c80 = arith.constant 80 : index
    %c0_27 = arith.constant 0 : index
    %54 = vector.load %arg6[%c0_26, %c80, %c0_27] : memref<1x128x32xbf16, #tpu.memory_space<vmem>>, vector<1x16x32xbf16>
    %55 = vector.shape_cast %54 : vector<1x16x32xbf16> to vector<16x32xbf16>
    %56 = vector.shape_cast %53 : vector<16x32xbf16> to vector<1x16x32xbf16>
    tpu.vector_store %arg6[%c0_26, %c80, %c0_27], %56 {strides = array<i32>} : memref<1x128x32xbf16, #tpu.memory_space<vmem>>, vector<1x16x32xbf16>,
    %c0_28 = arith.constant 0 : index
    %c48_29 = arith.constant 48 : index
    %c0_30 = arith.constant 0 : index
    %57 = vector.load %arg3[%c0_28, %c48_29, %c0_30] : memref<1x64x32xbf16, #tpu.memory_space<vmem>>, vector<1x16x32xbf16>
    %58 = vector.shape_cast %57 : vector<1x16x32xbf16> to vector<16x32xbf16>
    %59 = arith.extf %58 : vector<16x32xbf16> to vector<16x32xf32>
    %60 = vector.broadcast %5 : vector<1x32xf32> to vector<16x32xf32>
    %61 = arith.addf %59, %60 : vector<16x32xf32>
    %62 = vector.extract_strided_slice %4 {offsets = [96, 0], sizes = [16, 32], strides = [1, 1]} : vector<128x32xf32> to vector<16x32xf32>
    %63 = arith.addf %62, %61 : vector<16x32xf32>
    %64 = vector.extract_strided_slice %4 {offsets = [112, 0], sizes = [16, 32], strides = [1, 1]} : vector<128x32xf32> to vector<16x32xf32>
    %65 = arith.addf %64, %61 : vector<16x32xf32>
    %66 = arith.truncf %63 : vector<16x32xf32> to vector<16x32xbf16>
    %c0_31 = arith.constant 0 : index
    %c96 = arith.constant 96 : index
    %c0_32 = arith.constant 0 : index
    %67 = vector.load %arg6[%c0_31, %c96, %c0_32] : memref<1x128x32xbf16, #tpu.memory_space<vmem>>, vector<1x16x32xbf16>
    %68 = vector.shape_cast %67 : vector<1x16x32xbf16> to vector<16x32xbf16>
    %69 = vector.shape_cast %66 : vector<16x32xbf16> to vector<1x16x32xbf16>
    tpu.vector_store %arg6[%c0_31, %c96, %c0_32], %69 {strides = array<i32>} : memref<1x128x32xbf16, #tpu.memory_space<vmem>>, vector<1x16x32xbf16>,
    %70 = arith.truncf %65 : vector<16x32xf32> to vector<16x32xbf16>
    %c0_33 = arith.constant 0 : index
    %c112 = arith.constant 112 : index
    %c0_34 = arith.constant 0 : index
    %71 = vector.load %arg6[%c0_33, %c112, %c0_34] : memref<1x128x32xbf16, #tpu.memory_space<vmem>>, vector<1x16x32xbf16>
    %72 = vector.shape_cast %71 : vector<1x16x32xbf16> to vector<16x32xbf16>
    %73 = vector.shape_cast %70 : vector<16x32xbf16> to vector<1x16x32xbf16>
    tpu.vector_store %arg6[%c0_33, %c112, %c0_34], %73 {strides = array<i32>} : memref<1x128x32xbf16, #tpu.memory_space<vmem>>, vector<1x16x32xbf16>,
    return
  }
  func.func @transform_0(%arg0: i32, %arg1: i32) -> (i32, i32, i32) {
    %c0_i32 = arith.constant 0 : i32
    %c0_i32_0 = arith.constant 0 : i32
    return %arg0, %arg1, %c0_i32 : i32, i32, i32
  }
  func.func @transform_1(%arg0: i32, %arg1: i32) -> (i32, i32, i32) {
    %c0_i32 = arith.constant 0 : i32
    %c0_i32_0 = arith.constant 0 : i32
    return %arg0, %arg1, %c0_i32 : i32, i32, i32
  }
  func.func @transform_2(%arg0: i32, %arg1: i32) -> (i32, i32) {
    %c0_i32 = arith.constant 0 : i32
    %c0_i32_0 = arith.constant 0 : i32
    %c0_i32_1 = arith.constant 0 : i32
    return %c0_i32, %c0_i32_0 : i32, i32
  }
  func.func @transform_3(%arg0: i32, %arg1: i32) -> (i32, i32) {
    %c0_i32 = arith.constant 0 : i32
    %c0_i32_0 = arith.constant 0 : i32
    %c0_i32_1 = arith.constant 0 : i32
    return %c0_i32, %c0_i32_0 : i32, i32
  }
  func.func @transform_4(%arg0: i32, %arg1: i32) -> (i32, i32, i32) {
    %c0_i32 = arith.constant 0 : i32
    %c0_i32_0 = arith.constant 0 : i32
    return %arg0, %arg1, %c0_i32 : i32, i32, i32
  }
}

module attributes {stable_mosaic.version = 11 : i64} {
  func.func @_conv3x3_s1_kernel(%arg0: i32, %arg1: i32, %arg2: memref<1x288x32xbf16, #tpu.memory_space<vmem>>, %arg3: memref<1x72x32xbf16, #tpu.memory_space<vmem>>, %arg4: memref<32x288xbf16, #tpu.memory_space<vmem>>, %arg5: memref<1x32xf32, #tpu.memory_space<vmem>>, %arg6: memref<1x288x32xf32, #tpu.memory_space<vmem>>) attributes {dimension_semantics = [#tpu.dimension_semantics<parallel>, #tpu.dimension_semantics<parallel>], iteration_bounds = array<i64: 2, 1>, scalar_prefetch = 0 : i64, scratch_operands = 0 : i64, tpu.core_type = #tpu.core_type<tc>, window_params = [{transform_indices = @transform_0, window_bounds = array<i64: 1, 288, 32>}, {transform_indices = @transform_1, window_bounds = array<i64: 1, 72, 32>}, {pipeline_mode = #tpu.pipeline_mode<synchronous>, transform_indices = @transform_2, window_bounds = array<i64: 32, 288>}, {pipeline_mode = #tpu.pipeline_mode<synchronous>, transform_indices = @transform_3, window_bounds = array<i64: 1, 32>}, {transform_indices = @transform_4, window_bounds = array<i64: 1, 288, 32>}]} {
    %c0 = arith.constant 0 : index
    %c0_0 = arith.constant 0 : index
    %c0_1 = arith.constant 0 : index
    %0 = vector.load %arg2[%c0, %c0_0, %c0_1] : memref<1x288x32xbf16, #tpu.memory_space<vmem>>, vector<1x288x32xbf16>
    %1 = vector.shape_cast %0 : vector<1x288x32xbf16> to vector<288x32xbf16>
    %c0_2 = arith.constant 0 : index
    %c0_3 = arith.constant 0 : index
    %c0_4 = arith.constant 0 : index
    %2 = vector.load %arg3[%c0_2, %c0_3, %c0_4] : memref<1x72x32xbf16, #tpu.memory_space<vmem>>, vector<1x72x32xbf16>
    %3 = vector.shape_cast %2 : vector<1x72x32xbf16> to vector<72x32xbf16>
    %c0_5 = arith.constant 0 : index
    %c0_6 = arith.constant 0 : index
    %4 = vector.load %arg4[%c0_5, %c0_6] : memref<32x288xbf16, #tpu.memory_space<vmem>>, vector<32x288xbf16>
    %cst = arith.constant dense<0.000000e+00> : vector<288x288xf32>
    %5 = tpu.matmul %1, %4, %cst {dimension_numbers = #tpu.dot_dimension_numbers<[1], [0], [0], [1], [0, 0, 1, 1], [], []>} : vector<288x32xbf16>, vector<32x288xbf16>, vector<288x288xf32> -> vector<288x288xf32>
    %c0_7 = arith.constant 0 : index
    %c0_8 = arith.constant 0 : index
    %6 = vector.load %arg4[%c0_7, %c0_8] : memref<32x288xbf16, #tpu.memory_space<vmem>>, vector<32x288xbf16>
    %cst_9 = arith.constant dense<0.000000e+00> : vector<72x288xf32>
    %7 = tpu.matmul %3, %6, %cst_9 {dimension_numbers = #tpu.dot_dimension_numbers<[1], [0], [0], [1], [0, 0, 1, 1], [], []>} : vector<72x32xbf16>, vector<32x288xbf16>, vector<72x288xf32> -> vector<72x288xf32>
    %c0_10 = arith.constant 0 : index
    %c0_11 = arith.constant 0 : index
    %8 = vector.load %arg5[%c0_10, %c0_11] : memref<1x32xf32, #tpu.memory_space<vmem>>, vector<1x32xf32>
    %9 = vector.shape_cast %8 : vector<1x32xf32> to vector<1x32xf32>
    %10 = vector.broadcast %9 : vector<1x32xf32> to vector<288x32xf32>
    %11 = vector.extract_strided_slice %5 {offsets = [0, 0], sizes = [288, 32], strides = [1, 1]} : vector<288x288xf32> to vector<288x32xf32>
    %12 = arith.addf %10, %11 : vector<288x32xf32>
    %c0_12 = arith.constant 0 : index
    %c0_13 = arith.constant 0 : index
    %c0_14 = arith.constant 0 : index
    %13 = vector.load %arg6[%c0_12, %c0_13, %c0_14] : memref<1x288x32xf32, #tpu.memory_space<vmem>>, vector<1x288x32xf32>
    %14 = vector.shape_cast %13 : vector<1x288x32xf32> to vector<288x32xf32>
    %15 = vector.shape_cast %12 : vector<288x32xf32> to vector<1x288x32xf32>
    tpu.vector_store %arg6[%c0_12, %c0_13, %c0_14], %15 {strides = array<i32>} : memref<1x288x32xf32, #tpu.memory_space<vmem>>, vector<1x288x32xf32>,
    %c0_15 = arith.constant 0 : index
    %c0_16 = arith.constant 0 : index
    %c0_17 = arith.constant 0 : index
    %16 = vector.load %arg6[%c0_15, %c0_16, %c0_17] : memref<1x288x32xf32, #tpu.memory_space<vmem>>, vector<1x287x32xf32>
    %17 = vector.shape_cast %16 : vector<1x287x32xf32> to vector<287x32xf32>
    %18 = vector.extract_strided_slice %5 {offsets = [1, 32], sizes = [287, 32], strides = [1, 1]} : vector<288x288xf32> to vector<287x32xf32>
    %19 = arith.addf %17, %18 : vector<287x32xf32>
    %c0_18 = arith.constant 0 : index
    %c0_19 = arith.constant 0 : index
    %c0_20 = arith.constant 0 : index
    %20 = vector.load %arg6[%c0_18, %c0_19, %c0_20] : memref<1x288x32xf32, #tpu.memory_space<vmem>>, vector<1x287x32xf32>
    %21 = vector.shape_cast %20 : vector<1x287x32xf32> to vector<287x32xf32>
    %22 = vector.shape_cast %19 : vector<287x32xf32> to vector<1x287x32xf32>
    tpu.vector_store %arg6[%c0_18, %c0_19, %c0_20], %22 {strides = array<i32>} : memref<1x288x32xf32, #tpu.memory_space<vmem>>, vector<1x287x32xf32>,
    %c0_21 = arith.constant 0 : index
    %c287 = arith.constant 287 : index
    %c0_22 = arith.constant 0 : index
    %23 = vector.load %arg6[%c0_21, %c287, %c0_22] : memref<1x288x32xf32, #tpu.memory_space<vmem>>, vector<1x1x32xf32>
    %24 = vector.shape_cast %23 : vector<1x1x32xf32> to vector<1x32xf32>
    %25 = vector.extract_strided_slice %7 {offsets = [0, 32], sizes = [1, 32], strides = [1, 1]} : vector<72x288xf32> to vector<1x32xf32>
    %26 = arith.addf %24, %25 : vector<1x32xf32>
    %c0_23 = arith.constant 0 : index
    %c287_24 = arith.constant 287 : index
    %c0_25 = arith.constant 0 : index
    %27 = vector.load %arg6[%c0_23, %c287_24, %c0_25] : memref<1x288x32xf32, #tpu.memory_space<vmem>>, vector<1x1x32xf32>
    %28 = vector.shape_cast %27 : vector<1x1x32xf32> to vector<1x32xf32>
    %29 = vector.shape_cast %26 : vector<1x32xf32> to vector<1x1x32xf32>
    tpu.vector_store %arg6[%c0_23, %c287_24, %c0_25], %29 {strides = array<i32>} : memref<1x288x32xf32, #tpu.memory_space<vmem>>, vector<1x1x32xf32>,
    %c0_26 = arith.constant 0 : index
    %c0_27 = arith.constant 0 : index
    %c0_28 = arith.constant 0 : index
    %30 = vector.load %arg6[%c0_26, %c0_27, %c0_28] : memref<1x288x32xf32, #tpu.memory_space<vmem>>, vector<1x286x32xf32>
    %31 = vector.shape_cast %30 : vector<1x286x32xf32> to vector<286x32xf32>
    %32 = vector.extract_strided_slice %5 {offsets = [2, 64], sizes = [286, 32], strides = [1, 1]} : vector<288x288xf32> to vector<286x32xf32>
    %33 = arith.addf %31, %32 : vector<286x32xf32>
    %c0_29 = arith.constant 0 : index
    %c0_30 = arith.constant 0 : index
    %c0_31 = arith.constant 0 : index
    %34 = vector.load %arg6[%c0_29, %c0_30, %c0_31] : memref<1x288x32xf32, #tpu.memory_space<vmem>>, vector<1x286x32xf32>
    %35 = vector.shape_cast %34 : vector<1x286x32xf32> to vector<286x32xf32>
    %36 = vector.shape_cast %33 : vector<286x32xf32> to vector<1x286x32xf32>
    tpu.vector_store %arg6[%c0_29, %c0_30, %c0_31], %36 {strides = array<i32>} : memref<1x288x32xf32, #tpu.memory_space<vmem>>, vector<1x286x32xf32>,
    %c0_32 = arith.constant 0 : index
    %c286 = arith.constant 286 : index
    %c0_33 = arith.constant 0 : index
    %37 = vector.load %arg6[%c0_32, %c286, %c0_33] : memref<1x288x32xf32, #tpu.memory_space<vmem>>, vector<1x2x32xf32>
    %38 = vector.shape_cast %37 : vector<1x2x32xf32> to vector<2x32xf32>
    %39 = vector.extract_strided_slice %7 {offsets = [0, 64], sizes = [2, 32], strides = [1, 1]} : vector<72x288xf32> to vector<2x32xf32>
    %40 = arith.addf %38, %39 : vector<2x32xf32>
    %c0_34 = arith.constant 0 : index
    %c286_35 = arith.constant 286 : index
    %c0_36 = arith.constant 0 : index
    %41 = vector.load %arg6[%c0_34, %c286_35, %c0_36] : memref<1x288x32xf32, #tpu.memory_space<vmem>>, vector<1x2x32xf32>
    %42 = vector.shape_cast %41 : vector<1x2x32xf32> to vector<2x32xf32>
    %43 = vector.shape_cast %40 : vector<2x32xf32> to vector<1x2x32xf32>
    tpu.vector_store %arg6[%c0_34, %c286_35, %c0_36], %43 {strides = array<i32>} : memref<1x288x32xf32, #tpu.memory_space<vmem>>, vector<1x2x32xf32>,
    %c0_37 = arith.constant 0 : index
    %c0_38 = arith.constant 0 : index
    %c0_39 = arith.constant 0 : index
    %44 = vector.load %arg6[%c0_37, %c0_38, %c0_39] : memref<1x288x32xf32, #tpu.memory_space<vmem>>, vector<1x270x32xf32>
    %45 = vector.shape_cast %44 : vector<1x270x32xf32> to vector<270x32xf32>
    %46 = vector.extract_strided_slice %5 {offsets = [18, 96], sizes = [270, 32], strides = [1, 1]} : vector<288x288xf32> to vector<270x32xf32>
    %47 = arith.addf %45, %46 : vector<270x32xf32>
    %c0_40 = arith.constant 0 : index
    %c0_41 = arith.constant 0 : index
    %c0_42 = arith.constant 0 : index
    %48 = vector.load %arg6[%c0_40, %c0_41, %c0_42] : memref<1x288x32xf32, #tpu.memory_space<vmem>>, vector<1x270x32xf32>
    %49 = vector.shape_cast %48 : vector<1x270x32xf32> to vector<270x32xf32>
    %50 = vector.shape_cast %47 : vector<270x32xf32> to vector<1x270x32xf32>
    tpu.vector_store %arg6[%c0_40, %c0_41, %c0_42], %50 {strides = array<i32>} : memref<1x288x32xf32, #tpu.memory_space<vmem>>, vector<1x270x32xf32>,
    %c0_43 = arith.constant 0 : index
    %c270 = arith.constant 270 : index
    %c0_44 = arith.constant 0 : index
    %51 = vector.load %arg6[%c0_43, %c270, %c0_44] : memref<1x288x32xf32, #tpu.memory_space<vmem>>, vector<1x18x32xf32>
    %52 = vector.shape_cast %51 : vector<1x18x32xf32> to vector<18x32xf32>
    %53 = vector.extract_strided_slice %7 {offsets = [0, 96], sizes = [18, 32], strides = [1, 1]} : vector<72x288xf32> to vector<18x32xf32>
    %54 = arith.addf %52, %53 : vector<18x32xf32>
    %c0_45 = arith.constant 0 : index
    %c270_46 = arith.constant 270 : index
    %c0_47 = arith.constant 0 : index
    %55 = vector.load %arg6[%c0_45, %c270_46, %c0_47] : memref<1x288x32xf32, #tpu.memory_space<vmem>>, vector<1x18x32xf32>
    %56 = vector.shape_cast %55 : vector<1x18x32xf32> to vector<18x32xf32>
    %57 = vector.shape_cast %54 : vector<18x32xf32> to vector<1x18x32xf32>
    tpu.vector_store %arg6[%c0_45, %c270_46, %c0_47], %57 {strides = array<i32>} : memref<1x288x32xf32, #tpu.memory_space<vmem>>, vector<1x18x32xf32>,
    %c0_48 = arith.constant 0 : index
    %c0_49 = arith.constant 0 : index
    %c0_50 = arith.constant 0 : index
    %58 = vector.load %arg6[%c0_48, %c0_49, %c0_50] : memref<1x288x32xf32, #tpu.memory_space<vmem>>, vector<1x269x32xf32>
    %59 = vector.shape_cast %58 : vector<1x269x32xf32> to vector<269x32xf32>
    %60 = vector.extract_strided_slice %5 {offsets = [19, 128], sizes = [269, 32], strides = [1, 1]} : vector<288x288xf32> to vector<269x32xf32>
    %61 = arith.addf %59, %60 : vector<269x32xf32>
    %c0_51 = arith.constant 0 : index
    %c0_52 = arith.constant 0 : index
    %c0_53 = arith.constant 0 : index
    %62 = vector.load %arg6[%c0_51, %c0_52, %c0_53] : memref<1x288x32xf32, #tpu.memory_space<vmem>>, vector<1x269x32xf32>
    %63 = vector.shape_cast %62 : vector<1x269x32xf32> to vector<269x32xf32>
    %64 = vector.shape_cast %61 : vector<269x32xf32> to vector<1x269x32xf32>
    tpu.vector_store %arg6[%c0_51, %c0_52, %c0_53], %64 {strides = array<i32>} : memref<1x288x32xf32, #tpu.memory_space<vmem>>, vector<1x269x32xf32>,
    %c0_54 = arith.constant 0 : index
    %c269 = arith.constant 269 : index
    %c0_55 = arith.constant 0 : index
    %65 = vector.load %arg6[%c0_54, %c269, %c0_55] : memref<1x288x32xf32, #tpu.memory_space<vmem>>, vector<1x19x32xf32>
    %66 = vector.shape_cast %65 : vector<1x19x32xf32> to vector<19x32xf32>
    %67 = vector.extract_strided_slice %7 {offsets = [0, 128], sizes = [19, 32], strides = [1, 1]} : vector<72x288xf32> to vector<19x32xf32>
    %68 = arith.addf %66, %67 : vector<19x32xf32>
    %c0_56 = arith.constant 0 : index
    %c269_57 = arith.constant 269 : index
    %c0_58 = arith.constant 0 : index
    %69 = vector.load %arg6[%c0_56, %c269_57, %c0_58] : memref<1x288x32xf32, #tpu.memory_space<vmem>>, vector<1x19x32xf32>
    %70 = vector.shape_cast %69 : vector<1x19x32xf32> to vector<19x32xf32>
    %71 = vector.shape_cast %68 : vector<19x32xf32> to vector<1x19x32xf32>
    tpu.vector_store %arg6[%c0_56, %c269_57, %c0_58], %71 {strides = array<i32>} : memref<1x288x32xf32, #tpu.memory_space<vmem>>, vector<1x19x32xf32>,
    %c0_59 = arith.constant 0 : index
    %c0_60 = arith.constant 0 : index
    %c0_61 = arith.constant 0 : index
    %72 = vector.load %arg6[%c0_59, %c0_60, %c0_61] : memref<1x288x32xf32, #tpu.memory_space<vmem>>, vector<1x268x32xf32>
    %73 = vector.shape_cast %72 : vector<1x268x32xf32> to vector<268x32xf32>
    %74 = vector.extract_strided_slice %5 {offsets = [20, 160], sizes = [268, 32], strides = [1, 1]} : vector<288x288xf32> to vector<268x32xf32>
    %75 = arith.addf %73, %74 : vector<268x32xf32>
    %c0_62 = arith.constant 0 : index
    %c0_63 = arith.constant 0 : index
    %c0_64 = arith.constant 0 : index
    %76 = vector.load %arg6[%c0_62, %c0_63, %c0_64] : memref<1x288x32xf32, #tpu.memory_space<vmem>>, vector<1x268x32xf32>
    %77 = vector.shape_cast %76 : vector<1x268x32xf32> to vector<268x32xf32>
    %78 = vector.shape_cast %75 : vector<268x32xf32> to vector<1x268x32xf32>
    tpu.vector_store %arg6[%c0_62, %c0_63, %c0_64], %78 {strides = array<i32>} : memref<1x288x32xf32, #tpu.memory_space<vmem>>, vector<1x268x32xf32>,
    %c0_65 = arith.constant 0 : index
    %c268 = arith.constant 268 : index
    %c0_66 = arith.constant 0 : index
    %79 = vector.load %arg6[%c0_65, %c268, %c0_66] : memref<1x288x32xf32, #tpu.memory_space<vmem>>, vector<1x20x32xf32>
    %80 = vector.shape_cast %79 : vector<1x20x32xf32> to vector<20x32xf32>
    %81 = vector.extract_strided_slice %7 {offsets = [0, 160], sizes = [20, 32], strides = [1, 1]} : vector<72x288xf32> to vector<20x32xf32>
    %82 = arith.addf %80, %81 : vector<20x32xf32>
    %c0_67 = arith.constant 0 : index
    %c268_68 = arith.constant 268 : index
    %c0_69 = arith.constant 0 : index
    %83 = vector.load %arg6[%c0_67, %c268_68, %c0_69] : memref<1x288x32xf32, #tpu.memory_space<vmem>>, vector<1x20x32xf32>
    %84 = vector.shape_cast %83 : vector<1x20x32xf32> to vector<20x32xf32>
    %85 = vector.shape_cast %82 : vector<20x32xf32> to vector<1x20x32xf32>
    tpu.vector_store %arg6[%c0_67, %c268_68, %c0_69], %85 {strides = array<i32>} : memref<1x288x32xf32, #tpu.memory_space<vmem>>, vector<1x20x32xf32>,
    %c0_70 = arith.constant 0 : index
    %c0_71 = arith.constant 0 : index
    %c0_72 = arith.constant 0 : index
    %86 = vector.load %arg6[%c0_70, %c0_71, %c0_72] : memref<1x288x32xf32, #tpu.memory_space<vmem>>, vector<1x252x32xf32>
    %87 = vector.shape_cast %86 : vector<1x252x32xf32> to vector<252x32xf32>
    %88 = vector.extract_strided_slice %5 {offsets = [36, 192], sizes = [252, 32], strides = [1, 1]} : vector<288x288xf32> to vector<252x32xf32>
    %89 = arith.addf %87, %88 : vector<252x32xf32>
    %c0_73 = arith.constant 0 : index
    %c0_74 = arith.constant 0 : index
    %c0_75 = arith.constant 0 : index
    %90 = vector.load %arg6[%c0_73, %c0_74, %c0_75] : memref<1x288x32xf32, #tpu.memory_space<vmem>>, vector<1x252x32xf32>
    %91 = vector.shape_cast %90 : vector<1x252x32xf32> to vector<252x32xf32>
    %92 = vector.shape_cast %89 : vector<252x32xf32> to vector<1x252x32xf32>
    tpu.vector_store %arg6[%c0_73, %c0_74, %c0_75], %92 {strides = array<i32>} : memref<1x288x32xf32, #tpu.memory_space<vmem>>, vector<1x252x32xf32>,
    %c0_76 = arith.constant 0 : index
    %c252 = arith.constant 252 : index
    %c0_77 = arith.constant 0 : index
    %93 = vector.load %arg6[%c0_76, %c252, %c0_77] : memref<1x288x32xf32, #tpu.memory_space<vmem>>, vector<1x36x32xf32>
    %94 = vector.shape_cast %93 : vector<1x36x32xf32> to vector<36x32xf32>
    %95 = vector.extract_strided_slice %7 {offsets = [0, 192], sizes = [36, 32], strides = [1, 1]} : vector<72x288xf32> to vector<36x32xf32>
    %96 = arith.addf %94, %95 : vector<36x32xf32>
    %c0_78 = arith.constant 0 : index
    %c252_79 = arith.constant 252 : index
    %c0_80 = arith.constant 0 : index
    %97 = vector.load %arg6[%c0_78, %c252_79, %c0_80] : memref<1x288x32xf32, #tpu.memory_space<vmem>>, vector<1x36x32xf32>
    %98 = vector.shape_cast %97 : vector<1x36x32xf32> to vector<36x32xf32>
    %99 = vector.shape_cast %96 : vector<36x32xf32> to vector<1x36x32xf32>
    tpu.vector_store %arg6[%c0_78, %c252_79, %c0_80], %99 {strides = array<i32>} : memref<1x288x32xf32, #tpu.memory_space<vmem>>, vector<1x36x32xf32>,
    %c0_81 = arith.constant 0 : index
    %c0_82 = arith.constant 0 : index
    %c0_83 = arith.constant 0 : index
    %100 = vector.load %arg6[%c0_81, %c0_82, %c0_83] : memref<1x288x32xf32, #tpu.memory_space<vmem>>, vector<1x251x32xf32>
    %101 = vector.shape_cast %100 : vector<1x251x32xf32> to vector<251x32xf32>
    %102 = vector.extract_strided_slice %5 {offsets = [37, 224], sizes = [251, 32], strides = [1, 1]} : vector<288x288xf32> to vector<251x32xf32>
    %103 = arith.addf %101, %102 : vector<251x32xf32>
    %c0_84 = arith.constant 0 : index
    %c0_85 = arith.constant 0 : index
    %c0_86 = arith.constant 0 : index
    %104 = vector.load %arg6[%c0_84, %c0_85, %c0_86] : memref<1x288x32xf32, #tpu.memory_space<vmem>>, vector<1x251x32xf32>
    %105 = vector.shape_cast %104 : vector<1x251x32xf32> to vector<251x32xf32>
    %106 = vector.shape_cast %103 : vector<251x32xf32> to vector<1x251x32xf32>
    tpu.vector_store %arg6[%c0_84, %c0_85, %c0_86], %106 {strides = array<i32>} : memref<1x288x32xf32, #tpu.memory_space<vmem>>, vector<1x251x32xf32>,
    %c0_87 = arith.constant 0 : index
    %c251 = arith.constant 251 : index
    %c0_88 = arith.constant 0 : index
    %107 = vector.load %arg6[%c0_87, %c251, %c0_88] : memref<1x288x32xf32, #tpu.memory_space<vmem>>, vector<1x37x32xf32>
    %108 = vector.shape_cast %107 : vector<1x37x32xf32> to vector<37x32xf32>
    %109 = vector.extract_strided_slice %7 {offsets = [0, 224], sizes = [37, 32], strides = [1, 1]} : vector<72x288xf32> to vector<37x32xf32>
    %110 = arith.addf %108, %109 : vector<37x32xf32>
    %c0_89 = arith.constant 0 : index
    %c251_90 = arith.constant 251 : index
    %c0_91 = arith.constant 0 : index
    %111 = vector.load %arg6[%c0_89, %c251_90, %c0_91] : memref<1x288x32xf32, #tpu.memory_space<vmem>>, vector<1x37x32xf32>
    %112 = vector.shape_cast %111 : vector<1x37x32xf32> to vector<37x32xf32>
    %113 = vector.shape_cast %110 : vector<37x32xf32> to vector<1x37x32xf32>
    tpu.vector_store %arg6[%c0_89, %c251_90, %c0_91], %113 {strides = array<i32>} : memref<1x288x32xf32, #tpu.memory_space<vmem>>, vector<1x37x32xf32>,
    %c0_92 = arith.constant 0 : index
    %c0_93 = arith.constant 0 : index
    %c0_94 = arith.constant 0 : index
    %114 = vector.load %arg6[%c0_92, %c0_93, %c0_94] : memref<1x288x32xf32, #tpu.memory_space<vmem>>, vector<1x250x32xf32>
    %115 = vector.shape_cast %114 : vector<1x250x32xf32> to vector<250x32xf32>
    %116 = vector.extract_strided_slice %5 {offsets = [38, 256], sizes = [250, 32], strides = [1, 1]} : vector<288x288xf32> to vector<250x32xf32>
    %117 = arith.addf %115, %116 : vector<250x32xf32>
    %c0_95 = arith.constant 0 : index
    %c0_96 = arith.constant 0 : index
    %c0_97 = arith.constant 0 : index
    %118 = vector.load %arg6[%c0_95, %c0_96, %c0_97] : memref<1x288x32xf32, #tpu.memory_space<vmem>>, vector<1x250x32xf32>
    %119 = vector.shape_cast %118 : vector<1x250x32xf32> to vector<250x32xf32>
    %120 = vector.shape_cast %117 : vector<250x32xf32> to vector<1x250x32xf32>
    tpu.vector_store %arg6[%c0_95, %c0_96, %c0_97], %120 {strides = array<i32>} : memref<1x288x32xf32, #tpu.memory_space<vmem>>, vector<1x250x32xf32>,
    %c0_98 = arith.constant 0 : index
    %c250 = arith.constant 250 : index
    %c0_99 = arith.constant 0 : index
    %121 = vector.load %arg6[%c0_98, %c250, %c0_99] : memref<1x288x32xf32, #tpu.memory_space<vmem>>, vector<1x38x32xf32>
    %122 = vector.shape_cast %121 : vector<1x38x32xf32> to vector<38x32xf32>
    %123 = vector.extract_strided_slice %7 {offsets = [0, 256], sizes = [38, 32], strides = [1, 1]} : vector<72x288xf32> to vector<38x32xf32>
    %124 = arith.addf %122, %123 : vector<38x32xf32>
    %c0_100 = arith.constant 0 : index
    %c250_101 = arith.constant 250 : index
    %c0_102 = arith.constant 0 : index
    %125 = vector.load %arg6[%c0_100, %c250_101, %c0_102] : memref<1x288x32xf32, #tpu.memory_space<vmem>>, vector<1x38x32xf32>
    %126 = vector.shape_cast %125 : vector<1x38x32xf32> to vector<38x32xf32>
    %127 = vector.shape_cast %124 : vector<38x32xf32> to vector<1x38x32xf32>
    tpu.vector_store %arg6[%c0_100, %c250_101, %c0_102], %127 {strides = array<i32>} : memref<1x288x32xf32, #tpu.memory_space<vmem>>, vector<1x38x32xf32>,
    return
  }
  func.func @transform_0(%arg0: i32, %arg1: i32) -> (i32, i32, i32) {
    %c0_i32 = arith.constant 0 : i32
    %c0_i32_0 = arith.constant 0 : i32
    return %arg0, %arg1, %c0_i32 : i32, i32, i32
  }
  func.func @transform_1(%arg0: i32, %arg1: i32) -> (i32, i32, i32) {
    %c1_i32 = arith.constant 1 : i32
    %0 = arith.addi %arg1, %c1_i32 : i32
    %c4_i32 = arith.constant 4 : i32
    %1 = arith.muli %0, %c4_i32 : i32
    %c0_i32 = arith.constant 0 : i32
    %c0_i32_0 = arith.constant 0 : i32
    return %arg0, %1, %c0_i32 : i32, i32, i32
  }
  func.func @transform_2(%arg0: i32, %arg1: i32) -> (i32, i32) {
    %c0_i32 = arith.constant 0 : i32
    %c0_i32_0 = arith.constant 0 : i32
    %c0_i32_1 = arith.constant 0 : i32
    return %c0_i32, %c0_i32_0 : i32, i32
  }
  func.func @transform_3(%arg0: i32, %arg1: i32) -> (i32, i32) {
    %c0_i32 = arith.constant 0 : i32
    %c0_i32_0 = arith.constant 0 : i32
    %c0_i32_1 = arith.constant 0 : i32
    return %c0_i32, %c0_i32_0 : i32, i32
  }
  func.func @transform_4(%arg0: i32, %arg1: i32) -> (i32, i32, i32) {
    %c0_i32 = arith.constant 0 : i32
    %c0_i32_0 = arith.constant 0 : i32
    return %arg0, %arg1, %c0_i32 : i32, i32, i32
  }
}

module attributes {stable_mosaic.version = 11 : i64} {
  func.func @_conv3x3_s1_kernel(%arg0: i32, %arg1: i32, %arg2: memref<1x80x32xbf16, #tpu.memory_space<vmem>>, %arg3: memref<1x40x32xbf16, #tpu.memory_space<vmem>>, %arg4: memref<32x288xbf16, #tpu.memory_space<vmem>>, %arg5: memref<1x32xf32, #tpu.memory_space<vmem>>, %arg6: memref<1x80x32xf32, #tpu.memory_space<vmem>>) attributes {dimension_semantics = [#tpu.dimension_semantics<parallel>, #tpu.dimension_semantics<parallel>], iteration_bounds = array<i64: 2, 1>, scalar_prefetch = 0 : i64, scratch_operands = 0 : i64, tpu.core_type = #tpu.core_type<tc>, window_params = [{transform_indices = @transform_0, window_bounds = array<i64: 1, 80, 32>}, {transform_indices = @transform_1, window_bounds = array<i64: 1, 40, 32>}, {pipeline_mode = #tpu.pipeline_mode<synchronous>, transform_indices = @transform_2, window_bounds = array<i64: 32, 288>}, {pipeline_mode = #tpu.pipeline_mode<synchronous>, transform_indices = @transform_3, window_bounds = array<i64: 1, 32>}, {transform_indices = @transform_4, window_bounds = array<i64: 1, 80, 32>}]} {
    %c0 = arith.constant 0 : index
    %c0_0 = arith.constant 0 : index
    %c0_1 = arith.constant 0 : index
    %0 = vector.load %arg2[%c0, %c0_0, %c0_1] : memref<1x80x32xbf16, #tpu.memory_space<vmem>>, vector<1x80x32xbf16>
    %1 = vector.shape_cast %0 : vector<1x80x32xbf16> to vector<80x32xbf16>
    %c0_2 = arith.constant 0 : index
    %c0_3 = arith.constant 0 : index
    %c0_4 = arith.constant 0 : index
    %2 = vector.load %arg3[%c0_2, %c0_3, %c0_4] : memref<1x40x32xbf16, #tpu.memory_space<vmem>>, vector<1x40x32xbf16>
    %3 = vector.shape_cast %2 : vector<1x40x32xbf16> to vector<40x32xbf16>
    %c0_5 = arith.constant 0 : index
    %c0_6 = arith.constant 0 : index
    %4 = vector.load %arg4[%c0_5, %c0_6] : memref<32x288xbf16, #tpu.memory_space<vmem>>, vector<32x288xbf16>
    %cst = arith.constant dense<0.000000e+00> : vector<80x288xf32>
    %5 = tpu.matmul %1, %4, %cst {dimension_numbers = #tpu.dot_dimension_numbers<[1], [0], [0], [1], [0, 0, 1, 1], [], []>} : vector<80x32xbf16>, vector<32x288xbf16>, vector<80x288xf32> -> vector<80x288xf32>
    %c0_7 = arith.constant 0 : index
    %c0_8 = arith.constant 0 : index
    %6 = vector.load %arg4[%c0_7, %c0_8] : memref<32x288xbf16, #tpu.memory_space<vmem>>, vector<32x288xbf16>
    %cst_9 = arith.constant dense<0.000000e+00> : vector<40x288xf32>
    %7 = tpu.matmul %3, %6, %cst_9 {dimension_numbers = #tpu.dot_dimension_numbers<[1], [0], [0], [1], [0, 0, 1, 1], [], []>} : vector<40x32xbf16>, vector<32x288xbf16>, vector<40x288xf32> -> vector<40x288xf32>
    %c0_10 = arith.constant 0 : index
    %c0_11 = arith.constant 0 : index
    %8 = vector.load %arg5[%c0_10, %c0_11] : memref<1x32xf32, #tpu.memory_space<vmem>>, vector<1x32xf32>
    %9 = vector.shape_cast %8 : vector<1x32xf32> to vector<1x32xf32>
    %10 = vector.broadcast %9 : vector<1x32xf32> to vector<80x32xf32>
    %11 = vector.extract_strided_slice %5 {offsets = [0, 0], sizes = [80, 32], strides = [1, 1]} : vector<80x288xf32> to vector<80x32xf32>
    %12 = arith.addf %10, %11 : vector<80x32xf32>
    %c0_12 = arith.constant 0 : index
    %c0_13 = arith.constant 0 : index
    %c0_14 = arith.constant 0 : index
    %13 = vector.load %arg6[%c0_12, %c0_13, %c0_14] : memref<1x80x32xf32, #tpu.memory_space<vmem>>, vector<1x80x32xf32>
    %14 = vector.shape_cast %13 : vector<1x80x32xf32> to vector<80x32xf32>
    %15 = vector.shape_cast %12 : vector<80x32xf32> to vector<1x80x32xf32>
    tpu.vector_store %arg6[%c0_12, %c0_13, %c0_14], %15 {strides = array<i32>} : memref<1x80x32xf32, #tpu.memory_space<vmem>>, vector<1x80x32xf32>,
    %c0_15 = arith.constant 0 : index
    %c0_16 = arith.constant 0 : index
    %c0_17 = arith.constant 0 : index
    %16 = vector.load %arg6[%c0_15, %c0_16, %c0_17] : memref<1x80x32xf32, #tpu.memory_space<vmem>>, vector<1x79x32xf32>
    %17 = vector.shape_cast %16 : vector<1x79x32xf32> to vector<79x32xf32>
    %18 = vector.extract_strided_slice %5 {offsets = [1, 32], sizes = [79, 32], strides = [1, 1]} : vector<80x288xf32> to vector<79x32xf32>
    %19 = arith.addf %17, %18 : vector<79x32xf32>
    %c0_18 = arith.constant 0 : index
    %c0_19 = arith.constant 0 : index
    %c0_20 = arith.constant 0 : index
    %20 = vector.load %arg6[%c0_18, %c0_19, %c0_20] : memref<1x80x32xf32, #tpu.memory_space<vmem>>, vector<1x79x32xf32>
    %21 = vector.shape_cast %20 : vector<1x79x32xf32> to vector<79x32xf32>
    %22 = vector.shape_cast %19 : vector<79x32xf32> to vector<1x79x32xf32>
    tpu.vector_store %arg6[%c0_18, %c0_19, %c0_20], %22 {strides = array<i32>} : memref<1x80x32xf32, #tpu.memory_space<vmem>>, vector<1x79x32xf32>,
    %c0_21 = arith.constant 0 : index
    %c79 = arith.constant 79 : index
    %c0_22 = arith.constant 0 : index
    %23 = vector.load %arg6[%c0_21, %c79, %c0_22] : memref<1x80x32xf32, #tpu.memory_space<vmem>>, vector<1x1x32xf32>
    %24 = vector.shape_cast %23 : vector<1x1x32xf32> to vector<1x32xf32>
    %25 = vector.extract_strided_slice %7 {offsets = [0, 32], sizes = [1, 32], strides = [1, 1]} : vector<40x288xf32> to vector<1x32xf32>
    %26 = arith.addf %24, %25 : vector<1x32xf32>
    %c0_23 = arith.constant 0 : index
    %c79_24 = arith.constant 79 : index
    %c0_25 = arith.constant 0 : index
    %27 = vector.load %arg6[%c0_23, %c79_24, %c0_25] : memref<1x80x32xf32, #tpu.memory_space<vmem>>, vector<1x1x32xf32>
    %28 = vector.shape_cast %27 : vector<1x1x32xf32> to vector<1x32xf32>
    %29 = vector.shape_cast %26 : vector<1x32xf32> to vector<1x1x32xf32>
    tpu.vector_store %arg6[%c0_23, %c79_24, %c0_25], %29 {strides = array<i32>} : memref<1x80x32xf32, #tpu.memory_space<vmem>>, vector<1x1x32xf32>,
    %c0_26 = arith.constant 0 : index
    %c0_27 = arith.constant 0 : index
    %c0_28 = arith.constant 0 : index
    %30 = vector.load %arg6[%c0_26, %c0_27, %c0_28] : memref<1x80x32xf32, #tpu.memory_space<vmem>>, vector<1x78x32xf32>
    %31 = vector.shape_cast %30 : vector<1x78x32xf32> to vector<78x32xf32>
    %32 = vector.extract_strided_slice %5 {offsets = [2, 64], sizes = [78, 32], strides = [1, 1]} : vector<80x288xf32> to vector<78x32xf32>
    %33 = arith.addf %31, %32 : vector<78x32xf32>
    %c0_29 = arith.constant 0 : index
    %c0_30 = arith.constant 0 : index
    %c0_31 = arith.constant 0 : index
    %34 = vector.load %arg6[%c0_29, %c0_30, %c0_31] : memref<1x80x32xf32, #tpu.memory_space<vmem>>, vector<1x78x32xf32>
    %35 = vector.shape_cast %34 : vector<1x78x32xf32> to vector<78x32xf32>
    %36 = vector.shape_cast %33 : vector<78x32xf32> to vector<1x78x32xf32>
    tpu.vector_store %arg6[%c0_29, %c0_30, %c0_31], %36 {strides = array<i32>} : memref<1x80x32xf32, #tpu.memory_space<vmem>>, vector<1x78x32xf32>,
    %c0_32 = arith.constant 0 : index
    %c78 = arith.constant 78 : index
    %c0_33 = arith.constant 0 : index
    %37 = vector.load %arg6[%c0_32, %c78, %c0_33] : memref<1x80x32xf32, #tpu.memory_space<vmem>>, vector<1x2x32xf32>
    %38 = vector.shape_cast %37 : vector<1x2x32xf32> to vector<2x32xf32>
    %39 = vector.extract_strided_slice %7 {offsets = [0, 64], sizes = [2, 32], strides = [1, 1]} : vector<40x288xf32> to vector<2x32xf32>
    %40 = arith.addf %38, %39 : vector<2x32xf32>
    %c0_34 = arith.constant 0 : index
    %c78_35 = arith.constant 78 : index
    %c0_36 = arith.constant 0 : index
    %41 = vector.load %arg6[%c0_34, %c78_35, %c0_36] : memref<1x80x32xf32, #tpu.memory_space<vmem>>, vector<1x2x32xf32>
    %42 = vector.shape_cast %41 : vector<1x2x32xf32> to vector<2x32xf32>
    %43 = vector.shape_cast %40 : vector<2x32xf32> to vector<1x2x32xf32>
    tpu.vector_store %arg6[%c0_34, %c78_35, %c0_36], %43 {strides = array<i32>} : memref<1x80x32xf32, #tpu.memory_space<vmem>>, vector<1x2x32xf32>,
    %c0_37 = arith.constant 0 : index
    %c0_38 = arith.constant 0 : index
    %c0_39 = arith.constant 0 : index
    %44 = vector.load %arg6[%c0_37, %c0_38, %c0_39] : memref<1x80x32xf32, #tpu.memory_space<vmem>>, vector<1x70x32xf32>
    %45 = vector.shape_cast %44 : vector<1x70x32xf32> to vector<70x32xf32>
    %46 = vector.extract_strided_slice %5 {offsets = [10, 96], sizes = [70, 32], strides = [1, 1]} : vector<80x288xf32> to vector<70x32xf32>
    %47 = arith.addf %45, %46 : vector<70x32xf32>
    %c0_40 = arith.constant 0 : index
    %c0_41 = arith.constant 0 : index
    %c0_42 = arith.constant 0 : index
    %48 = vector.load %arg6[%c0_40, %c0_41, %c0_42] : memref<1x80x32xf32, #tpu.memory_space<vmem>>, vector<1x70x32xf32>
    %49 = vector.shape_cast %48 : vector<1x70x32xf32> to vector<70x32xf32>
    %50 = vector.shape_cast %47 : vector<70x32xf32> to vector<1x70x32xf32>
    tpu.vector_store %arg6[%c0_40, %c0_41, %c0_42], %50 {strides = array<i32>} : memref<1x80x32xf32, #tpu.memory_space<vmem>>, vector<1x70x32xf32>,
    %c0_43 = arith.constant 0 : index
    %c70 = arith.constant 70 : index
    %c0_44 = arith.constant 0 : index
    %51 = vector.load %arg6[%c0_43, %c70, %c0_44] : memref<1x80x32xf32, #tpu.memory_space<vmem>>, vector<1x10x32xf32>
    %52 = vector.shape_cast %51 : vector<1x10x32xf32> to vector<10x32xf32>
    %53 = vector.extract_strided_slice %7 {offsets = [0, 96], sizes = [10, 32], strides = [1, 1]} : vector<40x288xf32> to vector<10x32xf32>
    %54 = arith.addf %52, %53 : vector<10x32xf32>
    %c0_45 = arith.constant 0 : index
    %c70_46 = arith.constant 70 : index
    %c0_47 = arith.constant 0 : index
    %55 = vector.load %arg6[%c0_45, %c70_46, %c0_47] : memref<1x80x32xf32, #tpu.memory_space<vmem>>, vector<1x10x32xf32>
    %56 = vector.shape_cast %55 : vector<1x10x32xf32> to vector<10x32xf32>
    %57 = vector.shape_cast %54 : vector<10x32xf32> to vector<1x10x32xf32>
    tpu.vector_store %arg6[%c0_45, %c70_46, %c0_47], %57 {strides = array<i32>} : memref<1x80x32xf32, #tpu.memory_space<vmem>>, vector<1x10x32xf32>,
    %c0_48 = arith.constant 0 : index
    %c0_49 = arith.constant 0 : index
    %c0_50 = arith.constant 0 : index
    %58 = vector.load %arg6[%c0_48, %c0_49, %c0_50] : memref<1x80x32xf32, #tpu.memory_space<vmem>>, vector<1x69x32xf32>
    %59 = vector.shape_cast %58 : vector<1x69x32xf32> to vector<69x32xf32>
    %60 = vector.extract_strided_slice %5 {offsets = [11, 128], sizes = [69, 32], strides = [1, 1]} : vector<80x288xf32> to vector<69x32xf32>
    %61 = arith.addf %59, %60 : vector<69x32xf32>
    %c0_51 = arith.constant 0 : index
    %c0_52 = arith.constant 0 : index
    %c0_53 = arith.constant 0 : index
    %62 = vector.load %arg6[%c0_51, %c0_52, %c0_53] : memref<1x80x32xf32, #tpu.memory_space<vmem>>, vector<1x69x32xf32>
    %63 = vector.shape_cast %62 : vector<1x69x32xf32> to vector<69x32xf32>
    %64 = vector.shape_cast %61 : vector<69x32xf32> to vector<1x69x32xf32>
    tpu.vector_store %arg6[%c0_51, %c0_52, %c0_53], %64 {strides = array<i32>} : memref<1x80x32xf32, #tpu.memory_space<vmem>>, vector<1x69x32xf32>,
    %c0_54 = arith.constant 0 : index
    %c69 = arith.constant 69 : index
    %c0_55 = arith.constant 0 : index
    %65 = vector.load %arg6[%c0_54, %c69, %c0_55] : memref<1x80x32xf32, #tpu.memory_space<vmem>>, vector<1x11x32xf32>
    %66 = vector.shape_cast %65 : vector<1x11x32xf32> to vector<11x32xf32>
    %67 = vector.extract_strided_slice %7 {offsets = [0, 128], sizes = [11, 32], strides = [1, 1]} : vector<40x288xf32> to vector<11x32xf32>
    %68 = arith.addf %66, %67 : vector<11x32xf32>
    %c0_56 = arith.constant 0 : index
    %c69_57 = arith.constant 69 : index
    %c0_58 = arith.constant 0 : index
    %69 = vector.load %arg6[%c0_56, %c69_57, %c0_58] : memref<1x80x32xf32, #tpu.memory_space<vmem>>, vector<1x11x32xf32>
    %70 = vector.shape_cast %69 : vector<1x11x32xf32> to vector<11x32xf32>
    %71 = vector.shape_cast %68 : vector<11x32xf32> to vector<1x11x32xf32>
    tpu.vector_store %arg6[%c0_56, %c69_57, %c0_58], %71 {strides = array<i32>} : memref<1x80x32xf32, #tpu.memory_space<vmem>>, vector<1x11x32xf32>,
    %c0_59 = arith.constant 0 : index
    %c0_60 = arith.constant 0 : index
    %c0_61 = arith.constant 0 : index
    %72 = vector.load %arg6[%c0_59, %c0_60, %c0_61] : memref<1x80x32xf32, #tpu.memory_space<vmem>>, vector<1x68x32xf32>
    %73 = vector.shape_cast %72 : vector<1x68x32xf32> to vector<68x32xf32>
    %74 = vector.extract_strided_slice %5 {offsets = [12, 160], sizes = [68, 32], strides = [1, 1]} : vector<80x288xf32> to vector<68x32xf32>
    %75 = arith.addf %73, %74 : vector<68x32xf32>
    %c0_62 = arith.constant 0 : index
    %c0_63 = arith.constant 0 : index
    %c0_64 = arith.constant 0 : index
    %76 = vector.load %arg6[%c0_62, %c0_63, %c0_64] : memref<1x80x32xf32, #tpu.memory_space<vmem>>, vector<1x68x32xf32>
    %77 = vector.shape_cast %76 : vector<1x68x32xf32> to vector<68x32xf32>
    %78 = vector.shape_cast %75 : vector<68x32xf32> to vector<1x68x32xf32>
    tpu.vector_store %arg6[%c0_62, %c0_63, %c0_64], %78 {strides = array<i32>} : memref<1x80x32xf32, #tpu.memory_space<vmem>>, vector<1x68x32xf32>,
    %c0_65 = arith.constant 0 : index
    %c68 = arith.constant 68 : index
    %c0_66 = arith.constant 0 : index
    %79 = vector.load %arg6[%c0_65, %c68, %c0_66] : memref<1x80x32xf32, #tpu.memory_space<vmem>>, vector<1x12x32xf32>
    %80 = vector.shape_cast %79 : vector<1x12x32xf32> to vector<12x32xf32>
    %81 = vector.extract_strided_slice %7 {offsets = [0, 160], sizes = [12, 32], strides = [1, 1]} : vector<40x288xf32> to vector<12x32xf32>
    %82 = arith.addf %80, %81 : vector<12x32xf32>
    %c0_67 = arith.constant 0 : index
    %c68_68 = arith.constant 68 : index
    %c0_69 = arith.constant 0 : index
    %83 = vector.load %arg6[%c0_67, %c68_68, %c0_69] : memref<1x80x32xf32, #tpu.memory_space<vmem>>, vector<1x12x32xf32>
    %84 = vector.shape_cast %83 : vector<1x12x32xf32> to vector<12x32xf32>
    %85 = vector.shape_cast %82 : vector<12x32xf32> to vector<1x12x32xf32>
    tpu.vector_store %arg6[%c0_67, %c68_68, %c0_69], %85 {strides = array<i32>} : memref<1x80x32xf32, #tpu.memory_space<vmem>>, vector<1x12x32xf32>,
    %c0_70 = arith.constant 0 : index
    %c0_71 = arith.constant 0 : index
    %c0_72 = arith.constant 0 : index
    %86 = vector.load %arg6[%c0_70, %c0_71, %c0_72] : memref<1x80x32xf32, #tpu.memory_space<vmem>>, vector<1x60x32xf32>
    %87 = vector.shape_cast %86 : vector<1x60x32xf32> to vector<60x32xf32>
    %88 = vector.extract_strided_slice %5 {offsets = [20, 192], sizes = [60, 32], strides = [1, 1]} : vector<80x288xf32> to vector<60x32xf32>
    %89 = arith.addf %87, %88 : vector<60x32xf32>
    %c0_73 = arith.constant 0 : index
    %c0_74 = arith.constant 0 : index
    %c0_75 = arith.constant 0 : index
    %90 = vector.load %arg6[%c0_73, %c0_74, %c0_75] : memref<1x80x32xf32, #tpu.memory_space<vmem>>, vector<1x60x32xf32>
    %91 = vector.shape_cast %90 : vector<1x60x32xf32> to vector<60x32xf32>
    %92 = vector.shape_cast %89 : vector<60x32xf32> to vector<1x60x32xf32>
    tpu.vector_store %arg6[%c0_73, %c0_74, %c0_75], %92 {strides = array<i32>} : memref<1x80x32xf32, #tpu.memory_space<vmem>>, vector<1x60x32xf32>,
    %c0_76 = arith.constant 0 : index
    %c60 = arith.constant 60 : index
    %c0_77 = arith.constant 0 : index
    %93 = vector.load %arg6[%c0_76, %c60, %c0_77] : memref<1x80x32xf32, #tpu.memory_space<vmem>>, vector<1x20x32xf32>
    %94 = vector.shape_cast %93 : vector<1x20x32xf32> to vector<20x32xf32>
    %95 = vector.extract_strided_slice %7 {offsets = [0, 192], sizes = [20, 32], strides = [1, 1]} : vector<40x288xf32> to vector<20x32xf32>
    %96 = arith.addf %94, %95 : vector<20x32xf32>
    %c0_78 = arith.constant 0 : index
    %c60_79 = arith.constant 60 : index
    %c0_80 = arith.constant 0 : index
    %97 = vector.load %arg6[%c0_78, %c60_79, %c0_80] : memref<1x80x32xf32, #tpu.memory_space<vmem>>, vector<1x20x32xf32>
    %98 = vector.shape_cast %97 : vector<1x20x32xf32> to vector<20x32xf32>
    %99 = vector.shape_cast %96 : vector<20x32xf32> to vector<1x20x32xf32>
    tpu.vector_store %arg6[%c0_78, %c60_79, %c0_80], %99 {strides = array<i32>} : memref<1x80x32xf32, #tpu.memory_space<vmem>>, vector<1x20x32xf32>,
    %c0_81 = arith.constant 0 : index
    %c0_82 = arith.constant 0 : index
    %c0_83 = arith.constant 0 : index
    %100 = vector.load %arg6[%c0_81, %c0_82, %c0_83] : memref<1x80x32xf32, #tpu.memory_space<vmem>>, vector<1x59x32xf32>
    %101 = vector.shape_cast %100 : vector<1x59x32xf32> to vector<59x32xf32>
    %102 = vector.extract_strided_slice %5 {offsets = [21, 224], sizes = [59, 32], strides = [1, 1]} : vector<80x288xf32> to vector<59x32xf32>
    %103 = arith.addf %101, %102 : vector<59x32xf32>
    %c0_84 = arith.constant 0 : index
    %c0_85 = arith.constant 0 : index
    %c0_86 = arith.constant 0 : index
    %104 = vector.load %arg6[%c0_84, %c0_85, %c0_86] : memref<1x80x32xf32, #tpu.memory_space<vmem>>, vector<1x59x32xf32>
    %105 = vector.shape_cast %104 : vector<1x59x32xf32> to vector<59x32xf32>
    %106 = vector.shape_cast %103 : vector<59x32xf32> to vector<1x59x32xf32>
    tpu.vector_store %arg6[%c0_84, %c0_85, %c0_86], %106 {strides = array<i32>} : memref<1x80x32xf32, #tpu.memory_space<vmem>>, vector<1x59x32xf32>,
    %c0_87 = arith.constant 0 : index
    %c59 = arith.constant 59 : index
    %c0_88 = arith.constant 0 : index
    %107 = vector.load %arg6[%c0_87, %c59, %c0_88] : memref<1x80x32xf32, #tpu.memory_space<vmem>>, vector<1x21x32xf32>
    %108 = vector.shape_cast %107 : vector<1x21x32xf32> to vector<21x32xf32>
    %109 = vector.extract_strided_slice %7 {offsets = [0, 224], sizes = [21, 32], strides = [1, 1]} : vector<40x288xf32> to vector<21x32xf32>
    %110 = arith.addf %108, %109 : vector<21x32xf32>
    %c0_89 = arith.constant 0 : index
    %c59_90 = arith.constant 59 : index
    %c0_91 = arith.constant 0 : index
    %111 = vector.load %arg6[%c0_89, %c59_90, %c0_91] : memref<1x80x32xf32, #tpu.memory_space<vmem>>, vector<1x21x32xf32>
    %112 = vector.shape_cast %111 : vector<1x21x32xf32> to vector<21x32xf32>
    %113 = vector.shape_cast %110 : vector<21x32xf32> to vector<1x21x32xf32>
    tpu.vector_store %arg6[%c0_89, %c59_90, %c0_91], %113 {strides = array<i32>} : memref<1x80x32xf32, #tpu.memory_space<vmem>>, vector<1x21x32xf32>,
    %c0_92 = arith.constant 0 : index
    %c0_93 = arith.constant 0 : index
    %c0_94 = arith.constant 0 : index
    %114 = vector.load %arg6[%c0_92, %c0_93, %c0_94] : memref<1x80x32xf32, #tpu.memory_space<vmem>>, vector<1x58x32xf32>
    %115 = vector.shape_cast %114 : vector<1x58x32xf32> to vector<58x32xf32>
    %116 = vector.extract_strided_slice %5 {offsets = [22, 256], sizes = [58, 32], strides = [1, 1]} : vector<80x288xf32> to vector<58x32xf32>
    %117 = arith.addf %115, %116 : vector<58x32xf32>
    %c0_95 = arith.constant 0 : index
    %c0_96 = arith.constant 0 : index
    %c0_97 = arith.constant 0 : index
    %118 = vector.load %arg6[%c0_95, %c0_96, %c0_97] : memref<1x80x32xf32, #tpu.memory_space<vmem>>, vector<1x58x32xf32>
    %119 = vector.shape_cast %118 : vector<1x58x32xf32> to vector<58x32xf32>
    %120 = vector.shape_cast %117 : vector<58x32xf32> to vector<1x58x32xf32>
    tpu.vector_store %arg6[%c0_95, %c0_96, %c0_97], %120 {strides = array<i32>} : memref<1x80x32xf32, #tpu.memory_space<vmem>>, vector<1x58x32xf32>,
    %c0_98 = arith.constant 0 : index
    %c58 = arith.constant 58 : index
    %c0_99 = arith.constant 0 : index
    %121 = vector.load %arg6[%c0_98, %c58, %c0_99] : memref<1x80x32xf32, #tpu.memory_space<vmem>>, vector<1x22x32xf32>
    %122 = vector.shape_cast %121 : vector<1x22x32xf32> to vector<22x32xf32>
    %123 = vector.extract_strided_slice %7 {offsets = [0, 256], sizes = [22, 32], strides = [1, 1]} : vector<40x288xf32> to vector<22x32xf32>
    %124 = arith.addf %122, %123 : vector<22x32xf32>
    %c0_100 = arith.constant 0 : index
    %c58_101 = arith.constant 58 : index
    %c0_102 = arith.constant 0 : index
    %125 = vector.load %arg6[%c0_100, %c58_101, %c0_102] : memref<1x80x32xf32, #tpu.memory_space<vmem>>, vector<1x22x32xf32>
    %126 = vector.shape_cast %125 : vector<1x22x32xf32> to vector<22x32xf32>
    %127 = vector.shape_cast %124 : vector<22x32xf32> to vector<1x22x32xf32>
    tpu.vector_store %arg6[%c0_100, %c58_101, %c0_102], %127 {strides = array<i32>} : memref<1x80x32xf32, #tpu.memory_space<vmem>>, vector<1x22x32xf32>,
    return
  }
  func.func @transform_0(%arg0: i32, %arg1: i32) -> (i32, i32, i32) {
    %c0_i32 = arith.constant 0 : i32
    %c0_i32_0 = arith.constant 0 : i32
    return %arg0, %arg1, %c0_i32 : i32, i32, i32
  }
  func.func @transform_1(%arg0: i32, %arg1: i32) -> (i32, i32, i32) {
    %c1_i32 = arith.constant 1 : i32
    %0 = arith.addi %arg1, %c1_i32 : i32
    %c2_i32 = arith.constant 2 : i32
    %1 = arith.muli %0, %c2_i32 : i32
    %c0_i32 = arith.constant 0 : i32
    %c0_i32_0 = arith.constant 0 : i32
    return %arg0, %1, %c0_i32 : i32, i32, i32
  }
  func.func @transform_2(%arg0: i32, %arg1: i32) -> (i32, i32) {
    %c0_i32 = arith.constant 0 : i32
    %c0_i32_0 = arith.constant 0 : i32
    %c0_i32_1 = arith.constant 0 : i32
    return %c0_i32, %c0_i32_0 : i32, i32
  }
  func.func @transform_3(%arg0: i32, %arg1: i32) -> (i32, i32) {
    %c0_i32 = arith.constant 0 : i32
    %c0_i32_0 = arith.constant 0 : i32
    %c0_i32_1 = arith.constant 0 : i32
    return %c0_i32, %c0_i32_0 : i32, i32
  }
  func.func @transform_4(%arg0: i32, %arg1: i32) -> (i32, i32, i32) {
    %c0_i32 = arith.constant 0 : i32
    %c0_i32_0 = arith.constant 0 : i32
    return %arg0, %arg1, %c0_i32 : i32, i32, i32
  }
}

module attributes {stable_mosaic.version = 11 : i64} {
  func.func @_conv3x3_s1_kernel(%arg0: i32, %arg1: i32, %arg2: memref<1x48x32xbf16, #tpu.memory_space<vmem>>, %arg3: memref<1x24x32xbf16, #tpu.memory_space<vmem>>, %arg4: memref<32x288xbf16, #tpu.memory_space<vmem>>, %arg5: memref<1x32xf32, #tpu.memory_space<vmem>>, %arg6: memref<1x48x32xf32, #tpu.memory_space<vmem>>) attributes {dimension_semantics = [#tpu.dimension_semantics<parallel>, #tpu.dimension_semantics<parallel>], iteration_bounds = array<i64: 2, 1>, scalar_prefetch = 0 : i64, scratch_operands = 0 : i64, tpu.core_type = #tpu.core_type<tc>, window_params = [{transform_indices = @transform_0, window_bounds = array<i64: 1, 48, 32>}, {transform_indices = @transform_1, window_bounds = array<i64: 1, 24, 32>}, {pipeline_mode = #tpu.pipeline_mode<synchronous>, transform_indices = @transform_2, window_bounds = array<i64: 32, 288>}, {pipeline_mode = #tpu.pipeline_mode<synchronous>, transform_indices = @transform_3, window_bounds = array<i64: 1, 32>}, {transform_indices = @transform_4, window_bounds = array<i64: 1, 48, 32>}]} {
    %c0 = arith.constant 0 : index
    %c0_0 = arith.constant 0 : index
    %c0_1 = arith.constant 0 : index
    %0 = vector.load %arg2[%c0, %c0_0, %c0_1] : memref<1x48x32xbf16, #tpu.memory_space<vmem>>, vector<1x48x32xbf16>
    %1 = vector.shape_cast %0 : vector<1x48x32xbf16> to vector<48x32xbf16>
    %c0_2 = arith.constant 0 : index
    %c0_3 = arith.constant 0 : index
    %c0_4 = arith.constant 0 : index
    %2 = vector.load %arg3[%c0_2, %c0_3, %c0_4] : memref<1x24x32xbf16, #tpu.memory_space<vmem>>, vector<1x24x32xbf16>
    %3 = vector.shape_cast %2 : vector<1x24x32xbf16> to vector<24x32xbf16>
    %c0_5 = arith.constant 0 : index
    %c0_6 = arith.constant 0 : index
    %4 = vector.load %arg4[%c0_5, %c0_6] : memref<32x288xbf16, #tpu.memory_space<vmem>>, vector<32x288xbf16>
    %cst = arith.constant dense<0.000000e+00> : vector<48x288xf32>
    %5 = tpu.matmul %1, %4, %cst {dimension_numbers = #tpu.dot_dimension_numbers<[1], [0], [0], [1], [0, 0, 1, 1], [], []>} : vector<48x32xbf16>, vector<32x288xbf16>, vector<48x288xf32> -> vector<48x288xf32>
    %c0_7 = arith.constant 0 : index
    %c0_8 = arith.constant 0 : index
    %6 = vector.load %arg4[%c0_7, %c0_8] : memref<32x288xbf16, #tpu.memory_space<vmem>>, vector<32x288xbf16>
    %cst_9 = arith.constant dense<0.000000e+00> : vector<24x288xf32>
    %7 = tpu.matmul %3, %6, %cst_9 {dimension_numbers = #tpu.dot_dimension_numbers<[1], [0], [0], [1], [0, 0, 1, 1], [], []>} : vector<24x32xbf16>, vector<32x288xbf16>, vector<24x288xf32> -> vector<24x288xf32>
    %c0_10 = arith.constant 0 : index
    %c0_11 = arith.constant 0 : index
    %8 = vector.load %arg5[%c0_10, %c0_11] : memref<1x32xf32, #tpu.memory_space<vmem>>, vector<1x32xf32>
    %9 = vector.shape_cast %8 : vector<1x32xf32> to vector<1x32xf32>
    %10 = vector.broadcast %9 : vector<1x32xf32> to vector<48x32xf32>
    %11 = vector.extract_strided_slice %5 {offsets = [0, 0], sizes = [48, 32], strides = [1, 1]} : vector<48x288xf32> to vector<48x32xf32>
    %12 = arith.addf %10, %11 : vector<48x32xf32>
    %c0_12 = arith.constant 0 : index
    %c0_13 = arith.constant 0 : index
    %c0_14 = arith.constant 0 : index
    %13 = vector.load %arg6[%c0_12, %c0_13, %c0_14] : memref<1x48x32xf32, #tpu.memory_space<vmem>>, vector<1x48x32xf32>
    %14 = vector.shape_cast %13 : vector<1x48x32xf32> to vector<48x32xf32>
    %15 = vector.shape_cast %12 : vector<48x32xf32> to vector<1x48x32xf32>
    tpu.vector_store %arg6[%c0_12, %c0_13, %c0_14], %15 {strides = array<i32>} : memref<1x48x32xf32, #tpu.memory_space<vmem>>, vector<1x48x32xf32>,
    %c0_15 = arith.constant 0 : index
    %c0_16 = arith.constant 0 : index
    %c0_17 = arith.constant 0 : index
    %16 = vector.load %arg6[%c0_15, %c0_16, %c0_17] : memref<1x48x32xf32, #tpu.memory_space<vmem>>, vector<1x47x32xf32>
    %17 = vector.shape_cast %16 : vector<1x47x32xf32> to vector<47x32xf32>
    %18 = vector.extract_strided_slice %5 {offsets = [1, 32], sizes = [47, 32], strides = [1, 1]} : vector<48x288xf32> to vector<47x32xf32>
    %19 = arith.addf %17, %18 : vector<47x32xf32>
    %c0_18 = arith.constant 0 : index
    %c0_19 = arith.constant 0 : index
    %c0_20 = arith.constant 0 : index
    %20 = vector.load %arg6[%c0_18, %c0_19, %c0_20] : memref<1x48x32xf32, #tpu.memory_space<vmem>>, vector<1x47x32xf32>
    %21 = vector.shape_cast %20 : vector<1x47x32xf32> to vector<47x32xf32>
    %22 = vector.shape_cast %19 : vector<47x32xf32> to vector<1x47x32xf32>
    tpu.vector_store %arg6[%c0_18, %c0_19, %c0_20], %22 {strides = array<i32>} : memref<1x48x32xf32, #tpu.memory_space<vmem>>, vector<1x47x32xf32>,
    %c0_21 = arith.constant 0 : index
    %c47 = arith.constant 47 : index
    %c0_22 = arith.constant 0 : index
    %23 = vector.load %arg6[%c0_21, %c47, %c0_22] : memref<1x48x32xf32, #tpu.memory_space<vmem>>, vector<1x1x32xf32>
    %24 = vector.shape_cast %23 : vector<1x1x32xf32> to vector<1x32xf32>
    %25 = vector.extract_strided_slice %7 {offsets = [0, 32], sizes = [1, 32], strides = [1, 1]} : vector<24x288xf32> to vector<1x32xf32>
    %26 = arith.addf %24, %25 : vector<1x32xf32>
    %c0_23 = arith.constant 0 : index
    %c47_24 = arith.constant 47 : index
    %c0_25 = arith.constant 0 : index
    %27 = vector.load %arg6[%c0_23, %c47_24, %c0_25] : memref<1x48x32xf32, #tpu.memory_space<vmem>>, vector<1x1x32xf32>
    %28 = vector.shape_cast %27 : vector<1x1x32xf32> to vector<1x32xf32>
    %29 = vector.shape_cast %26 : vector<1x32xf32> to vector<1x1x32xf32>
    tpu.vector_store %arg6[%c0_23, %c47_24, %c0_25], %29 {strides = array<i32>} : memref<1x48x32xf32, #tpu.memory_space<vmem>>, vector<1x1x32xf32>,
    %c0_26 = arith.constant 0 : index
    %c0_27 = arith.constant 0 : index
    %c0_28 = arith.constant 0 : index
    %30 = vector.load %arg6[%c0_26, %c0_27, %c0_28] : memref<1x48x32xf32, #tpu.memory_space<vmem>>, vector<1x46x32xf32>
    %31 = vector.shape_cast %30 : vector<1x46x32xf32> to vector<46x32xf32>
    %32 = vector.extract_strided_slice %5 {offsets = [2, 64], sizes = [46, 32], strides = [1, 1]} : vector<48x288xf32> to vector<46x32xf32>
    %33 = arith.addf %31, %32 : vector<46x32xf32>
    %c0_29 = arith.constant 0 : index
    %c0_30 = arith.constant 0 : index
    %c0_31 = arith.constant 0 : index
    %34 = vector.load %arg6[%c0_29, %c0_30, %c0_31] : memref<1x48x32xf32, #tpu.memory_space<vmem>>, vector<1x46x32xf32>
    %35 = vector.shape_cast %34 : vector<1x46x32xf32> to vector<46x32xf32>
    %36 = vector.shape_cast %33 : vector<46x32xf32> to vector<1x46x32xf32>
    tpu.vector_store %arg6[%c0_29, %c0_30, %c0_31], %36 {strides = array<i32>} : memref<1x48x32xf32, #tpu.memory_space<vmem>>, vector<1x46x32xf32>,
    %c0_32 = arith.constant 0 : index
    %c46 = arith.constant 46 : index
    %c0_33 = arith.constant 0 : index
    %37 = vector.load %arg6[%c0_32, %c46, %c0_33] : memref<1x48x32xf32, #tpu.memory_space<vmem>>, vector<1x2x32xf32>
    %38 = vector.shape_cast %37 : vector<1x2x32xf32> to vector<2x32xf32>
    %39 = vector.extract_strided_slice %7 {offsets = [0, 64], sizes = [2, 32], strides = [1, 1]} : vector<24x288xf32> to vector<2x32xf32>
    %40 = arith.addf %38, %39 : vector<2x32xf32>
    %c0_34 = arith.constant 0 : index
    %c46_35 = arith.constant 46 : index
    %c0_36 = arith.constant 0 : index
    %41 = vector.load %arg6[%c0_34, %c46_35, %c0_36] : memref<1x48x32xf32, #tpu.memory_space<vmem>>, vector<1x2x32xf32>
    %42 = vector.shape_cast %41 : vector<1x2x32xf32> to vector<2x32xf32>
    %43 = vector.shape_cast %40 : vector<2x32xf32> to vector<1x2x32xf32>
    tpu.vector_store %arg6[%c0_34, %c46_35, %c0_36], %43 {strides = array<i32>} : memref<1x48x32xf32, #tpu.memory_space<vmem>>, vector<1x2x32xf32>,
    %c0_37 = arith.constant 0 : index
    %c0_38 = arith.constant 0 : index
    %c0_39 = arith.constant 0 : index
    %44 = vector.load %arg6[%c0_37, %c0_38, %c0_39] : memref<1x48x32xf32, #tpu.memory_space<vmem>>, vector<1x42x32xf32>
    %45 = vector.shape_cast %44 : vector<1x42x32xf32> to vector<42x32xf32>
    %46 = vector.extract_strided_slice %5 {offsets = [6, 96], sizes = [42, 32], strides = [1, 1]} : vector<48x288xf32> to vector<42x32xf32>
    %47 = arith.addf %45, %46 : vector<42x32xf32>
    %c0_40 = arith.constant 0 : index
    %c0_41 = arith.constant 0 : index
    %c0_42 = arith.constant 0 : index
    %48 = vector.load %arg6[%c0_40, %c0_41, %c0_42] : memref<1x48x32xf32, #tpu.memory_space<vmem>>, vector<1x42x32xf32>
    %49 = vector.shape_cast %48 : vector<1x42x32xf32> to vector<42x32xf32>
    %50 = vector.shape_cast %47 : vector<42x32xf32> to vector<1x42x32xf32>
    tpu.vector_store %arg6[%c0_40, %c0_41, %c0_42], %50 {strides = array<i32>} : memref<1x48x32xf32, #tpu.memory_space<vmem>>, vector<1x42x32xf32>,
    %c0_43 = arith.constant 0 : index
    %c42 = arith.constant 42 : index
    %c0_44 = arith.constant 0 : index
    %51 = vector.load %arg6[%c0_43, %c42, %c0_44] : memref<1x48x32xf32, #tpu.memory_space<vmem>>, vector<1x6x32xf32>
    %52 = vector.shape_cast %51 : vector<1x6x32xf32> to vector<6x32xf32>
    %53 = vector.extract_strided_slice %7 {offsets = [0, 96], sizes = [6, 32], strides = [1, 1]} : vector<24x288xf32> to vector<6x32xf32>
    %54 = arith.addf %52, %53 : vector<6x32xf32>
    %c0_45 = arith.constant 0 : index
    %c42_46 = arith.constant 42 : index
    %c0_47 = arith.constant 0 : index
    %55 = vector.load %arg6[%c0_45, %c42_46, %c0_47] : memref<1x48x32xf32, #tpu.memory_space<vmem>>, vector<1x6x32xf32>
    %56 = vector.shape_cast %55 : vector<1x6x32xf32> to vector<6x32xf32>
    %57 = vector.shape_cast %54 : vector<6x32xf32> to vector<1x6x32xf32>
    tpu.vector_store %arg6[%c0_45, %c42_46, %c0_47], %57 {strides = array<i32>} : memref<1x48x32xf32, #tpu.memory_space<vmem>>, vector<1x6x32xf32>,
    %c0_48 = arith.constant 0 : index
    %c0_49 = arith.constant 0 : index
    %c0_50 = arith.constant 0 : index
    %58 = vector.load %arg6[%c0_48, %c0_49, %c0_50] : memref<1x48x32xf32, #tpu.memory_space<vmem>>, vector<1x41x32xf32>
    %59 = vector.shape_cast %58 : vector<1x41x32xf32> to vector<41x32xf32>
    %60 = vector.extract_strided_slice %5 {offsets = [7, 128], sizes = [41, 32], strides = [1, 1]} : vector<48x288xf32> to vector<41x32xf32>
    %61 = arith.addf %59, %60 : vector<41x32xf32>
    %c0_51 = arith.constant 0 : index
    %c0_52 = arith.constant 0 : index
    %c0_53 = arith.constant 0 : index
    %62 = vector.load %arg6[%c0_51, %c0_52, %c0_53] : memref<1x48x32xf32, #tpu.memory_space<vmem>>, vector<1x41x32xf32>
    %63 = vector.shape_cast %62 : vector<1x41x32xf32> to vector<41x32xf32>
    %64 = vector.shape_cast %61 : vector<41x32xf32> to vector<1x41x32xf32>
    tpu.vector_store %arg6[%c0_51, %c0_52, %c0_53], %64 {strides = array<i32>} : memref<1x48x32xf32, #tpu.memory_space<vmem>>, vector<1x41x32xf32>,
    %c0_54 = arith.constant 0 : index
    %c41 = arith.constant 41 : index
    %c0_55 = arith.constant 0 : index
    %65 = vector.load %arg6[%c0_54, %c41, %c0_55] : memref<1x48x32xf32, #tpu.memory_space<vmem>>, vector<1x7x32xf32>
    %66 = vector.shape_cast %65 : vector<1x7x32xf32> to vector<7x32xf32>
    %67 = vector.extract_strided_slice %7 {offsets = [0, 128], sizes = [7, 32], strides = [1, 1]} : vector<24x288xf32> to vector<7x32xf32>
    %68 = arith.addf %66, %67 : vector<7x32xf32>
    %c0_56 = arith.constant 0 : index
    %c41_57 = arith.constant 41 : index
    %c0_58 = arith.constant 0 : index
    %69 = vector.load %arg6[%c0_56, %c41_57, %c0_58] : memref<1x48x32xf32, #tpu.memory_space<vmem>>, vector<1x7x32xf32>
    %70 = vector.shape_cast %69 : vector<1x7x32xf32> to vector<7x32xf32>
    %71 = vector.shape_cast %68 : vector<7x32xf32> to vector<1x7x32xf32>
    tpu.vector_store %arg6[%c0_56, %c41_57, %c0_58], %71 {strides = array<i32>} : memref<1x48x32xf32, #tpu.memory_space<vmem>>, vector<1x7x32xf32>,
    %c0_59 = arith.constant 0 : index
    %c0_60 = arith.constant 0 : index
    %c0_61 = arith.constant 0 : index
    %72 = vector.load %arg6[%c0_59, %c0_60, %c0_61] : memref<1x48x32xf32, #tpu.memory_space<vmem>>, vector<1x40x32xf32>
    %73 = vector.shape_cast %72 : vector<1x40x32xf32> to vector<40x32xf32>
    %74 = vector.extract_strided_slice %5 {offsets = [8, 160], sizes = [40, 32], strides = [1, 1]} : vector<48x288xf32> to vector<40x32xf32>
    %75 = arith.addf %73, %74 : vector<40x32xf32>
    %c0_62 = arith.constant 0 : index
    %c0_63 = arith.constant 0 : index
    %c0_64 = arith.constant 0 : index
    %76 = vector.load %arg6[%c0_62, %c0_63, %c0_64] : memref<1x48x32xf32, #tpu.memory_space<vmem>>, vector<1x40x32xf32>
    %77 = vector.shape_cast %76 : vector<1x40x32xf32> to vector<40x32xf32>
    %78 = vector.shape_cast %75 : vector<40x32xf32> to vector<1x40x32xf32>
    tpu.vector_store %arg6[%c0_62, %c0_63, %c0_64], %78 {strides = array<i32>} : memref<1x48x32xf32, #tpu.memory_space<vmem>>, vector<1x40x32xf32>,
    %c0_65 = arith.constant 0 : index
    %c40 = arith.constant 40 : index
    %c0_66 = arith.constant 0 : index
    %79 = vector.load %arg6[%c0_65, %c40, %c0_66] : memref<1x48x32xf32, #tpu.memory_space<vmem>>, vector<1x8x32xf32>
    %80 = vector.shape_cast %79 : vector<1x8x32xf32> to vector<8x32xf32>
    %81 = vector.extract_strided_slice %7 {offsets = [0, 160], sizes = [8, 32], strides = [1, 1]} : vector<24x288xf32> to vector<8x32xf32>
    %82 = arith.addf %80, %81 : vector<8x32xf32>
    %c0_67 = arith.constant 0 : index
    %c40_68 = arith.constant 40 : index
    %c0_69 = arith.constant 0 : index
    %83 = vector.load %arg6[%c0_67, %c40_68, %c0_69] : memref<1x48x32xf32, #tpu.memory_space<vmem>>, vector<1x8x32xf32>
    %84 = vector.shape_cast %83 : vector<1x8x32xf32> to vector<8x32xf32>
    %85 = vector.shape_cast %82 : vector<8x32xf32> to vector<1x8x32xf32>
    tpu.vector_store %arg6[%c0_67, %c40_68, %c0_69], %85 {strides = array<i32>} : memref<1x48x32xf32, #tpu.memory_space<vmem>>, vector<1x8x32xf32>,
    %c0_70 = arith.constant 0 : index
    %c0_71 = arith.constant 0 : index
    %c0_72 = arith.constant 0 : index
    %86 = vector.load %arg6[%c0_70, %c0_71, %c0_72] : memref<1x48x32xf32, #tpu.memory_space<vmem>>, vector<1x36x32xf32>
    %87 = vector.shape_cast %86 : vector<1x36x32xf32> to vector<36x32xf32>
    %88 = vector.extract_strided_slice %5 {offsets = [12, 192], sizes = [36, 32], strides = [1, 1]} : vector<48x288xf32> to vector<36x32xf32>
    %89 = arith.addf %87, %88 : vector<36x32xf32>
    %c0_73 = arith.constant 0 : index
    %c0_74 = arith.constant 0 : index
    %c0_75 = arith.constant 0 : index
    %90 = vector.load %arg6[%c0_73, %c0_74, %c0_75] : memref<1x48x32xf32, #tpu.memory_space<vmem>>, vector<1x36x32xf32>
    %91 = vector.shape_cast %90 : vector<1x36x32xf32> to vector<36x32xf32>
    %92 = vector.shape_cast %89 : vector<36x32xf32> to vector<1x36x32xf32>
    tpu.vector_store %arg6[%c0_73, %c0_74, %c0_75], %92 {strides = array<i32>} : memref<1x48x32xf32, #tpu.memory_space<vmem>>, vector<1x36x32xf32>,
    %c0_76 = arith.constant 0 : index
    %c36 = arith.constant 36 : index
    %c0_77 = arith.constant 0 : index
    %93 = vector.load %arg6[%c0_76, %c36, %c0_77] : memref<1x48x32xf32, #tpu.memory_space<vmem>>, vector<1x12x32xf32>
    %94 = vector.shape_cast %93 : vector<1x12x32xf32> to vector<12x32xf32>
    %95 = vector.extract_strided_slice %7 {offsets = [0, 192], sizes = [12, 32], strides = [1, 1]} : vector<24x288xf32> to vector<12x32xf32>
    %96 = arith.addf %94, %95 : vector<12x32xf32>
    %c0_78 = arith.constant 0 : index
    %c36_79 = arith.constant 36 : index
    %c0_80 = arith.constant 0 : index
    %97 = vector.load %arg6[%c0_78, %c36_79, %c0_80] : memref<1x48x32xf32, #tpu.memory_space<vmem>>, vector<1x12x32xf32>
    %98 = vector.shape_cast %97 : vector<1x12x32xf32> to vector<12x32xf32>
    %99 = vector.shape_cast %96 : vector<12x32xf32> to vector<1x12x32xf32>
    tpu.vector_store %arg6[%c0_78, %c36_79, %c0_80], %99 {strides = array<i32>} : memref<1x48x32xf32, #tpu.memory_space<vmem>>, vector<1x12x32xf32>,
    %c0_81 = arith.constant 0 : index
    %c0_82 = arith.constant 0 : index
    %c0_83 = arith.constant 0 : index
    %100 = vector.load %arg6[%c0_81, %c0_82, %c0_83] : memref<1x48x32xf32, #tpu.memory_space<vmem>>, vector<1x35x32xf32>
    %101 = vector.shape_cast %100 : vector<1x35x32xf32> to vector<35x32xf32>
    %102 = vector.extract_strided_slice %5 {offsets = [13, 224], sizes = [35, 32], strides = [1, 1]} : vector<48x288xf32> to vector<35x32xf32>
    %103 = arith.addf %101, %102 : vector<35x32xf32>
    %c0_84 = arith.constant 0 : index
    %c0_85 = arith.constant 0 : index
    %c0_86 = arith.constant 0 : index
    %104 = vector.load %arg6[%c0_84, %c0_85, %c0_86] : memref<1x48x32xf32, #tpu.memory_space<vmem>>, vector<1x35x32xf32>
    %105 = vector.shape_cast %104 : vector<1x35x32xf32> to vector<35x32xf32>
    %106 = vector.shape_cast %103 : vector<35x32xf32> to vector<1x35x32xf32>
    tpu.vector_store %arg6[%c0_84, %c0_85, %c0_86], %106 {strides = array<i32>} : memref<1x48x32xf32, #tpu.memory_space<vmem>>, vector<1x35x32xf32>,
    %c0_87 = arith.constant 0 : index
    %c35 = arith.constant 35 : index
    %c0_88 = arith.constant 0 : index
    %107 = vector.load %arg6[%c0_87, %c35, %c0_88] : memref<1x48x32xf32, #tpu.memory_space<vmem>>, vector<1x13x32xf32>
    %108 = vector.shape_cast %107 : vector<1x13x32xf32> to vector<13x32xf32>
    %109 = vector.extract_strided_slice %7 {offsets = [0, 224], sizes = [13, 32], strides = [1, 1]} : vector<24x288xf32> to vector<13x32xf32>
    %110 = arith.addf %108, %109 : vector<13x32xf32>
    %c0_89 = arith.constant 0 : index
    %c35_90 = arith.constant 35 : index
    %c0_91 = arith.constant 0 : index
    %111 = vector.load %arg6[%c0_89, %c35_90, %c0_91] : memref<1x48x32xf32, #tpu.memory_space<vmem>>, vector<1x13x32xf32>
    %112 = vector.shape_cast %111 : vector<1x13x32xf32> to vector<13x32xf32>
    %113 = vector.shape_cast %110 : vector<13x32xf32> to vector<1x13x32xf32>
    tpu.vector_store %arg6[%c0_89, %c35_90, %c0_91], %113 {strides = array<i32>} : memref<1x48x32xf32, #tpu.memory_space<vmem>>, vector<1x13x32xf32>,
    %c0_92 = arith.constant 0 : index
    %c0_93 = arith.constant 0 : index
    %c0_94 = arith.constant 0 : index
    %114 = vector.load %arg6[%c0_92, %c0_93, %c0_94] : memref<1x48x32xf32, #tpu.memory_space<vmem>>, vector<1x34x32xf32>
    %115 = vector.shape_cast %114 : vector<1x34x32xf32> to vector<34x32xf32>
    %116 = vector.extract_strided_slice %5 {offsets = [14, 256], sizes = [34, 32], strides = [1, 1]} : vector<48x288xf32> to vector<34x32xf32>
    %117 = arith.addf %115, %116 : vector<34x32xf32>
    %c0_95 = arith.constant 0 : index
    %c0_96 = arith.constant 0 : index
    %c0_97 = arith.constant 0 : index
    %118 = vector.load %arg6[%c0_95, %c0_96, %c0_97] : memref<1x48x32xf32, #tpu.memory_space<vmem>>, vector<1x34x32xf32>
    %119 = vector.shape_cast %118 : vector<1x34x32xf32> to vector<34x32xf32>
    %120 = vector.shape_cast %117 : vector<34x32xf32> to vector<1x34x32xf32>
    tpu.vector_store %arg6[%c0_95, %c0_96, %c0_97], %120 {strides = array<i32>} : memref<1x48x32xf32, #tpu.memory_space<vmem>>, vector<1x34x32xf32>,
    %c0_98 = arith.constant 0 : index
    %c34 = arith.constant 34 : index
    %c0_99 = arith.constant 0 : index
    %121 = vector.load %arg6[%c0_98, %c34, %c0_99] : memref<1x48x32xf32, #tpu.memory_space<vmem>>, vector<1x14x32xf32>
    %122 = vector.shape_cast %121 : vector<1x14x32xf32> to vector<14x32xf32>
    %123 = vector.extract_strided_slice %7 {offsets = [0, 256], sizes = [14, 32], strides = [1, 1]} : vector<24x288xf32> to vector<14x32xf32>
    %124 = arith.addf %122, %123 : vector<14x32xf32>
    %c0_100 = arith.constant 0 : index
    %c34_101 = arith.constant 34 : index
    %c0_102 = arith.constant 0 : index
    %125 = vector.load %arg6[%c0_100, %c34_101, %c0_102] : memref<1x48x32xf32, #tpu.memory_space<vmem>>, vector<1x14x32xf32>
    %126 = vector.shape_cast %125 : vector<1x14x32xf32> to vector<14x32xf32>
    %127 = vector.shape_cast %124 : vector<14x32xf32> to vector<1x14x32xf32>
    tpu.vector_store %arg6[%c0_100, %c34_101, %c0_102], %127 {strides = array<i32>} : memref<1x48x32xf32, #tpu.memory_space<vmem>>, vector<1x14x32xf32>,
    return
  }
  func.func @transform_0(%arg0: i32, %arg1: i32) -> (i32, i32, i32) {
    %c0_i32 = arith.constant 0 : i32
    %c0_i32_0 = arith.constant 0 : i32
    return %arg0, %arg1, %c0_i32 : i32, i32, i32
  }
  func.func @transform_1(%arg0: i32, %arg1: i32) -> (i32, i32, i32) {
    %c1_i32 = arith.constant 1 : i32
    %0 = arith.addi %arg1, %c1_i32 : i32
    %c2_i32 = arith.constant 2 : i32
    %1 = arith.muli %0, %c2_i32 : i32
    %c0_i32 = arith.constant 0 : i32
    %c0_i32_0 = arith.constant 0 : i32
    return %arg0, %1, %c0_i32 : i32, i32, i32
  }
  func.func @transform_2(%arg0: i32, %arg1: i32) -> (i32, i32) {
    %c0_i32 = arith.constant 0 : i32
    %c0_i32_0 = arith.constant 0 : i32
    %c0_i32_1 = arith.constant 0 : i32
    return %c0_i32, %c0_i32_0 : i32, i32
  }
  func.func @transform_3(%arg0: i32, %arg1: i32) -> (i32, i32) {
    %c0_i32 = arith.constant 0 : i32
    %c0_i32_0 = arith.constant 0 : i32
    %c0_i32_1 = arith.constant 0 : i32
    return %c0_i32, %c0_i32_0 : i32, i32
  }
  func.func @transform_4(%arg0: i32, %arg1: i32) -> (i32, i32, i32) {
    %c0_i32 = arith.constant 0 : i32
    %c0_i32_0 = arith.constant 0 : i32
    return %arg0, %arg1, %c0_i32 : i32, i32, i32
  }
}

module attributes {stable_mosaic.version = 11 : i64} {
  func.func @_matmul_bias_kernel(%arg0: i32, %arg1: memref<8x288xbf16, #tpu.memory_space<vmem>>, %arg2: memref<288x32xbf16, #tpu.memory_space<vmem>>, %arg3: memref<1x32xf32, #tpu.memory_space<vmem>>, %arg4: memref<8x32xf32, #tpu.memory_space<vmem>>) attributes {dimension_semantics = [#tpu.dimension_semantics<parallel>], iteration_bounds = array<i64: 1>, scalar_prefetch = 0 : i64, scratch_operands = 0 : i64, tpu.core_type = #tpu.core_type<tc>, window_params = [{transform_indices = @transform_0, window_bounds = array<i64: 8, 288>}, {pipeline_mode = #tpu.pipeline_mode<synchronous>, transform_indices = @transform_1, window_bounds = array<i64: 288, 32>}, {pipeline_mode = #tpu.pipeline_mode<synchronous>, transform_indices = @transform_2, window_bounds = array<i64: 1, 32>}, {transform_indices = @transform_3, window_bounds = array<i64: 8, 32>}]} {
    %c0 = arith.constant 0 : index
    %c0_0 = arith.constant 0 : index
    %0 = vector.load %arg1[%c0, %c0_0] : memref<8x288xbf16, #tpu.memory_space<vmem>>, vector<8x288xbf16>
    %c0_1 = arith.constant 0 : index
    %c0_2 = arith.constant 0 : index
    %1 = vector.load %arg2[%c0_1, %c0_2] : memref<288x32xbf16, #tpu.memory_space<vmem>>, vector<288x32xbf16>
    %cst = arith.constant dense<0.000000e+00> : vector<8x32xf32>
    %2 = tpu.matmul %0, %1, %cst {dimension_numbers = #tpu.dot_dimension_numbers<[1], [0], [0], [1], [0, 0, 1, 1], [], []>} : vector<8x288xbf16>, vector<288x32xbf16>, vector<8x32xf32> -> vector<8x32xf32>
    %c0_3 = arith.constant 0 : index
    %c0_4 = arith.constant 0 : index
    %3 = vector.load %arg3[%c0_3, %c0_4] : memref<1x32xf32, #tpu.memory_space<vmem>>, vector<1x32xf32>
    %4 = vector.broadcast %3 : vector<1x32xf32> to vector<8x32xf32>
    %5 = arith.addf %2, %4 : vector<8x32xf32>
    %c0_5 = arith.constant 0 : index
    %c0_6 = arith.constant 0 : index
    %6 = vector.load %arg4[%c0_5, %c0_6] : memref<8x32xf32, #tpu.memory_space<vmem>>, vector<8x32xf32>
    tpu.vector_store %arg4[%c0_5, %c0_6], %5 {strides = array<i32>} : memref<8x32xf32, #tpu.memory_space<vmem>>, vector<8x32xf32>,
    return
  }
  func.func @transform_0(%arg0: i32) -> (i32, i32) {
    %c0_i32 = arith.constant 0 : i32
    %c0_i32_0 = arith.constant 0 : i32
    return %arg0, %c0_i32 : i32, i32
  }
  func.func @transform_1(%arg0: i32) -> (i32, i32) {
    %c0_i32 = arith.constant 0 : i32
    %c0_i32_0 = arith.constant 0 : i32
    %c0_i32_1 = arith.constant 0 : i32
    return %c0_i32, %c0_i32_0 : i32, i32
  }
  func.func @transform_2(%arg0: i32) -> (i32, i32) {
    %c0_i32 = arith.constant 0 : i32
    %c0_i32_0 = arith.constant 0 : i32
    %c0_i32_1 = arith.constant 0 : i32
    return %c0_i32, %c0_i32_0 : i32, i32
  }
  func.func @transform_3(%arg0: i32) -> (i32, i32) {
    %c0_i32 = arith.constant 0 : i32
    %c0_i32_0 = arith.constant 0 : i32
    return %arg0, %c0_i32 : i32, i32
  }
}

</mosaic_0001>

<bundles_post_ra>
// kernel: _lambda_.10
= control target key start
LH: loop header
LB: loop body
LE: loop exit
PB: predicated region body
PF: predicated region fallthrough
CT: control target
= control target key end

     0   :  { %s634_s15 = smov 0   ;;  %s636_s16 = smov 0   ;;  %s689_s0 = inlined_call_operand.vmem [shape: f32[2,64,16], index: 0, kind: input, shape index: {}]   ;;  %s690_s1 = inlined_call_operand.vmem [shape: bf16[2,32,32], index: 1, kind: input, shape index: {}]   ;;  %s691_s2 = inlined_call_operand.vmem [shape: bf16[16,32], index: 2, kind: input, shape index: {}]   ;;  %s692_s3 = inlined_call_operand.vmem [shape: f32[1,32], index: 3, kind: input, shape index: {}]   ;;  %s693_s4 = inlined_call_operand.vmem [shape: bf16[2,64,32], index: 4, kind: output, shape index: {}]  }
   0x1   :  { %s638_s17 = smov 0  }
   0x2 LB: > { %s26_s18 = sadd.s32 1, %s603_s16  ;;  %p525_p0 = scmp.ge.s32.totalorder %s607_s17, 1  ;;  %s607_s17 = sphi %s638_s17, %s14_s17   ;;  %s603_s16 = sphi %s636_s16, %s695_s16   ;;  %s599_s15 = sphi %s634_s15, %s694_s15  }
   0x3   : > { %p28_p1 = scmp.ge.s32.totalorder %s26_s18, 2  ;;  %p200_p2 = scmp.lt.s32.totalorder %s607_s17, 3 }
   0x5   : > { %s697_s18 = smov (%p28_p1, %s26_s18), 0  ;;  %p201_p3 = pnand %p525_p0, %p200_p2 }
   0x6   : > { %p244_p4 = scmp.lt.s32.totalorder (!%p201_p3), %s599_s15, 1 }
   0x7   : > { %204 = sbr.rel (%p201_p3) target bundleno = 224 (0xe0), region = 36 }
   0xc   : > { %v584_v0 = vld [vmem:[%s691_s2] sm:$0xff]   ;;  %s699_s15 = smov (!%p244_p4, %s599_s15), 1  ;;  %vm294_vm0 = vcmask 130048   ;;  %vm385_vm1 = vcmask 257024  }
   0xd   : > { %548 = vmatprep.subr.bf16.mxu0 %v584_v0  ;;  %558 = vmatprep.subr.bf16.mxu1 %v584_v0  ;;  %s540_s21 = sshll.u32 %s699_s15, 6  ;;  %s541_s25 = sshll.u32 %s699_s15, 4  ;;  %v537_v16 = vld [vmem:[%s692_s3] ss:$0 sm:$0xff] }
   0xe   : > { %549 = vmatpush3.bf16.msra.mxu0 %v584_v0  ;;  %559 = vmatpush3.bf16.msra.mxu1 %v584_v0  ;;  %s251_s24 = scalar_lea.vmem %s689_s0, %s540_s21  ;;  %s261_s28 = scalar_lea.vmem %s690_s1, %s541_s25 }
   0xf   : > { %v274_v1 = vld [vmem:[%s251_s24] sm:$0xff]  ;;  %v275_v2 = vld [vmem:[%s251_s24 + $0x8] sm:$0xff]  ;;  %v276_v6 = vld [vmem:[%s251_s24 + $0x10] sm:$0xff]  ;;  %s542_s5 = sshll.u32 %s699_s15, 5 }
  0x10   : > { %v278_v3 = vld [vmem:[%s251_s24 + $0x20] sm:$0xff]  ;;  %v282_v4 = vpack.c.bf16 %v275_v2, %v274_v1  ;;  %v279_v5 = vld [vmem:[%s251_s24 + $0x28] sm:$0xff]  ;;  %v277_v7 = vld [vmem:[%s251_s24 + $0x18] sm:$0xff]  ;;  %s271_s8 = scalar_lea.vmem %s693_s4, %s542_s5 }
  0x11   : > { %v284_v8 = vpack.c.bf16 %v279_v5, %v278_v3  ;;  %v283_v9 = vpack.c.bf16 %v277_v7, %v276_v6  ;;  %v280_v10 = vld [vmem:[%s251_s24 + $0x30] sm:$0xff]  ;;  %v281_v11 = vld [vmem:[%s251_s24 + $0x38] sm:$0xff]  ;;  %v389_v13 = vld [vmem:[%s261_s28 + $0x4] sm:$0xff]  }
  0x12   : > { %550 = vmatprep.mubr.msk.bf16.mxu0 %vm294_vm0, %v282_v4  ;;  %v285_v12 = vpack.c.bf16 %v281_v11, %v280_v10  ;;  %v407_v14 = vld [vmem:[%s261_s28] ss:$12 sps:$4 sm:$0xff]   ;;  %v390_v15 = vunpack.c.l.bf16 %v389_v13  ;;  %v399_v19 = vunpack.c.h.bf16 %v389_v13 }
  0x13   : > { %554 = vmatprep.mubr.msk.bf16.mxu1 %vm294_vm0, %v284_v8  ;;  %551 = vmatmul.mubr.msk.bf16.vlgmr.msra.gmra.mxu0 %vm294_vm0, %v283_v9  ;;  %v408_v17 = vunpack.c.h.bf16 %v407_v14  ;;  %v374_v18 = vunpack.c.l.bf16 %v407_v14 }
  0x14   : > { %555 = vmatmul.mubr.msk.bf16.vlgmr.msra.gmra.mxu1 %vm294_vm0, %v285_v12  ;;  %v391_v20 = vadd.f32 %v537_v16, %v390_v15  ;;  %v400_v24 = vadd.f32 %v537_v16, %v399_v19 }
  0x15   : > { %v409_v21 = vadd.f32 %v537_v16, %v408_v17  ;;  %v381_v22 = vadd.f32 %v537_v16, %v374_v18 }
  0xd3   : > { %v552_v23 = vpop.f32.mrf.mxu0 }
  0xd4   : > { %v392_v25 = vadd.f32 %v552_v23, %v391_v20  ;;  %v556_v26 = vpop.f32.mrf.mxu1 }
  0xd5   : > { %v410_v27 = vadd.f32 %v556_v26, %v409_v21  ;;  %v341_v28 = vpop.f32.mrf.mxu0 }
  0xd6   : > { %v394_v29 = vpack.c.bf16 %v392_v25, %v392_v25  ;;  %v382_v30 = vadd.f32 %v381_v22, %v341_v28  ;;  %v357_v31 = vpop.f32.mrf.mxu1 }
  0xd7   : > { %v412_v32 = vpack.c.bf16 %v410_v27, %v410_v27  ;;  %v401_v33 = vadd.f32 %v400_v24, %v357_v31  ;;  %v553_v34 = vpop.f32.mrf.mxu0 }
  0xd8   : > { %395 = vst.msk [vmem:[%s271_s8 + $0x8] sm:$0xf] %vm385_vm1, %v394_v29  ;;  %v384_v35 = vpack.c.bf16 %v382_v30, %v382_v30  ;;  %v393_v36 = vadd.f32 %v553_v34, %v391_v20  ;;  %v557_v37 = vpop.f32.mrf.mxu1 }
  0xd9   : > { %413 = vst.msk [vmem:[%s271_s8 + $0x18] sm:$0xf] %vm385_vm1, %v412_v32  ;;  %v403_v38 = vpack.c.bf16 %v401_v33, %v401_v33  ;;  %v411_v39 = vadd.f32 %v557_v37, %v409_v21  ;;  %v344_v40 = vpop.f32.mrf.mxu0 }
  0xda   : > { %386 = vst.msk [vmem:[%s271_s8] sm:$0xf] %vm385_vm1, %v384_v35  ;;  %v396_v41 = vpack.c.bf16 %v393_v36, %v393_v36  ;;  %v383_v42 = vadd.f32 %v381_v22, %v344_v40  ;;  %v360_v43 = vpop.f32.mrf.mxu1 }
  0xdb   : > { %404 = vst.msk [vmem:[%s271_s8 + $0x10] sm:$0xf] %vm385_vm1, %v403_v38  ;;  %v414_v44 = vpack.c.bf16 %v411_v39, %v411_v39  ;;  %v402_v45 = vadd.f32 %v400_v24, %v360_v43 }
  0xdc   : > { %397 = vst.msk [vmem:[%s271_s8 + $0xc] sm:$0xf] %vm385_vm1, %v396_v41  ;;  %v387_v46 = vpack.c.bf16 %v383_v42, %v383_v42 }
  0xdd   : > { %415 = vst.msk [vmem:[%s271_s8 + $0x1c] sm:$0xf] %vm385_vm1, %v414_v44  ;;  %v405_v47 = vpack.c.bf16 %v402_v45, %v402_v45 }
  0xde   : > { %388 = vst.msk [vmem:[%s271_s8 + $0x4] sm:$0xf] %vm385_vm1, %v387_v46 }
  0xdf   : > { %406 = vst.msk [vmem:[%s271_s8 + $0x14] sm:$0xf] %vm385_vm1, %v405_v47 }
  0xe0 PF: > { %s14_s17 = sadd.s32 1, %s607_s17   ;;  %s694_s15 = smov %s603_s16 }
  0xe1   : > { %p11_p5 = scmp.ge.s32.totalorder %s14_s17, 4   ;;  %s695_s16 = smov %s697_s18 }
  0xe3   :  { %13 = sbr.rel (!%p11_p5) target bundleno = 2 (0x2), region = 69 }

// kernel: _lambda_.8
= control target key start
LH: loop header
LB: loop body
LE: loop exit
PB: predicated region body
PF: predicated region fallthrough
CT: control target
= control target key end

     0   :  { %vm44_vm0 = vcmask 261120   ;;  %vm116_vm1 = vcmask 257024   ;;  %s205_s1 = inlined_call_operand.vmem [shape: bf16[32,32], index: 1, kind: input, shape index: {}]   ;;  %s206_s0 = inlined_call_operand.vmem [shape: f32[32,32], index: 0, kind: input, shape index: {}]   ;;  %s207_s2 = inlined_call_operand.vmem [shape: f32[1,32], index: 2, kind: input, shape index: {}]   ;;  %s208_s3 = inlined_call_operand.vmem [shape: bf16[32,32], index: 3, kind: output, shape index: {}]  }
   0x1   :  { %v150_v0 = vld [vmem:[%s205_s1 + $0x8] sm:$0xff]   ;;  %v151_v1 = vld [vmem:[%s205_s1] sm:$0xff]   ;;  %v17_v5 = vld [vmem:[%s206_s0 + $0x10] sm:$0xff] }
   0x2   :  { %142 = vmatprep.subr.bf16.mxu0 %v150_v0  ;;  %v15_v2 = vld [vmem:[%s206_s0] sm:$0xff]  ;;  %v16_v3 = vld [vmem:[%s206_s0 + $0x8] sm:$0xff]  ;;  %v18_v6 = vld [vmem:[%s206_s0 + $0x18] sm:$0xff] }
   0x3   :  { %143 = vmatpush3.bf16.msra.mxu0 %v150_v0  ;;  %v19_v4 = vpack.c.bf16 %v16_v3, %v15_v2  ;;  %v20_v7 = vpack.c.bf16 %v18_v6, %v17_v5  ;;  %v125_v8 = vld [vmem:[%s207_s2] ss:$0 sm:$0xff] }
   0x4   :  { %144 = vmatprep.subr.bf16.mxu0 %v151_v1 }
   0x5   :  { %146 = vmatprep.mubr.msk.bf16.mxu0 %vm44_vm0, %v19_v4 }
   0x7   :  { %145 = vmatpush3.bf16.msra.mxu0 %v151_v1 }
   0xa   :  { %147 = vmatmul.mubr.msk.bf16.vlgmr.msra.gmra.mxu0 %vm44_vm0, %v20_v7 }
  0xca   :  { %v148_v9 = vpop.f32.mrf.mxu0 }
  0xcb   :  { %v94_v10 = vadd.f32 %v148_v9, %v125_v8 }
  0xcc   :  { %v85_v11 = vpop.f32.mrf.mxu0 }
  0xcd   :  { %v136_v12 = vpack.c.bf16 %v94_v10, %v94_v10  ;;  %v86_v13 = vadd.f32 %v125_v8, %v85_v11 }
  0xce   :  { %v149_v14 = vpop.f32.mrf.mxu0 }
  0xcf   :  { %119 = vst.msk [vmem:[%s208_s3 + $0x8] sm:$0xf] %vm116_vm1, %v136_v12  ;;  %v134_v15 = vpack.c.bf16 %v86_v13, %v86_v13  ;;  %v97_v16 = vadd.f32 %v149_v14, %v125_v8 }
  0xd0   :  { %v88_v17 = vpop.f32.mrf.mxu0 }
  0xd1   :  { %117 = vst.msk [vmem:[%s208_s3] sm:$0xf] %vm116_vm1, %v134_v15  ;;  %v137_v18 = vpack.c.bf16 %v97_v16, %v97_v16  ;;  %v89_v19 = vadd.f32 %v125_v8, %v88_v17 }
  0xd3   :  { %120 = vst.msk [vmem:[%s208_s3 + $0xc] sm:$0xf] %vm116_vm1, %v137_v18  ;;  %v135_v20 = vpack.c.bf16 %v89_v19, %v89_v19 }
  0xd5   :  { %118 = vst.msk [vmem:[%s208_s3 + $0x4] sm:$0xf] %vm116_vm1, %v135_v20 }

// kernel: _lambda_.12
= control target key start
LH: loop header
LB: loop body
LE: loop exit
PB: predicated region body
PF: predicated region fallthrough
CT: control target
= control target key end

     0   :  { %s873_s15 = smov 0   ;;  %s875_s16 = smov 0   ;;  %s987_s0 = inlined_call_operand.vmem [shape: f32[2,256,8], index: 0, kind: input, shape index: {}]   ;;  %s988_s1 = inlined_call_operand.vmem [shape: bf16[2,128,32], index: 1, kind: input, shape index: {}]   ;;  %s989_s2 = inlined_call_operand.vmem [shape: bf16[8,32], index: 2, kind: input, shape index: {}]   ;;  %s990_s3 = inlined_call_operand.vmem [shape: f32[1,32], index: 3, kind: input, shape index: {}]   ;;  %s991_s4 = inlined_call_operand.vmem [shape: bf16[2,256,32], index: 4, kind: output, shape index: {}]  }
   0x1   :  { %s877_s17 = smov 0   ;;  %s879_s18 = smov 0  }
   0x2   :  { %s881_s19 = smov 0  }
   0x3 LB: > { %s23_s20 = sadd.s32 1, %s838_s17  ;;  %s26_s21 = sadd.s32 1, %s842_s18  ;;  %s846_s19 = sphi %s881_s19, %s14_s19   ;;  %s842_s18 = sphi %s879_s18, %s995_s18   ;;  %s838_s17 = sphi %s877_s17, %s994_s17   ;;  %s834_s16 = sphi %s875_s16, %s993_s16   ;;  %s830_s15 = sphi %s873_s15, %s992_s15  }
   0x4   : > { %p24_p0 = scmp.ge.s32.totalorder %s23_s20, 2  ;;  %p665_p1 = scmp.ge.s32.totalorder %s846_s19, 1 }
   0x5   : > { %p200_p2 = scmp.lt.s32.totalorder %s846_s19, 5 }
   0x6   : > { %s997_s20 = smov (%p24_p0, %s23_s20), 0  ;;  %s999_s21 = smov (!%p24_p0, %s26_s21), %s842_s18 }
   0x7   : > { %p201_p3 = pnand %p665_p1, %p200_p2  ;;  %p28_p4 = scmp.ge.s32.totalorder %s999_s21, 2 }
   0x8   : > { %s666_s24 = sshll.u32 (!%p201_p3), %s830_s15, 4  ;;  %p244_p5 = scmp.lt.s32.totalorder (!%p201_p3), %s834_s16, 1 }
   0x9   : > { %s1001_s21 = smov (%p28_p4, %s999_s21), 0  ;;  %204 = sbr.rel (%p201_p3) target bundleno = 236 (0xec), region = 36 }
   0xa   : > { %p246_p6 = scmp.lt.s32.totalorder (!%p201_p3), %s666_s24, 31  ;;  %s669_s5 = sshll.u32 (!%p201_p3), %s830_s15, 3 }
   0xb   : > { %p256_p7 = scmp.lt.s32.totalorder (!%p201_p3), %s669_s5, 15 }
   0xe   : > { %v298_v0 = vld [vmem:[%s989_s2] sm:$0xf]  ;;  %vm324_vm0 = vcmask 1043456   ;;  %s1003_s16 = smov (!%p244_p5, %s834_s16), 1  ;;  %s1005_s24 = smov (!%p246_p6, %s666_s24), 31  ;;  %vm299_vm1 = vcmask 64512  }
   0xf   : > { %766 = vmatprep.subr.msk.bf16.mxu0 %vm324_vm0, %v298_v0  ;;  %767 = vmatprep.subr.msk.bf16.mxu1 %vm324_vm0, %v298_v0  ;;  %v326_v1 = vsel %vm324_vm0, %v298_v0, 0  ;;  %s667_s25 = sshll.u32 %s1003_s16, 5  ;;  %s1007_s5 = smov (!%p256_p7, %s669_s5), 15  ;;  %v683_v29 = vld [vmem:[%s990_s3] ss:$0 sm:$0xff]  ;;  %vm450_vm2 = vcmask 257024  }
  0x10   : > { %747 = vmatpush3.bf16.msra.mxu0 %v326_v1  ;;  %765 = vmatpush3.bf16.msra.mxu1 %v326_v1  ;;  %s912_s26 = sadd.s32 %s667_s25, %s1005_s24  ;;  %s670_s6 = sshll.u32 %s1003_s16, 4 }
  0x11   : > { %s668_s27 = sshll.u32 %s912_s26, 3  ;;  %s259_s7 = sadd.s32 %s670_s6, %s1007_s5 }
  0x12   : > { %s251_s30 = scalar_lea.vmem %s987_s0, %s668_s27  ;;  %s671_s8 = sshll.u32 %s259_s7, 2 }
  0x13   : > { %v274_v2 = vld [vmem:[%s251_s30] sm:$0xff]  ;;  %v275_v3 = vld [vmem:[%s251_s30 + $0x8] sm:$0xff]  ;;  %v276_v7 = vld [vmem:[%s251_s30 + $0x10] sm:$0xff]  ;;  %s261_s11 = scalar_lea.vmem %s988_s1, %s671_s8  ;;  %s674_s14 = sshll.u32 %s912_s26, 2 }
  0x14   : > { %v282_v4 = vld [vmem:[%s251_s30 + $0x40] sm:$0xff]  ;;  %v290_v5 = vpack.c.bf16 %v275_v3, %v274_v2  ;;  %v283_v6 = vld [vmem:[%s251_s30 + $0x48] sm:$0xff]  ;;  %v277_v8 = vld [vmem:[%s251_s30 + $0x18] sm:$0xff]  ;;  %s938_s22 = scalar_lea.vmem %s991_s4, %s674_s14 }
  0x15   : > { %v294_v9 = vpack.c.bf16 %v283_v6, %v282_v4  ;;  %v291_v10 = vpack.c.bf16 %v277_v8, %v276_v7  ;;  %v284_v11 = vld [vmem:[%s251_s30 + $0x50] sm:$0xff]  ;;  %v285_v12 = vld [vmem:[%s251_s30 + $0x58] sm:$0xff]  ;;  %v278_v13 = vld [vmem:[%s251_s30 + $0x20] sm:$0xff] }
  0x16   : > { %748 = vmatprep.mubr.msk.bf16.mxu0 %vm299_vm1, %v290_v5  ;;  %v295_v14 = vpack.c.bf16 %v285_v12, %v284_v11  ;;  %v279_v15 = vld [vmem:[%s251_s30 + $0x28] sm:$0xff]  ;;  %v286_v16 = vld [vmem:[%s251_s30 + $0x60] sm:$0xff]  ;;  %v280_v20 = vld [vmem:[%s251_s30 + $0x30] sm:$0xff] }
  0x17   : > { %v287_v17 = vld [vmem:[%s251_s30 + $0x68] sm:$0xff]  ;;  %756 = vmatprep.mubr.msk.bf16.mxu1 %vm299_vm1, %v294_v9  ;;  %749 = vmatmul.mubr.msk.bf16.vlgmr.msra.gmra.mxu0 %vm299_vm1, %v291_v10  ;;  %v292_v18 = vpack.c.bf16 %v279_v15, %v278_v13  ;;  %v281_v21 = vld [vmem:[%s251_s30 + $0x38] sm:$0xff]  ;;  %v288_v22 = vld [vmem:[%s251_s30 + $0x70] sm:$0xff] }
  0x18   : > { %v296_v19 = vpack.c.bf16 %v287_v17, %v286_v16  ;;  %757 = vmatmul.mubr.msk.bf16.vlgmr.msra.gmra.mxu1 %vm299_vm1, %v295_v14  ;;  %v289_v23 = vld [vmem:[%s251_s30 + $0x78] sm:$0xff]  ;;  %v293_v24 = vpack.c.bf16 %v281_v21, %v280_v20  ;;  %v719_v26 = vld [vmem:[%s261_s11] sm:$0xff]   ;;  %v735_v27 = vld [vmem:[%s261_s11 + $0x10] sm:$0xff]  }
  0x19   : > { %752 = vmatprep.mubr.msk.bf16.mxu0 %vm299_vm1, %v292_v18  ;;  %v297_v25 = vpack.c.bf16 %v289_v23, %v288_v22  ;;  %v720_v28 = vunpack.c.l.bf16 %v719_v26  ;;  %v728_v30 = vunpack.c.l.bf16 %v735_v27  ;;  %v721_v32 = vunpack.c.h.bf16 %v719_v26  ;;  %v734_v35 = vld [vmem:[%s261_s11 + $0x8] sm:$0xff]   ;;  %v736_v36 = vld [vmem:[%s261_s11 + $0x18] sm:$0xff]  }
  0x1a   : > { %760 = vmatprep.mubr.msk.bf16.mxu1 %vm299_vm1, %v296_v19  ;;  %v729_v34 = vunpack.c.h.bf16 %v735_v27  ;;  %v724_v41 = vunpack.c.l.bf16 %v734_v35  ;;  %v732_v45 = vunpack.c.l.bf16 %v736_v36  ;;  %v725_v56 = vunpack.c.h.bf16 %v734_v35 }
  0x1b   : > { %v436_v31 = vadd.f32 %v720_v28, %v683_v29  ;;  %v497_v33 = vadd.f32 %v728_v30, %v683_v29  ;;  %v437_v40 = vadd.f32 %v721_v32, %v683_v29  ;;  %v733_v61 = vunpack.c.h.bf16 %v736_v36 }
  0x1c   : > { %v498_v44 = vadd.f32 %v729_v34, %v683_v29  ;;  %v467_v55 = vadd.f32 %v724_v41, %v683_v29  ;;  %v527_v60 = vadd.f32 %v732_v45, %v683_v29  ;;  %v468_v7 = vadd.f32 %v725_v56, %v683_v29 }
  0x1d   : > { %v528_v11 = vadd.f32 %v733_v61, %v683_v29 }
  0x1f   : > { %753 = vmatmul.mubr.msk.bf16.gmra.mxu0 %vm299_vm1, %v293_v24 }
  0x20   : > { %761 = vmatmul.mubr.msk.bf16.gmra.mxu1 %vm299_vm1, %v297_v25 }
  0xd7   : > { %v750_v37 = vpop.f32.mrf.mxu0 }
  0xd8   : > { %v440_v38 = vadd.f32 %v750_v37, %v436_v31  ;;  %v758_v39 = vpop.f32.mrf.mxu1 }
  0xd9   : > { %v501_v42 = vadd.f32 %v758_v39, %v497_v33  ;;  %v362_v43 = vpop.f32.mrf.mxu0 }
  0xda   : > { %v704_v46 = vpack.c.bf16 %v440_v38, %v440_v38  ;;  %v438_v47 = vadd.f32 %v436_v31, %v362_v43  ;;  %v394_v48 = vpop.f32.mrf.mxu1 }
  0xdb   : > { %v712_v49 = vpack.c.bf16 %v501_v42, %v501_v42  ;;  %v499_v50 = vadd.f32 %v497_v33, %v394_v48  ;;  %v751_v51 = vpop.f32.mrf.mxu0 }
  0xdc   : > { %461 = vst.msk [vmem:[%s938_s22 + $0x8] sm:$0xf] %vm450_vm2, %v704_v46  ;;  %v702_v52 = vpack.c.bf16 %v438_v47, %v438_v47  ;;  %v441_v53 = vadd.f32 %v751_v51, %v437_v40  ;;  %v759_v54 = vpop.f32.mrf.mxu1 }
  0xdd   : > { %521 = vst.msk [vmem:[%s938_s22 + $0x28] sm:$0xf] %vm450_vm2, %v712_v49  ;;  %v710_v57 = vpack.c.bf16 %v499_v50, %v499_v50  ;;  %v502_v58 = vadd.f32 %v759_v54, %v498_v44  ;;  %v365_v59 = vpop.f32.mrf.mxu0 }
  0xde   : > { %451 = vst.msk [vmem:[%s938_s22] sm:$0xf] %vm450_vm2, %v702_v52  ;;  %v705_v62 = vpack.c.bf16 %v441_v53, %v441_v53  ;;  %v439_v63 = vadd.f32 %v437_v40, %v365_v59  ;;  %v397_v0 = vpop.f32.mrf.mxu1 }
  0xdf   : > { %511 = vst.msk [vmem:[%s938_s22 + $0x20] sm:$0xf] %vm450_vm2, %v710_v57  ;;  %v713_v1 = vpack.c.bf16 %v502_v58, %v502_v58  ;;  %v500_v2 = vadd.f32 %v498_v44, %v397_v0  ;;  %v754_v3 = vpop.f32.mrf.mxu0 }
  0xe0   : > { %462 = vst.msk [vmem:[%s938_s22 + $0xc] sm:$0xf] %vm450_vm2, %v705_v62  ;;  %v703_v4 = vpack.c.bf16 %v439_v63, %v439_v63  ;;  %v471_v5 = vadd.f32 %v754_v3, %v467_v55  ;;  %v762_v6 = vpop.f32.mrf.mxu1 }
  0xe1   : > { %522 = vst.msk [vmem:[%s938_s22 + $0x2c] sm:$0xf] %vm450_vm2, %v713_v1  ;;  %v711_v8 = vpack.c.bf16 %v500_v2, %v500_v2  ;;  %v531_v9 = vadd.f32 %v762_v6, %v527_v60  ;;  %v378_v10 = vpop.f32.mrf.mxu0 }
  0xe2   : > { %452 = vst.msk [vmem:[%s938_s22 + $0x4] sm:$0xf] %vm450_vm2, %v703_v4  ;;  %v708_v12 = vpack.c.bf16 %v471_v5, %v471_v5  ;;  %v469_v13 = vadd.f32 %v467_v55, %v378_v10  ;;  %v410_v14 = vpop.f32.mrf.mxu1 }
  0xe3   : > { %512 = vst.msk [vmem:[%s938_s22 + $0x24] sm:$0xf] %vm450_vm2, %v711_v8  ;;  %v716_v15 = vpack.c.bf16 %v531_v9, %v531_v9  ;;  %v529_v16 = vadd.f32 %v527_v60, %v410_v14  ;;  %v755_v17 = vpop.f32.mrf.mxu0 }
  0xe4   : > { %491 = vst.msk [vmem:[%s938_s22 + $0x18] sm:$0xf] %vm450_vm2, %v708_v12  ;;  %v706_v18 = vpack.c.bf16 %v469_v13, %v469_v13  ;;  %v472_v19 = vadd.f32 %v755_v17, %v468_v7  ;;  %v763_v20 = vpop.f32.mrf.mxu1 }
  0xe5   : > { %551 = vst.msk [vmem:[%s938_s22 + $0x38] sm:$0xf] %vm450_vm2, %v716_v15  ;;  %v714_v21 = vpack.c.bf16 %v529_v16, %v529_v16  ;;  %v532_v22 = vadd.f32 %v763_v20, %v528_v11  ;;  %v381_v23 = vpop.f32.mrf.mxu0 }
  0xe6   : > { %481 = vst.msk [vmem:[%s938_s22 + $0x10] sm:$0xf] %vm450_vm2, %v706_v18  ;;  %v709_v24 = vpack.c.bf16 %v472_v19, %v472_v19  ;;  %v470_v25 = vadd.f32 %v468_v7, %v381_v23  ;;  %v413_v26 = vpop.f32.mrf.mxu1 }
  0xe7   : > { %541 = vst.msk [vmem:[%s938_s22 + $0x30] sm:$0xf] %vm450_vm2, %v714_v21  ;;  %v717_v27 = vpack.c.bf16 %v532_v22, %v532_v22  ;;  %v530_v28 = vadd.f32 %v528_v11, %v413_v26 }
  0xe8   : > { %492 = vst.msk [vmem:[%s938_s22 + $0x1c] sm:$0xf] %vm450_vm2, %v709_v24  ;;  %v707_v29 = vpack.c.bf16 %v470_v25, %v470_v25 }
  0xe9   : > { %552 = vst.msk [vmem:[%s938_s22 + $0x3c] sm:$0xf] %vm450_vm2, %v717_v27  ;;  %v715_v30 = vpack.c.bf16 %v530_v28, %v530_v28 }
  0xea   : > { %482 = vst.msk [vmem:[%s938_s22 + $0x14] sm:$0xf] %vm450_vm2, %v707_v29 }
  0xeb   : > { %542 = vst.msk [vmem:[%s938_s22 + $0x34] sm:$0xf] %vm450_vm2, %v715_v30 }
  0xec PF: > { %s14_s19 = sadd.s32 1, %s846_s19   ;;  %s992_s15 = smov %s838_s17 }
  0xed   : > { %p11_p8 = scmp.ge.s32.totalorder %s14_s19, 6   ;;  %s993_s16 = smov %s842_s18 }
  0xee   : > { %s994_s17 = smov %s997_s20  ;;  %s995_s18 = smov %s1001_s21 }
  0xef   :  { %13 = sbr.rel (!%p11_p8) target bundleno = 3 (0x3), region = 69 }

// kernel: _lambda_.11
= control target key start
LH: loop header
LB: loop body
LE: loop exit
PB: predicated region body
PF: predicated region fallthrough
CT: control target
= control target key end

     0   :  { %s1647_s15 = smov 0   ;;  %s1649_s16 = smov 0   ;;  %s2349_s0 = inlined_call_operand.vmem [shape: bf16[2,120,32], index: 0, kind: input, shape index: {}, may-alias: {0,1}]   ;;  %s2350_s1 = inlined_call_operand.vmem [shape: bf16[2,120,32], index: 1, kind: input, shape index: {}, may-alias: {0,1}]   ;;  %s2351_s2 = inlined_call_operand.vmem [shape: bf16[32,288], index: 2, kind: input, shape index: {}]   ;;  %s2352_s3 = inlined_call_operand.vmem [shape: f32[1,32], index: 3, kind: input, shape index: {}]   ;;  %s2353_s4 = inlined_call_operand.vmem [shape: f32[2,80,32], index: 4, kind: output, shape index: {}]  }
   0x1   :  { %s1651_s17 = smov 0  }
   0x2 LB: > { %s26_s18 = sadd.s32 1, %s1610_s16  ;;  %p1451_p0 = scmp.ge.s32.totalorder %s1614_s17, 1  ;;  %s1614_s17 = sphi %s1651_s17, %s14_s17   ;;  %s1610_s16 = sphi %s1649_s16, %s2355_s16   ;;  %s1606_s15 = sphi %s1647_s15, %s2354_s15  }
   0x3   : > { %p28_p1 = scmp.ge.s32.totalorder %s26_s18, 2  ;;  %p216_p2 = scmp.lt.s32.totalorder %s1614_s17, 3 }
   0x5   : > { %s2357_s18 = smov (%p28_p1, %s26_s18), 0  ;;  %p217_p3 = pnand %p1451_p0, %p216_p2 }
   0x6   : > { %p270_p4 = scmp.lt.s32.totalorder (!%p217_p3), %s1606_s15, 1  ;;  %s1620_s23 = smov (!%p217_p3), 96  }
   0x7   : > { %220 = sbr.rel (%p217_p3) target bundleno = 480 (0x1e0), region = 36  ;;  %s1621_s24 = smov (!%p217_p3), 32  }
   0xc   : > { %v1576_v0 = vld [vmem:[%s2351_s2 + $0x1c] ss:$12 sps:$4 sm:$0xff]   ;;  %v1578_v1 = vld [vmem:[%s2351_s2 + $0x18] ss:$12 sps:$4 sm:$0xff]   ;;  %v1616_v2 = vmov 0   ;;  %s2359_s15 = smov (!%p270_p4, %s1606_s15), 1 }
   0xd   : > { %436 = vmatprep.mubr.bf16.mxu0 %v1616_v2  ;;  %416 = vmatprep.subr.bf16.mxu0 %v1576_v0  ;;  %v1579_v3 = vld [vmem:[%s2351_s2 + $0x4] ss:$12 sps:$4 sm:$0xff]   ;;  %v1581_v4 = vld [vmem:[%s2351_s2] ss:$12 sps:$4 sm:$0xff]   ;;  %v1617_v5 = vmov 0.0   ;;  %s1542_s29 = smul.u32 60, %s2359_s15 }
   0xe   : > { %1502 = vmatprep.subr.bf16.mxu1 %v1617_v5  ;;  %417 = vmatpush1.bf16.msra.mxu0 %v1578_v1  ;;  %v1589_v6 = vld [vmem:[%s2351_s2 + $0x20] ss:$12 sps:$4 sm:$0xff]   ;;  %vm388_vm0 = vcmask 261120   ;;  %v1590_v14 = vld [vmem:[%s2351_s2 + $0x8] ss:$12 sps:$4 sm:$0xff]   ;;  %vm1618_vm1 = vmmov 0  }
   0xf   : > { %418 = vmatprep.subr.bf16.mxu0 %v1579_v3  ;;  %1503 = vmatpush3.bf16.msra.mxu1 %v1589_v6  ;;  %s277_s6 = scalar_lea.vmem %s2349_s0, %s1542_s29  ;;  %s1489_s7 = sadd.s32 40, %s1542_s29  ;;  %v1725_v16 = vld [vmem:[%s2352_s3] ss:$0 sm:$0xff]  ;;  %vm825_vm2 = vcmask 1045504   ;;  %vm736_vm3 = vcmask 1046528   ;;  %vm988_vm4 = vcmask 1044480  }
  0x10   : > { %1504 = vmatprep.subr.bf16.mxu1 %v1617_v5  ;;  %v1582_v7 = vld [vmem:[%s277_s6] sm:$0xff]   ;;  %s1690_s10 = scalar_lea.vmem %s2350_s1, %s1489_s7  ;;  %v1583_v8 = vld [vmem:[%s277_s6 + $0x8] sm:$0xff]   ;;  %v1584_v9 = vld [vmem:[%s277_s6 + $0x10] sm:$0xff]   ;;  %1506 = vmatprep.mubr.msk.bf16.mxu1 %vm1618_vm1, %v1617_v5  ;;  %s1544_s13 = smul.u32 80, %s2359_s15  ;;  %vm1050_vm5 = vcmask 1043456   ;;  %vm1203_vm6 = vcmask 1042432  }
  0x11   : > { %v1585_v10 = vld [vmem:[%s277_s6 + $0x18] sm:$0xff]   ;;  %v1586_v11 = vld [vmem:[%s277_s6 + $0x20] sm:$0xff]   ;;  %v1588_v13 = vld [vmem:[%s1690_s10 + $0x8] sm:$0xff]   ;;  %s1619_s15 = smov 64   ;;  %vm1293_vm7 = vcmask 1041408   ;;  %vm805_vm8 = vcmask 260096  }
  0x12   : > { %419 = vmatpush1.bf16.msra.mxu0 %v1581_v4  ;;  %v1587_v12 = vld [vmem:[%s1690_s10] sm:$0xff]   ;;  %v1591_v15 = vld [vmem:[%s1690_s10 + $0x10] ss:$0 sps:$4 sm:$0xff]   ;;  %s1730_s22 = scalar_lea.vmem %s2353_s4, %s1544_s13  ;;  %vm813_vm9 = vcmask 253952   ;;  %vm894_vm10 = vcmask 259072   ;;  %vm901_vm11 = vcmask 254976  }
  0x13   : > { %591 = vmatprep.subr.bf16.mxu0 %v1576_v0  ;;  %1505 = vmatpush3.bf16.msra.mxu1 %v1590_v14  ;;  %vm1032_vm12 = vcmask 258048   ;;  %vm1039_vm13 = vcmask 256000   ;;  %vm1112_vm14 = vcmask 257024  }
  0x14   : > { %1526 = vmatprep.subr.bf16.mxu1 %v1617_v5 }
  0x15   : > { %1466 = vmatmul.mubr.msk.bf16.vlgmr.msra.gmra.mxu0 %vm388_vm0, %v1582_v7 }
  0x16   : > { %445 = vmatprep.mubr.bf16.mxu0 %v1616_v2  ;;  %592 = vmatpush1.bf16.msra.mxu0 %v1578_v1 }
  0x17   : > { %593 = vmatprep.subr.bf16.mxu0 %v1579_v3  ;;  %1507 = vmatmul.mubr.msk.bf16.vlgmr.msra.gmra.mxu1 %vm388_vm0, %v1582_v7 }
  0x18   : > { %1510 = vmatprep.mubr.msk.bf16.mxu1 %vm1618_vm1, %v1617_v5  ;;  %1527 = vmatpush3.bf16.msra.mxu1 %v1589_v6 }
  0x19   : > { %1528 = vmatprep.subr.bf16.mxu1 %v1617_v5 }
  0x1a   : > { %594 = vmatpush1.bf16.msra.mxu0 %v1581_v4 }
  0x1c   : > { %1529 = vmatpush3.bf16.msra.mxu1 %v1590_v14 }
  0x1d   : > { %1467 = vmatmul.mubr.msk.bf16.gmra.mxu0 %vm388_vm0, %v1583_v8 }
  0x1e   : > { %455 = vmatprep.mubr.bf16.mxu0 %v1616_v2 }
  0x1f   : > { %1511 = vmatmul.mubr.msk.bf16.gmra.mxu1 %vm388_vm0, %v1583_v8 }
  0x20   : > { %1514 = vmatprep.mubr.msk.bf16.mxu1 %vm1618_vm1, %v1617_v5 }
  0x25   : > { %1468 = vmatmul.mubr.msk.bf16.gmra.mxu0 %vm388_vm0, %v1584_v9 }
  0x26   : > { %465 = vmatprep.mubr.bf16.mxu0 %v1616_v2 }
  0x27   : > { %1515 = vmatmul.mubr.msk.bf16.gmra.mxu1 %vm388_vm0, %v1584_v9 }
  0x28   : > { %1518 = vmatprep.mubr.msk.bf16.mxu1 %vm1618_vm1, %v1617_v5 }
  0x2d   : > { %1469 = vmatmul.mubr.msk.bf16.gmra.mxu0 %vm388_vm0, %v1585_v10 }
  0x2e   : > { %475 = vmatprep.mubr.bf16.mxu0 %v1616_v2 }
  0x2f   : > { %1519 = vmatmul.mubr.msk.bf16.gmra.mxu1 %vm388_vm0, %v1585_v10 }
  0x30   : > { %1522 = vmatprep.mubr.msk.bf16.mxu1 %vm1618_vm1, %v1617_v5 }
  0x35   : > { %1470 = vmatmul.mubr.msk.bf16.gmra.mxu0 %vm388_vm0, %v1586_v11 }
  0x36   : > { %611 = vmatprep.mubr.bf16.mxu0 %v1616_v2 }
  0x37   : > { %1523 = vmatmul.mubr.msk.bf16.gmra.mxu1 %vm388_vm0, %v1586_v11 }
  0x38   : > { %1530 = vmatprep.mubr.msk.bf16.mxu1 %vm1618_vm1, %v1617_v5 }
  0x3d   : > { %1479 = vmatmul.mubr.msk.bf16.vlgmr.msra.gmra.mxu0 %vm388_vm0, %v1587_v12 }
  0x3e   : > { %621 = vmatprep.mubr.bf16.mxu0 %v1616_v2 }
  0x3f   : > { %1531 = vmatmul.mubr.msk.bf16.vlgmr.msra.gmra.mxu1 %vm388_vm0, %v1587_v12 }
  0x40   : > { %1534 = vmatprep.mubr.msk.bf16.mxu1 %vm1618_vm1, %v1617_v5 }
  0x45   : > { %1480 = vmatmul.mubr.msk.bf16.gmra.mxu0 %vm388_vm0, %v1588_v13 }
  0x46   : > { %628 = vmatprep.mubr.bf16.mxu0 %v1616_v2 }
  0x47   : > { %1535 = vmatmul.mubr.msk.bf16.gmra.mxu1 %vm388_vm0, %v1588_v13 }
  0x48   : > { %1538 = vmatprep.mubr.msk.bf16.mxu1 %vm1618_vm1, %v1617_v5 }
  0x4d   : > { %1481 = vmatmul.mubr.msk.bf16.gmra.mxu0 %vm388_vm0, %v1591_v15 }
  0x4f   : > { %1539 = vmatmul.mubr.msk.bf16.gmra.mxu1 %vm388_vm0, %v1591_v15 }
  0xd5   : > { %v438_v17 = vpop.f32.mrf.mxu0 }
  0xd6   : > { %v696_v18 = vadd.f32 %v1725_v16, %v438_v17  ;;  %v737_v20 = vrot.slane %v438_v17, 1  ;;  %v826_v22 = vrot.slane %v438_v17, 2 }
  0xd7   : > { %v440_v19 = vpop.f32.mrf.mxu0 }
  0xd8   : > { %706 = vst.msk [vmem:[%s1730_s22] sm:$0xff] %vm388_vm0, %v696_v18 }
  0xd9   : > { %v441_v21 = vpop.f32.mrf.mxu0 }
  0xda   : > { %v697_v23 = vadd.f32 %v1725_v16, %v441_v21  ;;  %v738_v24 = vrot.slane %v441_v21, 1  ;;  %v827_v25 = vrot.slane %v441_v21, 2 }
  0xdb   : > { %v443_v26 = vpop.f32.mrf.mxu0 }
  0xdc   : > { %707 = vst.msk [vmem:[%s1730_s22 + $0x8] sm:$0xff] %vm388_vm0, %v697_v23  ;;  %v828_v27 = vsel %vm825_vm2, %v826_v22, %v827_v25  ;;  %v739_v28 = vsel %vm736_vm3, %v737_v20, %v738_v24  ;;  %v989_v32 = vrot.slane %v443_v26, 3  ;;  %v1051_v38 = vrot.slane %v443_v26, 4 }
  0xdd   : > { %845 = vrot.lane.b32.xlu1 %v828_v27, %s1619_s15  ;;  %756 = vrot.lane.b32.xlu0 %v739_v28, %s1620_s23  ;;  %v447_v29 = vpop.f32.mrf.mxu0 }
  0xde   : > { %v698_v30 = vadd.f32 %v1725_v16, %v447_v29  ;;  %v740_v31 = vrot.slane %v447_v29, 1  ;;  %v829_v34 = vrot.slane %v447_v29, 2 }
  0xdf   : > { %v449_v33 = vpop.f32.mrf.mxu0 }
  0xe0   : > { %708 = vst.msk [vmem:[%s1730_s22 + $0x10] sm:$0xff] %vm388_vm0, %v698_v30  ;;  %v990_v35 = vrot.slane %v449_v33, 3  ;;  %v1052_v36 = vrot.slane %v449_v33, 4  ;;  %v741_v37 = vsel %vm736_vm3, %v738_v24, %v740_v31  ;;  %v830_v47 = vsel %vm825_vm2, %v827_v25, %v829_v34 }
  0xe1   : > { %758 = vrot.lane.b32.xlu0 %v741_v37, %s1620_s23  ;;  %v451_v39 = vpop.f32.mrf.mxu0  ;;  %v1204_v48 = vrot.slane %v449_v33, 5 }
  0xe2   : > { %v1748_v40 = vsel %vm988_vm4, %v989_v32, %v990_v35  ;;  %v699_v41 = vadd.f32 %v1725_v16, %v451_v39  ;;  %v742_v42 = vrot.slane %v451_v39, 1  ;;  %v1053_v43 = vsel %vm1050_vm5, %v1051_v38, %v1052_v36 }
  0xe3   : > { %v1752_v44 = vpop.f32.mrf.mxu0  ;;  %1068 = vrot.lane.b32.xlu1 %v1053_v43, %s1620_s23  ;;  %v831_v52 = vrot.slane %v451_v39, 2 }
  0xe4   : > { %709 = vst.msk [vmem:[%s1730_s22 + $0x18] sm:$0xff] %vm388_vm0, %v699_v41  ;;  %v992_v45 = vrot.slane %v1752_v44, 3  ;;  %v1205_v46 = vrot.slane %v1752_v44, 5  ;;  %v743_v53 = vsel %vm736_vm3, %v740_v31, %v742_v42  ;;  %v1054_v56 = vrot.slane %v1752_v44, 4 }
  0xe5   : > { %847 = vrot.lane.b32.xlu0 %v830_v47, %s1619_s15  ;;  %v1761_v49 = vpop.f32.mrf.mxu0  ;;  %v832_v62 = vsel %vm825_vm2, %v829_v34, %v831_v52 }
  0xe6   : > { %v1764_v50 = vsel %vm988_vm4, %v990_v35, %v992_v45  ;;  %v700_v51 = vadd.f32 %v1725_v16, %v1761_v49  ;;  %v1772_v55 = vsel %vm1203_vm6, %v1204_v48, %v1205_v46  ;;  %v833_v1 = vrot.slane %v1761_v49, 2 }
  0xe7   : > { %v1769_v54 = vpop.f32.mrf.mxu0  ;;  %760 = vrot.lane.b32.xlu1 %v743_v53, %s1620_s23  ;;  %v1801_v4 = vsel %vm1050_vm5, %v1052_v36, %v1054_v56  ;;  %v744_v8 = vrot.slane %v1761_v49, 1 }
  0xe8   : > { %710 = vst.msk [vmem:[%s1730_s22 + $0x20] sm:$0xff] %vm388_vm0, %v700_v51  ;;  %v994_v57 = vrot.slane %v1769_v54, 3  ;;  %v1207_v58 = vrot.slane %v1769_v54, 5  ;;  %v834_v13 = vsel %vm825_vm2, %v831_v52, %v833_v1  ;;  %v1056_v18 = vrot.slane %v1769_v54, 4 }
  0xe9   : > { %912 = vrot.lane.b32.xlu0 %v830_v47, %s1621_s24  ;;  %v1781_v59 = vpop.f32.mrf.mxu0  ;;  %v745_v19 = vsel %vm736_vm3, %v742_v42, %v744_v8 }
  0xea   : > { %v1784_v60 = vsel %vm988_vm4, %v992_v45, %v994_v57  ;;  %v701_v61 = vadd.f32 %v1725_v16, %v1781_v59  ;;  %v1792_v0 = vsel %vm1203_vm6, %v1205_v46, %v1207_v58  ;;  %v746_v22 = vrot.slane %v1781_v59, 1 }
  0xeb   : > { %v1789_v63 = vpop.f32.mrf.mxu0  ;;  %849 = vrot.lane.b32.xlu1 %v832_v62, %s1619_s15  ;;  %v835_v28 = vrot.slane %v1781_v59, 2  ;;  %v1855_v29 = vsel %vm1050_vm5, %v1054_v56, %v1056_v18 }
  0xec   : > { %711 = vst.msk [vmem:[%s1730_s22 + $0x28] sm:$0xff] %vm388_vm0, %v701_v61  ;;  %v996_v2 = vrot.slane %v1789_v63, 3  ;;  %v1209_v3 = vrot.slane %v1789_v63, 5  ;;  %v1058_v32 = vrot.slane %v1789_v63, 4  ;;  %v747_v33 = vsel %vm736_vm3, %v744_v8, %v746_v22 }
  0xed   : > { %1070 = vrot.lane.b32.xlu0 %v1801_v4, %s1620_s23  ;;  %v1805_v5 = vpop.f32.mrf.mxu0  ;;  %v836_v39 = vsel %vm825_vm2, %v833_v1, %v835_v28 }
  0xee   : > { %v1808_v6 = vsel %vm988_vm4, %v994_v57, %v996_v2  ;;  %v702_v7 = vadd.f32 %v1725_v16, %v1805_v5  ;;  %v1816_v10 = vsel %vm1203_vm6, %v1207_v58, %v1209_v3  ;;  %v837_v43 = vrot.slane %v1805_v5, 2 }
  0xef   : > { %v1813_v9 = vpop.f32.mrf.mxu0  ;;  %914 = vrot.lane.b32.xlu1 %v832_v62, %s1621_s24  ;;  %v1884_v44 = vsel %vm1050_vm5, %v1056_v18, %v1058_v32  ;;  %v748_v49 = vrot.slane %v1805_v5, 1 }
  0xf0   : > { %712 = vst.msk [vmem:[%s1730_s22 + $0x30] sm:$0xff] %vm388_vm0, %v702_v7  ;;  %v998_v11 = vrot.slane %v1813_v9, 3  ;;  %v1211_v12 = vrot.slane %v1813_v9, 5  ;;  %v838_v52 = vsel %vm825_vm2, %v835_v28, %v837_v43  ;;  %v1060_v54 = vrot.slane %v1813_v9, 4 }
  0xf1   : > { %851 = vrot.lane.b32.xlu0 %v834_v13, %s1619_s15  ;;  %v1825_v14 = vpop.f32.mrf.mxu0  ;;  %v749_v56 = vsel %vm736_vm3, %v746_v22, %v748_v49 }
  0xf2   : > { %v1828_v15 = vsel %vm988_vm4, %v996_v2, %v998_v11  ;;  %v703_v17 = vadd.f32 %v1725_v16, %v1825_v14  ;;  %v1837_v21 = vsel %vm1203_vm6, %v1209_v3, %v1211_v12  ;;  %v750_v58 = vrot.slane %v1825_v14, 1 }
  0xf3   : > { %v1834_v20 = vpop.f32.mrf.mxu0  ;;  %762 = vrot.lane.b32.xlu1 %v745_v19, %s1620_s23  ;;  %v839_v61 = vrot.slane %v1825_v14, 2  ;;  %v1921_v62 = vsel %vm1050_vm5, %v1058_v32, %v1060_v54  ;;  %v520_v14 = vpop.f32.mrf.mxu1 }
  0xf4   : > { %713 = vst.msk [vmem:[%s1730_s22 + $0x38] sm:$0xff] %vm388_vm0, %v703_v17  ;;  %v1000_v23 = vrot.slane %v1834_v20, 3  ;;  %v1213_v24 = vrot.slane %v1834_v20, 5  ;;  %v751_v2 = vsel %vm736_vm3, %v748_v49, %v750_v58 }
  0xf5   : > { %916 = vrot.lane.b32.xlu0 %v834_v13, %s1621_s24  ;;  %v1846_v25 = vpop.f32.mrf.mxu0  ;;  %v840_v5 = vsel %vm825_vm2, %v837_v43, %v839_v61  ;;  %v1508_v17 = vpop.f32.mrf.mxu1 }
  0xf6   : > { %v1849_v26 = vsel %vm988_vm4, %v998_v11, %v1000_v23  ;;  %v704_v27 = vadd.f32 %v1725_v16, %v1846_v25  ;;  %v1860_v31 = vsel %vm1203_vm6, %v1211_v12, %v1213_v24  ;;  %v841_v1 = vrot.slane %v1846_v25, 2 }
  0xf7   : > { %v1857_v30 = vpop.f32.mrf.mxu0  ;;  %1072 = vrot.lane.b32.xlu1 %v1855_v29, %s1620_s23  ;;  %v752_v9 = vrot.slane %v1846_v25, 1  ;;  %v522_v22 = vpop.f32.mrf.mxu1 }
  0xf8   : > { %714 = vst.msk [vmem:[%s1730_s22 + $0x40] sm:$0xff] %vm388_vm0, %v704_v27  ;;  %v1002_v34 = vrot.slane %v1857_v30, 3  ;;  %v1215_v35 = vrot.slane %v1857_v30, 5  ;;  %v842_v8 = vsel %vm825_vm2, %v839_v61, %v841_v1  ;;  %v1064_v25 = vrot.slane %v1857_v30, 4 }
  0xf9   : > { %764 = vrot.lane.b32.xlu0 %v747_v33, %s1620_s23  ;;  %v481_v36 = vpop.f32.mrf.mxu0  ;;  %v753_v12 = vsel %vm736_vm3, %v750_v58, %v752_v9 }
  0xfa   : > { %v1872_v37 = vsel %vm988_vm4, %v1000_v23, %v1002_v34  ;;  %v705_v38 = vadd.f32 %v1725_v16, %v481_v36  ;;  %v1879_v42 = vsel %vm1203_vm6, %v1213_v24, %v1215_v35  ;;  %v843_v11 = vrot.slane %v481_v36, 2  ;;  %v1509_v23 = vpop.f32.mrf.mxu1 }
  0xfb   : > { %v1876_v41 = vpop.f32.mrf.mxu0  ;;  %853 = vrot.lane.b32.xlu1 %v836_v39, %s1619_s15  ;;  %v754_v13 = vrot.slane %v481_v36, 1  ;;  %v1062_v24 = vrot.slane %v1834_v20, 4  ;;  %v716_v23 = vld [vmem:[%s1730_s22] sm:$0xff] }
  0xfc   : > { %715 = vst.msk [vmem:[%s1730_s22 + $0x48] sm:$0xff] %vm388_vm0, %v705_v38  ;;  %v1004_v45 = vrot.slane %v1876_v41, 3  ;;  %v1217_v16 = vrot.slane %v1876_v41, 5  ;;  %v844_v18 = vsel %vm825_vm2, %v841_v1, %v843_v11  ;;  %v526_v27 = vpop.f32.mrf.mxu1  ;;  %v1066_v20 = vrot.slane %v1876_v41, 4 }
  0xfd   : > { %1074 = vrot.lane.b32.xlu0 %v1884_v44, %s1620_s23  ;;  %v1892_v46 = vpop.f32.mrf.mxu0  ;;  %v755_v19 = vsel %vm736_vm3, %v752_v9, %v754_v13  ;;  %v1065_v28 = vsel %vm1050_vm5, %v1062_v24, %v1064_v25  ;;  %v1063_v33 = vsel %vm1050_vm5, %v1060_v54, %v1062_v24  ;;  %v1294_v36 = vrot.slane %v526_v27, 6 }
  0xfe   : > { %v1897_v47 = vsel %vm988_vm4, %v1002_v34, %v1004_v45  ;;  %v1902_v48 = vsel %vm1203_vm6, %v1215_v35, %v1217_v16  ;;  %v1512_v32 = vpop.f32.mrf.mxu1  ;;  %v1067_v49 = vsel %vm1050_vm5, %v1064_v25, %v1066_v20 }
  0xff   : > { %v1905_v51 = vpop.f32.mrf.mxu0  ;;  %918 = vrot.lane.b32.xlu1 %v836_v39, %s1621_s24 }
 0x100   : > { %v529_v34 = vpop.f32.mrf.mxu1 }
 0x101   : > { %855 = vrot.lane.b32.xlu0 %v838_v52, %s1619_s15  ;;  %v1910_v53 = vpop.f32.mrf.mxu0  ;;  %v1295_v38 = vrot.slane %v529_v34, 6 }
 0x102   : > { %v1513_v35 = vpop.f32.mrf.mxu1 }
 0x103   : > { %v1914_v57 = vpop.f32.mrf.mxu0  ;;  %766 = vrot.lane.b32.xlu1 %v749_v56, %s1620_s23 }
 0x104   : > { %v534_v30 = vpop.f32.mrf.mxu1 }
 0x105   : > { %920 = vrot.lane.b32.xlu0 %v838_v52, %s1621_s24  ;;  %v623_v59 = vpop.f32.mrf.mxu0  ;;  %v1297_v39 = vrot.slane %v534_v30, 6  ;;  %v1964_v52 = vsel %vm1293_vm7, %v1294_v36, %v1295_v38 }
 0x106   : > { %v1516_v43 = vpop.f32.mrf.mxu1 }
 0x107   : > { %v1923_v63 = vpop.f32.mrf.mxu0  ;;  %1076 = vrot.lane.b32.xlu1 %v1921_v62, %s1620_s23  ;;  %v1967_v54 = vsel %vm1293_vm7, %v1295_v38, %v1297_v39  ;;  %v718_v43 = vld [vmem:[%s1730_s22 + $0x10] sm:$0xff] }
 0x109   : > { %768 = vrot.lane.b32.xlu0 %v751_v2, %s1620_s23  ;;  %v626_v3 = vpop.f32.mrf.mxu0 }
 0x10b   : > { %v627_v7 = vpop.f32.mrf.mxu0  ;;  %857 = vrot.lane.b32.xlu1 %v840_v5, %s1619_s15 }
 0x10d   : > { %859 = vrot.lane.b32.xlu0 %v842_v8, %s1619_s15 }
 0x10f   : > { %922 = vrot.lane.b32.xlu1 %v840_v5, %s1621_s24 }
 0x111   : > { %924 = vrot.lane.b32.xlu0 %v842_v8, %s1621_s24 }
 0x113   : > { %770 = vrot.lane.b32.xlu1 %v753_v12, %s1620_s23 }
 0x115   : > { %863 = vrot.lane.b32.xlu0 %v843_v11, %s1619_s15 }
 0x117   : > { %774 = vrot.lane.b32.xlu1 %v754_v13, %s1620_s23 }
 0x119   : > { %928 = vrot.lane.b32.xlu0 %v843_v11, %s1621_s24 }
 0x11b   : > { %861 = vrot.lane.b32.xlu1 %v844_v18, %s1619_s15 }
 0x11d   : > { %772 = vrot.lane.b32.xlu0 %v755_v19, %s1620_s23 }
 0x11f   : > { %926 = vrot.lane.b32.xlu1 %v844_v18, %s1621_s24 }
 0x121   : > { %809 = vrot.lane.b32.xlu0 %v1892_v46, %s1620_s23 }
 0x123   : > { %1080 = vrot.lane.b32.xlu1 %v1065_v28, %s1620_s23 }
 0x125   : > { %1078 = vrot.lane.b32.xlu0 %v1063_v33, %s1620_s23 }
 0x127   : > { %1138 = vrot.lane.b32.xlu1 %v1855_v29, %s1619_s15 }
 0x129   : > { %1136 = vrot.lane.b32.xlu0 %v1801_v4, %s1619_s15  ;;  %v537_v4 = vpop.f32.mrf.mxu1 }
 0x12a   : > { %v1299_v58 = vrot.slane %v537_v4, 6 }
 0x12b   : > { %897 = vrot.lane.b32.xlu1 %v1892_v46, %s1619_s15  ;;  %v1517_v29 = vpop.f32.mrf.mxu1 }
 0x12c   : > { %v1976_v1 = vsel %vm1293_vm7, %v1297_v39, %v1299_v58 }
 0x12d   : > { %1082 = vrot.lane.b32.xlu0 %v1067_v49, %s1620_s23  ;;  %v542_v56 = vpop.f32.mrf.mxu1 }
 0x12e   : > { %v1301_v59 = vrot.slane %v542_v56, 6 }
 0x12f   : > { %960 = vrot.lane.b32.xlu1 %v1892_v46, %s1621_s24  ;;  %v1520_v61 = vpop.f32.mrf.mxu1 }
 0x130   : > { %v1979_v2 = vsel %vm1293_vm7, %v1299_v58, %v1301_v59 }
 0x131   : > { %1118 = vrot.lane.b32.xlu0 %v1905_v51, %s1620_s23  ;;  %v545_v3 = vpop.f32.mrf.mxu1 }
 0x132   : > { %v1303_v7 = vrot.slane %v545_v3, 6 }
 0x133   : > { %1084 = vrot.lane.b32.xlu1 %v1066_v20, %s1620_s23  ;;  %v1521_v46 = vpop.f32.mrf.mxu1 }
 0x134   : > { %v1989_v11 = vsel %vm1293_vm7, %v1301_v59, %v1303_v7 }
 0x135   : > { %962 = vrot.lane.b32.xlu0 %v1910_v53, %s1621_s24  ;;  %v550_v5 = vpop.f32.mrf.mxu1 }
 0x136   : > { %v1305_v8 = vrot.slane %v550_v5, 6 }
 0x137   : > { %1142 = vrot.lane.b32.xlu1 %v1921_v62, %s1619_s15  ;;  %v1524_v9 = vpop.f32.mrf.mxu1 }
 0x138   : > { %v1992_v12 = vsel %vm1293_vm7, %v1303_v7, %v1305_v8 }
 0x139   : > { %1140 = vrot.lane.b32.xlu0 %v1884_v44, %s1619_s15  ;;  %v1995_v53 = vpop.f32.mrf.mxu1 }
 0x13a   : > { %v1307_v62 = vrot.slane %v1995_v53, 6 }
 0x13b   : > { %1146 = vrot.lane.b32.xlu1 %v1065_v28, %s1619_s15  ;;  %v1525_v44 = vpop.f32.mrf.mxu1  ;;  %v717_v28 = vld [vmem:[%s1730_s22 + $0x8] sm:$0xff] }
 0x13c   : > { %v2007_v14 = vsel %vm1293_vm7, %v1305_v8, %v1307_v62  ;;  %v719_v44 = vld [vmem:[%s1730_s22 + $0x18] sm:$0xff] }
 0x13d   : > { %1144 = vrot.lane.b32.xlu0 %v1063_v33, %s1619_s15  ;;  %v2000_v13 = vpop.f32.mrf.mxu1 }
 0x13f   : > { %1150 = vrot.lane.b32.xlu1 %v1066_v20, %s1619_s15  ;;  %v1532_v17 = vpop.f32.mrf.mxu1 }
 0x141   : > { %1148 = vrot.lane.b32.xlu0 %v1067_v49, %s1619_s15  ;;  %v2011_v18 = vpop.f32.mrf.mxu1 }
 0x143   : > { %1219 = vrot.lane.b32.xlu1 %v1772_v55, %s1621_s24  ;;  %v1533_v55 = vpop.f32.mrf.mxu1 }
 0x145   : > { %1180 = vrot.lane.b32.xlu0 %v1905_v51, %s1619_s15  ;;  %v2017_v19 = vpop.f32.mrf.mxu1 }
 0x147   : > { %1223 = vrot.lane.b32.xlu1 %v1816_v10, %s1621_s24  ;;  %v1536_v22 = vpop.f32.mrf.mxu1 }
 0x149   : > { %1221 = vrot.lane.b32.xlu0 %v1792_v0, %s1621_s24  ;;  %v680_v10 = vpop.f32.mrf.mxu1 }
 0x14b   : > { %1120 = vrot.lane.b32.xlu1 %v1914_v57, %s1620_s23  ;;  %v1537_v27 = vpop.f32.mrf.mxu1 }
 0x14d   : > { %1225 = vrot.lane.b32.xlu0 %v1837_v21, %s1621_s24  ;;  %v630_v21 = vpop.f32.mrf.mxu0  ;;  %v684_v34 = vpop.f32.mrf.mxu1 }
 0x14f   : > { %v757_v24 = vpop.permute.xlu0 %756  ;;  %1227 = vrot.lane.b32.xlu1 %v1860_v31, %s1621_s24  ;;  %v846_v0 = vpop.permute.xlu1 %845 }
 0x150   : > { %v786_v25 = vadd.f32 %v757_v24, %v716_v23  ;;  %v631_v31 = vpop.f32.mrf.mxu0  ;;  %v1540_v20 = vpop.f32.mrf.mxu1 }
 0x151   : > { %1184 = vrot.lane.b32.xlu0 %v1923_v63, %s1619_s15 }
 0x152   : > { %796 = vst.msk [vmem:[%s1730_s22] sm:$0xff] %vm388_vm0, %v786_v25  ;;  %v632_v36 = vpop.f32.mrf.mxu0  ;;  %v686_v38 = vpop.f32.mrf.mxu1  ;;  %v720_v25 = vld [vmem:[%s1730_s22 + $0x20] sm:$0xff] }
 0x153   : > { %v759_v32 = vpop.permute.xlu0 %758  ;;  %1182 = vrot.lane.b32.xlu1 %v1914_v57, %s1619_s15 }
 0x154   : > { %v787_v33 = vadd.f32 %v759_v32, %v717_v28  ;;  %v633_v39 = vpop.f32.mrf.mxu0  ;;  %v1541_v29 = vpop.f32.mrf.mxu1 }
 0x155   : > { %1229 = vrot.lane.b32.xlu0 %v1879_v42, %s1621_s24  ;;  %v2037_v35 = vpop.permute.xlu1 %1068 }
 0x156   : > { %797 = vst.msk [vmem:[%s1730_s22 + $0x8] sm:$0xff] %vm388_vm0, %v787_v33 }
 0x157   : > { %v848_v30 = vpop.permute.xlu0 %847  ;;  %1231 = vrot.lane.b32.xlu1 %v1902_v48, %s1621_s24 }
 0x159   : > { %1233 = vrot.lane.b32.xlu0 %v1217_v16, %s1621_s24  ;;  %v815_v42 = vld [vmem:[%s1730_s22] sm:$0xff]  ;;  %v761_v49 = vpop.permute.xlu1 %760 }
 0x15a   : > { %v875_v4 = vadd.f32 %v846_v0, %v815_v42  ;;  %v788_v56 = vadd.f32 %v761_v49, %v718_v43  ;;  %v721_v43 = vld [vmem:[%s1730_s22 + $0x28] sm:$0xff] }
 0x15b   : > { %v913_v58 = vpop.permute.xlu0 %912  ;;  %1262 = vrot.lane.b32.xlu1 %v1905_v51, %s1621_s24 }
 0x15c   : > { %885 = vst.msk [vmem:[%s1730_s22] sm:$0xff] %vm388_vm0, %v875_v4  ;;  %798 = vst.msk [vmem:[%s1730_s22 + $0x10] sm:$0xff] %vm388_vm0, %v788_v56 }
 0x15d   : > { %v816_v48 = vld [vmem:[%s1730_s22 + $0x8] sm:$0xff]  ;;  %1264 = vrot.lane.b32.xlu0 %v1914_v57, %s1621_s24  ;;  %v850_v59 = vpop.permute.xlu1 %849 }
 0x15e   : > { %v876_v16 = vadd.f32 %v848_v30, %v816_v48 }
 0x15f   : > { %v1071_v61 = vpop.permute.xlu0 %1070  ;;  %1266 = vrot.lane.b32.xlu1 %v1923_v63, %s1621_s24 }
 0x160   : > { %886 = vst.msk [vmem:[%s1730_s22 + $0x8] sm:$0xff] %vm388_vm0, %v876_v16 }
 0x161   : > { %v915_v3 = vpop.permute.xlu1 %914 }
 0x163   : > { %v903_v46 = vld [vmem:[%s1730_s22] sm:$0xff]  ;;  %v852_v5 = vpop.permute.xlu0 %851  ;;  %v817_v8 = vld [vmem:[%s1730_s22 + $0x10] sm:$0xff] }
 0x164   : > { %v939_v7 = vadd.f32 %v913_v58, %v903_v46  ;;  %v877_v9 = vadd.f32 %v850_v59, %v817_v8  ;;  %v722_v46 = vld [vmem:[%s1730_s22 + $0x30] sm:$0xff] }
 0x165   : > { %v763_v17 = vpop.permute.xlu1 %762 }
 0x166   : > { %948 = vst.msk [vmem:[%s1730_s22] sm:$0xff] %vm388_vm0, %v939_v7  ;;  %887 = vst.msk [vmem:[%s1730_s22 + $0x10] sm:$0xff] %vm388_vm0, %v877_v9  ;;  %v789_v22 = vadd.f32 %v763_v17, %v719_v44 }
 0x167   : > { %v904_v55 = vld [vmem:[%s1730_s22 + $0x8] sm:$0xff]  ;;  %v917_v63 = vpop.permute.xlu0 %916 }
 0x168   : > { %v940_v23 = vadd.f32 %v915_v3, %v904_v55  ;;  %799 = vst.msk [vmem:[%s1730_s22 + $0x18] sm:$0xff] %vm388_vm0, %v789_v22 }
 0x169   : > { %v1073_v24 = vpop.permute.xlu1 %1072 }
 0x16a   : > { %949 = vst.msk [vmem:[%s1730_s22 + $0x8] sm:$0xff] %vm388_vm0, %v940_v23 }
 0x16b   : > { %v765_v10 = vpop.permute.xlu0 %764 }
 0x16c   : > { %v790_v0 = vadd.f32 %v765_v10, %v720_v25 }
 0x16d   : > { %v970_v27 = vld [vmem:[%s1730_s22] sm:$0xff]  ;;  %v905_v32 = vld [vmem:[%s1730_s22 + $0x10] sm:$0xff]  ;;  %v854_v21 = vpop.permute.xlu1 %853 }
 0x16e   : > { %v1015_v28 = vadd.f32 %v1748_v40, %v970_v27  ;;  %800 = vst.msk [vmem:[%s1730_s22 + $0x20] sm:$0xff] %vm388_vm0, %v790_v0  ;;  %v941_v33 = vadd.f32 %v917_v63, %v905_v32  ;;  %v723_v32 = vld [vmem:[%s1730_s22 + $0x38] sm:$0xff] }
 0x16f   : > { %v2077_v34 = vpop.permute.xlu0 %1074  ;;  %v818_v31 = vld [vmem:[%s1730_s22 + $0x18] sm:$0xff] }
 0x170   : > { %1024 = vst.msk [vmem:[%s1730_s22] sm:$0xff] %vm388_vm0, %v1015_v28  ;;  %950 = vst.msk [vmem:[%s1730_s22 + $0x10] sm:$0xff] %vm388_vm0, %v941_v33  ;;  %v878_v30 = vadd.f32 %v852_v5, %v818_v31 }
 0x171   : > { %v971_v20 = vld [vmem:[%s1730_s22 + $0x8] sm:$0xff]  ;;  %v919_v36 = vpop.permute.xlu1 %918 }
 0x172   : > { %v1016_v40 = vadd.f32 %v1764_v50, %v971_v20  ;;  %888 = vst.msk [vmem:[%s1730_s22 + $0x18] sm:$0xff] %vm388_vm0, %v878_v30 }
 0x173   : > { %v856_v38 = vpop.permute.xlu0 %855 }
 0x174   : > { %1025 = vst.msk [vmem:[%s1730_s22 + $0x8] sm:$0xff] %vm388_vm0, %v1016_v40 }
 0x175   : > { %v819_v42 = vld [vmem:[%s1730_s22 + $0x20] sm:$0xff]  ;;  %v767_v49 = vpop.permute.xlu1 %766 }
 0x176   : > { %v879_v39 = vadd.f32 %v854_v21, %v819_v42  ;;  %v791_v4 = vadd.f32 %v767_v49, %v721_v43  ;;  %v724_v49 = vld [vmem:[%s1730_s22 + $0x40] sm:$0xff] }
 0x177   : > { %v921_v29 = vpop.permute.xlu0 %920  ;;  %v1041_v56 = vld [vmem:[%s1730_s22] sm:$0xff]  ;;  %v972_v50 = vld [vmem:[%s1730_s22 + $0x10] sm:$0xff] }
 0x178   : > { %889 = vst.msk [vmem:[%s1730_s22 + $0x20] sm:$0xff] %vm388_vm0, %v879_v39  ;;  %v1095_v58 = vadd.f32 %v2037_v35, %v1041_v56  ;;  %v1017_v48 = vadd.f32 %v1784_v60, %v972_v50  ;;  %801 = vst.msk [vmem:[%s1730_s22 + $0x28] sm:$0xff] %vm388_vm0, %v791_v4 }
 0x179   : > { %v906_v16 = vld [vmem:[%s1730_s22 + $0x18] sm:$0xff]  ;;  %v2101_v59 = vpop.permute.xlu1 %1076 }
 0x17a   : > { %1104 = vst.msk [vmem:[%s1730_s22] sm:$0xff] %vm388_vm0, %v1095_v58  ;;  %1026 = vst.msk [vmem:[%s1730_s22 + $0x10] sm:$0xff] %vm388_vm0, %v1017_v48  ;;  %v942_v3 = vadd.f32 %v919_v36, %v906_v16 }
 0x17b   : > { %v769_v5 = vpop.permute.xlu0 %768  ;;  %v1042_v35 = vld [vmem:[%s1730_s22 + $0x8] sm:$0xff] }
 0x17c   : > { %v792_v7 = vadd.f32 %v769_v5, %v722_v46  ;;  %v1096_v60 = vadd.f32 %v1071_v61, %v1042_v35  ;;  %951 = vst.msk [vmem:[%s1730_s22 + $0x18] sm:$0xff] %vm388_vm0, %v942_v3 }
 0x17d   : > { %v858_v8 = vpop.permute.xlu1 %857 }
 0x17e   : > { %802 = vst.msk [vmem:[%s1730_s22 + $0x30] sm:$0xff] %vm388_vm0, %v792_v7  ;;  %1105 = vst.msk [vmem:[%s1730_s22 + $0x8] sm:$0xff] %vm388_vm0, %v1096_v60 }
 0x17f   : > { %v907_v9 = vld [vmem:[%s1730_s22 + $0x20] sm:$0xff]  ;;  %v860_v44 = vpop.permute.xlu0 %859  ;;  %v820_v55 = vld [vmem:[%s1730_s22 + $0x28] sm:$0xff] }
 0x180   : > { %v943_v17 = vadd.f32 %v921_v29, %v907_v9  ;;  %v880_v22 = vadd.f32 %v856_v38, %v820_v55 }
 0x181   : > { %v1043_v63 = vld [vmem:[%s1730_s22 + $0x10] sm:$0xff]  ;;  %v923_v61 = vpop.permute.xlu1 %922 }
 0x182   : > { %952 = vst.msk [vmem:[%s1730_s22 + $0x20] sm:$0xff] %vm388_vm0, %v943_v17  ;;  %v1097_v23 = vadd.f32 %v1073_v24, %v1043_v63  ;;  %890 = vst.msk [vmem:[%s1730_s22 + $0x28] sm:$0xff] %vm388_vm0, %v880_v22 }
 0x183   : > { %v925_v25 = vpop.permute.xlu0 %924  ;;  %v973_v10 = vld [vmem:[%s1730_s22 + $0x18] sm:$0xff] }
 0x184   : > { %1106 = vst.msk [vmem:[%s1730_s22 + $0x10] sm:$0xff] %vm388_vm0, %v1097_v23  ;;  %v1018_v0 = vadd.f32 %v1808_v6, %v973_v10  ;;  %v725_v6 = vld [vmem:[%s1730_s22 + $0x48] sm:$0x7f] }
 0x185   : > { %v821_v27 = vld [vmem:[%s1730_s22 + $0x30] sm:$0xff]  ;;  %v771_v21 = vpop.permute.xlu1 %770 }
 0x186   : > { %v881_v28 = vadd.f32 %v858_v8, %v821_v27  ;;  %1027 = vst.msk [vmem:[%s1730_s22 + $0x18] sm:$0xff] %vm388_vm0, %v1018_v0  ;;  %v793_v24 = vadd.f32 %v771_v21, %v723_v32  ;;  %v1128_v0 = vld [vmem:[%s1730_s22] sm:$0xff] }
 0x187   : > { %v864_v33 = vpop.permute.xlu0 %863 }
 0x188   : > { %891 = vst.msk [vmem:[%s1730_s22 + $0x30] sm:$0xff] %vm388_vm0, %v881_v28  ;;  %803 = vst.msk [vmem:[%s1730_s22 + $0x38] sm:$0xff] %vm388_vm0, %v793_v24 }
 0x189   : > { %v974_v31 = vld [vmem:[%s1730_s22 + $0x20] sm:$0xff]  ;;  %v908_v30 = vld [vmem:[%s1730_s22 + $0x28] sm:$0xff]  ;;  %v775_v40 = vpop.permute.xlu1 %774 }
 0x18a   : > { %v1019_v20 = vadd.f32 %v1828_v15, %v974_v31  ;;  %v944_v36 = vadd.f32 %v923_v61, %v908_v30  ;;  %v795_v38 = vadd.f32 %v775_v40, %v725_v6  ;;  %v1129_v61 = vld [vmem:[%s1730_s22 + $0x8] sm:$0xff] }
 0x18b   : > { %v2138_v42 = vpop.permute.xlu0 %928 }
 0x18c   : > { %1028 = vst.msk [vmem:[%s1730_s22 + $0x20] sm:$0xff] %vm388_vm0, %v1019_v20  ;;  %953 = vst.msk [vmem:[%s1730_s22 + $0x28] sm:$0xff] %vm388_vm0, %v944_v36 }
 0x18d   : > { %806 = vst.msk [vmem:[%s1730_s22 + $0x48] sm:$0x7f] %vm805_vm8, %v795_v38  ;;  %v862_v39 = vpop.permute.xlu1 %861  ;;  %v1044_v15 = vld [vmem:[%s1730_s22 + $0x18] sm:$0xff] }
 0x18e   : > { %v1098_v29 = vadd.f32 %v2077_v34, %v1044_v15  ;;  %v807_v34 = vld [vmem:[%s1730_s22 + $0x4f] sm:$0x1] }
 0x18f   : > { %v909_v43 = vld [vmem:[%s1730_s22 + $0x30] sm:$0xff]  ;;  %v773_v4 = vpop.permute.xlu0 %772  ;;  %v822_v58 = vld [vmem:[%s1730_s22 + $0x38] sm:$0xff] }
 0x190   : > { %v945_v56 = vadd.f32 %v925_v25, %v909_v43  ;;  %v794_v50 = vadd.f32 %v773_v4, %v724_v49  ;;  %v882_v48 = vadd.f32 %v860_v44, %v822_v58  ;;  %1107 = vst.msk [vmem:[%s1730_s22 + $0x18] sm:$0xff] %vm388_vm0, %v1098_v29 }
 0x191   : > { %v927_v16 = vpop.permute.xlu1 %926 }
 0x192   : > { %954 = vst.msk [vmem:[%s1730_s22 + $0x30] sm:$0xff] %vm388_vm0, %v945_v56  ;;  %804 = vst.msk [vmem:[%s1730_s22 + $0x40] sm:$0xff] %vm388_vm0, %v794_v50 }
 0x193   : > { %v1045_v3 = vld [vmem:[%s1730_s22 + $0x20] sm:$0xff]  ;;  %892 = vst.msk [vmem:[%s1730_s22 + $0x38] sm:$0xff] %vm388_vm0, %v882_v48  ;;  %v810_v46 = vpop.permute.xlu0 %809  ;;  %v975_v60 = vld [vmem:[%s1730_s22 + $0x28] sm:$0xff]  ;;  %v1130_v48 = vld [vmem:[%s1730_s22 + $0x10] sm:$0xff] }
 0x194   : > { %v1099_v5 = vadd.f32 %v2101_v59, %v1045_v3  ;;  %v824_v35 = vld [vmem:[%s1730_s22 + $0x48] sm:$0x3f]  ;;  %v812_v7 = vadd.f32 %v810_v46, %v807_v34  ;;  %v1020_v9 = vadd.f32 %v1849_v26, %v975_v60 }
 0x195   : > { %v884_v8 = vadd.f32 %v864_v33, %v824_v35  ;;  %v1081_v44 = vpop.permute.xlu1 %1080 }
 0x196   : > { %1108 = vst.msk [vmem:[%s1730_s22 + $0x20] sm:$0xff] %vm388_vm0, %v1099_v5  ;;  %1029 = vst.msk [vmem:[%s1730_s22 + $0x28] sm:$0xff] %vm388_vm0, %v1020_v9 }
 0x197   : > { %814 = vst.msk [vmem:[%s1730_s22 + $0x4f] sm:$0x1] %vm813_vm9, %v812_v7  ;;  %v1079_v59 = vpop.permute.xlu0 %1078  ;;  %v1131_v50 = vld [vmem:[%s1730_s22 + $0x18] sm:$0xff] }
 0x198   : > { %895 = vst.msk [vmem:[%s1730_s22 + $0x48] sm:$0x3f] %vm894_vm10, %v884_v8 }
 0x199   : > { %v823_v17 = vld [vmem:[%s1730_s22 + $0x40] sm:$0xff]  ;;  %v976_v55 = vld [vmem:[%s1730_s22 + $0x30] sm:$0xff]  ;;  %v1139_v23 = vpop.permute.xlu1 %1138 }
 0x19a   : > { %v883_v22 = vadd.f32 %v862_v39, %v823_v17  ;;  %v910_v26 = vld [vmem:[%s1730_s22 + $0x38] sm:$0xff]  ;;  %v1021_v63 = vadd.f32 %v1872_v37, %v976_v55  ;;  %v1161_v10 = vadd.f32 %v1139_v23, %v1129_v61 }
 0x19b   : > { %v946_v25 = vadd.f32 %v927_v16, %v910_v26  ;;  %v1137_v27 = vpop.permute.xlu0 %1136 }
 0x19c   : > { %893 = vst.msk [vmem:[%s1730_s22 + $0x40] sm:$0xff] %vm388_vm0, %v883_v22  ;;  %1030 = vst.msk [vmem:[%s1730_s22 + $0x30] sm:$0xff] %vm388_vm0, %v1021_v63  ;;  %v1160_v28 = vadd.f32 %v1137_v27, %v1128_v0 }
 0x19d   : > { %955 = vst.msk [vmem:[%s1730_s22 + $0x38] sm:$0xff] %vm388_vm0, %v946_v25  ;;  %1169 = vst.msk [vmem:[%s1730_s22 + $0x8] sm:$0xff] %vm388_vm0, %v1161_v10  ;;  %v1046_v32 = vld [vmem:[%s1730_s22 + $0x28] sm:$0xff]  ;;  %v898_v21 = vpop.permute.xlu1 %897 }
 0x19e   : > { %v896_v37 = vld [vmem:[%s1730_s22 + $0x4e] sm:$0x3]  ;;  %1168 = vst.msk [vmem:[%s1730_s22] sm:$0xff] %vm388_vm0, %v1160_v28  ;;  %v1100_v24 = vadd.f32 %v1079_v59, %v1046_v32  ;;  %v1132_v59 = vld [vmem:[%s1730_s22 + $0x20] sm:$0xff] }
 0x19f   : > { %v900_v33 = vadd.f32 %v898_v21, %v896_v37  ;;  %v1083_v31 = vpop.permute.xlu0 %1082 }
 0x1a0   : > { %1109 = vst.msk [vmem:[%s1730_s22 + $0x28] sm:$0xff] %vm388_vm0, %v1100_v24 }
 0x1a1   : > { %902 = vst.msk [vmem:[%s1730_s22 + $0x4e] sm:$0x3] %vm901_vm11, %v900_v33  ;;  %v961_v6 = vpop.permute.xlu1 %960 }
 0x1a3   : > { %v911_v20 = vld [vmem:[%s1730_s22 + $0x40] sm:$0x3f]  ;;  %v1047_v30 = vld [vmem:[%s1730_s22 + $0x30] sm:$0xff]  ;;  %v957_v40 = vld [vmem:[%s1730_s22 + $0x46] sm:$0xff]  ;;  %v1119_v36 = vpop.permute.xlu0 %1118 }
 0x1a4   : > { %v947_v38 = vadd.f32 %v2138_v42, %v911_v20  ;;  %v1101_v39 = vadd.f32 %v1081_v44, %v1047_v30  ;;  %v977_v15 = vld [vmem:[%s1730_s22 + $0x38] sm:$0xff]  ;;  %v966_v43 = vadd.f32 %v961_v6, %v957_v40 }
 0x1a5   : > { %v1022_v49 = vadd.f32 %v1897_v47, %v977_v15  ;;  %v1085_v4 = vpop.permute.xlu1 %1084  ;;  %v1195_v23 = vld [vmem:[%s1730_s22] sm:$0xff] }
 0x1a6   : > { %956 = vst.msk [vmem:[%s1730_s22 + $0x40] sm:$0x3f] %vm894_vm10, %v947_v38 }
 0x1a7   : > { %1110 = vst.msk [vmem:[%s1730_s22 + $0x30] sm:$0xff] %vm388_vm0, %v1101_v39  ;;  %968 = vst.msk [vmem:[%s1730_s22 + $0x46] sm:$0xff] %vm388_vm0, %v966_v43  ;;  %v963_v42 = vpop.permute.xlu0 %962  ;;  %v1133_v8 = vld [vmem:[%s1730_s22 + $0x28] sm:$0xff] }
 0x1a8   : > { %1031 = vst.msk [vmem:[%s1730_s22 + $0x38] sm:$0xff] %vm388_vm0, %v1022_v49  ;;  %v958_v29 = vld [vmem:[%s1730_s22 + $0x4e] sm:$0x3] }
 0x1a9   : > { %v967_v56 = vadd.f32 %v963_v42, %v958_v29  ;;  %v1143_v47 = vpop.permute.xlu1 %1142 }
 0x1aa   : > { %v1163_v58 = vadd.f32 %v1143_v47, %v1131_v50 }
 0x1ab   : > { %969 = vst.msk [vmem:[%s1730_s22 + $0x4e] sm:$0x3] %vm901_vm11, %v967_v56  ;;  %v1141_v16 = vpop.permute.xlu0 %1140 }
 0x1ac   : > { %v1162_v3 = vadd.f32 %v1141_v16, %v1130_v48  ;;  %1171 = vst.msk [vmem:[%s1730_s22 + $0x18] sm:$0xff] %vm388_vm0, %v1163_v58 }
 0x1ad   : > { %v978_v34 = vld [vmem:[%s1730_s22 + $0x40] sm:$0x1f]  ;;  %v1147_v60 = vpop.permute.xlu1 %1146 }
 0x1ae   : > { %v1034_v46 = vld [vmem:[%s1730_s22 + $0x45] sm:$0xff]  ;;  %v1023_v5 = vadd.f32 %v1004_v45, %v978_v34  ;;  %1170 = vst.msk [vmem:[%s1730_s22 + $0x10] sm:$0xff] %vm388_vm0, %v1162_v3  ;;  %v1165_v44 = vadd.f32 %v1147_v60, %v1133_v8  ;;  %v1134_v22 = vld [vmem:[%s1730_s22 + $0x30] sm:$0xff] }
 0x1af   : > { %v1048_v35 = vld [vmem:[%s1730_s22 + $0x38] sm:$0xff]  ;;  %v1036_v7 = vadd.f32 %v1034_v46, %v1905_v51  ;;  %v1145_v17 = vpop.permute.xlu0 %1144 }
 0x1b0   : > { %v1102_v9 = vadd.f32 %v1083_v31, %v1048_v35  ;;  %1033 = vst.msk [vmem:[%s1730_s22 + $0x40] sm:$0x1f] %vm1032_vm12, %v1023_v5  ;;  %v1164_v41 = vadd.f32 %v1145_v17, %v1132_v59  ;;  %v1196_v31 = vld [vmem:[%s1730_s22 + $0x8] sm:$0xff] }
 0x1b1   : > { %1038 = vst.msk [vmem:[%s1730_s22 + $0x45] sm:$0xff] %vm388_vm0, %v1036_v7  ;;  %1173 = vst.msk [vmem:[%s1730_s22 + $0x28] sm:$0xff] %vm388_vm0, %v1165_v44  ;;  %v1151_v51 = vpop.permute.xlu1 %1150 }
 0x1b2   : > { %1111 = vst.msk [vmem:[%s1730_s22 + $0x38] sm:$0xff] %vm388_vm0, %v1102_v9  ;;  %v1035_v45 = vld [vmem:[%s1730_s22 + $0x4d] sm:$0x7]  ;;  %1172 = vst.msk [vmem:[%s1730_s22 + $0x20] sm:$0xff] %vm388_vm0, %v1164_v41 }
 0x1b3   : > { %v1037_v55 = vadd.f32 %v1035_v45, %v1914_v57  ;;  %v1149_v26 = vpop.permute.xlu0 %1148  ;;  %v1198_v38 = vld [vmem:[%s1730_s22 + $0x18] sm:$0xff] }
 0x1b4   : > { %v1166_v63 = vadd.f32 %v1149_v26, %v1134_v22 }
 0x1b5   : > { %1040 = vst.msk [vmem:[%s1730_s22 + $0x4d] sm:$0x7] %vm1039_vm13, %v1037_v55  ;;  %v1220_v61 = vpop.permute.xlu1 %1219  ;;  %v1197_v24 = vld [vmem:[%s1730_s22 + $0x10] sm:$0xff] }
 0x1b6   : > { %1174 = vst.msk [vmem:[%s1730_s22 + $0x30] sm:$0xff] %vm388_vm0, %v1166_v63  ;;  %v1243_v0 = vadd.f32 %v1220_v61, %v1195_v23 }
 0x1b7   : > { %v1049_v10 = vld [vmem:[%s1730_s22 + $0x40] sm:$0xf]  ;;  %v1181_v57 = vpop.permute.xlu0 %1180 }
 0x1b8   : > { %v1114_v25 = vld [vmem:[%s1730_s22 + $0x44] sm:$0xff]  ;;  %v1103_v28 = vadd.f32 %v1085_v4, %v1049_v10  ;;  %1251 = vst.msk [vmem:[%s1730_s22] sm:$0xff] %vm388_vm0, %v1243_v0 }
 0x1b9   : > { %v1124_v27 = vadd.f32 %v1119_v36, %v1114_v25  ;;  %v1135_v37 = vld [vmem:[%s1730_s22 + $0x38] sm:$0xf]  ;;  %v1224_v21 = vpop.permute.xlu1 %1223  ;;  %v1199_v29 = vld [vmem:[%s1730_s22 + $0x20] sm:$0xff]  ;;  %v1200_v5 = vld [vmem:[%s1730_s22 + $0x28] sm:$0xff] }
 0x1ba   : > { %v1167_v32 = vadd.f32 %v1151_v51, %v1135_v37  ;;  %1113 = vst.msk [vmem:[%s1730_s22 + $0x40] sm:$0xf] %vm1112_vm14, %v1103_v28  ;;  %v1245_v33 = vadd.f32 %v1224_v21, %v1197_v24 }
 0x1bb   : > { %1126 = vst.msk [vmem:[%s1730_s22 + $0x44] sm:$0xff] %vm388_vm0, %v1124_v27  ;;  %v1222_v6 = vpop.permute.xlu0 %1221 }
 0x1bc   : > { %1175 = vst.msk [vmem:[%s1730_s22 + $0x38] sm:$0xf] %vm1112_vm14, %v1167_v32  ;;  %v1244_v20 = vadd.f32 %v1222_v6, %v1196_v31  ;;  %v1115_v40 = vld [vmem:[%s1730_s22 + $0x4c] sm:$0xf] }
 0x1bd   : > { %1253 = vst.msk [vmem:[%s1730_s22 + $0x10] sm:$0xff] %vm388_vm0, %v1245_v33  ;;  %v1121_v30 = vpop.permute.xlu1 %1120  ;;  %v1201_v9 = vld [vmem:[%s1730_s22 + $0x30] sm:$0xff] }
 0x1be   : > { %1252 = vst.msk [vmem:[%s1730_s22 + $0x8] sm:$0xff] %vm388_vm0, %v1244_v20  ;;  %v1125_v36 = vadd.f32 %v1121_v30, %v1115_v40 }
 0x1bf   : > { %v1226_v39 = vpop.permute.xlu0 %1225  ;;  %v1277_v15 = vld [vmem:[%s1730_s22] sm:$0xff] }
 0x1c0   : > { %v1246_v43 = vadd.f32 %v1226_v39, %v1198_v38  ;;  %v1317_v49 = vadd.f32 %v1964_v52, %v1277_v15  ;;  %1127 = vst.msk [vmem:[%s1730_s22 + $0x4c] sm:$0xf] %vm1112_vm14, %v1125_v36 }
 0x1c1   : > { %v1176_v4 = vld [vmem:[%s1730_s22 + $0x3c] sm:$0xff]  ;;  %v1228_v56 = vpop.permute.xlu1 %1227 }
 0x1c2   : > { %v1189_v42 = vadd.f32 %v1181_v57, %v1176_v4  ;;  %1254 = vst.msk [vmem:[%s1730_s22 + $0x18] sm:$0xff] %vm388_vm0, %v1246_v43  ;;  %1325 = vst.msk [vmem:[%s1730_s22] sm:$0xff] %vm388_vm0, %v1317_v49  ;;  %v1247_v50 = vadd.f32 %v1228_v56, %v1199_v29  ;;  %v1177_v3 = vld [vmem:[%s1730_s22 + $0x44] sm:$0xff] }
 0x1c3   : > { %v1185_v47 = vpop.permute.xlu0 %1184  ;;  %v1202_v17 = vld [vmem:[%s1730_s22 + $0x38] sm:$0x7] }
 0x1c4   : > { %1192 = vst.msk [vmem:[%s1730_s22 + $0x3c] sm:$0xff] %vm388_vm0, %v1189_v42  ;;  %v1279_v52 = vld [vmem:[%s1730_s22 + $0x10] sm:$0xff]  ;;  %1255 = vst.msk [vmem:[%s1730_s22 + $0x20] sm:$0xff] %vm388_vm0, %v1247_v50 }
 0x1c5   : > { %v1319_v58 = vadd.f32 %v1976_v1, %v1279_v52  ;;  %v1278_v48 = vld [vmem:[%s1730_s22 + $0x8] sm:$0xff]  ;;  %v1183_v34 = vpop.permute.xlu1 %1182 }
 0x1c6   : > { %v1318_v16 = vadd.f32 %v1967_v54, %v1278_v48  ;;  %v1190_v46 = vadd.f32 %v1183_v34, %v1177_v3 }
 0x1c7   : > { %1327 = vst.msk [vmem:[%s1730_s22 + $0x10] sm:$0xff] %vm388_vm0, %v1319_v58  ;;  %v1230_v35 = vpop.permute.xlu0 %1229  ;;  %v1178_v1 = vld [vmem:[%s1730_s22 + $0x4c] sm:$0xf] }
 0x1c8   : > { %1326 = vst.msk [vmem:[%s1730_s22 + $0x8] sm:$0xff] %vm388_vm0, %v1318_v16  ;;  %v1248_v7 = vadd.f32 %v1230_v35, %v1200_v5  ;;  %v1191_v8 = vadd.f32 %v1185_v47, %v1178_v1  ;;  %1193 = vst.msk [vmem:[%s1730_s22 + $0x44] sm:$0xff] %vm388_vm0, %v1190_v46 }
 0x1c9   : > { %v1280_v60 = vld [vmem:[%s1730_s22 + $0x18] sm:$0xff]  ;;  %v1232_v44 = vpop.permute.xlu1 %1231 }
 0x1ca   : > { %v1320_v54 = vadd.f32 %v1979_v2, %v1280_v60  ;;  %1256 = vst.msk [vmem:[%s1730_s22 + $0x28] sm:$0xff] %vm388_vm0, %v1248_v7  ;;  %v1249_v59 = vadd.f32 %v1232_v44, %v1201_v9 }
 0x1cb   : > { %1194 = vst.msk [vmem:[%s1730_s22 + $0x4c] sm:$0xf] %vm1112_vm14, %v1191_v8  ;;  %v1234_v41 = vpop.permute.xlu0 %1233  ;;  %v1281_v45 = vld [vmem:[%s1730_s22 + $0x20] sm:$0xff] }
 0x1cc   : > { %1328 = vst.msk [vmem:[%s1730_s22 + $0x18] sm:$0xff] %vm388_vm0, %v1320_v54  ;;  %v1250_v51 = vadd.f32 %v1234_v41, %v1202_v17  ;;  %v1321_v2 = vadd.f32 %v1989_v11, %v1281_v45  ;;  %1257 = vst.msk [vmem:[%s1730_s22 + $0x30] sm:$0xff] %vm388_vm0, %v1249_v59  ;;  %v1259_v55 = vld [vmem:[%s1730_s22 + $0x3b] sm:$0xff] }
 0x1cd   : > { %v1263_v22 = vpop.permute.xlu1 %1262 }
 0x1ce   : > { %1258 = vst.msk [vmem:[%s1730_s22 + $0x38] sm:$0x7] %vm1039_vm13, %v1250_v51  ;;  %v1271_v26 = vadd.f32 %v1263_v22, %v1259_v55 }
 0x1cf   : > { %1329 = vst.msk [vmem:[%s1730_s22 + $0x20] sm:$0xff] %vm388_vm0, %v1321_v2  ;;  %v1265_v63 = vpop.permute.xlu0 %1264  ;;  %v1260_v61 = vld [vmem:[%s1730_s22 + $0x43] sm:$0xff] }
 0x1d0   : > { %1274 = vst.msk [vmem:[%s1730_s22 + $0x3b] sm:$0xff] %vm388_vm0, %v1271_v26  ;;  %v1272_v11 = vadd.f32 %v1265_v63, %v1260_v61 }
 0x1d1   : > { %v1282_v23 = vld [vmem:[%s1730_s22 + $0x28] sm:$0xff]  ;;  %v1267_v10 = vpop.permute.xlu1 %1266 }
 0x1d2   : > { %v1322_v25 = vadd.f32 %v1992_v12, %v1282_v23  ;;  %v1261_v0 = vld [vmem:[%s1730_s22 + $0x4b] sm:$0x1f]  ;;  %1275 = vst.msk [vmem:[%s1730_s22 + $0x43] sm:$0xff] %vm388_vm0, %v1272_v11 }
 0x1d3   : > { %v1273_v57 = vadd.f32 %v1267_v10, %v1261_v0  ;;  %v1283_v27 = vld [vmem:[%s1730_s22 + $0x30] sm:$0xff] }
 0x1d4   : > { %1330 = vst.msk [vmem:[%s1730_s22 + $0x28] sm:$0xff] %vm388_vm0, %v1322_v25  ;;  %v1323_v28 = vadd.f32 %v2007_v14, %v1283_v27 }
 0x1d5   : > { %v1284_v37 = vld [vmem:[%s1730_s22 + $0x38] sm:$0x3]  ;;  %1276 = vst.msk [vmem:[%s1730_s22 + $0x4b] sm:$0x1f] %vm1032_vm12, %v1273_v57 }
 0x1d6   : > { %v1324_v12 = vadd.f32 %v1307_v62, %v1284_v37  ;;  %1331 = vst.msk [vmem:[%s1730_s22 + $0x30] sm:$0xff] %vm388_vm0, %v1323_v28 }
 0x1d7   : > { %v1333_v32 = vld [vmem:[%s1730_s22 + $0x3a] sm:$0xff] }
 0x1d8   : > { %1332 = vst.msk [vmem:[%s1730_s22 + $0x38] sm:$0x3] %vm901_vm11, %v1324_v12  ;;  %v1336_v21 = vadd.f32 %v1333_v32, %v2000_v13 }
 0x1d9   : > { %v1334_v24 = vld [vmem:[%s1730_s22 + $0x42] sm:$0xff] }
 0x1da   : > { %1339 = vst.msk [vmem:[%s1730_s22 + $0x3a] sm:$0xff] %vm388_vm0, %v1336_v21  ;;  %v1337_v33 = vadd.f32 %v1334_v24, %v2011_v18 }
 0x1dc   : > { %v1335_v31 = vld [vmem:[%s1730_s22 + $0x4a] sm:$0x3f]  ;;  %1340 = vst.msk [vmem:[%s1730_s22 + $0x42] sm:$0xff] %vm388_vm0, %v1337_v33 }
 0x1dd   : > { %v1338_v14 = vadd.f32 %v1335_v31, %v2017_v19 }
 0x1df   : > { %1341 = vst.msk [vmem:[%s1730_s22 + $0x4a] sm:$0x3f] %vm894_vm10, %v1338_v14 }
 0x1e0 PF: > { %s14_s17 = sadd.s32 1, %s1614_s17   ;;  %s2354_s15 = smov %s1610_s16 }
 0x1e1   : > { %p11_p5 = scmp.ge.s32.totalorder %s14_s17, 4   ;;  %s2355_s16 = smov %s2357_s18 }
 0x1e3   :  { %13 = sbr.rel (!%p11_p5) target bundleno = 2 (0x2), region = 69 }

// kernel: _lambda_.13
= control target key start
LH: loop header
LB: loop body
LE: loop exit
PB: predicated region body
PF: predicated region fallthrough
CT: control target
= control target key end

     0   :  { %s3733_s15 = smov 0   ;;  %s3735_s16 = smov 0   ;;  %s6369_s0 = inlined_call_operand.vmem [shape: bf16[2,360,32], index: 0, kind: input, shape index: {}, may-alias: {0,1}]   ;;  %s6370_s1 = inlined_call_operand.vmem [shape: bf16[2,360,32], index: 1, kind: input, shape index: {}, may-alias: {0,1}]   ;;  %s6371_s2 = inlined_call_operand.vmem [shape: bf16[32,288], index: 2, kind: input, shape index: {}]   ;;  %s6372_s3 = inlined_call_operand.vmem [shape: f32[1,32], index: 3, kind: input, shape index: {}]   ;;  %s6373_s4 = inlined_call_operand.vmem [shape: f32[2,288,32], index: 4, kind: output, shape index: {}]  }
   0x1   :  { %s3737_s17 = smov 0  }
   0x2 LB: > { %s26_s18 = sadd.s32 1, %s3696_s16  ;;  %p3432_p0 = scmp.ge.s32.totalorder %s3700_s17, 1  ;;  %s3700_s17 = sphi %s3737_s17, %s14_s17   ;;  %s3696_s16 = sphi %s3735_s16, %s6648_s16   ;;  %s3692_s15 = sphi %s3733_s15, %s6647_s15  }
   0x3   : > { %p28_p1 = scmp.ge.s32.totalorder %s26_s18, 2  ;;  %p216_p2 = scmp.lt.s32.totalorder %s3700_s17, 3 }
   0x5   : > { %s6650_s18 = smov (%p28_p1, %s26_s18), 0  ;;  %p217_p3 = pnand %p3432_p0, %p216_p2 }
   0x7   : > { %220 = sbr.rel (%p217_p3) target bundleno = 796 (0x31c), region = 36 }
   0xc   : > { %v3641_v0 = vld [vmem:[%s6371_s2 + $0x1c] ss:$12 sps:$4 sm:$0xff]   ;;  %p270_p4 = scmp.lt.s32.totalorder %s3692_s15, 1  ;;  %v3643_v1 = vld [vmem:[%s6371_s2 + $0x18] ss:$12 sps:$4 sm:$0xff]   ;;  %v6376_v2 = vmov 0  }
   0xd   : > { %570 = vmatprep.mubr.bf16.mxu0 %v6376_v2  ;;  %550 = vmatprep.subr.bf16.mxu0 %v3641_v0  ;;  %v3644_v3 = vld [vmem:[%s6371_s2 + $0x4] ss:$12 sps:$4 sm:$0xff]   ;;  %v3646_v4 = vld [vmem:[%s6371_s2] ss:$12 sps:$4 sm:$0xff]   ;;  %v3654_v6 = vld [vmem:[%s6371_s2 + $0x8] ss:$12 sps:$4 sm:$0xff]  }
   0xe   : > { %s6652_s15 = smov (!%p270_p4, %s3692_s15), 1  ;;  %551 = vmatpush1.bf16.msra.mxu0 %v3643_v1  ;;  %v3653_v5 = vld [vmem:[%s6371_s2 + $0x20] ss:$12 sps:$4 sm:$0xff]   ;;  %vm483_vm0 = vcmask 261120   ;;  %vm1547_vm1 = vcmask 1045504   ;;  %vm1250_vm2 = vcmask 1046528  }
   0xf   : > { %552 = vmatprep.subr.bf16.mxu0 %v3644_v3  ;;  %s3607_s29 = smul.u32 180, %s6652_s15  ;;  %3543 = vmatprep.subr.bf16.mxu1 %v3653_v5  ;;  %v3865_v27 = vld [vmem:[%s6372_s3] ss:$0 sm:$0xff]  ;;  %s3704_s23 = smov 96   ;;  %vm2099_vm3 = vcmask 1044480   ;;  %vm3148_vm4 = vcmask 1041408  }
  0x10   : > { %3544 = vmatpush3.bf16.msra.mxu1 %v3653_v5  ;;  %s3609_s13 = smul.u32 288, %s6652_s15  ;;  %s3703_s15 = smov 64   ;;  %vm2314_vm5 = vcmask 1043456   ;;  %vm2830_vm6 = vcmask 1042432   ;;  %vm3707_vm7 = vmmov 0   ;;  %vm1509_vm8 = vcmask 253952  }
  0x11   : > { %s3776_s8 = scalar_lea.vmem %s6369_s0, %s3607_s29  ;;  %3545 = vmatprep.subr.bf16.mxu1 %v3654_v6  ;;  %s3515_s9 = sadd.s32 144, %s3607_s29  ;;  %vm1501_vm9 = vcmask 260096   ;;  %vm1805_vm10 = vcmask 254976   ;;  %vm1798_vm11 = vcmask 259072   ;;  %vm2268_vm12 = vcmask 258048  }
  0x12   : > { %553 = vmatpush1.bf16.msra.mxu0 %v3646_v4  ;;  %v3647_v7 = vld [vmem:[%s3776_s8] sm:$0xff]   ;;  %v3648_v8 = vld [vmem:[%s3776_s8 + $0x8] sm:$0xff]   ;;  %v3649_v9 = vld [vmem:[%s3776_s8 + $0x10] sm:$0xff]   ;;  %s3795_s12 = scalar_lea.vmem %s6370_s1, %s3515_s9  ;;  %s3870_s22 = scalar_lea.vmem %s6373_s4, %s3609_s13  ;;  %vm2551_vm13 = vcmask 257024   ;;  %vm2278_vm14 = vcmask 256000  }
  0x13   : > { %3547 = vmatprep.mubr.msk.bf16.mxu1 %vm483_vm0, %v3647_v7  ;;  %v3650_v10 = vld [vmem:[%s3776_s8 + $0x18] sm:$0xff]   ;;  %v3651_v11 = vld [vmem:[%s3776_s8 + $0x20] sm:$0xff]   ;;  %v3652_v12 = vld [vmem:[%s3776_s8 + $0x28] sm:$0xff]   ;;  %s3705_s24 = smov 32  }
  0x14   : > { %3546 = vmatpush3.bf16.msra.mxu1 %v3654_v6  ;;  %v3655_v13 = vld [vmem:[%s3776_s8 + $0x30] sm:$0xff]   ;;  %v3657_v14 = vld [vmem:[%s3776_s8 + $0x40] sm:$0xff]   ;;  %v3656_v15 = vld [vmem:[%s3776_s8 + $0x38] sm:$0xff]  }
  0x15   : > { %3460 = vmatmul.mubr.msk.bf16.vlgmr.msra.gmra.mxu0 %vm483_vm0, %v3647_v7  ;;  %972 = vmatprep.subr.bf16.mxu1 %v3641_v0  ;;  %v3658_v16 = vld [vmem:[%s3776_s8 + $0x48] sm:$0xff]   ;;  %v3659_v17 = vld [vmem:[%s3776_s8 + $0x50] sm:$0xff]   ;;  %v3660_v18 = vld [vmem:[%s3776_s8 + $0x58] sm:$0xff]  }
  0x16   : > { %578 = vmatprep.mubr.bf16.mxu0 %v6376_v2  ;;  %v3661_v19 = vld [vmem:[%s3776_s8 + $0x60] sm:$0xff]   ;;  %v3662_v20 = vld [vmem:[%s3776_s8 + $0x68] sm:$0xff]   ;;  %v3663_v21 = vld [vmem:[%s3776_s8 + $0x70] sm:$0xff]  }
  0x17   : > { %3548 = vmatmul.mubr.msk.bf16.vlgmr.msra.gmra.mxu1 %vm483_vm0, %v3648_v8  ;;  %v3664_v22 = vld [vmem:[%s3776_s8 + $0x78] sm:$0xff]   ;;  %v3665_v23 = vld [vmem:[%s3776_s8 + $0x80] sm:$0xff]   ;;  %v3666_v24 = vld [vmem:[%s3776_s8 + $0x88] sm:$0xff]  }
  0x18   : > { %3551 = vmatprep.mubr.msk.bf16.mxu1 %vm483_vm0, %v3649_v9  ;;  %973 = vmatpush1.bf16.msra.mxu1 %v3643_v1  ;;  %v3667_v25 = vld [vmem:[%s3795_s12] sm:$0xff]   ;;  %v3668_v26 = vld [vmem:[%s3795_s12 + $0x8] sm:$0xff]  }
  0x19   : > { %974 = vmatprep.subr.bf16.mxu1 %v3644_v3 }
  0x1c   : > { %975 = vmatpush1.bf16.msra.mxu1 %v3646_v4 }
  0x1d   : > { %3461 = vmatmul.mubr.msk.bf16.gmra.mxu0 %vm483_vm0, %v3648_v8 }
  0x1e   : > { %588 = vmatprep.mubr.bf16.mxu0 %v6376_v2 }
  0x1f   : > { %3552 = vmatmul.mubr.msk.bf16.gmra.mxu1 %vm483_vm0, %v3650_v10 }
  0x20   : > { %3555 = vmatprep.mubr.msk.bf16.mxu1 %vm483_vm0, %v3651_v11 }
  0x25   : > { %3462 = vmatmul.mubr.msk.bf16.gmra.mxu0 %vm483_vm0, %v3649_v9 }
  0x26   : > { %598 = vmatprep.mubr.bf16.mxu0 %v6376_v2 }
  0x27   : > { %3556 = vmatmul.mubr.msk.bf16.gmra.mxu1 %vm483_vm0, %v3652_v12 }
  0x28   : > { %3559 = vmatprep.mubr.msk.bf16.mxu1 %vm483_vm0, %v3655_v13 }
  0x2d   : > { %3463 = vmatmul.mubr.msk.bf16.gmra.mxu0 %vm483_vm0, %v3650_v10 }
  0x2e   : > { %608 = vmatprep.mubr.bf16.mxu0 %v6376_v2 }
  0x2f   : > { %3560 = vmatmul.mubr.msk.bf16.gmra.mxu1 %vm483_vm0, %v3656_v15 }
  0x30   : > { %3563 = vmatprep.mubr.msk.bf16.mxu1 %vm483_vm0, %v3657_v14 }
  0x35   : > { %3464 = vmatmul.mubr.msk.bf16.gmra.mxu0 %vm483_vm0, %v3651_v11 }
  0x36   : > { %618 = vmatprep.mubr.bf16.mxu0 %v6376_v2 }
  0x37   : > { %3564 = vmatmul.mubr.msk.bf16.gmra.mxu1 %vm483_vm0, %v3658_v16 }
  0x38   : > { %3567 = vmatprep.mubr.msk.bf16.mxu1 %vm483_vm0, %v3659_v17 }
  0x3d   : > { %3465 = vmatmul.mubr.msk.bf16.gmra.mxu0 %vm483_vm0, %v3652_v12 }
  0x3e   : > { %628 = vmatprep.mubr.bf16.mxu0 %v6376_v2 }
  0x3f   : > { %3568 = vmatmul.mubr.msk.bf16.gmra.mxu1 %vm483_vm0, %v3660_v18 }
  0x40   : > { %3571 = vmatprep.mubr.msk.bf16.mxu1 %vm483_vm0, %v3661_v19 }
  0x45   : > { %3466 = vmatmul.mubr.msk.bf16.gmra.mxu0 %vm483_vm0, %v3655_v13 }
  0x46   : > { %638 = vmatprep.mubr.bf16.mxu0 %v6376_v2 }
  0x47   : > { %3572 = vmatmul.mubr.msk.bf16.gmra.mxu1 %vm483_vm0, %v3662_v20 }
  0x48   : > { %3575 = vmatprep.mubr.msk.bf16.mxu1 %vm483_vm0, %v3663_v21 }
  0x4d   : > { %3467 = vmatmul.mubr.msk.bf16.gmra.mxu0 %vm483_vm0, %v3656_v15 }
  0x4e   : > { %648 = vmatprep.mubr.bf16.mxu0 %v6376_v2 }
  0x4f   : > { %3576 = vmatmul.mubr.msk.bf16.gmra.mxu1 %vm483_vm0, %v3664_v22 }
  0x50   : > { %3579 = vmatprep.mubr.msk.bf16.mxu1 %vm483_vm0, %v3665_v23 }
  0x55   : > { %3468 = vmatmul.mubr.msk.bf16.gmra.mxu0 %vm483_vm0, %v3657_v14 }
  0x56   : > { %658 = vmatprep.mubr.bf16.mxu0 %v6376_v2 }
  0x57   : > { %3580 = vmatmul.mubr.msk.bf16.gmra.mxu1 %vm483_vm0, %v3666_v24 }
  0x58   : > { %992 = vmatprep.mubr.bf16.mxu1 %v6376_v2 }
  0x5d   : > { %3469 = vmatmul.mubr.msk.bf16.gmra.mxu0 %vm483_vm0, %v3658_v16 }
  0x5e   : > { %668 = vmatprep.mubr.bf16.mxu0 %v6376_v2 }
  0x5f   : > { %3501 = vmatmul.mubr.msk.bf16.vlgmr.msra.gmra.mxu1 %vm483_vm0, %v3667_v25 }
  0x60   : > { %1002 = vmatprep.mubr.bf16.mxu1 %v6376_v2 }
  0x65   : > { %3470 = vmatmul.mubr.msk.bf16.gmra.mxu0 %vm483_vm0, %v3659_v17 }
  0x66   : > { %678 = vmatprep.mubr.bf16.mxu0 %v6376_v2 }
  0x67   : > { %3502 = vmatmul.mubr.msk.bf16.gmra.mxu1 %vm483_vm0, %v3668_v26 }
  0x68   : > { %1011 = vmatprep.mubr.bf16.mxu1 %v6376_v2 }
  0x6d   : > { %3471 = vmatmul.mubr.msk.bf16.gmra.mxu0 %vm483_vm0, %v3660_v18 }
  0x6e   : > { %688 = vmatprep.mubr.bf16.mxu0 %v6376_v2 }
  0x75   : > { %3472 = vmatmul.mubr.msk.bf16.gmra.mxu0 %vm483_vm0, %v3661_v19 }
  0x76   : > { %698 = vmatprep.mubr.bf16.mxu0 %v6376_v2 }
  0x7d   : > { %3473 = vmatmul.mubr.msk.bf16.gmra.mxu0 %vm483_vm0, %v3662_v20 }
  0x7e   : > { %708 = vmatprep.mubr.bf16.mxu0 %v6376_v2 }
  0x85   : > { %3474 = vmatmul.mubr.msk.bf16.gmra.mxu0 %vm483_vm0, %v3663_v21 }
  0x86   : > { %718 = vmatprep.mubr.bf16.mxu0 %v6376_v2 }
  0x8d   : > { %3475 = vmatmul.mubr.msk.bf16.gmra.mxu0 %vm483_vm0, %v3664_v22 }
  0x8e   : > { %728 = vmatprep.mubr.bf16.mxu0 %v6376_v2 }
  0x95   : > { %3476 = vmatmul.mubr.msk.bf16.gmra.mxu0 %vm483_vm0, %v3665_v23 }
  0x96   : > { %738 = vmatprep.mubr.bf16.mxu0 %v6376_v2 }
  0x9d   : > { %3477 = vmatmul.mubr.msk.bf16.gmra.mxu0 %vm483_vm0, %v3666_v24 }
  0xd5   : > { %v572_v28 = vpop.f32.mrf.mxu0 }
  0xd6   : > { %v1106_v29 = vadd.f32 %v3865_v27, %v572_v28  ;;  %v1251_v32 = vrot.slane %v572_v28, 1  ;;  %v1548_v34 = vrot.slane %v572_v28, 2 }
  0xd7   : > { %v574_v30 = vpop.f32.mrf.mxu0  ;;  %v3549_v31 = vpop.f32.mrf.mxu1 }
  0xd8   : > { %1142 = vst.msk [vmem:[%s3870_s22] sm:$0xff] %vm483_vm0, %v1106_v29 }
  0xd9   : > { %v575_v33 = vpop.f32.mrf.mxu0  ;;  %v783_v38 = vpop.f32.mrf.mxu1 }
  0xda   : > { %v1107_v35 = vadd.f32 %v3865_v27, %v575_v33  ;;  %v1252_v36 = vrot.slane %v575_v33, 1  ;;  %v1549_v37 = vrot.slane %v575_v33, 2 }
  0xdb   : > { %v577_v39 = vpop.f32.mrf.mxu0  ;;  %v3550_v42 = vpop.f32.mrf.mxu1 }
  0xdc   : > { %1143 = vst.msk [vmem:[%s3870_s22 + $0x8] sm:$0xff] %vm483_vm0, %v1107_v35  ;;  %v1550_v40 = vsel %vm1547_vm1, %v1548_v34, %v1549_v37  ;;  %v1253_v41 = vsel %vm1250_vm2, %v1251_v32, %v1252_v36 }
  0xdd   : > { %1619 = vrot.lane.b32.xlu1 %v1550_v40, %s3703_s15  ;;  %1322 = vrot.lane.b32.xlu0 %v1253_v41, %s3704_s23  ;;  %v580_v43 = vpop.f32.mrf.mxu0  ;;  %v785_v46 = vpop.f32.mrf.mxu1 }
  0xde   : > { %v1108_v44 = vadd.f32 %v3865_v27, %v580_v43  ;;  %v1254_v45 = vrot.slane %v580_v43, 1  ;;  %v1551_v48 = vrot.slane %v580_v43, 2 }
  0xdf   : > { %v582_v47 = vpop.f32.mrf.mxu0  ;;  %v3553_v50 = vpop.f32.mrf.mxu1 }
  0xe0   : > { %1144 = vst.msk [vmem:[%s3870_s22 + $0x10] sm:$0xff] %vm483_vm0, %v1108_v44  ;;  %v1255_v49 = vsel %vm1250_vm2, %v1252_v36, %v1254_v45  ;;  %v2100_v55 = vrot.slane %v582_v47, 3  ;;  %v3152_v57 = vrot.slane %v3553_v50, 6  ;;  %v1552_v60 = vsel %vm1547_vm1, %v1549_v37, %v1551_v48 }
  0xe1   : > { %1324 = vrot.lane.b32.xlu0 %v1255_v49, %s3704_s23  ;;  %v3887_v51 = vpop.f32.mrf.mxu0  ;;  %v795_v54 = vpop.f32.mrf.mxu1  ;;  %v2315_v14 = vrot.slane %v582_v47, 4 }
  0xe2   : > { %v1109_v52 = vadd.f32 %v3865_v27, %v3887_v51  ;;  %v1256_v53 = vrot.slane %v3887_v51, 1  ;;  %v1553_v58 = vrot.slane %v3887_v51, 2  ;;  %v3149_v0 = vrot.slane %v795_v54, 6 }
  0xe3   : > { %v3892_v56 = vpop.f32.mrf.mxu0  ;;  %v3554_v62 = vpop.f32.mrf.mxu1 }
  0xe4   : > { %1145 = vst.msk [vmem:[%s3870_s22 + $0x18] sm:$0xff] %vm483_vm0, %v1109_v52  ;;  %v2101_v59 = vrot.slane %v3892_v56, 3  ;;  %v1257_v61 = vsel %vm1250_vm2, %v1254_v45, %v1256_v53  ;;  %v3154_v1 = vrot.slane %v3554_v62, 6  ;;  %v2316_v6 = vrot.slane %v3892_v56, 4 }
  0xe5   : > { %1621 = vrot.lane.b32.xlu0 %v1552_v60, %s3703_s15  ;;  %1326 = vrot.lane.b32.xlu1 %v1257_v61, %s3704_s23  ;;  %v3904_v63 = vpop.f32.mrf.mxu0  ;;  %v798_v5 = vpop.f32.mrf.mxu1  ;;  %v1554_v12 = vsel %vm1547_vm1, %v1551_v48, %v1553_v58 }
  0xe6   : > { %v3907_v3 = vsel %vm2099_vm3, %v2100_v55, %v2101_v59  ;;  %v1110_v4 = vadd.f32 %v3865_v27, %v3904_v63  ;;  %v3915_v8 = vsel %vm3148_vm4, %v3152_v57, %v3154_v1  ;;  %v3150_v9 = vrot.slane %v798_v5, 6 }
  0xe7   : > { %v3912_v7 = vpop.f32.mrf.mxu0  ;;  %6400 = vst [vmem:[#allocation2_spill] sm:$0xff] %v3915_v8  ;;  %v1555_v10 = vrot.slane %v3904_v63, 2  ;;  %v3557_v13 = vpop.f32.mrf.mxu1  ;;  %v1258_v18 = vrot.slane %v3904_v63, 1  ;;  %v2317_v24 = vsel %vm2314_vm5, %v2315_v14, %v2316_v6 }
  0xe8   : > { %1146 = vst.msk [vmem:[%s3870_s22 + $0x20] sm:$0xff] %vm483_vm0, %v1110_v4  ;;  %v2103_v11 = vrot.slane %v3912_v7, 3  ;;  %v3927_v16 = vsel %vm3148_vm4, %v3149_v0, %v3150_v9  ;;  %v3930_v17 = vsel %vm3148_vm4, %v3150_v9, %v3152_v57  ;;  %v2831_v22 = vrot.slane %v3912_v7, 5 }
  0xe9   : > { %1841 = vrot.lane.b32.xlu0 %v1554_v12, %s3705_s24  ;;  %1623 = vrot.lane.b32.xlu1 %v1554_v12, %s3703_s15  ;;  %v3924_v15 = vpop.f32.mrf.mxu0  ;;  %6401 = vst [vmem:[#allocation3_spill] sm:$0xff] %v3927_v16  ;;  %6402 = vst [vmem:[#allocation4_spill] sm:$0xff] %v3930_v17  ;;  %v811_v21 = vpop.f32.mrf.mxu1  ;;  %v3160_v25 = vrot.slane %v3557_v13, 6  ;;  %v2318_v28 = vrot.slane %v3912_v7, 4  ;;  %v1556_v31 = vsel %vm1547_vm1, %v1553_v58, %v1555_v10 }
  0xea   : > { %v3934_v19 = vsel %vm2099_vm3, %v2101_v59, %v2103_v11  ;;  %v1111_v20 = vadd.f32 %v3865_v27, %v3924_v15  ;;  %v3156_v26 = vrot.slane %v811_v21, 6  ;;  %v1259_v40 = vsel %vm1250_vm2, %v1256_v53, %v1258_v18 }
  0xeb   : > { %v3939_v23 = vpop.f32.mrf.mxu0  ;;  %v3558_v32 = vpop.f32.mrf.mxu1  ;;  %v1260_v44 = vrot.slane %v3924_v15, 1  ;;  %v2319_v47 = vsel %vm2314_vm5, %v2316_v6, %v2318_v28  ;;  %v1557_v59 = vrot.slane %v3924_v15, 2 }
  0xec   : > { %1147 = vst.msk [vmem:[%s3870_s22 + $0x28] sm:$0xff] %vm483_vm0, %v1111_v20  ;;  %v2105_v29 = vrot.slane %v3939_v23, 3  ;;  %v2832_v30 = vrot.slane %v3939_v23, 5  ;;  %v3955_v34 = vsel %vm3148_vm4, %v3154_v1, %v3156_v26  ;;  %v3162_v35 = vrot.slane %v3558_v32, 6 }
  0xed   : > { %2382 = vrot.lane.b32.xlu1 %v2317_v24, %s3704_s23  ;;  %1625 = vrot.lane.b32.xlu0 %v1556_v31, %s3703_s15  ;;  %v3952_v33 = vpop.f32.mrf.mxu0  ;;  %6403 = vst [vmem:[#allocation5_spill] sm:$0xff] %v3955_v34  ;;  %v814_v38 = vpop.f32.mrf.mxu1  ;;  %v1261_v60 = vsel %vm1250_vm2, %v1258_v18, %v1260_v44  ;;  %v2320_v20 = vrot.slane %v3939_v23, 4  ;;  %v1558_v21 = vsel %vm1547_vm1, %v1555_v10, %v1557_v59 }
  0xee   : > { %v3958_v36 = vsel %vm2099_vm3, %v2103_v11, %v2105_v29  ;;  %v1112_v37 = vadd.f32 %v3865_v27, %v3952_v33  ;;  %v3968_v41 = vsel %vm3148_vm4, %v3160_v25, %v3162_v35  ;;  %v3158_v42 = vrot.slane %v814_v38, 6 }
  0xef   : > { %v3962_v39 = vpop.f32.mrf.mxu0  ;;  %6404 = vst [vmem:[#allocation6_spill] sm:$0xff] %v3968_v41  ;;  %v3971_v43 = vsel %vm2830_vm6, %v2831_v22, %v2832_v30  ;;  %v3561_v48 = vpop.f32.mrf.mxu1 }
  0xf0   : > { %6405 = vst [vmem:[#allocation7_spill] sm:$0xff] %v3971_v43  ;;  %1148 = vst.msk [vmem:[%s3870_s22 + $0x30] sm:$0xff] %vm483_vm0, %v1112_v37  ;;  %v2107_v45 = vrot.slane %v3962_v39, 3  ;;  %v2834_v46 = vrot.slane %v3962_v39, 5  ;;  %v3986_v50 = vsel %vm3148_vm4, %v3156_v26, %v3158_v42  ;;  %v3989_v51 = vsel %vm3148_vm4, %v3158_v42, %v3160_v25 }
  0xf1   : > { %1328 = vrot.lane.b32.xlu1 %v1259_v40, %s3704_s23  ;;  %2384 = vrot.lane.b32.xlu0 %v2319_v47, %s3704_s23  ;;  %v3983_v49 = vpop.f32.mrf.mxu0  ;;  %6406 = vst [vmem:[#allocation8_spill] sm:$0xff] %v3986_v50  ;;  %6407 = vst [vmem:[#allocation9_spill] sm:$0xff] %v3989_v51  ;;  %v827_v54 = vpop.f32.mrf.mxu1  ;;  %v3168_v56 = vrot.slane %v3561_v48, 6  ;;  %v6375_v40 = vrot.slane %v3952_v33, 2  ;;  %v2321_v42 = vsel %vm2314_vm5, %v2318_v28, %v2320_v20 }
  0xf2   : > { %v3992_v52 = vsel %vm2099_vm3, %v2105_v29, %v2107_v45  ;;  %v1113_v53 = vadd.f32 %v3865_v27, %v3983_v49  ;;  %v3164_v57 = vrot.slane %v827_v54, 6  ;;  %v3999_v58 = vsel %vm2830_vm6, %v2832_v30, %v2834_v46 }
  0xf3   : > { %v3996_v55 = vpop.f32.mrf.mxu0  ;;  %6408 = vst [vmem:[#allocation10_spill] sm:$0xff] %v3999_v58  ;;  %v3562_v0 = vpop.f32.mrf.mxu1 }
  0xf4   : > { %1149 = vst.msk [vmem:[%s3870_s22 + $0x38] sm:$0xff] %vm483_vm0, %v1113_v53  ;;  %v2109_v61 = vrot.slane %v3996_v55, 3  ;;  %v2836_v62 = vrot.slane %v3996_v55, 5  ;;  %v4014_v4 = vsel %vm3148_vm4, %v3162_v35, %v3164_v57  ;;  %v3170_v5 = vrot.slane %v3562_v0, 6 }
  0xf5   : > { %1843 = vrot.lane.b32.xlu1 %v1556_v31, %s3705_s24  ;;  %1330 = vrot.lane.b32.xlu0 %v1261_v60, %s3704_s23  ;;  %v4011_v1 = vpop.f32.mrf.mxu0  ;;  %6409 = vst [vmem:[#allocation11_spill] sm:$0xff] %v4014_v4  ;;  %v830_v11 = vpop.f32.mrf.mxu1  ;;  %v1262_v31 = vrot.slane %v3952_v33, 1 }
  0xf6   : > { %v4017_v6 = vsel %vm2099_vm3, %v2107_v45, %v2109_v61  ;;  %v1114_v9 = vadd.f32 %v3865_v27, %v4011_v1  ;;  %v4024_v13 = vsel %vm3148_vm4, %v3168_v56, %v3170_v5  ;;  %v3166_v14 = vrot.slane %v830_v11, 6 }
  0xf7   : > { %v4021_v12 = vpop.f32.mrf.mxu0  ;;  %6410 = vst [vmem:[#allocation12_spill] sm:$0xff] %v4024_v13  ;;  %v4027_v18 = vsel %vm2830_vm6, %v2834_v46, %v2836_v62  ;;  %v3565_v25 = vpop.f32.mrf.mxu1 }
  0xf8   : > { %6411 = vst [vmem:[#allocation13_spill] sm:$0xff] %v4027_v18  ;;  %1150 = vst.msk [vmem:[%s3870_s22 + $0x40] sm:$0xff] %vm483_vm0, %v1114_v9  ;;  %v2111_v22 = vrot.slane %v4021_v12, 3  ;;  %v2838_v24 = vrot.slane %v4021_v12, 5  ;;  %v4042_v23 = vsel %vm3148_vm4, %v3164_v57, %v3166_v14  ;;  %v4045_v63 = vsel %vm3148_vm4, %v3166_v14, %v3168_v56 }
  0xf9   : > { %1627 = vrot.lane.b32.xlu1 %v1558_v21, %s3703_s15  ;;  %1845 = vrot.lane.b32.xlu0 %v1558_v21, %s3705_s24  ;;  %v4039_v26 = vpop.f32.mrf.mxu0  ;;  %6412 = vst [vmem:[#allocation14_spill] sm:$0xff] %v4042_v23  ;;  %6413 = vst [vmem:[#allocation15_spill] sm:$0xff] %v4045_v63  ;;  %v843_v30 = vpop.f32.mrf.mxu1  ;;  %v3176_v35 = vrot.slane %v3565_v25, 6  ;;  %v6374_v57 = vrot.slane %v3962_v39, 4  ;;  %v1263_v9 = vsel %vm1250_vm2, %v1260_v44, %v1262_v31 }
  0xfa   : > { %v4048_v10 = vsel %vm2099_vm3, %v2109_v61, %v2111_v22  ;;  %v1115_v29 = vadd.f32 %v3865_v27, %v4039_v26  ;;  %v3172_v37 = vrot.slane %v843_v30, 6  ;;  %v4056_v38 = vsel %vm2830_vm6, %v2836_v62, %v2838_v24 }
  0xfb   : > { %v4053_v32 = vpop.f32.mrf.mxu0  ;;  %6414 = vst [vmem:[#allocation16_spill] sm:$0xff] %v4056_v38  ;;  %v3566_v47 = vpop.f32.mrf.mxu1 }
  0xfc   : > { %1151 = vst.msk [vmem:[%s3870_s22 + $0x48] sm:$0xff] %vm483_vm0, %v1115_v29  ;;  %v2113_v45 = vrot.slane %v4053_v32, 3  ;;  %v2840_v46 = vrot.slane %v4053_v32, 5  ;;  %v4071_v53 = vsel %vm3148_vm4, %v3170_v5, %v3172_v37  ;;  %v3178_v7 = vrot.slane %v3566_v47, 6 }
  0xfd   : > { %2606 = vrot.lane.b32.xlu0 %v2321_v42, %s3703_s15  ;;  %2386 = vrot.lane.b32.xlu1 %v2321_v42, %s3704_s23  ;;  %v4068_v48 = vpop.f32.mrf.mxu0  ;;  %6415 = vst [vmem:[#allocation17_spill] sm:$0xff] %v4071_v53  ;;  %v846_v56 = vpop.f32.mrf.mxu1  ;;  %v1560_v5 = vsel %vm1547_vm1, %v1557_v59, %v6375_v40  ;;  %v3669_v40 = vld [vmem:[%s3795_s12 + $0x10] sm:$0xff]  }
  0xfe   : > { %v4074_v28 = vsel %vm2099_vm3, %v2111_v22, %v2113_v45  ;;  %v1116_v54 = vadd.f32 %v3865_v27, %v4068_v48  ;;  %v4082_v61 = vsel %vm3148_vm4, %v3176_v35, %v3178_v7  ;;  %v3174_v62 = vrot.slane %v846_v56, 6  ;;  %3503 = vmatmul.mubr.msk.bf16.gmra.mxu1 %vm483_vm0, %v3669_v40 }
  0xff   : > { %v4079_v60 = vpop.f32.mrf.mxu0  ;;  %6416 = vst [vmem:[#allocation18_spill] sm:$0xff] %v4082_v61  ;;  %v4085_v0 = vsel %vm2830_vm6, %v2838_v24, %v2840_v46  ;;  %v3569_v21 = vpop.f32.mrf.mxu1 }
 0x100   : > { %6417 = vst [vmem:[#allocation19_spill] sm:$0xff] %v4085_v0  ;;  %1152 = vst.msk [vmem:[%s3870_s22 + $0x50] sm:$0xff] %vm483_vm0, %v1116_v54  ;;  %v2115_v11 = vrot.slane %v4079_v60, 3  ;;  %v2842_v14 = vrot.slane %v4079_v60, 5  ;;  %v4104_v59 = vsel %vm3148_vm4, %v3172_v37, %v3174_v62  ;;  %v4107_v15 = vsel %vm3148_vm4, %v3174_v62, %v3176_v35 }
 0x101   : > { %1629 = vrot.lane.b32.xlu0 %v1560_v5, %s3703_s15  ;;  %1332 = vrot.lane.b32.xlu1 %v1263_v9, %s3704_s23  ;;  %v4101_v22 = vpop.f32.mrf.mxu0  ;;  %6418 = vst [vmem:[#allocation20_spill] sm:$0xff] %v4104_v59  ;;  %6419 = vst [vmem:[#allocation21_spill] sm:$0xff] %v4107_v15  ;;  %v859_v25 = vpop.f32.mrf.mxu1  ;;  %v3184_v30 = vrot.slane %v3569_v21, 6  ;;  %v1264_v37 = vrot.slane %v3983_v49, 1  ;;  %v2323_v35 = vsel %vm2314_vm5, %v2320_v20, %v6374_v57 }
 0x102   : > { %v4110_v44 = vsel %vm2099_vm3, %v2113_v45, %v2115_v11  ;;  %v1117_v24 = vadd.f32 %v3865_v27, %v4101_v22  ;;  %v3180_v42 = vrot.slane %v859_v25, 6  ;;  %v4117_v47 = vsel %vm2830_vm6, %v2840_v46, %v2842_v14 }
 0x103   : > { %6420 = vst [vmem:[#allocation22_spill] sm:$0xff] %v4110_v44  ;;  %v4114_v29 = vpop.f32.mrf.mxu0  ;;  %6421 = vst [vmem:[#allocation23_spill] sm:$0xff] %v4117_v47  ;;  %v3570_v56 = vpop.f32.mrf.mxu1 }
 0x104   : > { %1153 = vst.msk [vmem:[%s3870_s22 + $0x58] sm:$0xff] %vm483_vm0, %v1117_v24  ;;  %v2117_v45 = vrot.slane %v4114_v29, 3  ;;  %v2844_v54 = vrot.slane %v4114_v29, 5  ;;  %v4132_v62 = vsel %vm3148_vm4, %v3178_v7, %v3180_v42  ;;  %v3186_v9 = vrot.slane %v3570_v56, 6 }
 0x105   : > { %1847 = vrot.lane.b32.xlu1 %v1560_v5, %s3705_s24  ;;  %2388 = vrot.lane.b32.xlu0 %v2323_v35, %s3704_s23  ;;  %v4129_v46 = vpop.f32.mrf.mxu0  ;;  %6422 = vst [vmem:[#allocation24_spill] sm:$0xff] %v4132_v62  ;;  %v862_v24 = vpop.f32.mrf.mxu1  ;;  %v1561_v7 = vrot.slane %v3983_v49, 2 }
 0x106   : > { %v4135_v20 = vsel %vm2099_vm3, %v2115_v11, %v2117_v45  ;;  %v1118_v21 = vadd.f32 %v3865_v27, %v4129_v46  ;;  %v4142_v57 = vsel %vm3148_vm4, %v3184_v30, %v3186_v9  ;;  %v3182_v5 = vrot.slane %v862_v24, 6 }
 0x107   : > { %6423 = vst [vmem:[#allocation25_spill] sm:$0xff] %v4135_v20  ;;  %v4139_v25 = vpop.f32.mrf.mxu0  ;;  %6424 = vst [vmem:[#allocation26_spill] sm:$0xff] %v4142_v57  ;;  %v4146_v2 = vsel %vm2830_vm6, %v2842_v14, %v2844_v54  ;;  %v1265_v11 = vsel %vm1250_vm2, %v1262_v31, %v1264_v37  ;;  %v3573_v62 = vpop.f32.mrf.mxu1  ;;  %v2324_v31 = vrot.slane %v3996_v55, 4 }
 0x108   : > { %6425 = vst [vmem:[#allocation27_spill] sm:$0xff] %v4146_v2  ;;  %1154 = vst.msk [vmem:[%s3870_s22 + $0x60] sm:$0xff] %vm483_vm0, %v1118_v21  ;;  %v2119_v56 = vrot.slane %v4139_v25, 3  ;;  %v2846_v61 = vrot.slane %v4139_v25, 5  ;;  %v4161_v14 = vsel %vm3148_vm4, %v3180_v42, %v3182_v5  ;;  %v4164_v49 = vsel %vm3148_vm4, %v3182_v5, %v3184_v30 }
 0x109   : > { %2608 = vrot.lane.b32.xlu1 %v2323_v35, %s3703_s15  ;;  %1334 = vrot.lane.b32.xlu0 %v1265_v11, %s3704_s23  ;;  %v4158_v24 = vpop.f32.mrf.mxu0  ;;  %6426 = vst [vmem:[#allocation28_spill] sm:$0xff] %v4161_v14  ;;  %6427 = vst [vmem:[#allocation29_spill] sm:$0xff] %v4164_v49  ;;  %v875_v11 = vpop.f32.mrf.mxu1  ;;  %v1266_v42 = vrot.slane %v4011_v1, 1  ;;  %v3192_v59 = vrot.slane %v3573_v62, 6  ;;  %v6429_v5 = vmov 0   ;;  %v6431_v21 = vrot.slane %v3952_v33, 2 }
 0x10a   : > { %v4169_v57 = vsel %vm2099_vm3, %v2117_v45, %v2119_v56  ;;  %v1119_v35 = vadd.f32 %v3865_v27, %v4158_v24  ;;  %v3188_v30 = vrot.slane %v875_v11, 6  ;;  %1018 = vmatprep.mubr.bf16.mxu1 %v6429_v5  ;;  %v4179_v55 = vsel %vm2830_vm6, %v2844_v54, %v2846_v61 }
 0x10b   : > { %6428 = vst [vmem:[#allocation30_spill] sm:$0xff] %v4169_v57  ;;  %v4175_v14 = vpop.f32.mrf.mxu0  ;;  %6430 = vst [vmem:[#allocation31_spill] sm:$0xff] %v4179_v55  ;;  %v1562_v49 = vsel %vm1547_vm1, %v6431_v21, %v1561_v7  ;;  %v3574_v13 = vpop.f32.mrf.mxu1  ;;  %v6434_v45 = vrot.slane %v4011_v1, 2  ;;  %v1267_v63 = vsel %vm1250_vm2, %v1264_v37, %v1266_v42 }
 0x10c   : > { %1155 = vst.msk [vmem:[%s3870_s22 + $0x68] sm:$0xff] %vm483_vm0, %v1119_v35  ;;  %v2121_v40 = vrot.slane %v4175_v14, 3  ;;  %v2848_v15 = vrot.slane %v4175_v14, 5  ;;  %v4195_v33 = vsel %vm3148_vm4, %v3186_v9, %v3188_v30  ;;  %v3194_v21 = vrot.slane %v3574_v13, 6 }
 0x10d   : > { %1631 = vrot.lane.b32.xlu1 %v1562_v49, %s3703_s15  ;;  %1849 = vrot.lane.b32.xlu0 %v1562_v49, %s3705_s24  ;;  %v4192_v54 = vpop.f32.mrf.mxu0  ;;  %6432 = vst [vmem:[#allocation32_spill] sm:$0xff] %v4195_v33  ;;  %v6433_v35 = vrot.slane %v3962_v39, 4  ;;  %v1564_v53 = vsel %vm1547_vm1, %v1561_v7, %v6434_v45  ;;  %v878_v23 = vpop.f32.mrf.mxu1 }
 0x10e   : > { %v4204_v62 = vsel %vm2099_vm3, %v2119_v56, %v2121_v40  ;;  %v1120_v49 = vadd.f32 %v3865_v27, %v4192_v54  ;;  %v4212_v13 = vsel %vm3148_vm4, %v3192_v59, %v3194_v21  ;;  %v3190_v39 = vrot.slane %v878_v23, 6 }
 0x10f   : > { %v2325_v11 = vsel %vm2314_vm5, %v6433_v35, %v2324_v31  ;;  %6435 = vst [vmem:[#allocation33_spill] sm:$0xff] %v4204_v62  ;;  %v4209_v9 = vpop.f32.mrf.mxu0  ;;  %6436 = vst [vmem:[#allocation34_spill] sm:$0xff] %v4212_v13  ;;  %v4215_v35 = vsel %vm2830_vm6, %v2846_v61, %v2848_v15  ;;  %v6438_v56 = vrot.slane %v4021_v12, 4  ;;  %v3577_v41 = vpop.f32.mrf.mxu1  ;;  %v6439_v23 = vrot.slane %v4039_v26, 1 }
 0x110   : > { %6437 = vst [vmem:[#allocation35_spill] sm:$0xff] %v4215_v35  ;;  %1156 = vst.msk [vmem:[%s3870_s22 + $0x70] sm:$0xff] %vm483_vm0, %v1120_v49  ;;  %v2123_v37 = vrot.slane %v4209_v9, 3  ;;  %v2850_v33 = vrot.slane %v4209_v9, 5  ;;  %v4236_v49 = vsel %vm3148_vm4, %v3188_v30, %v3190_v39  ;;  %v4239_v7 = vsel %vm3148_vm4, %v3190_v39, %v3192_v59 }
 0x111   : > { %v4221_v45 = vsel %vm2314_vm5, %v2324_v31, %v6438_v56  ;;  %2610 = vrot.lane.b32.xlu0 %v2325_v11, %s3703_s15  ;;  %2390 = vrot.lane.b32.xlu1 %v2325_v11, %s3704_s23  ;;  %v4232_v61 = vsel %vm1250_vm2, %v1266_v42, %v6439_v23  ;;  %v644_v56 = vpop.f32.mrf.mxu0  ;;  %6440 = vst [vmem:[#allocation36_spill] sm:$0xff] %v4236_v49  ;;  %6441 = vst [vmem:[#allocation37_spill] sm:$0xff] %v4239_v7  ;;  %v891_v51 = vpop.f32.mrf.mxu1  ;;  %v6378_v42 = vrot.slane %v4192_v54, 2 }
 0x112   : > { %v4242_v13 = vsel %vm2099_vm3, %v2121_v40, %v2123_v37  ;;  %v1121_v11 = vadd.f32 %v3865_v27, %v644_v56  ;;  %v1280_v4 = vrot.slane %v644_v56, 1  ;;  %v1577_v50 = vrot.slane %v644_v56, 2 }
 0x113   : > { %6442 = vst [vmem:[#allocation38_spill] sm:$0xff] %v4242_v13  ;;  %v646_v23 = vpop.f32.mrf.mxu0  ;;  %v3200_v8 = vrot.slane %v3577_v41, 6  ;;  %v3196_v31 = vrot.slane %v891_v51, 6  ;;  %v4247_v34 = vsel %vm2830_vm6, %v2848_v15, %v2850_v33  ;;  %v6444_v40 = vrot.slane %v4192_v54, 1  ;;  %v3578_v56 = vpop.f32.mrf.mxu1 }
 0x114   : > { %6443 = vst [vmem:[#allocation39_spill] sm:$0xff] %v4247_v34  ;;  %1157 = vst.msk [vmem:[%s3870_s22 + $0x78] sm:$0xff] %vm483_vm0, %v1121_v11  ;;  %v2125_v59 = vrot.slane %v646_v23, 3  ;;  %v2340_v30 = vrot.slane %v646_v23, 4  ;;  %v2852_v39 = vrot.slane %v646_v23, 5  ;;  %v4265_v11 = vsel %vm1547_vm1, %v6378_v42, %v1577_v50 }
 0x115   : > { %v4254_v49 = vsel %vm1250_vm2, %v6444_v40, %v1280_v4  ;;  %1633 = vrot.lane.b32.xlu0 %v1564_v53, %s3703_s15  ;;  %1336 = vrot.lane.b32.xlu1 %v1267_v63, %s3704_s23  ;;  %v650_v51 = vpop.f32.mrf.mxu0  ;;  %v4260_v15 = vsel %vm3148_vm4, %v3194_v21, %v3196_v31  ;;  %v3202_v23 = vrot.slane %v3578_v56, 6  ;;  %v894_v17 = vpop.f32.mrf.mxu1 }
 0x116   : > { %6445 = vst [vmem:[#allocation40_spill] sm:$0xff] %v4260_v15  ;;  %v4268_v40 = vsel %vm2099_vm3, %v2123_v37, %v2125_v59  ;;  %v1122_v7 = vadd.f32 %v3865_v27, %v650_v51  ;;  %v1282_v16 = vrot.slane %v650_v51, 1  ;;  %v1579_v63 = vrot.slane %v650_v51, 2 }
 0x117   : > { %6446 = vst [vmem:[#allocation41_spill] sm:$0xff] %v4268_v40  ;;  %v652_v35 = vpop.f32.mrf.mxu0  ;;  %v4272_v41 = vsel %vm3148_vm4, %v3200_v8, %v3202_v23  ;;  %v3198_v21 = vrot.slane %v894_v17, 6  ;;  %v6448_v15 = vrot.slane %v4209_v9, 4  ;;  %v4280_v56 = vsel %vm2830_vm6, %v2850_v33, %v2852_v39  ;;  %v3581_v51 = vpop.f32.mrf.mxu1 }
 0x118   : > { %6447 = vst [vmem:[#allocation42_spill] sm:$0xff] %v4272_v41  ;;  %6449 = vst [vmem:[#allocation43_spill] sm:$0xff] %v4280_v56  ;;  %v2127_v37 = vrot.slane %v652_v35, 3  ;;  %v2342_v42 = vrot.slane %v652_v35, 4  ;;  %v2854_v2 = vrot.slane %v652_v35, 5  ;;  %v4285_v55 = vsel %vm1547_vm1, %v1577_v50, %v1579_v63 }
 0x119   : > { %v4277_v34 = vsel %vm2314_vm5, %v6448_v15, %v2340_v30  ;;  %1158 = vst.msk [vmem:[%s3870_s22 + $0x80] sm:$0xff] %vm483_vm0, %v1122_v7  ;;  %1851 = vrot.lane.b32.xlu1 %v1564_v53, %s3705_s24  ;;  %2392 = vrot.lane.b32.xlu0 %v4221_v45, %s3704_s23  ;;  %v654_v17 = vpop.f32.mrf.mxu0  ;;  %v4292_v33 = vsel %vm3148_vm4, %v3196_v31, %v3198_v21  ;;  %v907_v56 = vpop.f32.mrf.mxu1  ;;  %v3208_v47 = vrot.slane %v3581_v51, 6 }
 0x11a   : > { %6450 = vst [vmem:[#allocation44_spill] sm:$0xff] %v4292_v33  ;;  %v4295_v7 = vsel %vm3148_vm4, %v3198_v21, %v3200_v8  ;;  %v4298_v35 = vsel %vm1250_vm2, %v1280_v4, %v1282_v16  ;;  %v4301_v50 = vsel %vm2099_vm3, %v2125_v59, %v2127_v37  ;;  %v1123_v15 = vadd.f32 %v3865_v27, %v654_v17 }
 0x11b   : > { %6451 = vst [vmem:[#allocation45_spill] sm:$0xff] %v4295_v7  ;;  %6452 = vst [vmem:[#allocation46_spill] sm:$0xff] %v4301_v50  ;;  %v1284_v53 = vrot.slane %v654_v17, 1  ;;  %v1581_v41 = vrot.slane %v654_v17, 2  ;;  %v656_v0 = vpop.f32.mrf.mxu0  ;;  %v3204_v18 = vrot.slane %v907_v56, 6  ;;  %v4305_v31 = vsel %vm2314_vm5, %v2340_v30, %v2342_v42  ;;  %v4312_v33 = vpop.f32.mrf.mxu1 }
 0x11c   : > { %v4308_v8 = vsel %vm2830_vm6, %v2852_v39, %v2854_v2  ;;  %1159 = vst.msk [vmem:[%s3870_s22 + $0x88] sm:$0xff] %vm483_vm0, %v1123_v15  ;;  %v2129_v4 = vrot.slane %v656_v0, 3  ;;  %v2344_v21 = vrot.slane %v656_v0, 4  ;;  %v2856_v59 = vrot.slane %v656_v0, 5  ;;  %6454 = vst [vmem:[#allocation48_spill] sm:$0xff] %v4312_v33 }
 0x11d   : > { %6453 = vst [vmem:[#allocation47_spill] sm:$0xff] %v4308_v8  ;;  %v4315_v7 = vsel %vm1250_vm2, %v1282_v16, %v1284_v53  ;;  %2612 = vrot.lane.b32.xlu1 %v4221_v45, %s3703_s15  ;;  %1338 = vrot.lane.b32.xlu0 %v4232_v61, %s3704_s23  ;;  %v6455_v30 = vrot.slane %v4039_v26, 2  ;;  %v6456_v39 = vrot.slane %v4011_v1, 2  ;;  %v660_v51 = vpop.f32.mrf.mxu0  ;;  %v4327_v0 = vsel %vm3148_vm4, %v3202_v23, %v3204_v18  ;;  %v910_v1 = vpop.f32.mrf.mxu1 }
 0x11e   : > { %6457 = vst [vmem:[#allocation49_spill] sm:$0xff] %v4327_v0  ;;  %v6379_v16 = vrot.slane %v4312_v33, 6  ;;  %v4331_v17 = vsel %vm1547_vm1, %v1579_v63, %v1581_v41  ;;  %v4334_v45 = vsel %vm2099_vm3, %v2127_v37, %v2129_v4  ;;  %v1124_v61 = vadd.f32 %v3865_v27, %v660_v51 }
 0x11f   : > { %v1566_v56 = vsel %vm1547_vm1, %v6456_v39, %v6455_v30  ;;  %6458 = vst [vmem:[#allocation50_spill] sm:$0xff] %v4334_v45  ;;  %v1286_v15 = vrot.slane %v660_v51, 1  ;;  %v1583_v8 = vrot.slane %v660_v51, 2  ;;  %v662_v38 = vpop.f32.mrf.mxu0  ;;  %v3206_v23 = vrot.slane %v910_v1, 6  ;;  %v4350_v51 = vpop.f32.mrf.mxu1 }
 0x120   : > { %v4340_v30 = vsel %vm3148_vm4, %v3208_v47, %v6379_v16  ;;  %v4343_v39 = vsel %vm2314_vm5, %v2342_v42, %v2344_v21  ;;  %v4346_v63 = vsel %vm2830_vm6, %v2854_v2, %v2856_v59  ;;  %1160 = vst.msk [vmem:[%s3870_s22 + $0x90] sm:$0xff] %vm483_vm0, %v1124_v61  ;;  %v2131_v37 = vrot.slane %v662_v38, 3 }
 0x121   : > { %6459 = vst [vmem:[#allocation51_spill] sm:$0xff] %v4340_v30  ;;  %6460 = vst [vmem:[#allocation52_spill] sm:$0xff] %v4346_v63  ;;  %v2346_v0 = vrot.slane %v662_v38, 4  ;;  %v2858_v43 = vrot.slane %v662_v38, 5  ;;  %v4353_v58 = vsel %vm1547_vm1, %v1581_v41, %v1583_v8  ;;  %1635 = vrot.lane.b32.xlu1 %v1566_v56, %s3703_s15  ;;  %1853 = vrot.lane.b32.xlu0 %v1566_v56, %s3705_s24  ;;  %v664_v61 = vpop.f32.mrf.mxu0  ;;  %v4370_v1 = vpop.f32.mrf.mxu1 }
 0x122   : > { %v4359_v2 = vsel %vm3148_vm4, %v3204_v18, %v3206_v23  ;;  %v4362_v42 = vsel %vm3148_vm4, %v3206_v23, %v3208_v47  ;;  %v4365_v38 = vsel %vm1250_vm2, %v1284_v53, %v1286_v15  ;;  %v4368_v41 = vsel %vm2099_vm3, %v2129_v4, %v2131_v37 }
 0x123   : > { %6461 = vst [vmem:[#allocation53_spill] sm:$0xff] %v4359_v2  ;;  %6462 = vst [vmem:[#allocation54_spill] sm:$0xff] %v4362_v42  ;;  %v1125_v16 = vadd.f32 %v3865_v27, %v664_v61  ;;  %v1288_v30 = vrot.slane %v664_v61, 1  ;;  %v1585_v56 = vrot.slane %v664_v61, 2  ;;  %v6464_v18 = vrot.slane %v4053_v32, 4  ;;  %v666_v2 = vpop.f32.mrf.mxu0  ;;  %v4385_v42 = vpop.f32.mrf.mxu1 }
 0x124   : > { %6463 = vst [vmem:[#allocation55_spill] sm:$0xff] %v4368_v41  ;;  %v6465_v47 = vrot.slane %v4021_v12, 4  ;;  %v4380_v53 = vsel %vm2314_vm5, %v2344_v21, %v2346_v0  ;;  %v4383_v4 = vsel %vm2830_vm6, %v2856_v59, %v2858_v43  ;;  %v2133_v61 = vrot.slane %v666_v2, 3 }
 0x125   : > { %6466 = vst [vmem:[#allocation56_spill] sm:$0xff] %v4383_v4  ;;  %1161 = vst.msk [vmem:[%s3870_s22 + $0x98] sm:$0xff] %vm483_vm0, %v1125_v16  ;;  %v2348_v63 = vrot.slane %v666_v2, 4  ;;  %v2860_v33 = vrot.slane %v666_v2, 5  ;;  %v4390_v41 = vsel %vm1250_vm2, %v1286_v15, %v1288_v30  ;;  %v670_v21 = vpop.f32.mrf.mxu0  ;;  %v4396_v59 = vsel %vm1547_vm1, %v1583_v8, %v1585_v56 }
 0x126   : > { %v2329_v23 = vsel %vm2314_vm5, %v6465_v47, %v6464_v18  ;;  %v4398_v18 = vpop.f32.mrf.mxu1  ;;  %v4401_v16 = vsel %vm2099_vm3, %v2131_v37, %v2133_v61  ;;  %v1126_v2 = vadd.f32 %v3865_v27, %v670_v21  ;;  %v1290_v15 = vrot.slane %v670_v21, 1 }
 0x127   : > { %2614 = vrot.lane.b32.xlu0 %v2329_v23, %s3703_s15  ;;  %2394 = vrot.lane.b32.xlu1 %v2329_v23, %s3704_s23  ;;  %6467 = vst [vmem:[#allocation57_spill] sm:$0xff] %v4401_v16  ;;  %v1587_v47 = vrot.slane %v670_v21, 2  ;;  %v6468_v4 = vrot.slane %v4068_v48, 2  ;;  %v6469_v12 = vrot.slane %v4039_v26, 2  ;;  %v6470_v23 = vrot.slane %v4068_v48, 1  ;;  %v672_v40 = vpop.f32.mrf.mxu0 }
 0x128   : > { %v6471_v8 = vrot.slane %v4039_v26, 1  ;;  %v4415_v37 = vsel %vm2314_vm5, %v2346_v0, %v2348_v63  ;;  %v4418_v16 = vsel %vm2830_vm6, %v2858_v43, %v2860_v33  ;;  %1162 = vst.msk [vmem:[%s3870_s22 + $0xa0] sm:$0xff] %vm483_vm0, %v1126_v2  ;;  %v2135_v21 = vrot.slane %v672_v40, 3  ;;  %v4422_v57 = vpop.f32.mrf.mxu1 }
 0x129   : > { %v1568_v45 = vsel %vm1547_vm1, %v6469_v12, %v6468_v4  ;;  %6472 = vst [vmem:[#allocation58_spill] sm:$0xff] %v4418_v16  ;;  %v2350_v13 = vrot.slane %v672_v40, 4  ;;  %v2862_v62 = vrot.slane %v672_v40, 5  ;;  %v4425_v4 = vsel %vm1547_vm1, %v1585_v56, %v1587_v47  ;;  %v674_v26 = vpop.f32.mrf.mxu0 }
 0x12a   : > { %v1271_v50 = vsel %vm1250_vm2, %v6471_v8, %v6470_v23  ;;  %v4430_v0 = vsel %vm1250_vm2, %v1288_v30, %v1290_v15  ;;  %v4433_v43 = vsel %vm2099_vm3, %v2133_v61, %v2135_v21  ;;  %v4435_v12 = vpop.f32.mrf.mxu1  ;;  %v1127_v40 = vadd.f32 %v3865_v27, %v674_v26 }
 0x12b   : > { %1637 = vrot.lane.b32.xlu0 %v1568_v45, %s3703_s15  ;;  %1340 = vrot.lane.b32.xlu1 %v1271_v50, %s3704_s23  ;;  %6473 = vst [vmem:[#allocation59_spill] sm:$0xff] %v4433_v43  ;;  %v1292_v2 = vrot.slane %v674_v26, 1  ;;  %v1589_v23 = vrot.slane %v674_v26, 2  ;;  %v6474_v8 = vrot.slane %v4079_v60, 4  ;;  %v6475_v16 = vrot.slane %v4053_v32, 4  ;;  %v676_v20 = vpop.f32.mrf.mxu0 }
 0x12c   : > { %v4445_v30 = vsel %vm2314_vm5, %v2348_v63, %v2350_v13  ;;  %v4448_v61 = vsel %vm2830_vm6, %v2860_v33, %v2862_v62  ;;  %1163 = vst.msk [vmem:[%s3870_s22 + $0xa8] sm:$0xff] %vm483_vm0, %v1127_v40  ;;  %v1008_v43 = vpop.f32.mrf.mxu1  ;;  %v2137_v44 = vrot.slane %v676_v20, 3  ;;  %v2352_v26 = vrot.slane %v676_v20, 4 }
 0x12d   : > { %v2331_v50 = vsel %vm2314_vm5, %v6475_v16, %v6474_v8  ;;  %6476 = vst [vmem:[#allocation60_spill] sm:$0xff] %v4448_v61  ;;  %v2864_v56 = vrot.slane %v676_v20, 5  ;;  %v4453_v5 = vsel %vm1250_vm2, %v1290_v15, %v1292_v2  ;;  %v680_v32 = vpop.f32.mrf.mxu0  ;;  %v4458_v63 = vsel %vm1547_vm1, %v1587_v47, %v1589_v23 }
 0x12e   : > { %6477 = vst [vmem:[#allocation61_spill] sm:$0xff] %v4453_v5  ;;  %6478 = vst [vmem:[#allocation62_spill] sm:$0xff] %v4458_v63  ;;  %v4461_v33 = vsel %vm2099_vm3, %v2135_v21, %v2137_v44  ;;  %v1128_v16 = vadd.f32 %v3865_v27, %v680_v32  ;;  %v1294_v43 = vrot.slane %v680_v32, 1  ;;  %v1591_v40 = vrot.slane %v680_v32, 2 }
 0x12f   : > { %1855 = vrot.lane.b32.xlu1 %v1568_v45, %s3705_s24  ;;  %2396 = vrot.lane.b32.xlu0 %v2331_v50, %s3704_s23  ;;  %6479 = vst [vmem:[#allocation63_spill] sm:$0xff] %v4461_v33  ;;  %v1569_v20 = vrot.slane %v4101_v22, 2  ;;  %v6480_v15 = vrot.slane %v4101_v22, 1  ;;  %v6481_v8 = vrot.slane %v4068_v48, 1  ;;  %v682_v61 = vpop.f32.mrf.mxu0  ;;  %v4471_v5 = vsel %vm2314_vm5, %v2350_v13, %v2352_v26 }
 0x130   : > { %v4474_v47 = vsel %vm2830_vm6, %v2862_v62, %v2864_v56  ;;  %1164 = vst.msk [vmem:[%s3870_s22 + $0xb0] sm:$0xff] %vm483_vm0, %v1128_v16  ;;  %v2139_v21 = vrot.slane %v682_v61, 3  ;;  %v2354_v33 = vrot.slane %v682_v61, 4  ;;  %v2866_v32 = vrot.slane %v682_v61, 5 }
 0x131   : > { %v1273_v45 = vsel %vm1250_vm2, %v6481_v8, %v6480_v15  ;;  %6482 = vst [vmem:[#allocation64_spill] sm:$0xff] %v4474_v47  ;;  %v4479_v63 = vsel %vm1547_vm1, %v1589_v23, %v1591_v40  ;;  %v684_v15 = vpop.f32.mrf.mxu0  ;;  %v4484_v13 = vsel %vm1250_vm2, %v1292_v2, %v1294_v43  ;;  %v2332_v61 = vrot.slane %v4114_v29, 4 }
 0x132   : > { %6483 = vst [vmem:[#allocation65_spill] sm:$0xff] %v4479_v63  ;;  %6484 = vst [vmem:[#allocation66_spill] sm:$0xff] %v4484_v13  ;;  %v4487_v62 = vsel %vm2099_vm3, %v2137_v44, %v2139_v21  ;;  %v1129_v16 = vadd.f32 %v3865_v27, %v684_v15  ;;  %v1296_v8 = vrot.slane %v684_v15, 1  ;;  %v1593_v47 = vrot.slane %v684_v15, 2 }
 0x133   : > { %2616 = vrot.lane.b32.xlu1 %v2331_v50, %s3703_s15  ;;  %1342 = vrot.lane.b32.xlu0 %v1273_v45, %s3704_s23  ;;  %6485 = vst [vmem:[#allocation67_spill] sm:$0xff] %v4487_v62  ;;  %v6486_v23 = vrot.slane %v4068_v48, 2  ;;  %v686_v50 = vpop.f32.mrf.mxu0  ;;  %v4495_v45 = vsel %vm2314_vm5, %v2352_v26, %v2354_v33  ;;  %v4498_v2 = vsel %vm2830_vm6, %v2864_v56, %v2866_v32 }
 0x134   : > { %6487 = vst [vmem:[#allocation68_spill] sm:$0xff] %v4495_v45  ;;  %6488 = vst [vmem:[#allocation69_spill] sm:$0xff] %v4498_v2  ;;  %v2141_v44 = vrot.slane %v686_v50, 3  ;;  %v2356_v62 = vrot.slane %v686_v50, 4  ;;  %v2868_v13 = vrot.slane %v686_v50, 5  ;;  %v4503_v15 = vsel %vm1250_vm2, %v1294_v43, %v1296_v8 }
 0x135   : > { %v1570_v63 = vsel %vm1547_vm1, %v6486_v23, %v1569_v20  ;;  %1165 = vst.msk [vmem:[%s3870_s22 + $0xb8] sm:$0xff] %vm483_vm0, %v1129_v16  ;;  %6489 = vst [vmem:[#allocation70_spill] sm:$0xff] %v4503_v15  ;;  %v690_v48 = vpop.f32.mrf.mxu0  ;;  %v4508_v29 = vsel %vm1547_vm1, %v1591_v40, %v1593_v47  ;;  %v1274_v50 = vrot.slane %v4129_v46, 1  ;;  %v1571_v43 = vrot.slane %v4129_v46, 2 }
 0x136   : > { %6490 = vst [vmem:[#allocation71_spill] sm:$0xff] %v4508_v29  ;;  %v4511_v26 = vsel %vm2099_vm3, %v2139_v21, %v2141_v44  ;;  %v1298_v56 = vrot.slane %v690_v48, 1  ;;  %v1595_v23 = vrot.slane %v690_v48, 2  ;;  %v4514_v16 = vsel %vm2314_vm5, %v2354_v33, %v2356_v62 }
 0x137   : > { %1639 = vrot.lane.b32.xlu1 %v1570_v63, %s3703_s15  ;;  %1857 = vrot.lane.b32.xlu0 %v1570_v63, %s3705_s24  ;;  %6491 = vst [vmem:[#allocation72_spill] sm:$0xff] %v4511_v26  ;;  %v6492_v2 = vrot.slane %v4079_v60, 4  ;;  %v692_v15 = vpop.f32.mrf.mxu0  ;;  %v4522_v40 = vsel %vm2830_vm6, %v2866_v32, %v2868_v13 }
 0x138   : > { %6493 = vst [vmem:[#allocation73_spill] sm:$0xff] %v4522_v40  ;;  %v2143_v29 = vrot.slane %v692_v15, 3  ;;  %v2358_v21 = vrot.slane %v692_v15, 4  ;;  %v2870_v26 = vrot.slane %v692_v15, 5  ;;  %v4525_v45 = vsel %vm1547_vm1, %v1593_v47, %v1595_v23 }
 0x139   : > { %v2333_v63 = vsel %vm2314_vm5, %v6492_v2, %v2332_v61  ;;  %6494 = vst [vmem:[#allocation74_spill] sm:$0xff] %v4525_v45  ;;  %v694_v33 = vpop.f32.mrf.mxu0  ;;  %v4530_v60 = vsel %vm1250_vm2, %v1296_v8, %v1298_v56  ;;  %v2334_v15 = vrot.slane %v4139_v25, 4  ;;  %v1572_v40 = vsel %vm1547_vm1, %v1569_v20, %v1571_v43 }
 0x13a   : > { %6495 = vst [vmem:[#allocation75_spill] sm:$0xff] %v4530_v60  ;;  %v4533_v46 = vsel %vm2099_vm3, %v2141_v44, %v2143_v29  ;;  %v4536_v32 = vsel %vm2314_vm5, %v2356_v62, %v2358_v21  ;;  %v4539_v2 = vsel %vm2830_vm6, %v2868_v13, %v2870_v26  ;;  %v1276_v62 = vrot.slane %v4158_v24, 1 }
 0x13b   : > { %2618 = vrot.lane.b32.xlu0 %v2333_v63, %s3703_s15  ;;  %2398 = vrot.lane.b32.xlu1 %v2333_v63, %s3704_s23  ;;  %6496 = vst [vmem:[#allocation76_spill] sm:$0xff] %v4533_v46  ;;  %6497 = vst [vmem:[#allocation77_spill] sm:$0xff] %v4536_v32  ;;  %v696_v47 = vpop.f32.mrf.mxu0  ;;  %v6499_v63 = vrot.slane %v4101_v22, 1  ;;  %v1130_v13 = vadd.f32 %v3865_v27, %v690_v48  ;;  %v2335_v25 = vsel %vm2314_vm5, %v2332_v61, %v2334_v15 }
 0x13c   : > { %6498 = vst [vmem:[#allocation78_spill] sm:$0xff] %v4539_v2  ;;  %v1573_v20 = vrot.slane %v4158_v24, 2  ;;  %v1300_v48 = vrot.slane %v694_v33, 1  ;;  %v1597_v2 = vrot.slane %v694_v33, 2  ;;  %v2145_v46 = vrot.slane %v696_v47, 3 }
 0x13d   : > { %v1275_v45 = vsel %vm1250_vm2, %v6499_v63, %v1274_v50  ;;  %v4548_v8 = vpop.f32.mrf.mxu0  ;;  %1166 = vst.msk [vmem:[%s3870_s22 + $0xc0] sm:$0xff] %vm483_vm0, %v1130_v13  ;;  %v1131_v63 = vadd.f32 %v3865_v27, %v694_v33  ;;  %v2360_v61 = vrot.slane %v696_v47, 4  ;;  %v2872_v13 = vrot.slane %v696_v47, 5 }
 0x13e   : > { %v6387_v60 = vrot.slane %v4548_v8, 2  ;;  %v4573_v24 = vsel %vm2099_vm3, %v2143_v29, %v2145_v46 }
 0x13f   : > { %1641 = vrot.lane.b32.xlu0 %v1572_v40, %s3703_s15  ;;  %1344 = vrot.lane.b32.xlu1 %v1275_v45, %s3704_s23  ;;  %v4552_v44 = vpop.f32.mrf.mxu0  ;;  %v1277_v45 = vsel %vm1250_vm2, %v1274_v50, %v1276_v62  ;;  %1167 = vst.msk [vmem:[%s3870_s22 + $0xc8] sm:$0xff] %vm483_vm0, %v1131_v63  ;;  %6500 = vst [vmem:[#allocation79_spill] sm:$0xff] %v4573_v24  ;;  %v4617_v24 = vsel %vm2830_vm6, %v2870_v26, %v2872_v13 }
 0x140   : > { %v2147_v27 = vrot.slane %v4552_v44, 3  ;;  %v6388_v50 = vrot.slane %v4552_v44, 4  ;;  %v4592_v29 = vsel %vm1547_vm1, %v1597_v2, %v6387_v60  ;;  %6510 = vst [vmem:[#allocation87_spill] sm:$0xff] %v4617_v24  ;;  %v6511_v24 = vrot.slane %v4192_v54, 2 }
 0x141   : > { %v4559_v22 = vpop.f32.mrf.mxu0  ;;  %6503 = vst [vmem:[#allocation82_spill] sm:$0xff] %v4592_v29 }
 0x142   : > { %v4595_v63 = vsel %vm2099_vm3, %v2145_v46, %v2147_v27  ;;  %v2336_v46 = vrot.slane %v4175_v14, 4 }
 0x143   : > { %1859 = vrot.lane.b32.xlu1 %v1572_v40, %s3705_s24  ;;  %2400 = vrot.lane.b32.xlu0 %v2335_v25, %s3704_s23  ;;  %v4564_v32 = vpop.f32.mrf.mxu0  ;;  %v4581_v40 = vsel %vm1250_vm2, %v1298_v56, %v1300_v48  ;;  %6504 = vst [vmem:[#allocation83_spill] sm:$0xff] %v4595_v63  ;;  %v6505_v56 = vrot.slane %v4548_v8, 1  ;;  %v1574_v63 = vsel %vm1547_vm1, %v1571_v43, %v1573_v20 }
 0x145   : > { %v4578_v47 = vpop.f32.mrf.mxu0 }
 0x147   : > { %2620 = vrot.lane.b32.xlu1 %v2335_v25, %s3703_s15  ;;  %1346 = vrot.lane.b32.xlu0 %v1277_v45, %s3704_s23  ;;  %v4584_v25 = vsel %vm1547_vm1, %v1595_v23, %v1597_v2  ;;  %v4587_v45 = vsel %vm2314_vm5, %v2358_v21, %v2360_v61  ;;  %v4597_v33 = vpop.f32.mrf.mxu0  ;;  %v4602_v23 = vsel %vm1250_vm2, %v1300_v48, %v6505_v56  ;;  %v6508_v2 = vrot.slane %v4552_v44, 5  ;;  %v1178_v56 = vld [vmem:[%s3870_s22] sm:$0xff] }
 0x148   : > { %6501 = vst [vmem:[#allocation80_spill] sm:$0xff] %v4584_v25  ;;  %6502 = vst [vmem:[#allocation81_spill] sm:$0xff] %v4587_v45  ;;  %v4607_v21 = vsel %vm2314_vm5, %v2360_v61, %v6388_v50  ;;  %v4626_v61 = vld [vmem:[%s6372_s3] ss:$0 sm:$0xff] }
 0x149   : > { %6506 = vst [vmem:[#allocation84_spill] sm:$0xff] %v4602_v23  ;;  %6507 = vst [vmem:[#allocation85_spill] sm:$0xff] %v4607_v21  ;;  %v4612_v60 = vsel %vm2830_vm6, %v2872_v13, %v6508_v2  ;;  %v4621_v48 = vpop.f32.mrf.mxu0  ;;  %v1132_v14 = vadd.f32 %v4626_v61, %v4548_v8  ;;  %v1133_v43 = vadd.f32 %v4626_v61, %v4559_v22  ;;  %v6513_v21 = vrot.slane %v4209_v9, 4 }
 0x14a   : > { %6509 = vst [vmem:[#allocation86_spill] sm:$0xff] %v4612_v60  ;;  %v2337_v13 = vsel %vm2314_vm5, %v2334_v15, %v2336_v46  ;;  %v1576_v60 = vsel %vm1547_vm1, %v1573_v20, %v6511_v24  ;;  %v6512_v15 = vrot.slane %v4192_v54, 1  ;;  %v1179_v54 = vld [vmem:[%s3870_s22 + $0x8] sm:$0xff]  ;;  %v1135_v23 = vadd.f32 %v4626_v61, %v4621_v48 }
 0x14b   : > { %1643 = vrot.lane.b32.xlu1 %v1574_v63, %s3703_s15  ;;  %1861 = vrot.lane.b32.xlu0 %v1574_v63, %s3705_s24  ;;  %v4632_v26 = vpop.f32.mrf.mxu0  ;;  %1168 = vst.msk [vmem:[%s3870_s22 + $0xd0] sm:$0xff] %vm483_vm0, %v1132_v14  ;;  %1169 = vst.msk [vmem:[%s3870_s22 + $0xd8] sm:$0xff] %vm483_vm0, %v1133_v43  ;;  %v1304_v9 = vrot.slane %v4559_v22, 1 }
 0x14c   : > { %v1279_v14 = vsel %vm1250_vm2, %v1276_v62, %v6512_v15  ;;  %v2151_v62 = vrot.slane %v4597_v33, 3  ;;  %1171 = vst.msk [vmem:[%s3870_s22 + $0xe8] sm:$0xff] %vm483_vm0, %v1135_v23  ;;  %v6516_v23 = vrot.slane %v4548_v8, 1 }
 0x14d   : > { %v4641_v63 = vpop.f32.mrf.mxu0 }
 0x14f   : > { %2622 = vrot.lane.b32.xlu0 %v2337_v13, %s3703_s15  ;;  %2402 = vrot.lane.b32.xlu1 %v2337_v13, %s3704_s23  ;;  %v1323_v2 = vpop.permute.xlu0 %1322  ;;  %v4650_v43 = vpop.f32.mrf.mxu0  ;;  %v2149_v13 = vrot.slane %v4564_v32, 3 }
 0x150   : > { %v1430_v50 = vadd.f32 %v1323_v2, %v1178_v56  ;;  %v1134_v56 = vadd.f32 %v4626_v61, %v4578_v47  ;;  %v1620_v20 = vpop.permute.xlu1 %1619 }
 0x151   : > { %v4659_v2 = vpop.f32.mrf.mxu0 }
 0x152   : > { %1466 = vst.msk [vmem:[%s3870_s22] sm:$0xff] %vm483_vm0, %v1430_v50  ;;  %v4667_v50 = vsel %vm2099_vm3, %v2147_v27, %v2149_v13  ;;  %1170 = vst.msk [vmem:[%s3870_s22 + $0xe0] sm:$0xff] %vm483_vm0, %v1134_v56  ;;  %v4681_v27 = vsel %vm2099_vm3, %v2149_v13, %v2151_v62  ;;  %v6395_v56 = vrot.slane %v4578_v47, 2  ;;  %v2876_v13 = vrot.slane %v4564_v32, 5 }
 0x153   : > { %1645 = vrot.lane.b32.xlu0 %v1576_v60, %s3703_s15  ;;  %1348 = vrot.lane.b32.xlu1 %v1279_v14, %s3704_s23  ;;  %v1325_v24 = vpop.permute.xlu0 %1324  ;;  %v2339_v14 = vsel %vm2314_vm5, %v2336_v46, %v6513_v21  ;;  %6514 = vst [vmem:[#allocation88_spill] sm:$0xff] %v4667_v50  ;;  %v4673_v29 = vpop.f32.mrf.mxu0  ;;  %v2364_v21 = vrot.slane %v4564_v32, 4  ;;  %6515 = vst [vmem:[#allocation89_spill] sm:$0xff] %v4681_v27  ;;  %v1180_v50 = vld [vmem:[%s3870_s22 + $0x10] sm:$0xff]  ;;  %v4704_v46 = vsel %vm1250_vm2, %v6516_v23, %v1304_v9 }
 0x154   : > { %v1431_v15 = vadd.f32 %v1325_v24, %v1179_v54  ;;  %v1601_v54 = vrot.slane %v4559_v22, 2  ;;  %v6517_v32 = vrot.slane %v4548_v8, 2  ;;  %v6522_v8 = vrot.slane %v4578_v47, 1 }
 0x155   : > { %v4690_v24 = vpop.f32.mrf.mxu0 }
 0x156   : > { %1467 = vst.msk [vmem:[%s3870_s22 + $0x8] sm:$0xff] %vm483_vm0, %v1431_v15  ;;  %v4709_v27 = vsel %vm1547_vm1, %v6517_v32, %v1601_v54  ;;  %v4723_v23 = vsel %vm1547_vm1, %v1601_v54, %v6395_v56  ;;  %v4728_v32 = vsel %vm1250_vm2, %v1304_v9, %v6522_v8  ;;  %v6528_v54 = vrot.slane %v4552_v44, 5 }
 0x157   : > { %1863 = vrot.lane.b32.xlu1 %v1576_v60, %s3705_s24  ;;  %2404 = vrot.lane.b32.xlu0 %v2339_v14, %s3704_s23  ;;  %v1622_v22 = vpop.permute.xlu0 %1621  ;;  %v1327_v45 = vpop.permute.xlu1 %1326  ;;  %6518 = vst [vmem:[#allocation90_spill] sm:$0xff] %v4709_v27  ;;  %6521 = vst [vmem:[#allocation92_spill] sm:$0xff] %v4723_v23  ;;  %v6524_v27 = vrot.slane %v4597_v33, 4  ;;  %v2153_v8 = vrot.slane %v4632_v26, 3 }
 0x158   : > { %v1432_v25 = vadd.f32 %v1327_v45, %v1180_v50  ;;  %v4695_v15 = vpop.f32.mrf.mxu0  ;;  %v6519_v45 = vrot.slane %v4552_v44, 4  ;;  %6523 = vst [vmem:[#allocation93_spill] sm:$0xff] %v4728_v32  ;;  %v4743_v56 = vsel %vm2830_vm6, %v6528_v54, %v2876_v13  ;;  %v2155_v54 = vrot.slane %v4650_v43, 3  ;;  %v1181_v32 = vld [vmem:[%s3870_s22 + $0x18] sm:$0xff] }
 0x159   : > { %v1511_v60 = vld [vmem:[%s3870_s22] sm:$0xff]  ;;  %6529 = vst [vmem:[#allocation96_spill] sm:$0xff] %v4743_v56 }
 0x15a   : > { %1468 = vst.msk [vmem:[%s3870_s22 + $0x10] sm:$0xff] %vm483_vm0, %v1432_v25  ;;  %v4718_v50 = vpop.f32.mrf.mxu0 }
 0x15b   : > { %2624 = vrot.lane.b32.xlu1 %v2339_v14, %s3703_s15  ;;  %1350 = vrot.lane.b32.xlu0 %v4254_v49, %s3704_s23  ;;  %v4714_v14 = vsel %vm2314_vm5, %v6519_v45, %v2364_v21  ;;  %v1727_v49 = vadd.f32 %v1620_v20, %v1511_v60  ;;  %v4733_v45 = vsel %vm2314_vm5, %v2364_v21, %v6524_v27  ;;  %v1624_v25 = vpop.permute.xlu1 %1623  ;;  %v6526_v20 = vrot.slane %v4597_v33, 5 }
 0x15c   : > { %6520 = vst [vmem:[#allocation91_spill] sm:$0xff] %v4714_v14  ;;  %6525 = vst [vmem:[#allocation94_spill] sm:$0xff] %v4733_v45  ;;  %v1842_v14 = vpop.permute.xlu0 %1841  ;;  %v4747_v9 = vpop.f32.mrf.mxu0 }
 0x15d   : > { %v4738_v60 = vsel %vm2830_vm6, %v2876_v13, %v6526_v20  ;;  %1763 = vst.msk [vmem:[%s3870_s22] sm:$0xff] %vm483_vm0, %v1727_v49  ;;  %v1512_v21 = vld [vmem:[%s3870_s22 + $0x8] sm:$0xff]  ;;  %v1136_v20 = vadd.f32 %v4626_v61, %v4641_v63 }
 0x15e   : > { %6527 = vst [vmem:[#allocation95_spill] sm:$0xff] %v4738_v60  ;;  %v1728_v27 = vadd.f32 %v1622_v22, %v1512_v21  ;;  %v4755_v44 = vpop.f32.mrf.mxu0  ;;  %v1137_v22 = vadd.f32 %v4626_v61, %v4659_v2 }
 0x15f   : > { %1647 = vrot.lane.b32.xlu1 %v4265_v11, %s3703_s15  ;;  %1865 = vrot.lane.b32.xlu0 %v4265_v11, %s3705_s24  ;;  %v4757_v13 = vpop.permute.xlu1 %2382  ;;  %v4767_v11 = vsel %vm2099_vm3, %v2151_v62, %v2153_v8  ;;  %1172 = vst.msk [vmem:[%s3870_s22 + $0xf0] sm:$0xff] %vm483_vm0, %v1136_v20  ;;  %v2157_v62 = vrot.slane %v4673_v29, 3 }
 0x160   : > { %v4759_v49 = vpop.permute.xlu0 %1625  ;;  %1764 = vst.msk [vmem:[%s3870_s22 + $0x8] sm:$0xff] %vm483_vm0, %v1728_v27  ;;  %6530 = vst [vmem:[#allocation97_spill] sm:$0xff] %v4767_v11  ;;  %v4771_v21 = vpop.f32.mrf.mxu0  ;;  %v4781_v27 = vsel %vm2099_vm3, %v2153_v8, %v2155_v54  ;;  %v1138_v11 = vadd.f32 %v4626_v61, %v4690_v24 }
 0x161   : > { %v1513_v56 = vld [vmem:[%s3870_s22 + $0x10] sm:$0xff]  ;;  %1173 = vst.msk [vmem:[%s3870_s22 + $0xf8] sm:$0xff] %vm483_vm0, %v1137_v22  ;;  %v4795_v8 = vsel %vm2099_vm3, %v2155_v54, %v2157_v62 }
 0x162   : > { %v1729_v60 = vadd.f32 %v1624_v25, %v1513_v56  ;;  %v4788_v45 = vpop.f32.mrf.mxu0  ;;  %6531 = vst [vmem:[#allocation98_spill] sm:$0xff] %v4795_v8  ;;  %1174 = vst.msk [vmem:[%s3870_s22 + $0x100] sm:$0xff] %vm483_vm0, %v1138_v11  ;;  %v1182_v11 = vld [vmem:[%s3870_s22 + $0x20] sm:$0xff]  ;;  %v1605_v8 = vrot.slane %v4621_v48, 2 }
 0x163   : > { %2626 = vrot.lane.b32.xlu0 %v4277_v34, %s3703_s15  ;;  %2406 = vrot.lane.b32.xlu1 %v4277_v34, %s3704_s23  ;;  %v1329_v20 = vpop.permute.xlu1 %1328  ;;  %v1141_v56 = vadd.f32 %v4626_v61, %v4788_v45 }
 0x164   : > { %v1807_v34 = vld [vmem:[%s3870_s22] sm:$0xff]  ;;  %v4792_v23 = vpop.permute.xlu0 %2384  ;;  %1765 = vst.msk [vmem:[%s3870_s22 + $0x10] sm:$0xff] %vm483_vm0, %v1729_v60  ;;  %v1433_v22 = vadd.f32 %v1329_v20, %v1181_v32  ;;  %v1139_v32 = vadd.f32 %v4626_v61, %v4718_v50  ;;  %v2161_v20 = vrot.slane %v4747_v9, 3 }
 0x165   : > { %v1943_v25 = vadd.f32 %v1842_v14, %v1807_v34  ;;  %1177 = vst.msk [vmem:[%s3870_s22 + $0x118] sm:$0xff] %vm483_vm0, %v1141_v56  ;;  %v2159_v14 = vrot.slane %v4695_v15, 3 }
 0x166   : > { %1469 = vst.msk [vmem:[%s3870_s22 + $0x18] sm:$0xff] %vm483_vm0, %v1433_v22  ;;  %1175 = vst.msk [vmem:[%s3870_s22 + $0x108] sm:$0xff] %vm483_vm0, %v1139_v32  ;;  %v6399_v32 = vrot.slane %v4641_v63, 2 }
 0x167   : > { %1649 = vrot.lane.b32.xlu0 %v4285_v55, %s3703_s15  ;;  %1352 = vrot.lane.b32.xlu1 %v4298_v35, %s3704_s23  ;;  %1977 = vst.msk [vmem:[%s3870_s22] sm:$0xff] %vm483_vm0, %v1943_v25  ;;  %v1808_v60 = vld [vmem:[%s3870_s22 + $0x8] sm:$0xff]  ;;  %v1844_v54 = vpop.permute.xlu1 %1843  ;;  %v1308_v25 = vrot.slane %v4621_v48, 1  ;;  %v4821_v22 = vsel %vm2099_vm3, %v2157_v62, %v2159_v14  ;;  %v1140_v62 = vadd.f32 %v4626_v61, %v4755_v44 }
 0x168   : > { %v1331_v34 = vpop.permute.xlu0 %1330  ;;  %v1944_v35 = vadd.f32 %v1844_v54, %v1808_v60  ;;  %6532 = vst [vmem:[#allocation99_spill] sm:$0xff] %v4821_v22  ;;  %v2368_v60 = vrot.slane %v4632_v26, 4  ;;  %v4832_v54 = vsel %vm2099_vm3, %v2159_v14, %v2161_v20  ;;  %v2880_v22 = vrot.slane %v4632_v26, 5 }
 0x169   : > { %v1434_v56 = vadd.f32 %v1331_v34, %v1182_v11  ;;  %6533 = vst [vmem:[#allocation100_spill] sm:$0xff] %v4832_v54  ;;  %1176 = vst.msk [vmem:[%s3870_s22 + $0x110] sm:$0xff] %vm483_vm0, %v1140_v62  ;;  %v6535_v54 = vrot.slane %v4578_v47, 2 }
 0x16a   : > { %1978 = vst.msk [vmem:[%s3870_s22 + $0x8] sm:$0xff] %vm483_vm0, %v1944_v35 }
 0x16b   : > { %1867 = vrot.lane.b32.xlu1 %v4285_v55, %s3705_s24  ;;  %2408 = vrot.lane.b32.xlu0 %v4305_v31, %s3704_s23  ;;  %1470 = vst.msk [vmem:[%s3870_s22 + $0x20] sm:$0xff] %vm483_vm0, %v1434_v56  ;;  %v1628_v11 = vpop.permute.xlu1 %1627  ;;  %v1809_v48 = vld [vmem:[%s3870_s22 + $0x10] sm:$0xff]  ;;  %v6534_v55 = vrot.slane %v4578_v47, 1  ;;  %v4862_v62 = vsel %vm1547_vm1, %v6535_v54, %v1605_v8  ;;  %v6537_v47 = vrot.slane %v4641_v63, 1 }
 0x16c   : > { %v1846_v34 = vpop.permute.xlu0 %1845 }
 0x16d   : > { %v1945_v61 = vadd.f32 %v1846_v34, %v1809_v48  ;;  %v1514_v56 = vld [vmem:[%s3870_s22 + $0x18] sm:$0xff]  ;;  %v4857_v26 = vsel %vm1250_vm2, %v6534_v55, %v1308_v25  ;;  %v4876_v55 = vsel %vm1547_vm1, %v1605_v8, %v6399_v32  ;;  %v4881_v54 = vsel %vm1250_vm2, %v1308_v25, %v6537_v47 }
 0x16e   : > { %v2031_v35 = vld [vmem:[%s3870_s22] sm:$0xff]  ;;  %v1730_v34 = vadd.f32 %v4759_v49, %v1514_v56  ;;  %v6539_v49 = vrot.slane %v4650_v43, 5 }
 0x16f   : > { %2628 = vrot.lane.b32.xlu1 %v4305_v31, %s3703_s15  ;;  %1354 = vrot.lane.b32.xlu0 %v4315_v7, %s3704_s23  ;;  %v6536_v31 = vrot.slane %v4597_v33, 4  ;;  %v2201_v7 = vadd.f32 %v3907_v3, %v2031_v35  ;;  %1979 = vst.msk [vmem:[%s3870_s22 + $0x10] sm:$0xff] %vm483_vm0, %v1945_v61  ;;  %v6538_v3 = vrot.slane %v4650_v43, 4  ;;  %v6540_v35 = vrot.slane %v4597_v33, 5 }
 0x170   : > { %v4883_v14 = vpop.permute.xlu0 %2606  ;;  %v4893_v8 = vsel %vm2830_vm6, %v2880_v22, %v6539_v49  ;;  %1766 = vst.msk [vmem:[%s3870_s22 + $0x18] sm:$0xff] %vm483_vm0, %v1730_v34 }
 0x171   : > { %v4867_v48 = vsel %vm2314_vm5, %v6536_v31, %v2368_v60  ;;  %v2387_v31 = vpop.permute.xlu1 %2386  ;;  %v4888_v61 = vsel %vm2314_vm5, %v2368_v60, %v6538_v3  ;;  %v4898_v25 = vsel %vm2830_vm6, %v6540_v35, %v2880_v22  ;;  %2235 = vst.msk [vmem:[%s3870_s22] sm:$0xff] %vm483_vm0, %v2201_v7  ;;  %v2032_v56 = vld [vmem:[%s3870_s22 + $0x8] sm:$0xff]  ;;  %v6398_v60 = vrot.slane %v4771_v21, 3 }
 0x172   : > { %v1515_v47 = vld [vmem:[%s3870_s22 + $0x20] sm:$0xff]  ;;  %v2202_v33 = vadd.f32 %v3934_v19, %v2032_v56  ;;  %v1183_v3 = vld [vmem:[%s3870_s22 + $0x28] sm:$0xff] }
 0x173   : > { %1651 = vrot.lane.b32.xlu1 %v4331_v17, %s3703_s15  ;;  %1869 = vrot.lane.b32.xlu0 %v4331_v17, %s3705_s24  ;;  %v1731_v22 = vadd.f32 %v1628_v11, %v1515_v47  ;;  %v4920_v17 = vsel %vm2099_vm3, %v2161_v20, %v6398_v60 }
 0x174   : > { %v1630_v7 = vpop.permute.xlu0 %1629  ;;  %2236 = vst.msk [vmem:[%s3870_s22 + $0x8] sm:$0xff] %vm483_vm0, %v2202_v33 }
 0x175   : > { %v1333_v34 = vpop.permute.xlu1 %1332  ;;  %1767 = vst.msk [vmem:[%s3870_s22 + $0x20] sm:$0xff] %vm483_vm0, %v1731_v22 }
 0x176   : > { %v1435_v49 = vadd.f32 %v1333_v34, %v1183_v3  ;;  %v2033_v19 = vld [vmem:[%s3870_s22 + $0x10] sm:$0xff] }
 0x177   : > { %1801 = vrot.lane.b32.xlu1 %v4350_v51, %s3703_s15  ;;  %1505 = vrot.lane.b32.xlu0 %v4350_v51, %s3704_s23  ;;  %v2203_v11 = vadd.f32 %v3958_v36, %v2033_v19  ;;  %v1810_v56 = vld [vmem:[%s3870_s22 + $0x18] sm:$0xff]  ;;  %v1184_v34 = vld [vmem:[%s3870_s22 + $0x30] sm:$0xff] }
 0x178   : > { %1471 = vst.msk [vmem:[%s3870_s22 + $0x28] sm:$0xff] %vm483_vm0, %v1435_v49  ;;  %v2280_v35 = vld [vmem:[%s3870_s22] sm:$0xff]  ;;  %v4932_v33 = vpop.permute.xlu0 %2388 }
 0x179   : > { %v1848_v47 = vpop.permute.xlu1 %1847  ;;  %v2484_v20 = vadd.f32 %v4757_v13, %v2280_v35  ;;  %2237 = vst.msk [vmem:[%s3870_s22 + $0x10] sm:$0xff] %vm483_vm0, %v2203_v11  ;;  %v1312_v11 = vrot.slane %v4659_v2, 1  ;;  %v1609_v35 = vrot.slane %v4659_v2, 2  ;;  %v2884_v2 = vrot.slane %v4673_v29, 5 }
 0x17a   : > { %v1946_v22 = vadd.f32 %v1848_v47, %v1810_v56  ;;  %v2372_v56 = vrot.slane %v4673_v29, 4  ;;  %v1611_v47 = vrot.slane %v4690_v24, 2  ;;  %v6541_v29 = vrot.slane %v4641_v63, 1 }
 0x17b   : > { %2016 = vrot.lane.b32.xlu0 %v4350_v51, %s3705_s24  ;;  %2410 = vrot.lane.b32.xlu1 %v4343_v39, %s3704_s23  ;;  %2518 = vst.msk [vmem:[%s3870_s22] sm:$0xff] %vm483_vm0, %v2484_v20  ;;  %v2281_v36 = vld [vmem:[%s3870_s22 + $0x8] sm:$0xff] }
 0x17c   : > { %1980 = vst.msk [vmem:[%s3870_s22 + $0x18] sm:$0xff] %vm483_vm0, %v1946_v22  ;;  %v1335_v13 = vpop.permute.xlu0 %1334  ;;  %v2485_v49 = vadd.f32 %v4792_v23, %v2281_v36  ;;  %v1811_v36 = vld [vmem:[%s3870_s22 + $0x20] sm:$0xff] }
 0x17d   : > { %v2609_v3 = vpop.permute.xlu1 %2608  ;;  %v1436_v19 = vadd.f32 %v1335_v13, %v1184_v34  ;;  %v2374_v13 = vrot.slane %v4695_v15, 4 }
 0x17e   : > { %2519 = vst.msk [vmem:[%s3870_s22 + $0x8] sm:$0xff] %vm483_vm0, %v2485_v49  ;;  %v2886_v49 = vrot.slane %v4695_v15, 5  ;;  %v1187_v15 = vld [vmem:[%s3870_s22 + $0x48] sm:$0xff] }
 0x17f   : > { %2630 = vrot.lane.b32.xlu0 %v4343_v39, %s3703_s15  ;;  %2559 = vrot.lane.b32.xlu1 %v4370_v1, %s3704_s23  ;;  %v1516_v51 = vld [vmem:[%s3870_s22 + $0x28] sm:$0xff]  ;;  %1472 = vst.msk [vmem:[%s3870_s22 + $0x30] sm:$0xff] %vm483_vm0, %v1436_v19  ;;  %v1314_v39 = vrot.slane %v4690_v24, 1 }
 0x180   : > { %v1732_v23 = vadd.f32 %v1630_v7, %v1516_v51  ;;  %v2282_v20 = vld [vmem:[%s3870_s22 + $0x10] sm:$0xff]  ;;  %v1850_v34 = vpop.permute.xlu0 %1849  ;;  %v4978_v51 = vsel %vm1250_vm2, %v6541_v29, %v1312_v11 }
 0x181   : > { %v1632_v22 = vpop.permute.xlu1 %1631  ;;  %v2486_v60 = vadd.f32 %v2387_v31, %v2282_v20  ;;  %v1947_v32 = vadd.f32 %v1850_v34, %v1811_v36  ;;  %v6542_v31 = vrot.slane %v4641_v63, 2  ;;  %v6543_v20 = vrot.slane %v4650_v43, 4 }
 0x182   : > { %1768 = vst.msk [vmem:[%s3870_s22 + $0x28] sm:$0xff] %vm483_vm0, %v1732_v23  ;;  %v2574_v7 = vld [vmem:[%s3870_s22] sm:$0xff]  ;;  %v4999_v63 = vsel %vm1547_vm1, %v1609_v35, %v1611_v47  ;;  %v5004_v29 = vsel %vm1250_vm2, %v1312_v11, %v1314_v39 }
 0x183   : > { %v2034_v19 = vld [vmem:[%s3870_s22 + $0x18] sm:$0xff]  ;;  %1653 = vrot.lane.b32.xlu0 %v4353_v58, %s3703_s15  ;;  %1356 = vrot.lane.b32.xlu1 %v4365_v38, %s3704_s23  ;;  %v4983_v23 = vsel %vm1547_vm1, %v6542_v31, %v1609_v35  ;;  %v4988_v36 = vsel %vm2314_vm5, %v6543_v20, %v2372_v56  ;;  %v2702_v38 = vadd.f32 %v4883_v14, %v2574_v7 }
 0x184   : > { %2520 = vst.msk [vmem:[%s3870_s22 + $0x10] sm:$0xff] %vm483_vm0, %v2486_v60  ;;  %v2204_v34 = vadd.f32 %v3992_v52, %v2034_v19  ;;  %1981 = vst.msk [vmem:[%s3870_s22 + $0x20] sm:$0xff] %vm483_vm0, %v1947_v32  ;;  %v2611_v31 = vpop.permute.xlu0 %2610  ;;  %v5009_v52 = vsel %vm2314_vm5, %v2372_v56, %v2374_v13  ;;  %v5014_v32 = vsel %vm2830_vm6, %v2884_v2, %v2886_v49  ;;  %v6544_v60 = vrot.slane %v4650_v43, 5  ;;  %v1185_v19 = vld [vmem:[%s3870_s22 + $0x38] sm:$0xff] }
 0x185   : > { %v2391_v14 = vpop.permute.xlu1 %2390  ;;  %2734 = vst.msk [vmem:[%s3870_s22] sm:$0xff] %vm483_vm0, %v2702_v38  ;;  %v2575_v35 = vld [vmem:[%s3870_s22 + $0x8] sm:$0xff] }
 0x186   : > { %v5019_v11 = vsel %vm2830_vm6, %v6544_v60, %v2884_v2  ;;  %2238 = vst.msk [vmem:[%s3870_s22 + $0x18] sm:$0xff] %vm483_vm0, %v2204_v34  ;;  %v1517_v7 = vld [vmem:[%s3870_s22 + $0x30] sm:$0xff]  ;;  %v2703_v43 = vadd.f32 %v2609_v3, %v2575_v35 }
 0x187   : > { %1871 = vrot.lane.b32.xlu1 %v4353_v58, %s3705_s24  ;;  %2412 = vrot.lane.b32.xlu0 %v4380_v53, %s3704_s23  ;;  %v1733_v56 = vadd.f32 %v1632_v22, %v1517_v7 }
 0x188   : > { %v1634_v2 = vpop.permute.xlu0 %1633  ;;  %2735 = vst.msk [vmem:[%s3870_s22 + $0x8] sm:$0xff] %vm483_vm0, %v2703_v43 }
 0x189   : > { %v1337_v20 = vpop.permute.xlu1 %1336  ;;  %1769 = vst.msk [vmem:[%s3870_s22 + $0x30] sm:$0xff] %vm483_vm0, %v1733_v56  ;;  %v1812_v35 = vld [vmem:[%s3870_s22 + $0x28] sm:$0xff] }
 0x18a   : > { %v1437_v38 = vadd.f32 %v1337_v20, %v1185_v19  ;;  %v1316_v20 = vrot.slane %v4718_v50, 1 }
 0x18b   : > { %v2576_v34 = vld [vmem:[%s3870_s22 + $0x10] sm:$0xff]  ;;  %v2035_v58 = vld [vmem:[%s3870_s22 + $0x20] sm:$0xff]  ;;  %2018 = vrot.lane.b32.xlu1 %v4385_v42, %s3705_s24  ;;  %2561 = vrot.lane.b32.xlu0 %v4398_v18, %s3704_s23 }
 0x18c   : > { %v2704_v3 = vadd.f32 %v2611_v31, %v2576_v34  ;;  %v2205_v22 = vadd.f32 %v4017_v6, %v2035_v58  ;;  %1473 = vst.msk [vmem:[%s3870_s22 + $0x38] sm:$0xff] %vm483_vm0, %v1437_v38  ;;  %v5047_v43 = vpop.permute.xlu0 %2392  ;;  %v2376_v38 = vrot.slane %v4747_v9, 4  ;;  %v1318_v58 = vrot.slane %v4755_v44, 1 }
 0x18d   : > { %v2283_v60 = vld [vmem:[%s3870_s22 + $0x18] sm:$0xff]  ;;  %v1852_v7 = vpop.permute.xlu1 %1851 }
 0x18e   : > { %v2487_v56 = vadd.f32 %v4932_v33, %v2283_v60  ;;  %2736 = vst.msk [vmem:[%s3870_s22 + $0x10] sm:$0xff] %vm483_vm0, %v2704_v3  ;;  %2239 = vst.msk [vmem:[%s3870_s22 + $0x20] sm:$0xff] %vm483_vm0, %v2205_v22  ;;  %v1948_v42 = vadd.f32 %v1852_v7, %v1812_v35  ;;  %v1186_v33 = vld [vmem:[%s3870_s22 + $0x40] sm:$0xff]  ;;  %v1615_v3 = vrot.slane %v4755_v44, 2  ;;  %v2888_v7 = vrot.slane %v4747_v9, 5 }
 0x18f   : > { %2632 = vrot.lane.b32.xlu1 %v4380_v53, %s3703_s15  ;;  %1358 = vrot.lane.b32.xlu0 %v4390_v41, %s3704_s23  ;;  %v1613_v41 = vrot.slane %v4718_v50, 2  ;;  %v2378_v50 = vrot.slane %v4771_v21, 4  ;;  %v5091_v9 = vsel %vm1250_vm2, %v1314_v39, %v1316_v20  ;;  %v5116_v39 = vsel %vm1250_vm2, %v1316_v20, %v1318_v58 }
 0x190   : > { %2521 = vst.msk [vmem:[%s3870_s22 + $0x18] sm:$0xff] %vm483_vm0, %v2487_v56  ;;  %1982 = vst.msk [vmem:[%s3870_s22 + $0x28] sm:$0xff] %vm483_vm0, %v1948_v42  ;;  %v1339_v31 = vpop.permute.xlu0 %1338  ;;  %v2890_v56 = vrot.slane %v4771_v21, 5 }
 0x191   : > { %v2613_v6 = vpop.permute.xlu1 %2612  ;;  %v1438_v19 = vadd.f32 %v1339_v31, %v1186_v33  ;;  %v5111_v24 = vsel %vm1547_vm1, %v1613_v41, %v1615_v3 }
 0x193   : > { %1655 = vrot.lane.b32.xlu1 %v4396_v59, %s3703_s15  ;;  %1873 = vrot.lane.b32.xlu0 %v4396_v59, %s3705_s24  ;;  %v1518_v53 = vld [vmem:[%s3870_s22 + $0x38] sm:$0xff]  ;;  %1474 = vst.msk [vmem:[%s3870_s22 + $0x40] sm:$0xff] %vm483_vm0, %v1438_v19 }
 0x194   : > { %v1734_v34 = vadd.f32 %v1634_v2, %v1518_v53  ;;  %v1813_v59 = vld [vmem:[%s3870_s22 + $0x30] sm:$0xff]  ;;  %v1854_v35 = vpop.permute.xlu0 %1853 }
 0x195   : > { %v2284_v22 = vld [vmem:[%s3870_s22 + $0x20] sm:$0xff]  ;;  %v1636_v60 = vpop.permute.xlu1 %1635  ;;  %v1949_v33 = vadd.f32 %v1854_v35, %v1813_v59  ;;  %v5145_v59 = vld [vmem:[%s3795_s12 + $0x18] sm:$0xff]  }
 0x196   : > { %v2488_v42 = vadd.f32 %v2391_v14, %v2284_v22  ;;  %1770 = vst.msk [vmem:[%s3870_s22 + $0x38] sm:$0xff] %vm483_vm0, %v1734_v34  ;;  %v5096_v14 = vsel %vm1547_vm1, %v1611_v47, %v1613_v41  ;;  %v5131_v41 = vsel %vm2830_vm6, %v2886_v49, %v2888_v7  ;;  %v3706_v49 = vmov 0.0   ;;  %3504 = vmatmul.mubr.msk.bf16.gmra.mxu1 %vm483_vm0, %v5145_v59 }
 0x197   : > { %v2036_v2 = vld [vmem:[%s3870_s22 + $0x28] sm:$0xff]  ;;  %v2577_v31 = vld [vmem:[%s3870_s22 + $0x18] sm:$0xff]  ;;  %2020 = vrot.lane.b32.xlu0 %v4422_v57, %s3705_s24  ;;  %2414 = vrot.lane.b32.xlu1 %v4415_v37, %s3704_s23  ;;  %v5101_v57 = vsel %vm2314_vm5, %v2374_v13, %v2376_v38 }
 0x198   : > { %2522 = vst.msk [vmem:[%s3870_s22 + $0x20] sm:$0xff] %vm483_vm0, %v2488_v42  ;;  %v2206_v19 = vadd.f32 %v4048_v10, %v2036_v2  ;;  %v2705_v53 = vadd.f32 %v2613_v6, %v2577_v31  ;;  %1983 = vst.msk [vmem:[%s3870_s22 + $0x30] sm:$0xff] %vm483_vm0, %v1949_v33  ;;  %v5121_v10 = vsel %vm2314_vm5, %v2376_v38, %v2378_v50  ;;  %3583 = vmatprep.subr.bf16.mxu1 %v3706_v49 }
 0x199   : > { %v2615_v47 = vpop.permute.xlu0 %2614  ;;  %v2395_v13 = vpop.permute.xlu1 %2394  ;;  %v5126_v6 = vsel %vm2830_vm6, %v2888_v7, %v2890_v56 }
 0x19a   : > { %2240 = vst.msk [vmem:[%s3870_s22 + $0x28] sm:$0xff] %vm483_vm0, %v2206_v19  ;;  %2737 = vst.msk [vmem:[%s3870_s22 + $0x18] sm:$0xff] %vm483_vm0, %v2705_v53  ;;  %v1519_v20 = vld [vmem:[%s3870_s22 + $0x40] sm:$0xff] }
 0x19b   : > { %2634 = vrot.lane.b32.xlu0 %v4415_v37, %s3703_s15  ;;  %2563 = vrot.lane.b32.xlu1 %v4435_v12, %s3704_s23  ;;  %v1735_v38 = vadd.f32 %v1636_v60, %v1519_v20  ;;  %v3673_v37 = vld [vmem:[%s6371_s2 + $0x20] ss:$12 sps:$4 sm:$0xff]   ;;  %v3674_v20 = vld [vmem:[%s6371_s2 + $0x8] ss:$12 sps:$4 sm:$0xff]  }
 0x19c   : > { %3584 = vmatpush3.bf16.msra.mxu1 %v3673_v37 }
 0x19d   : > { %v1638_v34 = vpop.permute.xlu0 %1637  ;;  %v1341_v22 = vpop.permute.xlu1 %1340  ;;  %1771 = vst.msk [vmem:[%s3870_s22 + $0x40] sm:$0xff] %vm483_vm0, %v1735_v38  ;;  %3585 = vmatprep.subr.bf16.mxu1 %v3706_v49  ;;  %v1814_v31 = vld [vmem:[%s3870_s22 + $0x38] sm:$0xff]  ;;  %v1188_v38 = vld [vmem:[%s3870_s22 + $0x50] sm:$0xff] }
 0x19e   : > { %v1439_v35 = vadd.f32 %v1341_v22, %v1187_v15  ;;  %v5187_v22 = vld [vmem:[%s3795_s12 + $0x20] ss:$0 sps:$4 sm:$0xff]  }
 0x19f   : > { %v2578_v60 = vld [vmem:[%s3870_s22 + $0x20] sm:$0xff]  ;;  %v2037_v7 = vld [vmem:[%s3870_s22 + $0x30] sm:$0xff]  ;;  %1657 = vrot.lane.b32.xlu0 %v4425_v4, %s3703_s15  ;;  %1360 = vrot.lane.b32.xlu1 %v4430_v0, %s3704_s23  ;;  %v6545_v0 = vmov 0  }
 0x1a0   : > { %v2706_v42 = vadd.f32 %v2615_v47, %v2578_v60  ;;  %v2207_v33 = vadd.f32 %v4074_v28, %v2037_v7  ;;  %1475 = vst.msk [vmem:[%s3870_s22 + $0x48] sm:$0xff] %vm483_vm0, %v1439_v35  ;;  %1024 = vmatprep.mubr.bf16.mxu1 %v6545_v0  ;;  %3586 = vmatpush3.bf16.msra.mxu1 %v3674_v20  ;;  %v5198_v7 = vpop.f32.mrf.mxu0  ;;  %v6547_v20 = vld [vmem:[#allocation62_spill] sm:$0xff] }
 0x1a1   : > { %v2285_v2 = vld [vmem:[%s3870_s22 + $0x28] sm:$0xff]  ;;  %v1856_v19 = vpop.permute.xlu1 %1855  ;;  %v5166_v53 = vpop.permute.xlu0 %2396  ;;  %3505 = vmatmul.mubr.msk.bf16.gmra.mxu1 %vm483_vm0, %v5187_v22 }
 0x1a2   : > { %v2489_v28 = vadd.f32 %v5047_v43, %v2285_v2  ;;  %2738 = vst.msk [vmem:[%s3870_s22 + $0x20] sm:$0xff] %vm483_vm0, %v2706_v42  ;;  %2241 = vst.msk [vmem:[%s3870_s22 + $0x30] sm:$0xff] %vm483_vm0, %v2207_v33  ;;  %v1950_v47 = vadd.f32 %v1856_v19, %v1814_v31  ;;  %v2165_v31 = vrot.slane %v5198_v7, 3  ;;  %v2892_v19 = vrot.slane %v5198_v7, 5  ;;  %3587 = vmatprep.mubr.msk.bf16.mxu1 %vm3707_vm7, %v3706_v49 }
 0x1a3   : > { %1875 = vrot.lane.b32.xlu1 %v4425_v4, %s3705_s24  ;;  %2416 = vrot.lane.b32.xlu0 %v4445_v30, %s3704_s23  ;;  %v6546_v4 = vld [vmem:[#allocation61_spill] sm:$0xff] }
 0x1a4   : > { %2523 = vst.msk [vmem:[%s3870_s22 + $0x28] sm:$0xff] %vm483_vm0, %v2489_v28  ;;  %1984 = vst.msk [vmem:[%s3870_s22 + $0x38] sm:$0xff] %vm483_vm0, %v1950_v47  ;;  %v1815_v2 = vld [vmem:[%s3870_s22 + $0x40] sm:$0xff] }
 0x1a5   : > { %v2617_v43 = vpop.permute.xlu1 %2616  ;;  %v1343_v15 = vpop.permute.xlu0 %1342 }
 0x1a6   : > { %v1440_v35 = vadd.f32 %v1343_v15, %v1188_v38  ;;  %v6548_v38 = vrot.slane %v4771_v21, 3 }
 0x1a7   : > { %2636 = vrot.lane.b32.xlu1 %v4445_v30, %s3703_s15  ;;  %1362 = vrot.lane.b32.xlu0 %v6546_v4, %s3704_s23  ;;  %v1520_v37 = vld [vmem:[%s3870_s22 + $0x48] sm:$0xff] }
 0x1a8   : > { %1476 = vst.msk [vmem:[%s3870_s22 + $0x50] sm:$0xff] %vm483_vm0, %v1440_v35  ;;  %v1736_v60 = vadd.f32 %v1638_v34, %v1520_v37  ;;  %v5217_v15 = vsel %vm2099_vm3, %v6548_v38, %v2165_v31  ;;  %v5229_v37 = vsel %vm2830_vm6, %v2890_v56, %v2892_v19 }
 0x1a9   : > { %v2286_v42 = vld [vmem:[%s3870_s22 + $0x30] sm:$0xff]  ;;  %v1640_v33 = vpop.permute.xlu1 %1639  ;;  %v1858_v30 = vpop.permute.xlu0 %1857 }
 0x1aa   : > { %v2490_v0 = vadd.f32 %v2395_v13, %v2286_v42  ;;  %v1951_v28 = vadd.f32 %v1858_v30, %v1815_v2  ;;  %1772 = vst.msk [vmem:[%s3870_s22 + $0x48] sm:$0xff] %vm483_vm0, %v1736_v60  ;;  %v6549_v13 = vld [vmem:[#allocation22_spill] sm:$0xff] }
 0x1ab   : > { %v2038_v34 = vld [vmem:[%s3870_s22 + $0x38] sm:$0xff]  ;;  %v2579_v47 = vld [vmem:[%s3870_s22 + $0x28] sm:$0xff]  ;;  %1659 = vrot.lane.b32.xlu1 %v6547_v20, %s3703_s15  ;;  %1877 = vrot.lane.b32.xlu0 %v6547_v20, %s3705_s24  ;;  %v6551_v20 = vld [vmem:[#allocation66_spill] sm:$0xff] }
 0x1ac   : > { %2524 = vst.msk [vmem:[%s3870_s22 + $0x30] sm:$0xff] %vm483_vm0, %v2490_v0  ;;  %v2208_v35 = vadd.f32 %v6549_v13, %v2038_v34  ;;  %v2707_v4 = vadd.f32 %v2617_v43, %v2579_v47  ;;  %1985 = vst.msk [vmem:[%s3870_s22 + $0x40] sm:$0xff] %vm483_vm0, %v1951_v28  ;;  %v3675_v2 = vld [vmem:[%s3795_s12] sm:$0xff]   ;;  %v1189_v0 = vld [vmem:[%s3870_s22 + $0x58] sm:$0xff] }
 0x1ad   : > { %v2619_v60 = vpop.permute.xlu0 %2618  ;;  %v2399_v42 = vpop.permute.xlu1 %2398  ;;  %3588 = vmatmul.mubr.msk.bf16.vlgmr.msra.gmra.mxu1 %vm483_vm0, %v3675_v2  ;;  %v6552_v13 = vld [vmem:[#allocation25_spill] sm:$0xff] }
 0x1ae   : > { %2242 = vst.msk [vmem:[%s3870_s22 + $0x38] sm:$0xff] %vm483_vm0, %v2208_v35  ;;  %2739 = vst.msk [vmem:[%s3870_s22 + $0x28] sm:$0xff] %vm483_vm0, %v2707_v4  ;;  %3591 = vmatprep.mubr.msk.bf16.mxu1 %vm3707_vm7, %v3706_v49 }
 0x1af   : > { %v1521_v43 = vld [vmem:[%s3870_s22 + $0x50] sm:$0xff]  ;;  %2638 = vrot.lane.b32.xlu0 %v4471_v5, %s3703_s15  ;;  %2418 = vrot.lane.b32.xlu1 %v4471_v5, %s3704_s23 }
 0x1b0   : > { %v1737_v56 = vadd.f32 %v1640_v33, %v1521_v43  ;;  %v6550_v33 = vld [vmem:[#allocation65_spill] sm:$0xff] }
 0x1b1   : > { %v1642_v30 = vpop.permute.xlu0 %1641  ;;  %v1345_v28 = vpop.permute.xlu1 %1344  ;;  %v1816_v43 = vld [vmem:[%s3870_s22 + $0x48] sm:$0xff] }
 0x1b2   : > { %1773 = vst.msk [vmem:[%s3870_s22 + $0x50] sm:$0xff] %vm483_vm0, %v1737_v56  ;;  %v1441_v34 = vadd.f32 %v1345_v28, %v1189_v0 }
 0x1b3   : > { %v2580_v47 = vld [vmem:[%s3870_s22 + $0x30] sm:$0xff]  ;;  %v2039_v5 = vld [vmem:[%s3870_s22 + $0x40] sm:$0xff]  ;;  %1661 = vrot.lane.b32.xlu0 %v6550_v33, %s3703_s15  ;;  %1364 = vrot.lane.b32.xlu1 %v6551_v20, %s3704_s23 }
 0x1b4   : > { %v2708_v38 = vadd.f32 %v2619_v60, %v2580_v47  ;;  %v2209_v35 = vadd.f32 %v6552_v13, %v2039_v5  ;;  %1477 = vst.msk [vmem:[%s3870_s22 + $0x58] sm:$0xff] %vm483_vm0, %v1441_v34  ;;  %v6553_v60 = vld [vmem:[#allocation68_spill] sm:$0xff]  ;;  %v1190_v47 = vld [vmem:[%s3870_s22 + $0x60] sm:$0xff] }
 0x1b5   : > { %v2287_v4 = vld [vmem:[%s3870_s22 + $0x38] sm:$0xff]  ;;  %v1860_v56 = vpop.permute.xlu1 %1859  ;;  %v5260_v2 = vpop.permute.xlu0 %2400  ;;  %v6554_v20 = vld [vmem:[#allocation70_spill] sm:$0xff] }
 0x1b6   : > { %v2491_v0 = vadd.f32 %v5166_v53, %v2287_v4  ;;  %2740 = vst.msk [vmem:[%s3870_s22 + $0x30] sm:$0xff] %vm483_vm0, %v2708_v38  ;;  %2243 = vst.msk [vmem:[%s3870_s22 + $0x40] sm:$0xff] %vm483_vm0, %v2209_v35  ;;  %v1952_v28 = vadd.f32 %v1860_v56, %v1816_v43  ;;  %v3676_v53 = vld [vmem:[%s3795_s12 + $0x8] sm:$0xff]  }
 0x1b7   : > { %1879 = vrot.lane.b32.xlu1 %v6550_v33, %s3705_s24  ;;  %2420 = vrot.lane.b32.xlu0 %v6553_v60, %s3704_s23 }
 0x1b8   : > { %2525 = vst.msk [vmem:[%s3870_s22 + $0x38] sm:$0xff] %vm483_vm0, %v2491_v0  ;;  %1986 = vst.msk [vmem:[%s3870_s22 + $0x48] sm:$0xff] %vm483_vm0, %v1952_v28  ;;  %3592 = vmatmul.mubr.msk.bf16.gmra.mxu1 %vm483_vm0, %v3676_v53 }
 0x1b9   : > { %v2621_v34 = vpop.permute.xlu1 %2620  ;;  %v1347_v5 = vpop.permute.xlu0 %1346  ;;  %3595 = vmatprep.mubr.msk.bf16.mxu1 %vm3707_vm7, %v3706_v49  ;;  %v1817_v43 = vld [vmem:[%s3870_s22 + $0x50] sm:$0xff] }
 0x1ba   : > { %v1442_v33 = vadd.f32 %v1347_v5, %v1190_v47  ;;  %v6555_v47 = vld [vmem:[#allocation71_spill] sm:$0xff] }
 0x1bb   : > { %2640 = vrot.lane.b32.xlu1 %v6553_v60, %s3703_s15  ;;  %1366 = vrot.lane.b32.xlu0 %v6554_v20, %s3704_s23  ;;  %v1522_v38 = vld [vmem:[%s3870_s22 + $0x58] sm:$0xff] }
 0x1bc   : > { %1478 = vst.msk [vmem:[%s3870_s22 + $0x60] sm:$0xff] %vm483_vm0, %v1442_v33  ;;  %v1738_v13 = vadd.f32 %v1642_v30, %v1522_v38  ;;  %v6556_v30 = vld [vmem:[#allocation30_spill] sm:$0xff]  ;;  %v3677_v33 = vld [vmem:[%s3795_s12 + $0x10] sm:$0xff]  }
 0x1bd   : > { %v2288_v35 = vld [vmem:[%s3870_s22 + $0x40] sm:$0xff]  ;;  %v1644_v4 = vpop.permute.xlu1 %1643  ;;  %v1862_v56 = vpop.permute.xlu0 %1861 }
 0x1be   : > { %v2492_v0 = vadd.f32 %v2399_v42, %v2288_v35  ;;  %v1953_v28 = vadd.f32 %v1862_v56, %v1817_v43  ;;  %1774 = vst.msk [vmem:[%s3870_s22 + $0x58] sm:$0xff] %vm483_vm0, %v1738_v13  ;;  %v1191_v43 = vld [vmem:[%s3870_s22 + $0x68] sm:$0xff] }
 0x1bf   : > { %v2040_v60 = vld [vmem:[%s3870_s22 + $0x48] sm:$0xff]  ;;  %v2581_v53 = vld [vmem:[%s3870_s22 + $0x38] sm:$0xff]  ;;  %1663 = vrot.lane.b32.xlu1 %v6555_v47, %s3703_s15  ;;  %1881 = vrot.lane.b32.xlu0 %v6555_v47, %s3705_s24 }
 0x1c0   : > { %2526 = vst.msk [vmem:[%s3870_s22 + $0x40] sm:$0xff] %vm483_vm0, %v2492_v0  ;;  %v2210_v5 = vadd.f32 %v6556_v30, %v2040_v60  ;;  %v2709_v42 = vadd.f32 %v2621_v34, %v2581_v53  ;;  %1987 = vst.msk [vmem:[%s3870_s22 + $0x50] sm:$0xff] %vm483_vm0, %v1953_v28  ;;  %3596 = vmatmul.mubr.msk.bf16.gmra.mxu1 %vm483_vm0, %v3677_v33  ;;  %v6557_v53 = vld [vmem:[#allocation74_spill] sm:$0xff]  ;;  %v6558_v47 = vld [vmem:[#allocation75_spill] sm:$0xff] }
 0x1c1   : > { %v2623_v20 = vpop.permute.xlu0 %2622  ;;  %v2403_v38 = vpop.permute.xlu1 %2402  ;;  %3599 = vmatprep.mubr.msk.bf16.mxu1 %vm3707_vm7, %v3706_v49 }
 0x1c2   : > { %2244 = vst.msk [vmem:[%s3870_s22 + $0x48] sm:$0xff] %vm483_vm0, %v2210_v5  ;;  %2741 = vst.msk [vmem:[%s3870_s22 + $0x38] sm:$0xff] %vm483_vm0, %v2709_v42 }
 0x1c3   : > { %v1523_v13 = vld [vmem:[%s3870_s22 + $0x60] sm:$0xff]  ;;  %2642 = vrot.lane.b32.xlu0 %v4514_v16, %s3703_s15  ;;  %2422 = vrot.lane.b32.xlu1 %v4514_v16, %s3704_s23  ;;  %v6559_v16 = vld [vmem:[#allocation33_spill] sm:$0xff] }
 0x1c4   : > { %v1739_v34 = vadd.f32 %v1644_v4, %v1523_v13 }
 0x1c5   : > { %v1646_v35 = vpop.permute.xlu0 %1645  ;;  %v1349_v56 = vpop.permute.xlu1 %1348  ;;  %v1818_v42 = vld [vmem:[%s3870_s22 + $0x58] sm:$0xff] }
 0x1c6   : > { %1775 = vst.msk [vmem:[%s3870_s22 + $0x60] sm:$0xff] %vm483_vm0, %v1739_v34  ;;  %v1443_v0 = vadd.f32 %v1349_v56, %v1191_v43  ;;  %v5335_v34 = vpop.f32.mrf.mxu1  ;;  %v6560_v43 = vld [vmem:[#allocation77_spill] sm:$0xff]  ;;  %v1192_v56 = vld [vmem:[%s3870_s22 + $0x70] sm:$0xff] }
 0x1c7   : > { %v2582_v28 = vld [vmem:[%s3870_s22 + $0x40] sm:$0xff]  ;;  %v2041_v60 = vld [vmem:[%s3870_s22 + $0x50] sm:$0xff]  ;;  %1665 = vrot.lane.b32.xlu0 %v6557_v53, %s3703_s15  ;;  %1368 = vrot.lane.b32.xlu1 %v6558_v47, %s3704_s23 }
 0x1c8   : > { %v2710_v30 = vadd.f32 %v2623_v20, %v2582_v28  ;;  %v2211_v4 = vadd.f32 %v6559_v16, %v2041_v60  ;;  %1479 = vst.msk [vmem:[%s3870_s22 + $0x68] sm:$0xff] %vm483_vm0, %v1443_v0  ;;  %3600 = vmatmul.mubr.msk.bf16.gmra.mxu1 %vm483_vm0, %v5145_v59 }
 0x1c9   : > { %v2289_v5 = vld [vmem:[%s3870_s22 + $0x48] sm:$0xff]  ;;  %v1864_v33 = vpop.permute.xlu1 %1863  ;;  %v5331_v13 = vpop.permute.xlu0 %2404  ;;  %3603 = vmatprep.mubr.msk.bf16.mxu1 %vm3707_vm7, %v3706_v49 }
 0x1ca   : > { %v2493_v20 = vadd.f32 %v5260_v2, %v2289_v5  ;;  %2742 = vst.msk [vmem:[%s3870_s22 + $0x40] sm:$0xff] %vm483_vm0, %v2710_v30  ;;  %2245 = vst.msk [vmem:[%s3870_s22 + $0x50] sm:$0xff] %vm483_vm0, %v2211_v4  ;;  %v1954_v59 = vadd.f32 %v1864_v33, %v1818_v42  ;;  %v1013_v49 = vpop.f32.mrf.mxu1 }
 0x1cb   : > { %1883 = vrot.lane.b32.xlu1 %v6557_v53, %s3705_s24  ;;  %2424 = vrot.lane.b32.xlu0 %v6560_v43, %s3704_s23 }
 0x1cc   : > { %2527 = vst.msk [vmem:[%s3870_s22 + $0x48] sm:$0xff] %vm483_vm0, %v2493_v20  ;;  %1988 = vst.msk [vmem:[%s3870_s22 + $0x58] sm:$0xff] %vm483_vm0, %v1954_v59  ;;  %v5351_v60 = vpop.f32.mrf.mxu1 }
 0x1cd   : > { %v2625_v2 = vpop.permute.xlu1 %2624  ;;  %v1351_v0 = vpop.permute.xlu0 %1350  ;;  %v1819_v5 = vld [vmem:[%s3870_s22 + $0x60] sm:$0xff] }
 0x1ce   : > { %v1444_v28 = vadd.f32 %v1351_v0, %v1192_v56  ;;  %v1016_v30 = vpop.f32.mrf.mxu1 }
 0x1cf   : > { %2644 = vrot.lane.b32.xlu1 %v6560_v43, %s3703_s15  ;;  %1370 = vrot.lane.b32.xlu0 %v4581_v40, %s3704_s23  ;;  %v1524_v53 = vld [vmem:[%s3870_s22 + $0x68] sm:$0xff]  ;;  %v1193_v30 = vld [vmem:[%s3870_s22 + $0x78] sm:$0xff] }
 0x1d0   : > { %1480 = vst.msk [vmem:[%s3870_s22 + $0x70] sm:$0xff] %vm483_vm0, %v1444_v28  ;;  %v1740_v47 = vadd.f32 %v1646_v35, %v1524_v53  ;;  %3604 = vmatmul.mubr.msk.bf16.gmra.mxu1 %vm483_vm0, %v5187_v22  ;;  %v1017_v40 = vpop.f32.mrf.mxu1  ;;  %v6561_v35 = vld [vmem:[#allocation80_spill] sm:$0xff]  ;;  %v6562_v22 = vld [vmem:[#allocation38_spill] sm:$0xff]  ;;  %v6563_v53 = vld [vmem:[#allocation81_spill] sm:$0xff] }
 0x1d1   : > { %v2290_v16 = vld [vmem:[%s3870_s22 + $0x50] sm:$0xff]  ;;  %v1648_v4 = vpop.permute.xlu1 %1647  ;;  %v1866_v42 = vpop.permute.xlu0 %1865 }
 0x1d2   : > { %v2494_v33 = vadd.f32 %v2403_v38, %v2290_v16  ;;  %v1955_v20 = vadd.f32 %v1866_v42, %v1819_v5  ;;  %1776 = vst.msk [vmem:[%s3870_s22 + $0x68] sm:$0xff] %vm483_vm0, %v1740_v47  ;;  %v6565_v40 = vld [vmem:[#allocation84_spill] sm:$0xff] }
 0x1d3   : > { %v2042_v59 = vld [vmem:[%s3870_s22 + $0x58] sm:$0xff]  ;;  %v2583_v43 = vld [vmem:[%s3870_s22 + $0x48] sm:$0xff]  ;;  %1667 = vrot.lane.b32.xlu1 %v6561_v35, %s3703_s15  ;;  %1885 = vrot.lane.b32.xlu0 %v6561_v35, %s3705_s24 }
 0x1d4   : > { %2528 = vst.msk [vmem:[%s3870_s22 + $0x50] sm:$0xff] %vm483_vm0, %v2494_v33  ;;  %v2212_v49 = vadd.f32 %v6562_v22, %v2042_v59  ;;  %v2711_v38 = vadd.f32 %v2625_v2, %v2583_v43  ;;  %1989 = vst.msk [vmem:[%s3870_s22 + $0x60] sm:$0xff] %vm483_vm0, %v1955_v20  ;;  %v6564_v20 = vld [vmem:[#allocation82_spill] sm:$0xff] }
 0x1d5   : > { %v2627_v56 = vpop.permute.xlu0 %2626  ;;  %v2407_v0 = vpop.permute.xlu1 %2406 }
 0x1d6   : > { %2246 = vst.msk [vmem:[%s3870_s22 + $0x58] sm:$0xff] %vm483_vm0, %v2212_v49  ;;  %2743 = vst.msk [vmem:[%s3870_s22 + $0x48] sm:$0xff] %vm483_vm0, %v2711_v38 }
 0x1d7   : > { %v1525_v28 = vld [vmem:[%s3870_s22 + $0x70] sm:$0xff]  ;;  %2646 = vrot.lane.b32.xlu0 %v6563_v53, %s3703_s15  ;;  %2426 = vrot.lane.b32.xlu1 %v6563_v53, %s3704_s23 }
 0x1d8   : > { %v1741_v2 = vadd.f32 %v1648_v4, %v1525_v28  ;;  %v6566_v4 = vld [vmem:[#allocation41_spill] sm:$0xff] }
 0x1d9   : > { %v1650_v47 = vpop.permute.xlu0 %1649  ;;  %v1353_v16 = vpop.permute.xlu1 %1352  ;;  %v1820_v22 = vld [vmem:[%s3870_s22 + $0x68] sm:$0xff] }
 0x1da   : > { %1777 = vst.msk [vmem:[%s3870_s22 + $0x70] sm:$0xff] %vm483_vm0, %v1741_v2  ;;  %v1445_v5 = vadd.f32 %v1353_v16, %v1193_v30 }
 0x1db   : > { %v2584_v42 = vld [vmem:[%s3870_s22 + $0x50] sm:$0xff]  ;;  %v2043_v33 = vld [vmem:[%s3870_s22 + $0x60] sm:$0xff]  ;;  %1669 = vrot.lane.b32.xlu0 %v6564_v20, %s3703_s15  ;;  %1372 = vrot.lane.b32.xlu1 %v6565_v40, %s3704_s23 }
 0x1dc   : > { %v2712_v59 = vadd.f32 %v2627_v56, %v2584_v42  ;;  %v2213_v43 = vadd.f32 %v6566_v4, %v2043_v33  ;;  %1481 = vst.msk [vmem:[%s3870_s22 + $0x78] sm:$0xff] %vm483_vm0, %v1445_v5  ;;  %v6567_v56 = vld [vmem:[#allocation85_spill] sm:$0xff] }
 0x1dd   : > { %v2291_v35 = vld [vmem:[%s3870_s22 + $0x58] sm:$0xff]  ;;  %v1868_v49 = vpop.permute.xlu1 %1867  ;;  %v2409_v38 = vpop.permute.xlu0 %2408 }
 0x1de   : > { %v2495_v28 = vadd.f32 %v5331_v13, %v2291_v35  ;;  %2744 = vst.msk [vmem:[%s3870_s22 + $0x50] sm:$0xff] %vm483_vm0, %v2712_v59  ;;  %2247 = vst.msk [vmem:[%s3870_s22 + $0x60] sm:$0xff] %vm483_vm0, %v2213_v43  ;;  %v1956_v53 = vadd.f32 %v1868_v49, %v1820_v22  ;;  %v1194_v13 = vld [vmem:[%s3870_s22 + $0x80] sm:$0xff]  ;;  %v1503_v35 = vld [vmem:[%s3870_s22 + $0x11f] sm:$0x1] }
 0x1df   : > { %1887 = vrot.lane.b32.xlu1 %v6564_v20, %s3705_s24  ;;  %2428 = vrot.lane.b32.xlu0 %v6567_v56, %s3704_s23  ;;  %v6568_v49 = vld [vmem:[#allocation90_spill] sm:$0xff] }
 0x1e0   : > { %2529 = vst.msk [vmem:[%s3870_s22 + $0x58] sm:$0xff] %vm483_vm0, %v2495_v28  ;;  %1990 = vst.msk [vmem:[%s3870_s22 + $0x68] sm:$0xff] %vm483_vm0, %v1956_v53 }
 0x1e1   : > { %v2629_v2 = vpop.permute.xlu1 %2628  ;;  %v1355_v30 = vpop.permute.xlu0 %1354  ;;  %v1821_v40 = vld [vmem:[%s3870_s22 + $0x70] sm:$0xff] }
 0x1e2   : > { %v1446_v16 = vadd.f32 %v1355_v30, %v1194_v13 }
 0x1e3   : > { %2648 = vrot.lane.b32.xlu1 %v6567_v56, %s3703_s15  ;;  %1374 = vrot.lane.b32.xlu0 %v4704_v46, %s3704_s23  ;;  %v1526_v5 = vld [vmem:[%s3870_s22 + $0x78] sm:$0xff] }
 0x1e4   : > { %1482 = vst.msk [vmem:[%s3870_s22 + $0x80] sm:$0xff] %vm483_vm0, %v1446_v16  ;;  %v1742_v42 = vadd.f32 %v1650_v47, %v1526_v5  ;;  %v6569_v47 = vld [vmem:[#allocation46_spill] sm:$0xff]  ;;  %v6570_v16 = vld [vmem:[#allocation91_spill] sm:$0xff] }
 0x1e5   : > { %v2292_v33 = vld [vmem:[%s3870_s22 + $0x60] sm:$0xff]  ;;  %v1652_v20 = vpop.permute.xlu1 %1651  ;;  %v1870_v59 = vpop.permute.xlu0 %1869 }
 0x1e6   : > { %v2496_v4 = vadd.f32 %v2407_v0, %v2292_v33  ;;  %v1957_v43 = vadd.f32 %v1870_v59, %v1821_v40  ;;  %1778 = vst.msk [vmem:[%s3870_s22 + $0x78] sm:$0xff] %vm483_vm0, %v1742_v42  ;;  %v6571_v40 = vld [vmem:[#allocation92_spill] sm:$0xff]  ;;  %v6572_v59 = vld [vmem:[#allocation93_spill] sm:$0xff] }
 0x1e7   : > { %v2044_v22 = vld [vmem:[%s3870_s22 + $0x68] sm:$0xff]  ;;  %v2585_v46 = vld [vmem:[%s3870_s22 + $0x58] sm:$0xff]  ;;  %1671 = vrot.lane.b32.xlu1 %v6568_v49, %s3703_s15  ;;  %1889 = vrot.lane.b32.xlu0 %v6568_v49, %s3705_s24 }
 0x1e8   : > { %2530 = vst.msk [vmem:[%s3870_s22 + $0x60] sm:$0xff] %vm483_vm0, %v2496_v4  ;;  %v2214_v28 = vadd.f32 %v6569_v47, %v2044_v22  ;;  %v2713_v0 = vadd.f32 %v2629_v2, %v2585_v46  ;;  %1991 = vst.msk [vmem:[%s3870_s22 + $0x70] sm:$0xff] %vm483_vm0, %v1957_v43  ;;  %v6573_v4 = vld [vmem:[#allocation50_spill] sm:$0xff] }
 0x1e9   : > { %v5437_v53 = vpop.permute.xlu1 %1801  ;;  %v1506_v56 = vpop.permute.xlu0 %1505 }
 0x1ea   : > { %2248 = vst.msk [vmem:[%s3870_s22 + $0x68] sm:$0xff] %vm483_vm0, %v2214_v28  ;;  %2745 = vst.msk [vmem:[%s3870_s22 + $0x58] sm:$0xff] %vm483_vm0, %v2713_v0  ;;  %v1508_v13 = vadd.f32 %v1506_v56, %v1503_v35  ;;  %v6574_v28 = vld [vmem:[#allocation94_spill] sm:$0xff]  ;;  %v1195_v56 = vld [vmem:[%s3870_s22 + $0x88] sm:$0xff] }
 0x1eb   : > { %v1527_v30 = vld [vmem:[%s3870_s22 + $0x80] sm:$0xff]  ;;  %2650 = vrot.lane.b32.xlu0 %v6570_v16, %s3703_s15  ;;  %2430 = vrot.lane.b32.xlu1 %v6570_v16, %s3704_s23 }
 0x1ec   : > { %v1743_v2 = vadd.f32 %v1652_v20, %v1527_v30  ;;  %1510 = vst.msk [vmem:[%s3870_s22 + $0x11f] sm:$0x1] %vm1509_vm8, %v1508_v13 }
 0x1ed   : > { %v5449_v5 = vpop.permute.xlu0 %2016  ;;  %v2411_v42 = vpop.permute.xlu1 %2410  ;;  %v1822_v16 = vld [vmem:[%s3870_s22 + $0x78] sm:$0xff] }
 0x1ee   : > { %1779 = vst.msk [vmem:[%s3870_s22 + $0x80] sm:$0xff] %vm483_vm0, %v1743_v2 }
 0x1ef   : > { %v2045_v33 = vld [vmem:[%s3870_s22 + $0x70] sm:$0xff]  ;;  %1673 = vrot.lane.b32.xlu0 %v6571_v40, %s3703_s15  ;;  %1376 = vrot.lane.b32.xlu1 %v6572_v59, %s3704_s23  ;;  %v2586_v20 = vld [vmem:[%s3870_s22 + $0x60] sm:$0xff] }
 0x1f0   : > { %v2215_v43 = vadd.f32 %v6573_v4, %v2045_v33 }
 0x1f1   : > { %v2293_v35 = vld [vmem:[%s3870_s22 + $0x68] sm:$0xff]  ;;  %v2631_v22 = vpop.permute.xlu0 %2630  ;;  %v5461_v46 = vpop.permute.xlu1 %2559 }
 0x1f2   : > { %v2497_v49 = vadd.f32 %v2409_v38, %v2293_v35  ;;  %2249 = vst.msk [vmem:[%s3870_s22 + $0x70] sm:$0xff] %vm483_vm0, %v2215_v43  ;;  %v2714_v47 = vadd.f32 %v2631_v22, %v2586_v20  ;;  %v1196_v20 = vld [vmem:[%s3870_s22 + $0x90] sm:$0xff] }
 0x1f3   : > { %1891 = vrot.lane.b32.xlu1 %v6571_v40, %s3705_s24  ;;  %2432 = vrot.lane.b32.xlu0 %v6574_v28, %s3704_s23 }
 0x1f4   : > { %2531 = vst.msk [vmem:[%s3870_s22 + $0x68] sm:$0xff] %vm483_vm0, %v2497_v49  ;;  %2746 = vst.msk [vmem:[%s3870_s22 + $0x60] sm:$0xff] %vm483_vm0, %v2714_v47 }
 0x1f5   : > { %v1654_v0 = vpop.permute.xlu0 %1653  ;;  %v1357_v13 = vpop.permute.xlu1 %1356 }
 0x1f6   : > { %v1447_v30 = vadd.f32 %v1357_v13, %v1195_v56  ;;  %v1823_v13 = vld [vmem:[%s3870_s22 + $0x80] sm:$0xff] }
 0x1f7   : > { %2652 = vrot.lane.b32.xlu1 %v6574_v28, %s3703_s15  ;;  %1378 = vrot.lane.b32.xlu0 %v4857_v26, %s3704_s23 }
 0x1f8   : > { %1483 = vst.msk [vmem:[%s3870_s22 + $0x88] sm:$0xff] %vm483_vm0, %v1447_v30 }
 0x1f9   : > { %v2294_v38 = vld [vmem:[%s3870_s22 + $0x70] sm:$0xff]  ;;  %v1872_v2 = vpop.permute.xlu1 %1871  ;;  %v2413_v33 = vpop.permute.xlu0 %2412 }
 0x1fa   : > { %v2498_v40 = vadd.f32 %v2411_v42, %v2294_v38  ;;  %v1958_v59 = vadd.f32 %v1872_v2, %v1822_v16 }
 0x1fb   : > { %1675 = vrot.lane.b32.xlu1 %v4862_v62, %s3703_s15  ;;  %1893 = vrot.lane.b32.xlu0 %v4862_v62, %s3705_s24  ;;  %v2587_v43 = vld [vmem:[%s3870_s22 + $0x68] sm:$0xff] }
 0x1fc   : > { %2532 = vst.msk [vmem:[%s3870_s22 + $0x70] sm:$0xff] %vm483_vm0, %v2498_v40  ;;  %1992 = vst.msk [vmem:[%s3870_s22 + $0x78] sm:$0xff] %vm483_vm0, %v1958_v59 }
 0x1fd   : > { %v5490_v26 = vpop.permute.xlu1 %2018  ;;  %v5492_v4 = vpop.permute.xlu0 %2561 }
 0x1ff   : > { %2654 = vrot.lane.b32.xlu0 %v4867_v48, %s3703_s15  ;;  %2434 = vrot.lane.b32.xlu1 %v4867_v48, %s3704_s23  ;;  %v1528_v42 = vld [vmem:[%s3870_s22 + $0x88] sm:$0xff] }
 0x200   : > { %v1744_v62 = vadd.f32 %v1654_v0, %v1528_v42  ;;  %v6575_v48 = vld [vmem:[#allocation55_spill] sm:$0xff] }
 0x201   : > { %v2633_v35 = vpop.permute.xlu1 %2632  ;;  %v1359_v22 = vpop.permute.xlu0 %1358 }
 0x202   : > { %v2715_v49 = vadd.f32 %v2633_v35, %v2587_v43  ;;  %v1448_v47 = vadd.f32 %v1359_v22, %v1196_v20  ;;  %1780 = vst.msk [vmem:[%s3870_s22 + $0x88] sm:$0xff] %vm483_vm0, %v1744_v62  ;;  %v1197_v22 = vld [vmem:[%s3870_s22 + $0x98] sm:$0xff] }
 0x203   : > { %v2046_v28 = vld [vmem:[%s3870_s22 + $0x78] sm:$0xff]  ;;  %1677 = vrot.lane.b32.xlu0 %v4876_v55, %s3703_s15  ;;  %1380 = vrot.lane.b32.xlu1 %v4881_v54, %s3704_s23  ;;  %v2588_v59 = vld [vmem:[%s3870_s22 + $0x70] sm:$0xff] }
 0x204   : > { %v2216_v0 = vadd.f32 %v6575_v48, %v2046_v28  ;;  %2747 = vst.msk [vmem:[%s3870_s22 + $0x68] sm:$0xff] %vm483_vm0, %v2715_v49  ;;  %1484 = vst.msk [vmem:[%s3870_s22 + $0x90] sm:$0xff] %vm483_vm0, %v1448_v47 }
 0x205   : > { %v1656_v56 = vpop.permute.xlu1 %1655  ;;  %v1874_v30 = vpop.permute.xlu0 %1873 }
 0x206   : > { %2250 = vst.msk [vmem:[%s3870_s22 + $0x78] sm:$0xff] %vm483_vm0, %v2216_v0  ;;  %v1959_v38 = vadd.f32 %v1874_v30, %v1823_v13  ;;  %v1198_v30 = vld [vmem:[%s3870_s22 + $0xa0] sm:$0xff] }
 0x207   : > { %1895 = vrot.lane.b32.xlu1 %v4876_v55, %s3705_s24  ;;  %2436 = vrot.lane.b32.xlu0 %v4888_v61, %s3704_s23 }
 0x208   : > { %1993 = vst.msk [vmem:[%s3870_s22 + $0x80] sm:$0xff] %vm483_vm0, %v1959_v38 }
 0x209   : > { %v5522_v54 = vpop.permute.xlu0 %2020  ;;  %v2415_v16 = vpop.permute.xlu1 %2414 }
 0x20b   : > { %v1529_v2 = vld [vmem:[%s3870_s22 + $0x90] sm:$0xff]  ;;  %2656 = vrot.lane.b32.xlu1 %v4888_v61, %s3703_s15  ;;  %1382 = vrot.lane.b32.xlu0 %v4978_v51, %s3704_s23  ;;  %v6576_v61 = vld [vmem:[#allocation57_spill] sm:$0xff] }
 0x20c   : > { %v1745_v55 = vadd.f32 %v1656_v56, %v1529_v2 }
 0x20d   : > { %v2295_v40 = vld [vmem:[%s3870_s22 + $0x78] sm:$0xff]  ;;  %v2635_v42 = vpop.permute.xlu0 %2634  ;;  %v5531_v62 = vpop.permute.xlu1 %2563 }
 0x20e   : > { %v2499_v43 = vadd.f32 %v2413_v33, %v2295_v40  ;;  %1781 = vst.msk [vmem:[%s3870_s22 + $0x90] sm:$0xff] %vm483_vm0, %v1745_v55  ;;  %v2716_v35 = vadd.f32 %v2635_v42, %v2588_v59 }
 0x20f   : > { %v2047_v20 = vld [vmem:[%s3870_s22 + $0x80] sm:$0xff]  ;;  %1679 = vrot.lane.b32.xlu1 %v4983_v23, %s3703_s15  ;;  %1897 = vrot.lane.b32.xlu0 %v4983_v23, %s3705_s24  ;;  %v1824_v23 = vld [vmem:[%s3870_s22 + $0x88] sm:$0xff] }
 0x210   : > { %2533 = vst.msk [vmem:[%s3870_s22 + $0x78] sm:$0xff] %vm483_vm0, %v2499_v43  ;;  %v2217_v51 = vadd.f32 %v6576_v61, %v2047_v20  ;;  %2748 = vst.msk [vmem:[%s3870_s22 + $0x70] sm:$0xff] %vm483_vm0, %v2716_v35  ;;  %v6577_v20 = vld [vmem:[#allocation59_spill] sm:$0xff] }
 0x211   : > { %v1658_v33 = vpop.permute.xlu0 %1657  ;;  %v1361_v49 = vpop.permute.xlu1 %1360 }
 0x212   : > { %2251 = vst.msk [vmem:[%s3870_s22 + $0x80] sm:$0xff] %vm483_vm0, %v2217_v51  ;;  %v1449_v47 = vadd.f32 %v1361_v49, %v1197_v22 }
 0x213   : > { %2658 = vrot.lane.b32.xlu0 %v4988_v36, %s3703_s15  ;;  %2438 = vrot.lane.b32.xlu1 %v4988_v36, %s3704_s23 }
 0x214   : > { %1485 = vst.msk [vmem:[%s3870_s22 + $0x98] sm:$0xff] %vm483_vm0, %v1449_v47 }
 0x215   : > { %v1876_v28 = vpop.permute.xlu1 %1875  ;;  %v2417_v48 = vpop.permute.xlu0 %2416  ;;  %v1825_v42 = vld [vmem:[%s3870_s22 + $0x90] sm:$0xff] }
 0x216   : > { %v1960_v0 = vadd.f32 %v1876_v28, %v1824_v23  ;;  %v1199_v23 = vld [vmem:[%s3870_s22 + $0xa8] sm:$0xff] }
 0x217   : > { %1681 = vrot.lane.b32.xlu0 %v4999_v63, %s3703_s15  ;;  %1384 = vrot.lane.b32.xlu1 %v5004_v29, %s3704_s23  ;;  %v2589_v36 = vld [vmem:[%s3870_s22 + $0x78] sm:$0xff] }
 0x218   : > { %1994 = vst.msk [vmem:[%s3870_s22 + $0x88] sm:$0xff] %vm483_vm0, %v1960_v0 }
 0x219   : > { %v2296_v56 = vld [vmem:[%s3870_s22 + $0x80] sm:$0xff]  ;;  %v2637_v13 = vpop.permute.xlu1 %2636  ;;  %v1363_v38 = vpop.permute.xlu0 %1362 }
 0x21a   : > { %v2500_v2 = vadd.f32 %v2415_v16, %v2296_v56  ;;  %v2717_v55 = vadd.f32 %v2637_v13, %v2589_v36  ;;  %v1450_v40 = vadd.f32 %v1363_v38, %v1198_v30 }
 0x21b   : > { %1899 = vrot.lane.b32.xlu1 %v4999_v63, %s3705_s24  ;;  %2440 = vrot.lane.b32.xlu0 %v5009_v52, %s3704_s23  ;;  %v1530_v29 = vld [vmem:[%s3870_s22 + $0x98] sm:$0xff] }
 0x21c   : > { %2534 = vst.msk [vmem:[%s3870_s22 + $0x80] sm:$0xff] %vm483_vm0, %v2500_v2  ;;  %2749 = vst.msk [vmem:[%s3870_s22 + $0x78] sm:$0xff] %vm483_vm0, %v2717_v55  ;;  %v1746_v16 = vadd.f32 %v1658_v33, %v1530_v29  ;;  %v1617_v29 = vrot.slane %v4788_v45, 2 }
 0x21d   : > { %1486 = vst.msk [vmem:[%s3870_s22 + $0xa0] sm:$0xff] %vm483_vm0, %v1450_v40  ;;  %v1660_v59 = vpop.permute.xlu1 %1659  ;;  %v1878_v43 = vpop.permute.xlu0 %1877 }
 0x21e   : > { %v1961_v35 = vadd.f32 %v1878_v43, %v1825_v42  ;;  %1782 = vst.msk [vmem:[%s3870_s22 + $0x98] sm:$0xff] %vm483_vm0, %v1746_v16  ;;  %v1320_v42 = vrot.slane %v4788_v45, 1 }
 0x21f   : > { %v2048_v63 = vld [vmem:[%s3870_s22 + $0x88] sm:$0xff]  ;;  %2660 = vrot.lane.b32.xlu1 %v5009_v52, %s3703_s15  ;;  %1386 = vrot.lane.b32.xlu0 %v5091_v9, %s3704_s23 }
 0x220   : > { %v2218_v61 = vadd.f32 %v6577_v20, %v2048_v63  ;;  %1995 = vst.msk [vmem:[%s3870_s22 + $0x90] sm:$0xff] %vm483_vm0, %v1961_v35 }
 0x221   : > { %v2639_v51 = vpop.permute.xlu0 %2638  ;;  %v2419_v33 = vpop.permute.xlu1 %2418 }
 0x222   : > { %2252 = vst.msk [vmem:[%s3870_s22 + $0x88] sm:$0xff] %vm483_vm0, %v2218_v61 }
 0x223   : > { %v2590_v49 = vld [vmem:[%s3870_s22 + $0x80] sm:$0xff]  ;;  %1683 = vrot.lane.b32.xlu1 %v5096_v14, %s3703_s15  ;;  %1901 = vrot.lane.b32.xlu0 %v5096_v14, %s3705_s24  ;;  %v6578_v14 = vld [vmem:[#allocation63_spill] sm:$0xff] }
 0x224   : > { %v1531_v22 = vld [vmem:[%s3870_s22 + $0xa0] sm:$0xff]  ;;  %v2718_v9 = vadd.f32 %v2639_v51, %v2590_v49 }
 0x225   : > { %v1747_v52 = vadd.f32 %v1660_v59, %v1531_v22  ;;  %v1662_v47 = vpop.permute.xlu0 %1661  ;;  %v1365_v28 = vpop.permute.xlu1 %1364  ;;  %v1826_v30 = vld [vmem:[%s3870_s22 + $0x98] sm:$0xff] }
 0x226   : > { %2750 = vst.msk [vmem:[%s3870_s22 + $0x80] sm:$0xff] %vm483_vm0, %v2718_v9  ;;  %v1451_v0 = vadd.f32 %v1365_v28, %v1199_v23  ;;  %v6579_v9 = vld [vmem:[#allocation67_spill] sm:$0xff]  ;;  %v1618_v28 = vsel %vm1547_vm1, %v1615_v3, %v1617_v29 }
 0x227   : > { %1783 = vst.msk [vmem:[%s3870_s22 + $0xa0] sm:$0xff] %vm483_vm0, %v1747_v52  ;;  %v2049_v56 = vld [vmem:[%s3870_s22 + $0x90] sm:$0xff]  ;;  %2442 = vrot.lane.b32.xlu1 %v5101_v57, %s3704_s23  ;;  %1685 = vrot.lane.b32.xlu0 %v5111_v24, %s3703_s15 }
 0x228   : > { %v2219_v36 = vadd.f32 %v6578_v14, %v2049_v56  ;;  %1487 = vst.msk [vmem:[%s3870_s22 + $0xa8] sm:$0xff] %vm483_vm0, %v1451_v0  ;;  %v2380_v14 = vrot.slane %v5198_v7, 4 }
 0x229   : > { %v2297_v13 = vld [vmem:[%s3870_s22 + $0x88] sm:$0xff]  ;;  %v1880_v38 = vpop.permute.xlu1 %1879  ;;  %v2421_v2 = vpop.permute.xlu0 %2420 }
 0x22a   : > { %v2501_v55 = vadd.f32 %v2417_v48, %v2297_v13  ;;  %2253 = vst.msk [vmem:[%s3870_s22 + $0x90] sm:$0xff] %vm483_vm0, %v2219_v36  ;;  %v1962_v40 = vadd.f32 %v1880_v38, %v1826_v30  ;;  %v1200_v48 = vld [vmem:[%s3870_s22 + $0xb0] sm:$0xff]  ;;  %v1201_v13 = vld [vmem:[%s3870_s22 + $0xb8] sm:$0xff] }
 0x22b   : > { %1388 = vrot.lane.b32.xlu1 %v5116_v39, %s3704_s23  ;;  %2444 = vrot.lane.b32.xlu0 %v5121_v10, %s3704_s23 }
 0x22c   : > { %2535 = vst.msk [vmem:[%s3870_s22 + $0x88] sm:$0xff] %vm483_vm0, %v2501_v55  ;;  %1996 = vst.msk [vmem:[%s3870_s22 + $0x98] sm:$0xff] %vm483_vm0, %v1962_v40  ;;  %v6580_v40 = vld [vmem:[#allocation72_spill] sm:$0xff] }
 0x22d   : > { %v2641_v16 = vpop.permute.xlu1 %2640  ;;  %v1367_v59 = vpop.permute.xlu0 %1366 }
 0x22e   : > { %v1452_v43 = vadd.f32 %v1367_v59, %v1200_v48  ;;  %v1827_v61 = vld [vmem:[%s3870_s22 + $0xa0] sm:$0xff] }
 0x22f   : > { %1903 = vrot.lane.b32.xlu1 %v5111_v24, %s3705_s24  ;;  %1689 = vrot.lane.b32.xlu0 %v1617_v29, %s3703_s15  ;;  %v1532_v39 = vld [vmem:[%s3870_s22 + $0xa8] sm:$0xff]  ;;  %v1321_v24 = vsel %vm1250_vm2, %v1318_v58, %v1320_v42 }
 0x230   : > { %1488 = vst.msk [vmem:[%s3870_s22 + $0xb0] sm:$0xff] %vm483_vm0, %v1452_v43  ;;  %v1748_v35 = vadd.f32 %v1662_v47, %v1532_v39 }
 0x231   : > { %v2298_v63 = vld [vmem:[%s3870_s22 + $0x90] sm:$0xff]  ;;  %v1664_v20 = vpop.permute.xlu1 %1663  ;;  %v1882_v51 = vpop.permute.xlu0 %1881 }
 0x232   : > { %v2502_v45 = vadd.f32 %v2419_v33, %v2298_v63  ;;  %v1963_v22 = vadd.f32 %v1882_v51, %v1827_v61  ;;  %1784 = vst.msk [vmem:[%s3870_s22 + $0xa8] sm:$0xff] %vm483_vm0, %v1748_v35  ;;  %v2381_v35 = vsel %vm2314_vm5, %v2378_v50, %v2380_v14  ;;  %v1202_v63 = vld [vmem:[%s3870_s22 + $0xc0] sm:$0xff] }
 0x233   : > { %v2050_v49 = vld [vmem:[%s3870_s22 + $0x98] sm:$0xff]  ;;  %v2591_v52 = vld [vmem:[%s3870_s22 + $0x88] sm:$0xff]  ;;  %1392 = vrot.lane.b32.xlu1 %v1320_v42, %s3704_s23  ;;  %1390 = vrot.lane.b32.xlu0 %v1321_v24, %s3704_s23 }
 0x234   : > { %2536 = vst.msk [vmem:[%s3870_s22 + $0x90] sm:$0xff] %vm483_vm0, %v2502_v45  ;;  %v2220_v47 = vadd.f32 %v6579_v9, %v2050_v49  ;;  %v2719_v33 = vadd.f32 %v2641_v16, %v2591_v52  ;;  %1997 = vst.msk [vmem:[%s3870_s22 + $0xa0] sm:$0xff] %vm483_vm0, %v1963_v22 }
 0x235   : > { %v2643_v23 = vpop.permute.xlu0 %2642  ;;  %v2423_v58 = vpop.permute.xlu1 %2422 }
 0x236   : > { %2254 = vst.msk [vmem:[%s3870_s22 + $0x98] sm:$0xff] %vm483_vm0, %v2220_v47  ;;  %2751 = vst.msk [vmem:[%s3870_s22 + $0x88] sm:$0xff] %vm483_vm0, %v2719_v33 }
 0x237   : > { %v1533_v0 = vld [vmem:[%s3870_s22 + $0xb0] sm:$0xff]  ;;  %1907 = vrot.lane.b32.xlu1 %v1617_v29, %s3705_s24  ;;  %1905 = vrot.lane.b32.xlu0 %v1618_v28, %s3705_s24 }
 0x238   : > { %v1749_v56 = vadd.f32 %v1664_v20, %v1533_v0 }
 0x239   : > { %v1666_v36 = vpop.permute.xlu0 %1665  ;;  %v1369_v30 = vpop.permute.xlu1 %1368  ;;  %v1828_v48 = vld [vmem:[%s3870_s22 + $0xa8] sm:$0xff] }
 0x23a   : > { %1785 = vst.msk [vmem:[%s3870_s22 + $0xb0] sm:$0xff] %vm483_vm0, %v1749_v56  ;;  %v1453_v44 = vadd.f32 %v1369_v30, %v1201_v13 }
 0x23b   : > { %v2592_v3 = vld [vmem:[%s3870_s22 + $0x90] sm:$0xff]  ;;  %v2051_v38 = vld [vmem:[%s3870_s22 + $0xa0] sm:$0xff]  ;;  %1687 = vrot.lane.b32.xlu1 %v1618_v28, %s3703_s15  ;;  %2448 = vrot.lane.b32.xlu0 %v2380_v14, %s3704_s23 }
 0x23c   : > { %v2720_v55 = vadd.f32 %v2643_v23, %v2592_v3  ;;  %v2221_v29 = vadd.f32 %v6580_v40, %v2051_v38  ;;  %1489 = vst.msk [vmem:[%s3870_s22 + $0xb8] sm:$0xff] %vm483_vm0, %v1453_v44  ;;  %v6582_v38 = vld [vmem:[#allocation79_spill] sm:$0xff] }
 0x23d   : > { %v2299_v16 = vld [vmem:[%s3870_s22 + $0x98] sm:$0xff]  ;;  %v1884_v59 = vpop.permute.xlu1 %1883  ;;  %v2425_v42 = vpop.permute.xlu0 %2424 }
 0x23e   : > { %v2503_v43 = vadd.f32 %v2421_v2, %v2299_v16  ;;  %2752 = vst.msk [vmem:[%s3870_s22 + $0x90] sm:$0xff] %vm483_vm0, %v2720_v55  ;;  %2255 = vst.msk [vmem:[%s3870_s22 + $0xa0] sm:$0xff] %vm483_vm0, %v2221_v29  ;;  %v1964_v39 = vadd.f32 %v1884_v59, %v1828_v48 }
 0x23f   : > { %2662 = vrot.lane.b32.xlu0 %v5101_v57, %s3703_s15  ;;  %2446 = vrot.lane.b32.xlu1 %v2381_v35, %s3704_s23 }
 0x240   : > { %2537 = vst.msk [vmem:[%s3870_s22 + $0x98] sm:$0xff] %vm483_vm0, %v2503_v43  ;;  %1998 = vst.msk [vmem:[%s3870_s22 + $0xa8] sm:$0xff] %vm483_vm0, %v1964_v39  ;;  %v6583_v39 = vld [vmem:[#allocation10_spill] sm:$0xff] }
 0x241   : > { %v2645_v2 = vpop.permute.xlu1 %2644  ;;  %v1371_v20 = vpop.permute.xlu0 %1370  ;;  %v1829_v45 = vld [vmem:[%s3870_s22 + $0xb0] sm:$0xff] }
 0x242   : > { %v1454_v61 = vadd.f32 %v1371_v20, %v1202_v63 }
 0x243   : > { %2666 = vrot.lane.b32.xlu0 %v2381_v35, %s3703_s15  ;;  %2664 = vrot.lane.b32.xlu1 %v5121_v10, %s3703_s15  ;;  %v1534_v21 = vld [vmem:[%s3870_s22 + $0xb8] sm:$0xff]  ;;  %v6581_v10 = vld [vmem:[#allocation76_spill] sm:$0xff]  ;;  %v6584_v35 = vld [vmem:[#allocation7_spill] sm:$0xff] }
 0x244   : > { %1490 = vst.msk [vmem:[%s3870_s22 + $0xc0] sm:$0xff] %vm483_vm0, %v1454_v61  ;;  %v1750_v50 = vadd.f32 %v1666_v36, %v1534_v21  ;;  %v6585_v61 = vld [vmem:[#allocation16_spill] sm:$0xff]  ;;  %v6586_v21 = vld [vmem:[#allocation13_spill] sm:$0xff] }
 0x245   : > { %v2300_v57 = vld [vmem:[%s3870_s22 + $0xa0] sm:$0xff]  ;;  %v1668_v51 = vpop.permute.xlu1 %1667  ;;  %v1886_v22 = vpop.permute.xlu0 %1885 }
 0x246   : > { %v2504_v24 = vadd.f32 %v2423_v58, %v2300_v57  ;;  %v1965_v49 = vadd.f32 %v1886_v22, %v1829_v45  ;;  %1786 = vst.msk [vmem:[%s3870_s22 + $0xb8] sm:$0xff] %vm483_vm0, %v1750_v50 }
 0x247   : > { %v2052_v52 = vld [vmem:[%s3870_s22 + $0xa8] sm:$0xff]  ;;  %v2593_v9 = vld [vmem:[%s3870_s22 + $0x98] sm:$0xff]  ;;  %2773 = vrot.lane.b32.xlu0 %v4370_v1, %s3703_s15  ;;  %2668 = vrot.lane.b32.xlu1 %v2380_v14, %s3703_s15 }
 0x248   : > { %2538 = vst.msk [vmem:[%s3870_s22 + $0xa0] sm:$0xff] %vm483_vm0, %v2504_v24  ;;  %v2222_v47 = vadd.f32 %v6581_v10, %v2052_v52  ;;  %v2721_v33 = vadd.f32 %v2645_v2, %v2593_v9  ;;  %1999 = vst.msk [vmem:[%s3870_s22 + $0xb0] sm:$0xff] %vm483_vm0, %v1965_v49  ;;  %v1203_v14 = vld [vmem:[%s3870_s22 + $0xc8] sm:$0xff] }
 0x249   : > { %v2647_v23 = vpop.permute.xlu0 %2646  ;;  %v2427_v58 = vpop.permute.xlu1 %2426 }
 0x24a   : > { %2256 = vst.msk [vmem:[%s3870_s22 + $0xa8] sm:$0xff] %vm483_vm0, %v2222_v47  ;;  %2753 = vst.msk [vmem:[%s3870_s22 + $0x98] sm:$0xff] %vm483_vm0, %v2721_v33  ;;  %v6587_v47 = vld [vmem:[#allocation23_spill] sm:$0xff] }
 0x24b   : > { %v1535_v28 = vld [vmem:[%s3870_s22 + $0xc0] sm:$0xff]  ;;  %2777 = vrot.lane.b32.xlu0 %v4435_v12, %s3703_s15  ;;  %2775 = vrot.lane.b32.xlu1 %v4398_v18, %s3703_s15  ;;  %v6588_v33 = vld [vmem:[#allocation19_spill] sm:$0xff] }
 0x24c   : > { %v1751_v0 = vadd.f32 %v1668_v51, %v1535_v28 }
 0x24d   : > { %v1670_v56 = vpop.permute.xlu0 %1669  ;;  %v1373_v36 = vpop.permute.xlu1 %1372  ;;  %v1830_v29 = vld [vmem:[%s3870_s22 + $0xb8] sm:$0xff] }
 0x24e   : > { %1787 = vst.msk [vmem:[%s3870_s22 + $0xc0] sm:$0xff] %vm483_vm0, %v1751_v0  ;;  %v1455_v13 = vadd.f32 %v1373_v36, %v1203_v14  ;;  %v6590_v36 = vld [vmem:[#allocation31_spill] sm:$0xff] }
 0x24f   : > { %v2594_v30 = vld [vmem:[%s3870_s22 + $0xa0] sm:$0xff]  ;;  %v2053_v44 = vld [vmem:[%s3870_s22 + $0xb0] sm:$0xff]  ;;  %2781 = vrot.lane.b32.xlu0 %v5351_v60, %s3703_s15  ;;  %2779 = vrot.lane.b32.xlu1 %v5335_v34, %s3703_s15 }
 0x250   : > { %v2722_v3 = vadd.f32 %v2647_v23, %v2594_v30  ;;  %v2223_v55 = vadd.f32 %v6582_v38, %v2053_v44  ;;  %1491 = vst.msk [vmem:[%s3870_s22 + $0xc8] sm:$0xff] %vm483_vm0, %v1455_v13  ;;  %v6589_v23 = vld [vmem:[#allocation83_spill] sm:$0xff]  ;;  %v1205_v38 = vld [vmem:[%s3870_s22 + $0xd8] sm:$0xff] }
 0x251   : > { %v2301_v40 = vld [vmem:[%s3870_s22 + $0xa8] sm:$0xff]  ;;  %v1888_v16 = vpop.permute.xlu1 %1887  ;;  %v2429_v48 = vpop.permute.xlu0 %2428 }
 0x252   : > { %v2505_v59 = vadd.f32 %v2425_v42, %v2301_v40  ;;  %2754 = vst.msk [vmem:[%s3870_s22 + $0xa0] sm:$0xff] %vm483_vm0, %v2722_v3  ;;  %2257 = vst.msk [vmem:[%s3870_s22 + $0xb0] sm:$0xff] %vm483_vm0, %v2223_v55  ;;  %v1966_v43 = vadd.f32 %v1888_v16, %v1830_v29  ;;  %v1204_v42 = vld [vmem:[%s3870_s22 + $0xd0] sm:$0xff]  ;;  %v6591_v13 = vld [vmem:[#allocation27_spill] sm:$0xff] }
 0x253   : > { %2896 = vrot.lane.b32.xlu0 %v6583_v39, %s3705_s24  ;;  %2894 = vrot.lane.b32.xlu1 %v6584_v35, %s3705_s24  ;;  %v6593_v39 = vld [vmem:[#allocation35_spill] sm:$0xff] }
 0x254   : > { %2539 = vst.msk [vmem:[%s3870_s22 + $0xa8] sm:$0xff] %vm483_vm0, %v2505_v59  ;;  %2000 = vst.msk [vmem:[%s3870_s22 + $0xb8] sm:$0xff] %vm483_vm0, %v1966_v43  ;;  %v6592_v43 = vld [vmem:[#allocation39_spill] sm:$0xff] }
 0x255   : > { %v2649_v2 = vpop.permute.xlu1 %2648  ;;  %v1375_v63 = vpop.permute.xlu0 %1374  ;;  %v1831_v22 = vld [vmem:[%s3870_s22 + $0xc0] sm:$0xff] }
 0x256   : > { %v1456_v20 = vadd.f32 %v1375_v63, %v1204_v42  ;;  %v1020_v44 = vpop.f32.mrf.mxu1 }
 0x257   : > { %2900 = vrot.lane.b32.xlu0 %v6585_v61, %s3705_s24  ;;  %2898 = vrot.lane.b32.xlu1 %v6586_v21, %s3705_s24  ;;  %v1536_v50 = vld [vmem:[%s3870_s22 + $0xc8] sm:$0xff] }
 0x258   : > { %1492 = vst.msk [vmem:[%s3870_s22 + $0xd0] sm:$0xff] %vm483_vm0, %v1456_v20  ;;  %v1752_v57 = vadd.f32 %v1670_v56, %v1536_v50  ;;  %v1021_v29 = vpop.f32.mrf.mxu1 }
 0x259   : > { %v2302_v51 = vld [vmem:[%s3870_s22 + $0xb0] sm:$0xff]  ;;  %v1672_v45 = vpop.permute.xlu1 %1671  ;;  %v1890_v24 = vpop.permute.xlu0 %1889 }
 0x25a   : > { %v2506_v49 = vadd.f32 %v2427_v58, %v2302_v51  ;;  %v1967_v52 = vadd.f32 %v1890_v24, %v1831_v22  ;;  %1788 = vst.msk [vmem:[%s3870_s22 + $0xc8] sm:$0xff] %vm483_vm0, %v1752_v57  ;;  %v1022_v63 = vpop.f32.mrf.mxu1  ;;  %v6595_v22 = vld [vmem:[#allocation47_spill] sm:$0xff] }
 0x25b   : > { %v2054_v9 = vld [vmem:[%s3870_s22 + $0xb8] sm:$0xff]  ;;  %v2595_v10 = vld [vmem:[%s3870_s22 + $0xa8] sm:$0xff]  ;;  %2904 = vrot.lane.b32.xlu0 %v6587_v47, %s3705_s24  ;;  %2902 = vrot.lane.b32.xlu1 %v6588_v33, %s3705_s24  ;;  %v6597_v33 = vld [vmem:[#allocation56_spill] sm:$0xff] }
 0x25c   : > { %2540 = vst.msk [vmem:[%s3870_s22 + $0xb0] sm:$0xff] %vm483_vm0, %v2506_v49  ;;  %v2224_v28 = vadd.f32 %v6589_v23, %v2054_v9  ;;  %v2723_v0 = vadd.f32 %v2649_v2, %v2595_v10  ;;  %2001 = vst.msk [vmem:[%s3870_s22 + $0xc0] sm:$0xff] %vm483_vm0, %v1967_v52  ;;  %v6594_v2 = vld [vmem:[#allocation88_spill] sm:$0xff]  ;;  %v6596_v24 = vld [vmem:[#allocation43_spill] sm:$0xff] }
 0x25d   : > { %v2651_v58 = vpop.permute.xlu0 %2650  ;;  %v2431_v56 = vpop.permute.xlu1 %2430  ;;  %v1206_v52 = vld [vmem:[%s3870_s22 + $0xe0] sm:$0xff]  ;;  %v6598_v23 = vld [vmem:[#allocation52_spill] sm:$0xff] }
 0x25e   : > { %2258 = vst.msk [vmem:[%s3870_s22 + $0xb8] sm:$0xff] %vm483_vm0, %v2224_v28  ;;  %2755 = vst.msk [vmem:[%s3870_s22 + $0xa8] sm:$0xff] %vm483_vm0, %v2723_v0 }
 0x25f   : > { %v1537_v14 = vld [vmem:[%s3870_s22 + $0xd0] sm:$0xff]  ;;  %2908 = vrot.lane.b32.xlu0 %v6590_v36, %s3705_s24  ;;  %2906 = vrot.lane.b32.xlu1 %v6591_v13, %s3705_s24 }
 0x260   : > { %v1753_v30 = vadd.f32 %v1672_v45, %v1537_v14  ;;  %v1023_v45 = vpop.f32.mrf.mxu1 }
 0x261   : > { %v1674_v3 = vpop.permute.xlu0 %1673  ;;  %v1377_v55 = vpop.permute.xlu1 %1376  ;;  %v1832_v61 = vld [vmem:[%s3870_s22 + $0xc8] sm:$0xff] }
 0x262   : > { %1789 = vst.msk [vmem:[%s3870_s22 + $0xd0] sm:$0xff] %vm483_vm0, %v1753_v30  ;;  %v1457_v40 = vadd.f32 %v1377_v55, %v1205_v38  ;;  %v1207_v45 = vld [vmem:[%s3870_s22 + $0xe8] sm:$0xff] }
 0x263   : > { %v2596_v16 = vld [vmem:[%s3870_s22 + $0xb0] sm:$0xff]  ;;  %v2055_v59 = vld [vmem:[%s3870_s22 + $0xc0] sm:$0xff]  ;;  %2912 = vrot.lane.b32.xlu0 %v6592_v43, %s3705_s24  ;;  %2910 = vrot.lane.b32.xlu1 %v6593_v39, %s3705_s24 }
 0x264   : > { %v2724_v35 = vadd.f32 %v2651_v58, %v2596_v16  ;;  %v2225_v42 = vadd.f32 %v6594_v2, %v2055_v59  ;;  %1493 = vst.msk [vmem:[%s3870_s22 + $0xd8] sm:$0xff] %vm483_vm0, %v1457_v40  ;;  %v6599_v16 = vld [vmem:[#allocation60_spill] sm:$0xff]  ;;  %v6601_v59 = vld [vmem:[#allocation89_spill] sm:$0xff] }
 0x265   : > { %v2303_v20 = vld [vmem:[%s3870_s22 + $0xb8] sm:$0xff]  ;;  %v1892_v21 = vpop.permute.xlu1 %1891  ;;  %v5783_v50 = vpop.permute.xlu0 %2432 }
 0x266   : > { %v2507_v57 = vadd.f32 %v2429_v48, %v2303_v20  ;;  %2756 = vst.msk [vmem:[%s3870_s22 + $0xb0] sm:$0xff] %vm483_vm0, %v2724_v35  ;;  %2259 = vst.msk [vmem:[%s3870_s22 + $0xc0] sm:$0xff] %vm483_vm0, %v2225_v42  ;;  %v1968_v51 = vadd.f32 %v1892_v21, %v1832_v61  ;;  %v1026_v48 = vpop.f32.mrf.mxu1  ;;  %v6602_v20 = vld [vmem:[#allocation69_spill] sm:$0xff]  ;;  %v6603_v61 = vld [vmem:[#allocation64_spill] sm:$0xff] }
 0x267   : > { %2916 = vrot.lane.b32.xlu0 %v6595_v22, %s3705_s24  ;;  %2914 = vrot.lane.b32.xlu1 %v6596_v24, %s3705_s24 }
 0x268   : > { %2541 = vst.msk [vmem:[%s3870_s22 + $0xb8] sm:$0xff] %vm483_vm0, %v2507_v57  ;;  %2002 = vst.msk [vmem:[%s3870_s22 + $0xc8] sm:$0xff] %vm483_vm0, %v1968_v51  ;;  %v1027_v47 = vpop.f32.mrf.mxu1 }
 0x269   : > { %v2653_v49 = vpop.permute.xlu1 %2652  ;;  %v1379_v9 = vpop.permute.xlu0 %1378  ;;  %v1833_v13 = vld [vmem:[%s3870_s22 + $0xd0] sm:$0xff] }
 0x26a   : > { %v1458_v10 = vadd.f32 %v1379_v9, %v1206_v52  ;;  %v1028_v58 = vpop.f32.mrf.mxu1  ;;  %v6604_v9 = vld [vmem:[#allocation78_spill] sm:$0xff] }
 0x26b   : > { %2920 = vrot.lane.b32.xlu0 %v6597_v33, %s3705_s24  ;;  %2918 = vrot.lane.b32.xlu1 %v6598_v23, %s3705_s24  ;;  %v1538_v28 = vld [vmem:[%s3870_s22 + $0xd8] sm:$0xff] }
 0x26c   : > { %1494 = vst.msk [vmem:[%s3870_s22 + $0xe0] sm:$0xff] %vm483_vm0, %v1458_v10  ;;  %v1754_v0 = vadd.f32 %v1674_v3, %v1538_v28  ;;  %v1029_v55 = vpop.f32.mrf.mxu1  ;;  %v6600_v3 = vld [vmem:[#allocation58_spill] sm:$0xff]  ;;  %v6605_v10 = vld [vmem:[#allocation73_spill] sm:$0xff] }
 0x26d   : > { %v2304_v14 = vld [vmem:[%s3870_s22 + $0xc0] sm:$0xff]  ;;  %v1676_v36 = vpop.permute.xlu1 %1675  ;;  %v1894_v30 = vpop.permute.xlu0 %1893  ;;  %v6606_v33 = vld [vmem:[#allocation97_spill] sm:$0xff]  ;;  %v6608_v55 = vld [vmem:[#allocation87_spill] sm:$0xff] }
 0x26e   : > { %v2508_v44 = vadd.f32 %v2431_v56, %v2304_v14  ;;  %v1969_v38 = vadd.f32 %v1894_v30, %v1833_v13  ;;  %1790 = vst.msk [vmem:[%s3870_s22 + $0xd8] sm:$0xff] %vm483_vm0, %v1754_v0  ;;  %v5820_v39 = vpop.f32.mrf.mxu1 }
 0x26f   : > { %v2056_v40 = vld [vmem:[%s3870_s22 + $0xc8] sm:$0xff]  ;;  %v2597_v29 = vld [vmem:[%s3870_s22 + $0xb8] sm:$0xff]  ;;  %2924 = vrot.lane.b32.xlu0 %v6599_v16, %s3705_s24  ;;  %2922 = vrot.lane.b32.xlu1 %v6600_v3, %s3705_s24 }
 0x270   : > { %2542 = vst.msk [vmem:[%s3870_s22 + $0xc0] sm:$0xff] %vm483_vm0, %v2508_v44  ;;  %v2226_v43 = vadd.f32 %v6601_v59, %v2056_v40  ;;  %v2725_v56 = vadd.f32 %v2653_v49, %v2597_v29  ;;  %2003 = vst.msk [vmem:[%s3870_s22 + $0xd0] sm:$0xff] %vm483_vm0, %v1969_v38  ;;  %v3589_v42 = vpop.f32.mrf.mxu1  ;;  %v6607_v38 = vld [vmem:[#allocation86_spill] sm:$0xff]  ;;  %v1208_v29 = vld [vmem:[%s3870_s22 + $0xf0] sm:$0xff] }
 0x271   : > { %v2655_v35 = vpop.permute.xlu0 %2654  ;;  %v2435_v2 = vpop.permute.xlu1 %2434 }
 0x272   : > { %2260 = vst.msk [vmem:[%s3870_s22 + $0xc8] sm:$0xff] %vm483_vm0, %v2226_v43  ;;  %2757 = vst.msk [vmem:[%s3870_s22 + $0xb8] sm:$0xff] %vm483_vm0, %v2725_v56  ;;  %v5831_v57 = vpop.f32.mrf.mxu1  ;;  %v6609_v43 = vld [vmem:[#allocation95_spill] sm:$0xff]  ;;  %v6610_v56 = vld [vmem:[#allocation96_spill] sm:$0xff] }
 0x273   : > { %v1539_v63 = vld [vmem:[%s3870_s22 + $0xe0] sm:$0xff]  ;;  %2928 = vrot.lane.b32.xlu0 %v6602_v20, %s3705_s24  ;;  %2926 = vrot.lane.b32.xlu1 %v6603_v61, %s3705_s24 }
 0x274   : > { %v1755_v21 = vadd.f32 %v1676_v36, %v1539_v63  ;;  %v3590_v48 = vpop.f32.mrf.mxu1 }
 0x275   : > { %v1678_v51 = vpop.permute.xlu0 %1677  ;;  %v1381_v22 = vpop.permute.xlu1 %1380  ;;  %v1834_v58 = vld [vmem:[%s3870_s22 + $0xd8] sm:$0xff] }
 0x276   : > { %1791 = vst.msk [vmem:[%s3870_s22 + $0xe0] sm:$0xff] %vm483_vm0, %v1755_v21  ;;  %v1459_v24 = vadd.f32 %v1381_v22, %v1207_v45 }
 0x277   : > { %v2598_v49 = vld [vmem:[%s3870_s22 + $0xc0] sm:$0xff]  ;;  %v2057_v52 = vld [vmem:[%s3870_s22 + $0xd0] sm:$0xff]  ;;  %2932 = vrot.lane.b32.xlu0 %v6604_v9, %s3705_s24  ;;  %2930 = vrot.lane.b32.xlu1 %v6605_v10, %s3705_s24 }
 0x278   : > { %v2726_v47 = vadd.f32 %v2655_v35, %v2598_v49  ;;  %v2227_v23 = vadd.f32 %v6606_v33, %v2057_v52  ;;  %1495 = vst.msk [vmem:[%s3870_s22 + $0xe8] sm:$0xff] %vm483_vm0, %v1459_v24  ;;  %v5845_v28 = vpop.f32.mrf.mxu1 }
 0x279   : > { %v2305_v0 = vld [vmem:[%s3870_s22 + $0xc8] sm:$0xff]  ;;  %v1896_v14 = vpop.permute.xlu1 %1895  ;;  %v5849_v36 = vpop.permute.xlu0 %2436 }
 0x27a   : > { %v2509_v13 = vadd.f32 %v5783_v50, %v2305_v0  ;;  %2758 = vst.msk [vmem:[%s3870_s22 + $0xc0] sm:$0xff] %vm483_vm0, %v2726_v47  ;;  %2261 = vst.msk [vmem:[%s3870_s22 + $0xd0] sm:$0xff] %vm483_vm0, %v2227_v23  ;;  %v1970_v30 = vadd.f32 %v1896_v14, %v1834_v58  ;;  %v3593_v44 = vpop.f32.mrf.mxu1  ;;  %v1209_v0 = vld [vmem:[%s3870_s22 + $0xf8] sm:$0xff] }
 0x27b   : > { %2936 = vrot.lane.b32.xlu0 %v6607_v38, %s3705_s24  ;;  %2934 = vrot.lane.b32.xlu1 %v6608_v55, %s3705_s24 }
 0x27c   : > { %2543 = vst.msk [vmem:[%s3870_s22 + $0xc8] sm:$0xff] %vm483_vm0, %v2509_v13  ;;  %2004 = vst.msk [vmem:[%s3870_s22 + $0xd8] sm:$0xff] %vm483_vm0, %v1970_v30  ;;  %v5864_v50 = vpop.f32.mrf.mxu1 }
 0x27d   : > { %v2657_v40 = vpop.permute.xlu1 %2656  ;;  %v1383_v16 = vpop.permute.xlu0 %1382  ;;  %v1835_v21 = vld [vmem:[%s3870_s22 + $0xe0] sm:$0xff] }
 0x27e   : > { %v1460_v3 = vadd.f32 %v1383_v16, %v1208_v29  ;;  %v3594_v59 = vpop.f32.mrf.mxu1 }
 0x27f   : > { %2940 = vrot.lane.b32.xlu0 %v6609_v43, %s3705_s24  ;;  %2938 = vrot.lane.b32.xlu1 %v6610_v56, %s3705_s24  ;;  %v1540_v35 = vld [vmem:[%s3870_s22 + $0xe8] sm:$0xff]  ;;  %v1210_v56 = vld [vmem:[%s3870_s22 + $0x100] sm:$0xff] }
 0x280   : > { %1496 = vst.msk [vmem:[%s3870_s22 + $0xf0] sm:$0xff] %vm483_vm0, %v1460_v3  ;;  %v1756_v42 = vadd.f32 %v1678_v51, %v1540_v35  ;;  %v5874_v63 = vpop.f32.mrf.mxu1 }
 0x281   : > { %v2306_v20 = vld [vmem:[%s3870_s22 + $0xd0] sm:$0xff]  ;;  %v1680_v61 = vpop.permute.xlu1 %1679  ;;  %v1898_v45 = vpop.permute.xlu0 %1897 }
 0x282   : > { %v2510_v22 = vadd.f32 %v2435_v2, %v2306_v20  ;;  %v1971_v24 = vadd.f32 %v1898_v45, %v1835_v21  ;;  %1792 = vst.msk [vmem:[%s3870_s22 + $0xe8] sm:$0xff] %vm483_vm0, %v1756_v42  ;;  %v3597_v48 = vpop.f32.mrf.mxu1 }
 0x283   : > { %v2058_v49 = vld [vmem:[%s3870_s22 + $0xd8] sm:$0xff]  ;;  %v2599_v52 = vld [vmem:[%s3870_s22 + $0xc8] sm:$0xff]  ;;  %2944 = vrot.lane.b32.xlu0 %v4893_v8, %s3705_s24  ;;  %2942 = vrot.lane.b32.xlu1 %v4898_v25, %s3705_s24 }
 0x284   : > { %2544 = vst.msk [vmem:[%s3870_s22 + $0xd0] sm:$0xff] %vm483_vm0, %v2510_v22  ;;  %v2228_v51 = vadd.f32 %v4781_v27, %v2058_v49  ;;  %v2727_v2 = vadd.f32 %v2657_v40, %v2599_v52  ;;  %2005 = vst.msk [vmem:[%s3870_s22 + $0xe0] sm:$0xff] %vm483_vm0, %v1971_v24  ;;  %v1084_v9 = vpop.f32.mrf.mxu1 }
 0x285   : > { %v2659_v10 = vpop.permute.xlu0 %2658  ;;  %v2439_v47 = vpop.permute.xlu1 %2438  ;;  %v6612_v9 = vld [vmem:[#allocation99_spill] sm:$0xff] }
 0x286   : > { %2262 = vst.msk [vmem:[%s3870_s22 + $0xd8] sm:$0xff] %vm483_vm0, %v2228_v51  ;;  %2759 = vst.msk [vmem:[%s3870_s22 + $0xc8] sm:$0xff] %vm483_vm0, %v2727_v2  ;;  %v3598_v8 = vpop.f32.mrf.mxu1 }
 0x287   : > { %v1541_v25 = vld [vmem:[%s3870_s22 + $0xf0] sm:$0xff]  ;;  %2948 = vrot.lane.b32.xlu0 %v5014_v32, %s3705_s24  ;;  %2946 = vrot.lane.b32.xlu1 %v5019_v11, %s3705_s24  ;;  %v6611_v11 = vld [vmem:[#allocation98_spill] sm:$0xff] }
 0x288   : > { %v1757_v27 = vadd.f32 %v1680_v61, %v1541_v25  ;;  %v1088_v33 = vpop.f32.mrf.mxu1 }
 0x289   : > { %v1682_v23 = vpop.permute.xlu0 %1681  ;;  %v1385_v58 = vpop.permute.xlu1 %1384  ;;  %v1836_v29 = vld [vmem:[%s3870_s22 + $0xe8] sm:$0xff] }
 0x28a   : > { %1793 = vst.msk [vmem:[%s3870_s22 + $0xf0] sm:$0xff] %vm483_vm0, %v1757_v27  ;;  %v1461_v14 = vadd.f32 %v1385_v58, %v1209_v0  ;;  %v3601_v13 = vpop.f32.mrf.mxu1  ;;  %v1211_v33 = vld [vmem:[%s3870_s22 + $0x108] sm:$0xff] }
 0x28b   : > { %v2600_v30 = vld [vmem:[%s3870_s22 + $0xd0] sm:$0xff]  ;;  %v2059_v44 = vld [vmem:[%s3870_s22 + $0xe0] sm:$0xff]  ;;  %2952 = vrot.lane.b32.xlu0 %v5126_v6, %s3705_s24  ;;  %2950 = vrot.lane.b32.xlu1 %v5131_v41, %s3705_s24 }
 0x28c   : > { %v2728_v32 = vadd.f32 %v2659_v10, %v2600_v30  ;;  %v2229_v38 = vadd.f32 %v6611_v11, %v2059_v44  ;;  %1497 = vst.msk [vmem:[%s3870_s22 + $0xf8] sm:$0xff] %vm483_vm0, %v1461_v14  ;;  %v1090_v55 = vpop.f32.mrf.mxu1  ;;  %v6613_v13 = vld [vmem:[#allocation100_spill] sm:$0xff] }
 0x28d   : > { %v2307_v40 = vld [vmem:[%s3870_s22 + $0xd8] sm:$0xff]  ;;  %v1900_v16 = vpop.permute.xlu1 %1899  ;;  %v2441_v3 = vpop.permute.xlu0 %2440 }
 0x28e   : > { %v2511_v59 = vadd.f32 %v5849_v36, %v2307_v40  ;;  %2760 = vst.msk [vmem:[%s3870_s22 + $0xd0] sm:$0xff] %vm483_vm0, %v2728_v32  ;;  %2263 = vst.msk [vmem:[%s3870_s22 + $0xe0] sm:$0xff] %vm483_vm0, %v2229_v38  ;;  %v1972_v6 = vadd.f32 %v1900_v16, %v1836_v29  ;;  %v3602_v41 = vpop.f32.mrf.mxu1  ;;  %v1213_v40 = vld [vmem:[%s3870_s22 + $0x118] sm:$0x7f]  ;;  %v1212_v16 = vld [vmem:[%s3870_s22 + $0x110] sm:$0xff] }
 0x28f   : > { %2956 = vrot.lane.b32.xlu0 %v2892_v19, %s3705_s24  ;;  %2954 = vrot.lane.b32.xlu1 %v5229_v37, %s3705_s24 }
 0x290   : > { %2545 = vst.msk [vmem:[%s3870_s22 + $0xd8] sm:$0xff] %vm483_vm0, %v2511_v59  ;;  %2006 = vst.msk [vmem:[%s3870_s22 + $0xe8] sm:$0xff] %vm483_vm0, %v1972_v6  ;;  %v1094_v36 = vpop.f32.mrf.mxu1 }
 0x291   : > { %v2661_v43 = vpop.permute.xlu1 %2660  ;;  %v1387_v35 = vpop.permute.xlu0 %1386  ;;  %v1837_v22 = vld [vmem:[%s3870_s22 + $0xf0] sm:$0xff] }
 0x292   : > { %v1462_v42 = vadd.f32 %v1387_v35, %v1210_v56  ;;  %v3605_v20 = vpop.f32.mrf.mxu1 }
 0x293   : > { %3061 = vrot.lane.b32.xlu0 %v4398_v18, %s3705_s24  ;;  %3059 = vrot.lane.b32.xlu1 %v4370_v1, %s3705_s24  ;;  %v1542_v19 = vld [vmem:[%s3870_s22 + $0xf8] sm:$0xff] }
 0x294   : > { %1498 = vst.msk [vmem:[%s3870_s22 + $0x100] sm:$0xff] %vm483_vm0, %v1462_v42  ;;  %v1758_v37 = vadd.f32 %v1682_v23, %v1542_v19  ;;  %v1096_v61 = vpop.f32.mrf.mxu1 }
 0x295   : > { %v2308_v21 = vld [vmem:[%s3870_s22 + $0xe0] sm:$0xff]  ;;  %v1684_v45 = vpop.permute.xlu1 %1683  ;;  %v1902_v24 = vpop.permute.xlu0 %1901 }
 0x296   : > { %v2512_v48 = vadd.f32 %v2439_v47, %v2308_v21  ;;  %v1973_v49 = vadd.f32 %v1902_v24, %v1837_v22  ;;  %1794 = vst.msk [vmem:[%s3870_s22 + $0xf8] sm:$0xff] %vm483_vm0, %v1758_v37  ;;  %v3606_v52 = vpop.f32.mrf.mxu1 }
 0x297   : > { %v2060_v51 = vld [vmem:[%s3870_s22 + $0xe8] sm:$0xff]  ;;  %v2601_v2 = vld [vmem:[%s3870_s22 + $0xd8] sm:$0xff]  ;;  %3065 = vrot.lane.b32.xlu0 %v5335_v34, %s3705_s24  ;;  %3063 = vrot.lane.b32.xlu1 %v4435_v12, %s3705_s24 }
 0x298   : > { %2546 = vst.msk [vmem:[%s3870_s22 + $0xe0] sm:$0xff] %vm483_vm0, %v2512_v48  ;;  %v2230_v10 = vadd.f32 %v6612_v9, %v2060_v51  ;;  %v2729_v47 = vadd.f32 %v2661_v43, %v2601_v2  ;;  %2007 = vst.msk [vmem:[%s3870_s22 + $0xf0] sm:$0xff] %vm483_vm0, %v1973_v49 }
 0x299   : > { %v2443_v8 = vpop.permute.xlu1 %2442  ;;  %v1686_v25 = vpop.permute.xlu0 %1685 }
 0x29a   : > { %2264 = vst.msk [vmem:[%s3870_s22 + $0xe8] sm:$0xff] %vm483_vm0, %v2230_v10  ;;  %2761 = vst.msk [vmem:[%s3870_s22 + $0xd8] sm:$0xff] %vm483_vm0, %v2729_v47 }
 0x29b   : > { %v1543_v34 = vld [vmem:[%s3870_s22 + $0x100] sm:$0xff]  ;;  %3067 = vrot.lane.b32.xlu1 %v5351_v60, %s3705_s24 }
 0x29c   : > { %v1759_v27 = vadd.f32 %v1684_v45, %v1543_v34 }
 0x29d   : > { %v1389_v23 = vpop.permute.xlu1 %1388  ;;  %v5959_v0 = vpop.permute.xlu0 %2444  ;;  %v1838_v60 = vld [vmem:[%s3870_s22 + $0xf8] sm:$0xff] }
 0x29e   : > { %1795 = vst.msk [vmem:[%s3870_s22 + $0x100] sm:$0xff] %vm483_vm0, %v1759_v27  ;;  %v1463_v58 = vadd.f32 %v1389_v23, %v1211_v33 }
 0x29f   : > { %v2061_v14 = vld [vmem:[%s3870_s22 + $0xf0] sm:$0xff]  ;;  %v2602_v2 = vld [vmem:[%s3870_s22 + $0xe0] sm:$0xff] }
 0x2a0   : > { %v2231_v30 = vadd.f32 %v6613_v13, %v2061_v14  ;;  %1499 = vst.msk [vmem:[%s3870_s22 + $0x108] sm:$0xff] %vm483_vm0, %v1463_v58 }
 0x2a1   : > { %v2309_v44 = vld [vmem:[%s3870_s22 + $0xe8] sm:$0xff]  ;;  %v1904_v32 = vpop.permute.xlu1 %1903  ;;  %v1690_v11 = vpop.permute.xlu0 %1689 }
 0x2a2   : > { %v2513_v38 = vadd.f32 %v2441_v3, %v2309_v44  ;;  %2265 = vst.msk [vmem:[%s3870_s22 + $0xf0] sm:$0xff] %vm483_vm0, %v2231_v30  ;;  %v1974_v55 = vadd.f32 %v1904_v32, %v1838_v60 }
 0x2a4   : > { %2547 = vst.msk [vmem:[%s3870_s22 + $0xe8] sm:$0xff] %vm483_vm0, %v2513_v38  ;;  %2008 = vst.msk [vmem:[%s3870_s22 + $0xf8] sm:$0xff] %vm483_vm0, %v1974_v55 }
 0x2a5   : > { %v1393_v29 = vpop.permute.xlu1 %1392  ;;  %v1391_v59 = vpop.permute.xlu0 %1390  ;;  %v1839_v35 = vld [vmem:[%s3870_s22 + $0x100] sm:$0xff] }
 0x2a6   : > { %v1465_v6 = vadd.f32 %v1393_v29, %v1213_v40  ;;  %v1464_v3 = vadd.f32 %v1391_v59, %v1212_v16 }
 0x2a7   : > { %v1544_v41 = vld [vmem:[%s3870_s22 + $0x108] sm:$0xff] }
 0x2a8   : > { %v1760_v36 = vadd.f32 %v1686_v25, %v1544_v41  ;;  %1502 = vst.msk [vmem:[%s3870_s22 + $0x118] sm:$0x7f] %vm1501_vm9, %v1465_v6 }
 0x2a9   : > { %1500 = vst.msk [vmem:[%s3870_s22 + $0x110] sm:$0xff] %vm483_vm0, %v1464_v3  ;;  %v2310_v43 = vld [vmem:[%s3870_s22 + $0xf0] sm:$0xff]  ;;  %v1908_v56 = vpop.permute.xlu1 %1907  ;;  %v1906_v42 = vpop.permute.xlu0 %1905 }
 0x2aa   : > { %v2514_v20 = vadd.f32 %v2443_v8, %v2310_v43  ;;  %1796 = vst.msk [vmem:[%s3870_s22 + $0x108] sm:$0xff] %vm483_vm0, %v1760_v36  ;;  %v1975_v19 = vadd.f32 %v1906_v42, %v1839_v35 }
 0x2ab   : > { %v2062_v37 = vld [vmem:[%s3870_s22 + $0xf8] sm:$0xff]  ;;  %v2603_v33 = vld [vmem:[%s3870_s22 + $0xe8] sm:$0xff] }
 0x2ac   : > { %2548 = vst.msk [vmem:[%s3870_s22 + $0xf0] sm:$0xff] %vm483_vm0, %v2514_v20  ;;  %v2232_v61 = vadd.f32 %v4920_v17, %v2062_v37  ;;  %2009 = vst.msk [vmem:[%s3870_s22 + $0x100] sm:$0xff] %vm483_vm0, %v1975_v19  ;;  %v2799_v20 = vld [vmem:[%s3870_s22 + $0x8] sm:$0xff]  ;;  %v2798_v37 = vld [vmem:[%s3870_s22] sm:$0xff] }
 0x2ad   : > { %v1688_v21 = vpop.permute.xlu1 %1687  ;;  %v5991_v45 = vpop.permute.xlu0 %2448 }
 0x2ae   : > { %2266 = vst.msk [vmem:[%s3870_s22 + $0xf8] sm:$0xff] %vm483_vm0, %v2232_v61 }
 0x2af   : > { %v1546_v22 = vld [vmem:[%s3870_s22 + $0x118] sm:$0x3f]  ;;  %v1800_v24 = vld [vmem:[%s3870_s22 + $0x11e] sm:$0x3] }
 0x2b0   : > { %v1545_v48 = vld [vmem:[%s3870_s22 + $0x110] sm:$0xff]  ;;  %v1804_v17 = vadd.f32 %v5437_v53, %v1800_v24  ;;  %v1762_v49 = vadd.f32 %v1690_v11, %v1546_v22  ;;  %v2801_v24 = vld [vmem:[%s3870_s22 + $0x18] sm:$0xff] }
 0x2b1   : > { %v1761_v52 = vadd.f32 %v1688_v21, %v1545_v48  ;;  %v1840_v51 = vld [vmem:[%s3870_s22 + $0x108] sm:$0x3f]  ;;  %v2663_v9 = vpop.permute.xlu0 %2662  ;;  %v2447_v10 = vpop.permute.xlu1 %2446 }
 0x2b2   : > { %1806 = vst.msk [vmem:[%s3870_s22 + $0x11e] sm:$0x3] %vm1805_vm10, %v1804_v17  ;;  %v1976_v47 = vadd.f32 %v1908_v56, %v1840_v51  ;;  %v2730_v53 = vadd.f32 %v2663_v9, %v2602_v2  ;;  %v2800_v17 = vld [vmem:[%s3870_s22 + $0x10] sm:$0xff]  ;;  %v2803_v51 = vld [vmem:[%s3870_s22 + $0x28] sm:$0xff] }
 0x2b3   : > { %1799 = vst.msk [vmem:[%s3870_s22 + $0x118] sm:$0x3f] %vm1798_vm11, %v1762_v49  ;;  %v2063_v8 = vld [vmem:[%s3870_s22 + $0x100] sm:$0xff]  ;;  %v2604_v34 = vld [vmem:[%s3870_s22 + $0xf0] sm:$0xff] }
 0x2b4   : > { %1797 = vst.msk [vmem:[%s3870_s22 + $0x110] sm:$0xff] %vm483_vm0, %v1761_v52  ;;  %2762 = vst.msk [vmem:[%s3870_s22 + $0xe0] sm:$0xff] %vm483_vm0, %v2730_v53  ;;  %v2233_v25 = vadd.f32 %v5217_v15, %v2063_v8 }
 0x2b5   : > { %2010 = vst.msk [vmem:[%s3870_s22 + $0x108] sm:$0x3f] %vm1798_vm11, %v1976_v47  ;;  %v2667_v27 = vpop.permute.xlu0 %2666  ;;  %v2665_v23 = vpop.permute.xlu1 %2664  ;;  %v2311_v58 = vld [vmem:[%s3870_s22 + $0xf8] sm:$0xff] }
 0x2b6   : > { %2267 = vst.msk [vmem:[%s3870_s22 + $0x100] sm:$0xff] %vm483_vm0, %v2233_v25  ;;  %v2732_v14 = vadd.f32 %v2667_v27, %v2604_v34  ;;  %v2731_v13 = vadd.f32 %v2665_v23, %v2603_v33  ;;  %v2515_v30 = vadd.f32 %v5959_v0, %v2311_v58  ;;  %v2802_v33 = vld [vmem:[%s3870_s22 + $0x20] sm:$0xff] }
 0x2b8   : > { %2764 = vst.msk [vmem:[%s3870_s22 + $0xf0] sm:$0xff] %vm483_vm0, %v2732_v14  ;;  %2763 = vst.msk [vmem:[%s3870_s22 + $0xe8] sm:$0xff] %vm483_vm0, %v2731_v13 }
 0x2b9   : > { %2549 = vst.msk [vmem:[%s3870_s22 + $0xf8] sm:$0xff] %vm483_vm0, %v2515_v30  ;;  %v2013_v15 = vld [vmem:[%s3870_s22 + $0x11e] sm:$0x3]  ;;  %v2774_v32 = vpop.permute.xlu0 %2773  ;;  %v2669_v11 = vpop.permute.xlu1 %2668  ;;  %v6615_v30 = vld [vmem:[#allocation3_spill] sm:$0xff] }
 0x2ba   : > { %v2027_v38 = vadd.f32 %v5522_v54, %v2013_v15 }
 0x2bb   : > { %v2011_v44 = vld [vmem:[%s3870_s22 + $0x10e] sm:$0xff]  ;;  %v2012_v60 = vld [vmem:[%s3870_s22 + $0x116] sm:$0xff] }
 0x2bc   : > { %v2025_v0 = vadd.f32 %v5449_v5, %v2011_v44  ;;  %v2026_v55 = vadd.f32 %v5490_v26, %v2012_v60  ;;  %v2064_v40 = vld [vmem:[%s3870_s22 + $0x108] sm:$0x1f]  ;;  %2030 = vst.msk [vmem:[%s3870_s22 + $0x11e] sm:$0x3] %vm1805_vm10, %v2027_v38  ;;  %v2805_v44 = vld [vmem:[%s3870_s22 + $0x38] sm:$0xff] }
 0x2bd   : > { %v2234_v29 = vadd.f32 %v2165_v31, %v2064_v40  ;;  %v2312_v54 = vld [vmem:[%s3870_s22 + $0x100] sm:$0xff]  ;;  %v6041_v16 = vpop.permute.xlu0 %2777  ;;  %v2776_v5 = vpop.permute.xlu1 %2775 }
 0x2be   : > { %2028 = vst.msk [vmem:[%s3870_s22 + $0x10e] sm:$0xff] %vm483_vm0, %v2025_v0  ;;  %2029 = vst.msk [vmem:[%s3870_s22 + $0x116] sm:$0xff] %vm483_vm0, %v2026_v55  ;;  %v2516_v26 = vadd.f32 %v2447_v10, %v2312_v54 }
 0x2bf   : > { %2269 = vst.msk [vmem:[%s3870_s22 + $0x108] sm:$0x1f] %vm2268_vm12, %v2234_v29  ;;  %v6616_v29 = vld [vmem:[#allocation5_spill] sm:$0xff] }
 0x2c0   : > { %v2605_v59 = vld [vmem:[%s3870_s22 + $0xf8] sm:$0xf]  ;;  %2550 = vst.msk [vmem:[%s3870_s22 + $0x100] sm:$0xff] %vm483_vm0, %v2516_v26 }
 0x2c1   : > { %v2733_v7 = vadd.f32 %v2669_v11, %v2605_v59  ;;  %v6048_v31 = vpop.permute.xlu0 %2781  ;;  %v6050_v6 = vpop.permute.xlu1 %2779  ;;  %v2807_v59 = vld [vmem:[%s3870_s22 + $0x48] sm:$0xff] }
 0x2c3   : > { %2765 = vst.msk [vmem:[%s3870_s22 + $0xf8] sm:$0xf] %vm2551_vm13, %v2733_v7 }
 0x2c5   : > { %v2270_v3 = vld [vmem:[%s3870_s22 + $0x10d] sm:$0xff]  ;;  %v2271_v41 = vld [vmem:[%s3870_s22 + $0x115] sm:$0xff]  ;;  %v2272_v36 = vld [vmem:[%s3870_s22 + $0x11d] sm:$0x7]  ;;  %v2897_v19 = vpop.permute.xlu0 %2896  ;;  %v2895_v61 = vpop.permute.xlu1 %2894 }
 0x2c6   : > { %v2273_v43 = vadd.f32 %v2270_v3, %v4370_v1  ;;  %v2274_v56 = vadd.f32 %v2271_v41, %v4398_v18  ;;  %v2275_v35 = vadd.f32 %v2272_v36, %v4435_v12  ;;  %v2313_v42 = vld [vmem:[%s3870_s22 + $0x108] sm:$0xf]  ;;  %v2991_v18 = vadd.f32 %v2897_v19, %v2799_v20  ;;  %v2806_v3 = vld [vmem:[%s3870_s22 + $0x40] sm:$0xff] }
 0x2c7   : > { %v2517_v1 = vadd.f32 %v5991_v45, %v2313_v42  ;;  %v2990_v12 = vadd.f32 %v2895_v61, %v2798_v37  ;;  %v2766_v21 = vld [vmem:[%s3870_s22 + $0xfc] sm:$0xff] }
 0x2c8   : > { %2276 = vst.msk [vmem:[%s3870_s22 + $0x10d] sm:$0xff] %vm483_vm0, %v2273_v43  ;;  %2277 = vst.msk [vmem:[%s3870_s22 + $0x115] sm:$0xff] %vm483_vm0, %v2274_v56  ;;  %v2788_v22 = vadd.f32 %v2774_v32, %v2766_v21  ;;  %v2804_v32 = vld [vmem:[%s3870_s22 + $0x30] sm:$0xff] }
 0x2c9   : > { %2279 = vst.msk [vmem:[%s3870_s22 + $0x11d] sm:$0x7] %vm2278_vm14, %v2275_v35  ;;  %v2901_v48 = vpop.permute.xlu0 %2900  ;;  %v2899_v49 = vpop.permute.xlu1 %2898  ;;  %v6619_v21 = vld [vmem:[#allocation8_spill] sm:$0xff] }
 0x2ca   : > { %2552 = vst.msk [vmem:[%s3870_s22 + $0x108] sm:$0xf] %vm2551_vm13, %v2517_v1  ;;  %v2993_v45 = vadd.f32 %v2901_v48, %v2801_v24  ;;  %v2992_v52 = vadd.f32 %v2899_v49, %v2800_v17 }
 0x2cb   : > { %3023 = vst.msk [vmem:[%s3870_s22 + $0x8] sm:$0xff] %vm483_vm0, %v2991_v18  ;;  %3022 = vst.msk [vmem:[%s3870_s22] sm:$0xff] %vm483_vm0, %v2990_v12  ;;  %v6618_v18 = vld [vmem:[#allocation9_spill] sm:$0xff] }
 0x2cc   : > { %2793 = vst.msk [vmem:[%s3870_s22 + $0xfc] sm:$0xff] %vm483_vm0, %v2788_v22  ;;  %3025 = vst.msk [vmem:[%s3870_s22 + $0x18] sm:$0xff] %vm483_vm0, %v2993_v45 }
 0x2cd   : > { %3024 = vst.msk [vmem:[%s3870_s22 + $0x10] sm:$0xff] %vm483_vm0, %v2992_v52  ;;  %v2905_v47 = vpop.permute.xlu0 %2904  ;;  %v2903_v53 = vpop.permute.xlu1 %2902  ;;  %v6620_v52 = vld [vmem:[#allocation11_spill] sm:$0xff] }
 0x2ce   : > { %v2995_v27 = vadd.f32 %v2905_v47, %v2803_v51  ;;  %v2994_v13 = vadd.f32 %v2903_v53, %v2802_v33  ;;  %v2810_v53 = vld [vmem:[%s3870_s22 + $0x60] sm:$0xff] }
 0x2cf   : > { %v2553_v9 = vld [vmem:[%s3870_s22 + $0x10c] sm:$0xff]  ;;  %v2554_v10 = vld [vmem:[%s3870_s22 + $0x114] sm:$0xff] }
 0x2d0   : > { %v2555_v2 = vld [vmem:[%s3870_s22 + $0x11c] sm:$0xf]  ;;  %v2568_v25 = vadd.f32 %v5461_v46, %v2553_v9  ;;  %v2569_v34 = vadd.f32 %v5492_v4, %v2554_v10  ;;  %v6614_v46 = vld [vmem:[#allocation4_spill] sm:$0xff]  ;;  %3027 = vst.msk [vmem:[%s3870_s22 + $0x28] sm:$0xff] %vm483_vm0, %v2995_v27  ;;  %3026 = vst.msk [vmem:[%s3870_s22 + $0x20] sm:$0xff] %vm483_vm0, %v2994_v13 }
 0x2d1   : > { %v2570_v8 = vadd.f32 %v5531_v62, %v2555_v2  ;;  %v2767_v23 = vld [vmem:[%s3870_s22 + $0x104] sm:$0xff]  ;;  %v2909_v60 = vpop.permute.xlu0 %2908  ;;  %v2907_v11 = vpop.permute.xlu1 %2906 }
 0x2d2   : > { %v3085_v58 = vld [vmem:[%s3870_s22 + $0x8] sm:$0xff]  ;;  %v3084_v14 = vld [vmem:[%s3870_s22] sm:$0xff]  ;;  %2571 = vst.msk [vmem:[%s3870_s22 + $0x10c] sm:$0xff] %vm483_vm0, %v2568_v25  ;;  %v2789_v62 = vadd.f32 %v2776_v5, %v2767_v23  ;;  %2572 = vst.msk [vmem:[%s3870_s22 + $0x114] sm:$0xff] %vm483_vm0, %v2569_v34  ;;  %v2997_v38 = vadd.f32 %v2909_v60, %v2805_v44  ;;  %v2996_v0 = vadd.f32 %v2907_v11, %v2804_v32 }
 0x2d3   : > { %2573 = vst.msk [vmem:[%s3870_s22 + $0x11c] sm:$0xf] %vm2551_vm13, %v2570_v8  ;;  %v3245_v4 = vadd.f32 %v6614_v46, %v3085_v58  ;;  %v3244_v15 = vadd.f32 %v6615_v30, %v3084_v14  ;;  %v3087_v55 = vld [vmem:[%s3870_s22 + $0x18] sm:$0xff]  ;;  %v6617_v5 = vld [vmem:[#allocation2_spill] sm:$0xff]  ;;  %v2811_v10 = vld [vmem:[%s3870_s22 + $0x68] sm:$0xff] }
 0x2d4   : > { %2794 = vst.msk [vmem:[%s3870_s22 + $0x104] sm:$0xff] %vm483_vm0, %v2789_v62  ;;  %v3086_v40 = vld [vmem:[%s3870_s22 + $0x10] sm:$0xff]  ;;  %v3247_v54 = vadd.f32 %v6616_v29, %v3087_v55  ;;  %3029 = vst.msk [vmem:[%s3870_s22 + $0x38] sm:$0xff] %vm483_vm0, %v2997_v38  ;;  %v6621_v2 = vld [vmem:[#allocation6_spill] sm:$0xff] }
 0x2d5   : > { %3277 = vst.msk [vmem:[%s3870_s22 + $0x8] sm:$0xff] %vm483_vm0, %v3245_v4  ;;  %3276 = vst.msk [vmem:[%s3870_s22] sm:$0xff] %vm483_vm0, %v3244_v15  ;;  %v3246_v26 = vadd.f32 %v6617_v5, %v3086_v40  ;;  %v2913_v7 = vpop.permute.xlu0 %2912  ;;  %v2911_v41 = vpop.permute.xlu1 %2910  ;;  %v6622_v23 = vld [vmem:[#allocation15_spill] sm:$0xff]  ;;  %v6623_v14 = vld [vmem:[#allocation14_spill] sm:$0xff] }
 0x2d6   : > { %3028 = vst.msk [vmem:[%s3870_s22 + $0x30] sm:$0xff] %vm483_vm0, %v2996_v0  ;;  %3279 = vst.msk [vmem:[%s3870_s22 + $0x18] sm:$0xff] %vm483_vm0, %v3247_v54  ;;  %v2999_v36 = vadd.f32 %v2913_v7, %v2807_v59  ;;  %v2998_v43 = vadd.f32 %v2911_v41, %v2806_v3  ;;  %v2813_v62 = vld [vmem:[%s3870_s22 + $0x78] sm:$0xff]  ;;  %v2812_v4 = vld [vmem:[%s3870_s22 + $0x70] sm:$0xff] }
 0x2d7   : > { %3278 = vst.msk [vmem:[%s3870_s22 + $0x10] sm:$0xff] %vm483_vm0, %v3246_v26  ;;  %v3089_v61 = vld [vmem:[%s3870_s22 + $0x28] sm:$0xff]  ;;  %v3088_v1 = vld [vmem:[%s3870_s22 + $0x20] sm:$0xff]  ;;  %v6624_v11 = vld [vmem:[#allocation17_spill] sm:$0xff] }
 0x2d8   : > { %3031 = vst.msk [vmem:[%s3870_s22 + $0x48] sm:$0xff] %vm483_vm0, %v2999_v36  ;;  %3030 = vst.msk [vmem:[%s3870_s22 + $0x40] sm:$0xff] %vm483_vm0, %v2998_v43  ;;  %v3249_v12 = vadd.f32 %v6618_v18, %v3089_v61  ;;  %v3248_v22 = vadd.f32 %v6619_v21, %v3088_v1  ;;  %v6625_v0 = vld [vmem:[#allocation12_spill] sm:$0xff]  ;;  %v2815_v40 = vld [vmem:[%s3870_s22 + $0x88] sm:$0xff] }
 0x2d9   : > { %v2768_v56 = vld [vmem:[%s3870_s22 + $0x10c] sm:$0xff]  ;;  %v2769_v42 = vld [vmem:[%s3870_s22 + $0x114] sm:$0xff]  ;;  %v2915_v24 = vpop.permute.xlu1 %2914  ;;  %v2814_v54 = vld [vmem:[%s3870_s22 + $0x80] sm:$0xff] }
 0x2da   : > { %v2770_v35 = vld [vmem:[%s3870_s22 + $0x11c] sm:$0xf]  ;;  %v2790_v20 = vadd.f32 %v6041_v16, %v2768_v56  ;;  %v2791_v37 = vadd.f32 %v6050_v6, %v2769_v42  ;;  %v2808_v6 = vld [vmem:[%s3870_s22 + $0x50] sm:$0xff]  ;;  %3281 = vst.msk [vmem:[%s3870_s22 + $0x28] sm:$0xff] %vm483_vm0, %v3249_v12  ;;  %3280 = vst.msk [vmem:[%s3870_s22 + $0x20] sm:$0xff] %vm483_vm0, %v3248_v22 }
 0x2db   : > { %v2792_v19 = vadd.f32 %v6048_v31, %v2770_v35  ;;  %v2809_v16 = vld [vmem:[%s3870_s22 + $0x58] sm:$0xff]  ;;  %v2917_v31 = vpop.permute.xlu0 %2916  ;;  %v3000_v17 = vadd.f32 %v2915_v24, %v2808_v6  ;;  %v6627_v43 = vld [vmem:[#allocation20_spill] sm:$0xff]  ;;  %v6629_v22 = vld [vmem:[#allocation18_spill] sm:$0xff] }
 0x2dc   : > { %2795 = vst.msk [vmem:[%s3870_s22 + $0x10c] sm:$0xff] %vm483_vm0, %v2790_v20  ;;  %2796 = vst.msk [vmem:[%s3870_s22 + $0x114] sm:$0xff] %vm483_vm0, %v2791_v37  ;;  %v3001_v48 = vadd.f32 %v2917_v31, %v2809_v16  ;;  %v3091_v49 = vld [vmem:[%s3870_s22 + $0x38] sm:$0xff]  ;;  %v2816_v20 = vld [vmem:[%s3870_s22 + $0x90] sm:$0xff] }
 0x2dd   : > { %2797 = vst.msk [vmem:[%s3870_s22 + $0x11c] sm:$0xf] %vm2551_vm13, %v2792_v19  ;;  %v3090_v45 = vld [vmem:[%s3870_s22 + $0x30] sm:$0xff]  ;;  %v3251_v51 = vadd.f32 %v6620_v52, %v3091_v49  ;;  %v2919_v8 = vpop.permute.xlu1 %2918  ;;  %v6626_v41 = vld [vmem:[#allocation21_spill] sm:$0xff]  ;;  %v2819_v31 = vld [vmem:[%s3870_s22 + $0xa8] sm:$0xff] }
 0x2de   : > { %v3250_v9 = vadd.f32 %v6621_v2, %v3090_v45  ;;  %3033 = vst.msk [vmem:[%s3870_s22 + $0x58] sm:$0xff] %vm483_vm0, %v3001_v48  ;;  %3032 = vst.msk [vmem:[%s3870_s22 + $0x50] sm:$0xff] %vm483_vm0, %v3000_v17  ;;  %v3002_v34 = vadd.f32 %v2919_v8, %v2810_v53  ;;  %v2817_v35 = vld [vmem:[%s3870_s22 + $0x98] sm:$0xff]  ;;  %v6628_v12 = vld [vmem:[#allocation24_spill] sm:$0xff] }
 0x2df   : > { %v2921_v47 = vpop.permute.xlu0 %2920  ;;  %3283 = vst.msk [vmem:[%s3870_s22 + $0x38] sm:$0xff] %vm483_vm0, %v3251_v51  ;;  %v3093_v27 = vld [vmem:[%s3870_s22 + $0x48] sm:$0xff]  ;;  %v3092_v33 = vld [vmem:[%s3870_s22 + $0x40] sm:$0xff]  ;;  %v6630_v51 = vld [vmem:[#allocation29_spill] sm:$0xff] }
 0x2e0   : > { %3282 = vst.msk [vmem:[%s3870_s22 + $0x30] sm:$0xff] %vm483_vm0, %v3250_v9  ;;  %v3003_v25 = vadd.f32 %v2921_v47, %v2811_v10  ;;  %v3253_v58 = vadd.f32 %v6622_v23, %v3093_v27  ;;  %v3252_v13 = vadd.f32 %v6623_v14, %v3092_v33  ;;  %3034 = vst.msk [vmem:[%s3870_s22 + $0x60] sm:$0xff] %vm483_vm0, %v3002_v34  ;;  %v2818_v24 = vld [vmem:[%s3870_s22 + $0xa0] sm:$0xff]  ;;  %v6631_v9 = vld [vmem:[#allocation28_spill] sm:$0xff] }
 0x2e1   : > { %v2923_v30 = vpop.permute.xlu1 %2922  ;;  %v2821_v47 = vld [vmem:[%s3870_s22 + $0xb8] sm:$0xff]  ;;  %v2820_v8 = vld [vmem:[%s3870_s22 + $0xb0] sm:$0xff] }
 0x2e2   : > { %3035 = vst.msk [vmem:[%s3870_s22 + $0x68] sm:$0xff] %vm483_vm0, %v3003_v25  ;;  %3285 = vst.msk [vmem:[%s3870_s22 + $0x48] sm:$0xff] %vm483_vm0, %v3253_v58  ;;  %v3004_v44 = vadd.f32 %v2923_v30, %v2812_v4  ;;  %v6632_v58 = vld [vmem:[#allocation32_spill] sm:$0xff]  ;;  %v2822_v30 = vld [vmem:[%s3870_s22 + $0xc0] sm:$0xff] }
 0x2e3   : > { %v2925_v46 = vpop.permute.xlu0 %2924  ;;  %3284 = vst.msk [vmem:[%s3870_s22 + $0x40] sm:$0xff] %vm483_vm0, %v3252_v13  ;;  %v6633_v13 = vld [vmem:[#allocation26_spill] sm:$0xff] }
 0x2e4   : > { %v3005_v15 = vadd.f32 %v2925_v46, %v2813_v62  ;;  %3036 = vst.msk [vmem:[%s3870_s22 + $0x70] sm:$0xff] %vm483_vm0, %v3004_v44  ;;  %v2823_v46 = vld [vmem:[%s3870_s22 + $0xc8] sm:$0xff] }
 0x2e5   : > { %v3095_v60 = vld [vmem:[%s3870_s22 + $0x58] sm:$0xff]  ;;  %v3094_v32 = vld [vmem:[%s3870_s22 + $0x50] sm:$0xff]  ;;  %v2927_v5 = vpop.permute.xlu1 %2926 }
 0x2e6   : > { %v3255_v38 = vadd.f32 %v6624_v11, %v3095_v60  ;;  %v3254_v55 = vadd.f32 %v6625_v0, %v3094_v32  ;;  %3037 = vst.msk [vmem:[%s3870_s22 + $0x78] sm:$0xff] %vm483_vm0, %v3005_v15  ;;  %v3006_v59 = vadd.f32 %v2927_v5, %v2814_v54  ;;  %v2824_v5 = vld [vmem:[%s3870_s22 + $0xd0] sm:$0xff] }
 0x2e7   : > { %v2929_v29 = vpop.permute.xlu0 %2928  ;;  %v3096_v3 = vld [vmem:[%s3870_s22 + $0x60] sm:$0xff] }
 0x2e8   : > { %3287 = vst.msk [vmem:[%s3870_s22 + $0x58] sm:$0xff] %vm483_vm0, %v3255_v38  ;;  %3286 = vst.msk [vmem:[%s3870_s22 + $0x50] sm:$0xff] %vm483_vm0, %v3254_v55  ;;  %v3007_v26 = vadd.f32 %v2929_v29, %v2815_v40  ;;  %v3256_v56 = vadd.f32 %v6627_v43, %v3096_v3  ;;  %v6634_v38 = vld [vmem:[#allocation37_spill] sm:$0xff]  ;;  %v6635_v55 = vld [vmem:[#allocation36_spill] sm:$0xff] }
 0x2e9   : > { %v3097_v7 = vld [vmem:[%s3870_s22 + $0x68] sm:$0xff]  ;;  %3038 = vst.msk [vmem:[%s3870_s22 + $0x80] sm:$0xff] %vm483_vm0, %v3006_v59  ;;  %v2931_v19 = vpop.permute.xlu1 %2930  ;;  %v2825_v29 = vld [vmem:[%s3870_s22 + $0xd8] sm:$0xff] }
 0x2ea   : > { %v3257_v36 = vadd.f32 %v6626_v41, %v3097_v7  ;;  %3039 = vst.msk [vmem:[%s3870_s22 + $0x88] sm:$0xff] %vm483_vm0, %v3007_v26  ;;  %3288 = vst.msk [vmem:[%s3870_s22 + $0x60] sm:$0xff] %vm483_vm0, %v3256_v56  ;;  %v3008_v61 = vadd.f32 %v2931_v19, %v2816_v20  ;;  %v6637_v56 = vld [vmem:[#allocation34_spill] sm:$0xff]  ;;  %v2827_v20 = vld [vmem:[%s3870_s22 + $0xe8] sm:$0xff] }
 0x2eb   : > { %v2933_v42 = vpop.permute.xlu0 %2932  ;;  %v3098_v18 = vld [vmem:[%s3870_s22 + $0x70] sm:$0xff]  ;;  %v2826_v19 = vld [vmem:[%s3870_s22 + $0xe0] sm:$0xff] }
 0x2ec   : > { %3289 = vst.msk [vmem:[%s3870_s22 + $0x68] sm:$0xff] %vm483_vm0, %v3257_v36  ;;  %v3009_v37 = vadd.f32 %v2933_v42, %v2817_v35  ;;  %v3258_v16 = vadd.f32 %v6629_v22, %v3098_v18  ;;  %3040 = vst.msk [vmem:[%s3870_s22 + $0x90] sm:$0xff] %vm483_vm0, %v3008_v61  ;;  %v6636_v36 = vld [vmem:[#allocation40_spill] sm:$0xff] }
 0x2ed   : > { %v3099_v1 = vld [vmem:[%s3870_s22 + $0x78] sm:$0xff]  ;;  %v2935_v48 = vpop.permute.xlu1 %2934 }
 0x2ee   : > { %v3259_v21 = vadd.f32 %v6628_v12, %v3099_v1  ;;  %3041 = vst.msk [vmem:[%s3870_s22 + $0x98] sm:$0xff] %vm483_vm0, %v3009_v37  ;;  %3290 = vst.msk [vmem:[%s3870_s22 + $0x70] sm:$0xff] %vm483_vm0, %v3258_v16  ;;  %v3010_v49 = vadd.f32 %v2935_v48, %v2818_v24  ;;  %v6639_v16 = vld [vmem:[#allocation44_spill] sm:$0xff]  ;;  %v2829_v24 = vld [vmem:[%s3870_s22 + $0xf8] sm:$0x7] }
 0x2ef   : > { %v2937_v6 = vpop.permute.xlu0 %2936  ;;  %v2828_v48 = vld [vmem:[%s3870_s22 + $0xf0] sm:$0xff] }
 0x2f0   : > { %3291 = vst.msk [vmem:[%s3870_s22 + $0x78] sm:$0xff] %vm483_vm0, %v3259_v21  ;;  %v3011_v17 = vadd.f32 %v2937_v6, %v2819_v31  ;;  %v3100_v52 = vld [vmem:[%s3870_s22 + $0x80] sm:$0xff]  ;;  %3042 = vst.msk [vmem:[%s3870_s22 + $0xa0] sm:$0xff] %vm483_vm0, %v3010_v49  ;;  %v6638_v21 = vld [vmem:[#allocation45_spill] sm:$0xff] }
 0x2f1   : > { %v3101_v45 = vld [vmem:[%s3870_s22 + $0x88] sm:$0xff]  ;;  %v3260_v10 = vadd.f32 %v6631_v9, %v3100_v52  ;;  %v2939_v25 = vpop.permute.xlu1 %2938 }
 0x2f2   : > { %v3261_v2 = vadd.f32 %v6630_v51, %v3101_v45  ;;  %3043 = vst.msk [vmem:[%s3870_s22 + $0xa8] sm:$0xff] %vm483_vm0, %v3011_v17  ;;  %v3012_v27 = vadd.f32 %v2939_v25, %v2820_v8  ;;  %v3055_v8 = vld [vmem:[%s3870_s22 + $0x103] sm:$0xff] }
 0x2f3   : > { %v2941_v53 = vpop.permute.xlu0 %2940  ;;  %3292 = vst.msk [vmem:[%s3870_s22 + $0x80] sm:$0xff] %vm483_vm0, %v3260_v10  ;;  %v3102_v23 = vld [vmem:[%s3870_s22 + $0x90] sm:$0xff]  ;;  %v6641_v10 = vld [vmem:[#allocation42_spill] sm:$0xff] }
 0x2f4   : > { %3293 = vst.msk [vmem:[%s3870_s22 + $0x88] sm:$0xff] %vm483_vm0, %v3261_v2  ;;  %v3013_v34 = vadd.f32 %v2941_v53, %v2821_v47  ;;  %v3262_v62 = vadd.f32 %v6633_v13, %v3102_v23  ;;  %3044 = vst.msk [vmem:[%s3870_s22 + $0xb0] sm:$0xff] %vm483_vm0, %v3012_v27  ;;  %v6640_v2 = vld [vmem:[#allocation49_spill] sm:$0xff] }
 0x2f5   : > { %v3103_v33 = vld [vmem:[%s3870_s22 + $0x98] sm:$0xff]  ;;  %v2943_v15 = vpop.permute.xlu1 %2942 }
 0x2f6   : > { %v3263_v14 = vadd.f32 %v6632_v58, %v3103_v33  ;;  %3045 = vst.msk [vmem:[%s3870_s22 + $0xb8] sm:$0xff] %vm483_vm0, %v3013_v34  ;;  %3294 = vst.msk [vmem:[%s3870_s22 + $0x90] sm:$0xff] %vm483_vm0, %v3262_v62  ;;  %v3014_v60 = vadd.f32 %v2943_v15, %v2822_v30  ;;  %v3054_v34 = vld [vmem:[%s3870_s22 + $0xfb] sm:$0xff]  ;;  %v3057_v30 = vld [vmem:[%s3870_s22 + $0x113] sm:$0xff] }
 0x2f7   : > { %v2945_v4 = vpop.permute.xlu0 %2944  ;;  %v3104_v11 = vld [vmem:[%s3870_s22 + $0xa0] sm:$0xff]  ;;  %v6643_v62 = vld [vmem:[#allocation53_spill] sm:$0xff] }
 0x2f8   : > { %3295 = vst.msk [vmem:[%s3870_s22 + $0x98] sm:$0xff] %vm483_vm0, %v3263_v14  ;;  %v3015_v44 = vadd.f32 %v2945_v4, %v2823_v46  ;;  %v3264_v40 = vadd.f32 %v6635_v55, %v3104_v11  ;;  %3046 = vst.msk [vmem:[%s3870_s22 + $0xc0] sm:$0xff] %vm483_vm0, %v3014_v60  ;;  %v6642_v14 = vld [vmem:[#allocation54_spill] sm:$0xff] }
 0x2f9   : > { %v3105_v32 = vld [vmem:[%s3870_s22 + $0xa8] sm:$0xff]  ;;  %v2947_v26 = vpop.permute.xlu1 %2946 }
 0x2fa   : > { %v3265_v0 = vadd.f32 %v6634_v38, %v3105_v32  ;;  %3047 = vst.msk [vmem:[%s3870_s22 + $0xc8] sm:$0xff] %vm483_vm0, %v3015_v44  ;;  %3296 = vst.msk [vmem:[%s3870_s22 + $0xa0] sm:$0xff] %vm483_vm0, %v3264_v40  ;;  %v3016_v7 = vadd.f32 %v2947_v26, %v2824_v5  ;;  %v3056_v44 = vld [vmem:[%s3870_s22 + $0x10b] sm:$0xff]  ;;  %v3058_v5 = vld [vmem:[%s3870_s22 + $0x11b] sm:$0x1f] }
 0x2fb   : > { %v2949_v54 = vpop.permute.xlu0 %2948  ;;  %v3106_v41 = vld [vmem:[%s3870_s22 + $0xb0] sm:$0xff] }
 0x2fc   : > { %3297 = vst.msk [vmem:[%s3870_s22 + $0xa8] sm:$0xff] %vm483_vm0, %v3265_v0  ;;  %v3017_v59 = vadd.f32 %v2949_v54, %v2825_v29  ;;  %v3266_v35 = vadd.f32 %v6637_v56, %v3106_v41  ;;  %3048 = vst.msk [vmem:[%s3870_s22 + $0xd0] sm:$0xff] %vm483_vm0, %v3016_v7  ;;  %v6644_v0 = vld [vmem:[#allocation48_spill] sm:$0xff]  ;;  %v6646_v29 = vld [vmem:[#allocation51_spill] sm:$0xff] }
 0x2fd   : > { %v3107_v3 = vld [vmem:[%s3870_s22 + $0xb8] sm:$0xff]  ;;  %v2951_v37 = vpop.permute.xlu1 %2950  ;;  %v6645_v55 = vrot.slane %v6644_v0, 6 }
 0x2fe   : > { %v3267_v43 = vadd.f32 %v6636_v36, %v3107_v3  ;;  %3049 = vst.msk [vmem:[%s3870_s22 + $0xd8] sm:$0xff] %vm483_vm0, %v3017_v59  ;;  %3298 = vst.msk [vmem:[%s3870_s22 + $0xb0] sm:$0xff] %vm483_vm0, %v3266_v35  ;;  %v3018_v1 = vadd.f32 %v2951_v37, %v2826_v19 }
 0x2ff   : > { %v2953_v42 = vpop.permute.xlu0 %2952  ;;  %v3108_v12 = vld [vmem:[%s3870_s22 + $0xc0] sm:$0xff] }
 0x300   : > { %3299 = vst.msk [vmem:[%s3870_s22 + $0xb8] sm:$0xff] %vm483_vm0, %v3267_v43  ;;  %v3019_v61 = vadd.f32 %v2953_v42, %v2827_v20  ;;  %v3268_v31 = vadd.f32 %v6639_v16, %v3108_v12  ;;  %3050 = vst.msk [vmem:[%s3870_s22 + $0xe0] sm:$0xff] %vm483_vm0, %v3018_v1 }
 0x301   : > { %v3109_v18 = vld [vmem:[%s3870_s22 + $0xc8] sm:$0xff]  ;;  %v2955_v17 = vpop.permute.xlu1 %2954 }
 0x302   : > { %v3269_v22 = vadd.f32 %v6638_v21, %v3109_v18  ;;  %3051 = vst.msk [vmem:[%s3870_s22 + $0xe8] sm:$0xff] %vm483_vm0, %v3019_v61  ;;  %3300 = vst.msk [vmem:[%s3870_s22 + $0xc0] sm:$0xff] %vm483_vm0, %v3268_v31  ;;  %v3020_v45 = vadd.f32 %v2955_v17, %v2828_v48 }
 0x303   : > { %v2957_v6 = vpop.permute.xlu0 %2956  ;;  %v3110_v51 = vld [vmem:[%s3870_s22 + $0xd0] sm:$0xff] }
 0x304   : > { %3301 = vst.msk [vmem:[%s3870_s22 + $0xc8] sm:$0xff] %vm483_vm0, %v3269_v22  ;;  %v3021_v49 = vadd.f32 %v2957_v6, %v2829_v24  ;;  %v3270_v47 = vadd.f32 %v6641_v10, %v3110_v51  ;;  %3052 = vst.msk [vmem:[%s3870_s22 + $0xf0] sm:$0xff] %vm483_vm0, %v3020_v45 }
 0x305   : > { %v3111_v52 = vld [vmem:[%s3870_s22 + $0xd8] sm:$0xff]  ;;  %v3060_v25 = vpop.permute.xlu1 %3059 }
 0x306   : > { %v3271_v9 = vadd.f32 %v6640_v2, %v3111_v52  ;;  %3053 = vst.msk [vmem:[%s3870_s22 + $0xf8] sm:$0x7] %vm2278_vm14, %v3021_v49  ;;  %v3074_v33 = vadd.f32 %v3060_v25, %v3054_v34 }
 0x307   : > { %v3062_v53 = vpop.permute.xlu0 %3061  ;;  %3302 = vst.msk [vmem:[%s3870_s22 + $0xd0] sm:$0xff] %vm483_vm0, %v3270_v47  ;;  %v3112_v58 = vld [vmem:[%s3870_s22 + $0xe0] sm:$0xff] }
 0x308   : > { %3303 = vst.msk [vmem:[%s3870_s22 + $0xd8] sm:$0xff] %vm483_vm0, %v3271_v9  ;;  %v3075_v27 = vadd.f32 %v3062_v53, %v3055_v8  ;;  %v3272_v46 = vadd.f32 %v6643_v62, %v3112_v58  ;;  %3079 = vst.msk [vmem:[%s3870_s22 + $0xfb] sm:$0xff] %vm483_vm0, %v3074_v33 }
 0x309   : > { %v3113_v23 = vld [vmem:[%s3870_s22 + $0xe8] sm:$0xff]  ;;  %v3064_v15 = vpop.permute.xlu1 %3063 }
 0x30a   : > { %v3273_v13 = vadd.f32 %v6642_v14, %v3113_v23  ;;  %3080 = vst.msk [vmem:[%s3870_s22 + $0x103] sm:$0xff] %vm483_vm0, %v3075_v27  ;;  %3304 = vst.msk [vmem:[%s3870_s22 + $0xe0] sm:$0xff] %vm483_vm0, %v3272_v46  ;;  %v3076_v32 = vadd.f32 %v3064_v15, %v3056_v44 }
 0x30b   : > { %v3066_v4 = vpop.permute.xlu0 %3065  ;;  %v3114_v38 = vld [vmem:[%s3870_s22 + $0xf0] sm:$0xff] }
 0x30c   : > { %3305 = vst.msk [vmem:[%s3870_s22 + $0xe8] sm:$0xff] %vm483_vm0, %v3273_v13  ;;  %v3077_v60 = vadd.f32 %v3066_v4, %v3057_v30  ;;  %v3274_v54 = vadd.f32 %v6646_v29, %v3114_v38  ;;  %3081 = vst.msk [vmem:[%s3870_s22 + $0x10b] sm:$0xff] %vm483_vm0, %v3076_v32 }
 0x30d   : > { %v3115_v11 = vld [vmem:[%s3870_s22 + $0xf8] sm:$0x3]  ;;  %v3068_v26 = vpop.permute.xlu1 %3067 }
 0x30e   : > { %v3275_v40 = vadd.f32 %v6645_v55, %v3115_v11  ;;  %3082 = vst.msk [vmem:[%s3870_s22 + $0x113] sm:$0xff] %vm483_vm0, %v3077_v60  ;;  %3306 = vst.msk [vmem:[%s3870_s22 + $0xf0] sm:$0xff] %vm483_vm0, %v3274_v54  ;;  %v3078_v59 = vadd.f32 %v3068_v26, %v3058_v5 }
 0x30f   : > { %v3308_v7 = vld [vmem:[%s3870_s22 + $0xfa] sm:$0xff] }
 0x310   : > { %3307 = vst.msk [vmem:[%s3870_s22 + $0xf8] sm:$0x3] %vm1805_vm10, %v3275_v40  ;;  %v3313_v41 = vadd.f32 %v3308_v7, %v5820_v39 }
 0x311   : > { %v3309_v3 = vld [vmem:[%s3870_s22 + $0x102] sm:$0xff]  ;;  %3083 = vst.msk [vmem:[%s3870_s22 + $0x11b] sm:$0x1f] %vm2268_vm12, %v3078_v59 }
 0x312   : > { %v3314_v36 = vadd.f32 %v3309_v3, %v5831_v57  ;;  %3318 = vst.msk [vmem:[%s3870_s22 + $0xfa] sm:$0xff] %vm483_vm0, %v3313_v41 }
 0x313   : > { %v3310_v43 = vld [vmem:[%s3870_s22 + $0x10a] sm:$0xff] }
 0x314   : > { %3319 = vst.msk [vmem:[%s3870_s22 + $0x102] sm:$0xff] %vm483_vm0, %v3314_v36  ;;  %v3315_v35 = vadd.f32 %v3310_v43, %v5845_v28 }
 0x315   : > { %v3311_v56 = vld [vmem:[%s3870_s22 + $0x112] sm:$0xff] }
 0x316   : > { %v3316_v42 = vadd.f32 %v3311_v56, %v5864_v50  ;;  %3320 = vst.msk [vmem:[%s3870_s22 + $0x10a] sm:$0xff] %vm483_vm0, %v3315_v35 }
 0x318   : > { %3321 = vst.msk [vmem:[%s3870_s22 + $0x112] sm:$0xff] %vm483_vm0, %v3316_v42  ;;  %v3312_v20 = vld [vmem:[%s3870_s22 + $0x11a] sm:$0x3f] }
 0x319   : > { %v3317_v39 = vadd.f32 %v3312_v20, %v5874_v63 }
 0x31b   : > { %3322 = vst.msk [vmem:[%s3870_s22 + $0x11a] sm:$0x3f] %vm1798_vm11, %v3317_v39 }
 0x31c PF: > { %s14_s17 = sadd.s32 1, %s3700_s17   ;;  %s6647_s15 = smov %s3696_s16 }
 0x31d   : > { %p11_p5 = scmp.ge.s32.totalorder %s14_s17, 4   ;;  %s6648_s16 = smov %s6650_s18 }
 0x31f   :  { %13 = sbr.rel (!%p11_p5) target bundleno = 2 (0x2), region = 69 }

// kernel: _lambda_.9
= control target key start
LH: loop header
LB: loop body
LE: loop exit
PB: predicated region body
PF: predicated region fallthrough
CT: control target
= control target key end

     0   :  { %s1306_s15 = smov 0   ;;  %s1308_s16 = smov 0   ;;  %s1739_s0 = inlined_call_operand.vmem [shape: bf16[2,72,32], index: 0, kind: input, shape index: {}, may-alias: {0,1}]   ;;  %s1740_s1 = inlined_call_operand.vmem [shape: bf16[2,72,32], index: 1, kind: input, shape index: {}, may-alias: {0,1}]   ;;  %s1741_s2 = inlined_call_operand.vmem [shape: bf16[32,288], index: 2, kind: input, shape index: {}]   ;;  %s1742_s3 = inlined_call_operand.vmem [shape: f32[1,32], index: 3, kind: input, shape index: {}]   ;;  %s1743_s4 = inlined_call_operand.vmem [shape: f32[2,48,32], index: 4, kind: output, shape index: {}]  }
   0x1   :  { %s1310_s17 = smov 0  }
   0x2 LB: > { %s26_s18 = sadd.s32 1, %s1269_s16  ;;  %p1141_p0 = scmp.ge.s32.totalorder %s1273_s17, 1  ;;  %s1273_s17 = sphi %s1310_s17, %s14_s17   ;;  %s1269_s16 = sphi %s1308_s16, %s1745_s16   ;;  %s1265_s15 = sphi %s1306_s15, %s1744_s15  }
   0x3   : > { %p28_p1 = scmp.ge.s32.totalorder %s26_s18, 2  ;;  %p216_p2 = scmp.lt.s32.totalorder %s1273_s17, 3 }
   0x5   : > { %s1747_s18 = smov (%p28_p1, %s26_s18), 0  ;;  %p217_p3 = pnand %p1141_p0, %p216_p2 }
   0x6   : > { %p270_p4 = scmp.lt.s32.totalorder (!%p217_p3), %s1265_s15, 1  ;;  %s1279_s23 = smov (!%p217_p3), 96  }
   0x7   : > { %220 = sbr.rel (%p217_p3) target bundleno = 431 (0x1af), region = 36  ;;  %s1280_s24 = smov (!%p217_p3), 32  }
   0xc   : > { %v1238_v0 = vld [vmem:[%s1741_s2 + $0x1c] ss:$12 sps:$4 sm:$0xff]   ;;  %v1240_v1 = vld [vmem:[%s1741_s2 + $0x18] ss:$12 sps:$4 sm:$0xff]   ;;  %v1275_v2 = vmov 0   ;;  %s1749_s15 = smov (!%p270_p4, %s1265_s15), 1 }
   0xd   : > { %414 = vmatprep.mubr.bf16.mxu0 %v1275_v2  ;;  %394 = vmatprep.subr.bf16.mxu0 %v1238_v0  ;;  %v1241_v3 = vld [vmem:[%s1741_s2 + $0x4] ss:$12 sps:$4 sm:$0xff]   ;;  %v1243_v4 = vld [vmem:[%s1741_s2] ss:$12 sps:$4 sm:$0xff]   ;;  %v1276_v5 = vmov 0.0   ;;  %vm1277_vm0 = vmmov 0  }
   0xe   : > { %1180 = vmatprep.subr.bf16.mxu1 %v1276_v5  ;;  %395 = vmatpush1.bf16.msra.mxu0 %v1240_v1  ;;  %v1248_v6 = vld [vmem:[%s1741_s2 + $0x20] ss:$12 sps:$4 sm:$0xff]   ;;  %s1204_s29 = smul.u32 36, %s1749_s15  ;;  %v1249_v7 = vld [vmem:[%s1741_s2 + $0x8] ss:$12 sps:$4 sm:$0xff]   ;;  %vm372_vm1 = vcmask 261120  }
   0xf   : > { %1184 = vmatprep.mubr.msk.bf16.mxu1 %vm1277_vm0, %v1276_v5  ;;  %396 = vmatprep.subr.bf16.mxu0 %v1241_v3  ;;  %s1206_s13 = smul.u32 48, %s1749_s15  ;;  %v1368_v13 = vld [vmem:[%s1742_s3] ss:$0 sm:$0xff]  ;;  %vm698_vm2 = vcmask 1045504   ;;  %vm641_vm3 = vcmask 1046528   ;;  %vm814_vm4 = vcmask 1040384  }
  0x10   : > { %1181 = vmatpush3.bf16.msra.mxu1 %v1248_v6  ;;  %s277_s8 = scalar_lea.vmem %s1739_s0, %s1204_s29  ;;  %s1170_s9 = sadd.s32 24, %s1204_s29  ;;  %vm754_vm5 = vcmask 1041408   ;;  %vm889_vm6 = vcmask 1043456   ;;  %vm943_vm7 = vcmask 1042432   ;;  %vm682_vm8 = vcmask 260096  }
  0x11   : > { %1182 = vmatprep.subr.bf16.mxu1 %v1276_v5  ;;  %v1244_v8 = vld [vmem:[%s277_s8] sm:$0xff]   ;;  %s293_s12 = scalar_lea.vmem %s1740_s1, %s1170_s9  ;;  %v1245_v9 = vld [vmem:[%s277_s8 + $0x8] sm:$0xff]   ;;  %v1246_v10 = vld [vmem:[%s277_s8 + $0x10] sm:$0xff]   ;;  %s1373_s22 = scalar_lea.vmem %s1743_s4, %s1206_s13  ;;  %vm690_vm9 = vcmask 253952   ;;  %vm739_vm10 = vcmask 259072   ;;  %vm746_vm11 = vcmask 254976  }
  0x12   : > { %397 = vmatpush1.bf16.msra.mxu0 %v1243_v4  ;;  %v1247_v11 = vld [vmem:[%s293_s12] sm:$0xff]   ;;  %v1250_v12 = vld [vmem:[%s293_s12 + $0x8] ss:$0 sps:$4 sm:$0xff]   ;;  %s1278_s15 = smov 64   ;;  %vm923_vm12 = vcmask 257024   ;;  %vm977_vm13 = vcmask 256000  }
  0x13   : > { %527 = vmatprep.subr.bf16.mxu0 %v1238_v0  ;;  %vm990_vm14 = vcmask 258048  }
  0x14   : > { %1183 = vmatpush3.bf16.msra.mxu1 %v1249_v7 }
  0x15   : > { %1154 = vmatmul.mubr.msk.bf16.vlgmr.msra.gmra.mxu0 %vm372_vm1, %v1244_v8  ;;  %1196 = vmatprep.subr.bf16.mxu1 %v1248_v6 }
  0x16   : > { %528 = vmatpush1.bf16.msra.mxu0 %v1240_v1  ;;  %424 = vmatprep.mubr.bf16.mxu0 %v1275_v2 }
  0x17   : > { %529 = vmatprep.subr.bf16.mxu0 %v1241_v3  ;;  %1185 = vmatmul.mubr.msk.bf16.vlgmr.msra.gmra.mxu1 %vm372_vm1, %v1244_v8 }
  0x18   : > { %1188 = vmatprep.mubr.msk.bf16.mxu1 %vm1277_vm0, %v1276_v5  ;;  %1197 = vmatpush3.bf16.msra.mxu1 %v1248_v6 }
  0x19   : > { %1198 = vmatprep.subr.bf16.mxu1 %v1249_v7 }
  0x1a   : > { %530 = vmatpush1.bf16.msra.mxu0 %v1243_v4 }
  0x1c   : > { %1199 = vmatpush3.bf16.msra.mxu1 %v1249_v7 }
  0x1d   : > { %1155 = vmatmul.mubr.msk.bf16.gmra.mxu0 %vm372_vm1, %v1245_v9 }
  0x1e   : > { %434 = vmatprep.mubr.bf16.mxu0 %v1275_v2 }
  0x1f   : > { %1189 = vmatmul.mubr.msk.bf16.gmra.mxu1 %vm372_vm1, %v1245_v9 }
  0x20   : > { %1192 = vmatprep.mubr.msk.bf16.mxu1 %vm1277_vm0, %v1276_v5 }
  0x25   : > { %1156 = vmatmul.mubr.msk.bf16.gmra.mxu0 %vm372_vm1, %v1246_v10 }
  0x26   : > { %547 = vmatprep.mubr.bf16.mxu0 %v1275_v2 }
  0x27   : > { %1193 = vmatmul.mubr.msk.bf16.gmra.mxu1 %vm372_vm1, %v1246_v10 }
  0x28   : > { %1200 = vmatprep.mubr.msk.bf16.mxu1 %vm372_vm1, %v1247_v11 }
  0x2d   : > { %1162 = vmatmul.mubr.msk.bf16.vlgmr.msra.gmra.mxu0 %vm372_vm1, %v1247_v11 }
  0x2e   : > { %556 = vmatprep.mubr.bf16.mxu0 %v1275_v2 }
  0x2f   : > { %1201 = vmatmul.mubr.msk.bf16.vlgmr.msra.gmra.mxu1 %vm372_vm1, %v1250_v12 }
  0x35   : > { %1163 = vmatmul.mubr.msk.bf16.gmra.mxu0 %vm372_vm1, %v1250_v12 }
  0xd5   : > { %v1375_v14 = vpop.f32.mrf.mxu0 }
  0xd6   : > { %v617_v15 = vadd.f32 %v1368_v13, %v1375_v14  ;;  %v699_v21 = vrot.slane %v1375_v14, 2  ;;  %v642_v25 = vrot.slane %v1375_v14, 1  ;;  %v755_v7 = vrot.slane %v1375_v14, 6 }
  0xd7   : > { %v418_v16 = vpop.f32.mrf.mxu0  ;;  %v479_v17 = vpop.f32.mrf.mxu1 }
  0xd8   : > { %623 = vst.msk [vmem:[%s1373_s22] sm:$0xff] %vm372_vm1, %v617_v15  ;;  %v815_v26 = vrot.slane %v418_v16, 7 }
  0xd9   : > { %v1381_v18 = vpop.f32.mrf.mxu0  ;;  %v1186_v19 = vpop.f32.mrf.mxu1 }
  0xda   : > { %v618_v20 = vadd.f32 %v1368_v13, %v1381_v18  ;;  %v700_v22 = vrot.slane %v1381_v18, 2  ;;  %v643_v23 = vrot.slane %v1381_v18, 1  ;;  %v756_v6 = vrot.slane %v1381_v18, 6 }
  0xdb   : > { %v1388_v24 = vpop.f32.mrf.mxu0  ;;  %v481_v17 = vpop.f32.mrf.mxu1 }
  0xdc   : > { %624 = vst.msk [vmem:[%s1373_s22 + $0x8] sm:$0xff] %vm372_vm1, %v618_v20  ;;  %v816_v27 = vrot.slane %v1388_v24, 7  ;;  %v701_v28 = vsel %vm698_vm2, %v699_v21, %v700_v22  ;;  %v644_v29 = vsel %vm641_vm3, %v642_v25, %v643_v23  ;;  %v757_v10 = vsel %vm754_vm5, %v755_v7, %v756_v6 }
  0xdd   : > { %710 = vrot.lane.b32.xlu1 %v701_v28, %s1278_s15  ;;  %v1397_v30 = vpop.f32.mrf.mxu0  ;;  %653 = vrot.lane.b32.xlu0 %v644_v29, %s1279_s23  ;;  %v1187_v18 = vpop.f32.mrf.mxu1  ;;  %v1002_v21 = vrot.slane %v481_v17, 6 }
  0xde   : > { %v1400_v31 = vsel %vm814_vm4, %v815_v26, %v816_v27  ;;  %v619_v32 = vadd.f32 %v1368_v13, %v1397_v30  ;;  %v645_v33 = vrot.slane %v1397_v30, 1  ;;  %v702_v37 = vrot.slane %v1397_v30, 2 }
  0xdf   : > { %v1406_v34 = vpop.f32.mrf.mxu0  ;;  %v758_v8 = vrot.slane %v1397_v30, 6  ;;  %v486_v19 = vpop.f32.mrf.mxu1  ;;  %v890_v30 = vrot.slane %v1388_v24, 4 }
  0xe0   : > { %625 = vst.msk [vmem:[%s1373_s22 + $0x10] sm:$0xff] %vm372_vm1, %v619_v32  ;;  %v818_v35 = vrot.slane %v1406_v34, 7  ;;  %v646_v36 = vsel %vm641_vm3, %v643_v23, %v645_v33  ;;  %v703_v46 = vsel %vm698_vm2, %v700_v22, %v702_v37  ;;  %v1003_v22 = vrot.slane %v486_v19, 6 }
  0xe1   : > { %v1413_v38 = vpop.f32.mrf.mxu0  ;;  %655 = vrot.lane.b32.xlu0 %v646_v36, %s1279_s23  ;;  %v759_v12 = vsel %vm754_vm5, %v756_v6, %v758_v8  ;;  %v1190_v23 = vpop.f32.mrf.mxu1  ;;  %v891_v25 = vrot.slane %v1406_v34, 4  ;;  %v629_v6 = vld [vmem:[%s1373_s22] sm:$0xff] }
  0xe2   : > { %v1416_v39 = vsel %vm814_vm4, %v816_v27, %v818_v35  ;;  %v620_v40 = vadd.f32 %v1368_v13, %v1413_v38  ;;  %v647_v41 = vrot.slane %v1413_v38, 1  ;;  %v704_v43 = vrot.slane %v1413_v38, 2 }
  0xe3   : > { %v1422_v42 = vpop.f32.mrf.mxu0  ;;  %v760_v9 = vrot.slane %v1413_v38, 6  ;;  %v1498_v26 = vsel %vm754_vm5, %v1002_v21, %v1003_v22  ;;  %v489_v27 = vpop.f32.mrf.mxu1 }
  0xe4   : > { %626 = vst.msk [vmem:[%s1373_s22 + $0x18] sm:$0xff] %vm372_vm1, %v620_v40  ;;  %v820_v44 = vrot.slane %v1422_v42, 7  ;;  %v648_v45 = vsel %vm641_vm3, %v645_v33, %v647_v41  ;;  %v705_v54 = vsel %vm698_vm2, %v702_v37, %v704_v43  ;;  %v893_v20 = vrot.slane %v1422_v42, 4 }
  0xe5   : > { %657 = vrot.lane.b32.xlu1 %v648_v45, %s1279_s23  ;;  %v436_v47 = vpop.f32.mrf.mxu0  ;;  %712 = vrot.lane.b32.xlu0 %v703_v46, %s1278_s15  ;;  %v761_v15 = vsel %vm754_vm5, %v758_v8, %v760_v9  ;;  %v1191_v32 = vpop.f32.mrf.mxu1  ;;  %v1005_v36 = vrot.slane %v489_v27, 6  ;;  %v945_v46 = vrot.slane %v1406_v34, 5 }
  0xe6   : > { %v1432_v48 = vsel %vm814_vm4, %v818_v35, %v820_v44  ;;  %v621_v49 = vadd.f32 %v1368_v13, %v436_v47  ;;  %v706_v50 = vrot.slane %v436_v47, 2  ;;  %v649_v52 = vrot.slane %v436_v47, 1 }
  0xe7   : > { %v1436_v51 = vpop.f32.mrf.mxu0  ;;  %v762_v11 = vrot.slane %v436_v47, 6  ;;  %v894_v29 = vsel %vm889_vm6, %v891_v25, %v893_v20  ;;  %v892_v35 = vsel %vm889_vm6, %v890_v30, %v891_v25  ;;  %v494_v37 = vpop.f32.mrf.mxu1 }
  0xe8   : > { %627 = vst.msk [vmem:[%s1373_s22 + $0x20] sm:$0xff] %vm372_vm1, %v621_v49  ;;  %v822_v53 = vrot.slane %v1436_v51, 7  ;;  %v707_v55 = vsel %vm698_vm2, %v704_v43, %v706_v50  ;;  %v650_v62 = vsel %vm641_vm3, %v647_v41, %v649_v52  ;;  %v895_v33 = vrot.slane %v1436_v51, 4 }
  0xe9   : > { %714 = vrot.lane.b32.xlu1 %v705_v54, %s1278_s15  ;;  %v440_v56 = vpop.f32.mrf.mxu0  ;;  %716 = vrot.lane.b32.xlu0 %v707_v55, %s1278_s15  ;;  %v763_v14 = vsel %vm754_vm5, %v760_v9, %v762_v11  ;;  %v1007_v40 = vrot.slane %v494_v37, 6  ;;  %v1512_v41 = vsel %vm754_vm5, %v1003_v22, %v1005_v36  ;;  %v1194_v43 = vpop.f32.mrf.mxu1  ;;  %v944_v49 = vrot.slane %v1388_v24, 5 }
  0xea   : > { %v1445_v57 = vsel %vm814_vm4, %v820_v44, %v822_v53  ;;  %v622_v58 = vadd.f32 %v1368_v13, %v440_v56  ;;  %v651_v59 = vrot.slane %v440_v56, 1  ;;  %v708_v3 = vrot.slane %v440_v56, 2 }
  0xeb   : > { %v1449_v60 = vpop.f32.mrf.mxu0  ;;  %v764_v13 = vrot.slane %v440_v56, 6  ;;  %v1515_v44 = vsel %vm754_vm5, %v1005_v36, %v1007_v40  ;;  %v896_v45 = vsel %vm889_vm6, %v893_v20, %v895_v33  ;;  %v1522_v47 = vpop.f32.mrf.mxu1  ;;  %v632_v23 = vld [vmem:[%s1373_s22 + $0x18] sm:$0xff] }
  0xec   : > { %628 = vst.msk [vmem:[%s1373_s22 + $0x28] sm:$0xff] %vm372_vm1, %v622_v58  ;;  %v824_v61 = vrot.slane %v1449_v60, 7  ;;  %v652_v63 = vsel %vm641_vm3, %v649_v52, %v651_v59  ;;  %v709_v5 = vsel %vm698_vm2, %v706_v50, %v708_v3  ;;  %v897_v28 = vrot.slane %v1449_v60, 4 }
  0xed   : > { %659 = vrot.lane.b32.xlu1 %v650_v62, %s1279_s23  ;;  %v549_v0 = vpop.f32.mrf.mxu0  ;;  %661 = vrot.lane.b32.xlu0 %v652_v63, %s1279_s23  ;;  %v765_v16 = vsel %vm754_vm5, %v762_v11, %v764_v13  ;;  %v1195_v52 = vpop.f32.mrf.mxu1  ;;  %v1009_v54 = vrot.slane %v1522_v47, 6  ;;  %v949_v62 = vrot.slane %v1436_v51, 5 }
  0xee   : > { %v1460_v1 = vsel %vm814_vm4, %v822_v53, %v824_v61  ;;  %v898_v38 = vsel %vm889_vm6, %v895_v33, %v897_v28  ;;  %v946_v53 = vsel %vm943_vm7, %v944_v49, %v945_v46 }
  0xef   : > { %v1463_v2 = vpop.f32.mrf.mxu0  ;;  %v1532_v56 = vsel %vm754_vm5, %v1007_v40, %v1009_v54 }
  0xf1   : > { %663 = vrot.lane.b32.xlu1 %v651_v59, %s1279_s23  ;;  %v553_v4 = vpop.f32.mrf.mxu0  ;;  %686 = vrot.lane.b32.xlu0 %v549_v0, %s1279_s23 }
  0xf3   : > { %v554_v50 = vpop.f32.mrf.mxu0  ;;  %v634_v36 = vld [vmem:[%s1373_s22 + $0x28] sm:$0x7f] }
  0xf5   : > { %718 = vrot.lane.b32.xlu1 %v709_v5, %s1278_s15  ;;  %720 = vrot.lane.b32.xlu0 %v708_v3, %s1278_s15  ;;  %v558_v55 = vpop.f32.mrf.mxu0  ;;  %v951_v5 = vrot.slane %v1449_v60, 5 }
  0xf7   : > { %v559_v58 = vpop.f32.mrf.mxu0 }
  0xf9   : > { %742 = vrot.lane.b32.xlu1 %v549_v0, %s1278_s15  ;;  %766 = vrot.lane.b32.xlu0 %v757_v10, %s1280_s24  ;;  %v560_v63 = vpop.f32.mrf.mxu0  ;;  %v630_v10 = vld [vmem:[%s1373_s22 + $0x8] sm:$0xff] }
  0xfb   : > { %v561_v3 = vpop.f32.mrf.mxu0 }
  0xfd   : > { %768 = vrot.lane.b32.xlu1 %v759_v12, %s1280_s24  ;;  %770 = vrot.lane.b32.xlu0 %v761_v15, %s1280_s24 }
 0x101   : > { %772 = vrot.lane.b32.xlu1 %v763_v14, %s1280_s24  ;;  %774 = vrot.lane.b32.xlu0 %v765_v16, %s1280_s24 }
 0x105   : > { %776 = vrot.lane.b32.xlu1 %v764_v13, %s1280_s24  ;;  %797 = vrot.lane.b32.xlu0 %v549_v0, %s1280_s24  ;;  %v631_v13 = vld [vmem:[%s1373_s22 + $0x10] sm:$0xff] }
 0x109   : > { %852 = vrot.lane.b32.xlu1 %v1388_v24, %s1279_s23  ;;  %854 = vrot.lane.b32.xlu0 %v1406_v34, %s1279_s23  ;;  %v1202_v34 = vpop.f32.mrf.mxu1  ;;  %v947_v24 = vrot.slane %v1422_v42, 5 }
 0x10b   : > { %v1535_v59 = vpop.f32.mrf.mxu1  ;;  %v948_v4 = vsel %vm943_vm7, %v945_v46, %v947_v24 }
 0x10d   : > { %856 = vrot.lane.b32.xlu1 %v1422_v42, %s1279_s23  ;;  %858 = vrot.lane.b32.xlu0 %v1436_v51, %s1279_s23  ;;  %v1203_v0 = vpop.f32.mrf.mxu1  ;;  %v950_v42 = vsel %vm943_vm7, %v947_v24, %v949_v62  ;;  %v952_v51 = vsel %vm943_vm7, %v949_v62, %v951_v5 }
 0x111   : > { %860 = vrot.lane.b32.xlu1 %v1449_v60, %s1279_s23  ;;  %901 = vrot.lane.b32.xlu0 %v894_v29, %s1278_s15 }
 0x115   : > { %899 = vrot.lane.b32.xlu1 %v892_v35, %s1278_s15  ;;  %905 = vrot.lane.b32.xlu0 %v898_v38, %s1278_s15  ;;  %v684_v38 = vld [vmem:[%s1373_s22 + $0x2f] sm:$0x1] }
 0x119   : > { %903 = vrot.lane.b32.xlu1 %v896_v45, %s1278_s15  ;;  %879 = vrot.lane.b32.xlu0 %v1463_v2, %s1279_s23 }
 0x11d   : > { %907 = vrot.lane.b32.xlu1 %v897_v28, %s1278_s15  ;;  %953 = vrot.lane.b32.xlu0 %v946_v53, %s1280_s24  ;;  %v633_v28 = vld [vmem:[%s1373_s22 + $0x20] sm:$0xff] }
 0x121   : > { %930 = vrot.lane.b32.xlu1 %v554_v50, %s1278_s15  ;;  %928 = vrot.lane.b32.xlu0 %v1463_v2, %s1278_s15 }
 0x125   : > { %955 = vrot.lane.b32.xlu1 %v948_v4, %s1280_s24  ;;  %957 = vrot.lane.b32.xlu0 %v950_v42, %s1280_s24 }
 0x129   : > { %959 = vrot.lane.b32.xlu1 %v952_v51, %s1280_s24  ;;  %961 = vrot.lane.b32.xlu0 %v951_v5, %s1280_s24 }
 0x12d   : > { %981 = vrot.lane.b32.xlu1 %v1463_v2, %s1280_s24  ;;  %983 = vrot.lane.b32.xlu0 %v554_v50, %s1280_s24 }
 0x14f   : > { %v654_v7 = vpop.permute.xlu0 %653  ;;  %v711_v9 = vpop.permute.xlu1 %710 }
 0x150   : > { %v671_v8 = vadd.f32 %v654_v7, %v629_v6 }
 0x152   : > { %677 = vst.msk [vmem:[%s1373_s22] sm:$0xff] %vm372_vm1, %v671_v8 }
 0x153   : > { %v656_v11 = vpop.permute.xlu0 %655 }
 0x154   : > { %v672_v12 = vadd.f32 %v656_v11, %v630_v10 }
 0x156   : > { %678 = vst.msk [vmem:[%s1373_s22 + $0x8] sm:$0xff] %vm372_vm1, %v672_v12 }
 0x157   : > { %v658_v15 = vpop.permute.xlu1 %657  ;;  %v713_v14 = vpop.permute.xlu0 %712 }
 0x158   : > { %v673_v16 = vadd.f32 %v658_v15, %v631_v13 }
 0x159   : > { %v692_v17 = vld [vmem:[%s1373_s22] sm:$0xff] }
 0x15a   : > { %679 = vst.msk [vmem:[%s1373_s22 + $0x10] sm:$0xff] %vm372_vm1, %v673_v16  ;;  %v728_v19 = vadd.f32 %v711_v9, %v692_v17 }
 0x15b   : > { %v715_v18 = vpop.permute.xlu1 %714  ;;  %v717_v20 = vpop.permute.xlu0 %716 }
 0x15c   : > { %734 = vst.msk [vmem:[%s1373_s22] sm:$0xff] %vm372_vm1, %v728_v19 }
 0x15d   : > { %v693_v21 = vld [vmem:[%s1373_s22 + $0x8] sm:$0xff] }
 0x15e   : > { %v729_v22 = vadd.f32 %v713_v14, %v693_v21 }
 0x15f   : > { %v660_v25 = vpop.permute.xlu1 %659  ;;  %v662_v29 = vpop.permute.xlu0 %661 }
 0x160   : > { %v674_v27 = vadd.f32 %v660_v25, %v632_v23  ;;  %735 = vst.msk [vmem:[%s1373_s22 + $0x8] sm:$0xff] %vm372_vm1, %v729_v22  ;;  %v675_v32 = vadd.f32 %v662_v29, %v633_v28 }
 0x161   : > { %v694_v30 = vld [vmem:[%s1373_s22 + $0x10] sm:$0xff] }
 0x162   : > { %v730_v33 = vadd.f32 %v715_v18, %v694_v30  ;;  %680 = vst.msk [vmem:[%s1373_s22 + $0x18] sm:$0xff] %vm372_vm1, %v674_v27  ;;  %681 = vst.msk [vmem:[%s1373_s22 + $0x20] sm:$0xff] %vm372_vm1, %v675_v32 }
 0x163   : > { %v664_v35 = vpop.permute.xlu1 %663  ;;  %v687_v40 = vpop.permute.xlu0 %686  ;;  %v748_v34 = vld [vmem:[%s1373_s22] sm:$0xff] }
 0x164   : > { %736 = vst.msk [vmem:[%s1373_s22 + $0x10] sm:$0xff] %vm372_vm1, %v730_v33  ;;  %v676_v37 = vadd.f32 %v664_v35, %v634_v36  ;;  %v689_v43 = vadd.f32 %v687_v40, %v684_v38 }
 0x166   : > { %683 = vst.msk [vmem:[%s1373_s22 + $0x28] sm:$0x7f] %vm682_vm8, %v676_v37 }
 0x167   : > { %691 = vst.msk [vmem:[%s1373_s22 + $0x2f] sm:$0x1] %vm690_vm9, %v689_v43  ;;  %v719_v45 = vpop.permute.xlu1 %718  ;;  %v721_v46 = vpop.permute.xlu0 %720  ;;  %v749_v4 = vld [vmem:[%s1373_s22 + $0x8] sm:$0xff] }
 0x169   : > { %v695_v49 = vld [vmem:[%s1373_s22 + $0x18] sm:$0xff]  ;;  %v696_v50 = vld [vmem:[%s1373_s22 + $0x20] sm:$0xff] }
 0x16a   : > { %v731_v52 = vadd.f32 %v717_v20, %v695_v49  ;;  %v732_v53 = vadd.f32 %v719_v45, %v696_v50 }
 0x16b   : > { %v743_v55 = vpop.permute.xlu1 %742  ;;  %v767_v58 = vpop.permute.xlu0 %766  ;;  %v750_v51 = vld [vmem:[%s1373_s22 + $0x10] sm:$0xff] }
 0x16c   : > { %737 = vst.msk [vmem:[%s1373_s22 + $0x18] sm:$0xff] %vm372_vm1, %v731_v52  ;;  %738 = vst.msk [vmem:[%s1373_s22 + $0x20] sm:$0xff] %vm372_vm1, %v732_v53  ;;  %v784_v62 = vadd.f32 %v767_v58, %v748_v34 }
 0x16d   : > { %v697_v24 = vld [vmem:[%s1373_s22 + $0x28] sm:$0x3f] }
 0x16e   : > { %v733_v63 = vadd.f32 %v721_v46, %v697_v24  ;;  %v741_v0 = vld [vmem:[%s1373_s22 + $0x2e] sm:$0x3]  ;;  %790 = vst.msk [vmem:[%s1373_s22] sm:$0xff] %vm372_vm1, %v784_v62 }
 0x16f   : > { %v745_v3 = vadd.f32 %v743_v55, %v741_v0  ;;  %v769_v5 = vpop.permute.xlu1 %768  ;;  %v771_v6 = vpop.permute.xlu0 %770 }
 0x170   : > { %740 = vst.msk [vmem:[%s1373_s22 + $0x28] sm:$0x3f] %vm739_vm10, %v733_v63  ;;  %v785_v42 = vadd.f32 %v769_v5, %v749_v4  ;;  %v786_v7 = vadd.f32 %v771_v6, %v750_v51 }
 0x171   : > { %747 = vst.msk [vmem:[%s1373_s22 + $0x2e] sm:$0x3] %vm746_vm11, %v745_v3 }
 0x172   : > { %791 = vst.msk [vmem:[%s1373_s22 + $0x8] sm:$0xff] %vm372_vm1, %v785_v42  ;;  %792 = vst.msk [vmem:[%s1373_s22 + $0x10] sm:$0xff] %vm372_vm1, %v786_v7 }
 0x173   : > { %v751_v8 = vld [vmem:[%s1373_s22 + $0x18] sm:$0xff]  ;;  %v773_v9 = vpop.permute.xlu1 %772  ;;  %v752_v11 = vld [vmem:[%s1373_s22 + $0x20] sm:$0xff]  ;;  %v775_v12 = vpop.permute.xlu0 %774 }
 0x174   : > { %v787_v10 = vadd.f32 %v773_v9, %v751_v8  ;;  %v788_v13 = vadd.f32 %v775_v12, %v752_v11 }
 0x175   : > { %v802_v15 = vld [vmem:[%s1373_s22] sm:$0xff] }
 0x176   : > { %793 = vst.msk [vmem:[%s1373_s22 + $0x18] sm:$0xff] %vm372_vm1, %v787_v10  ;;  %794 = vst.msk [vmem:[%s1373_s22 + $0x20] sm:$0xff] %vm372_vm1, %v788_v13  ;;  %v832_v17 = vadd.f32 %v1400_v31, %v802_v15 }
 0x177   : > { %v777_v14 = vpop.permute.xlu1 %776  ;;  %v753_v16 = vld [vmem:[%s1373_s22 + $0x28] sm:$0x3]  ;;  %v798_v20 = vpop.permute.xlu0 %797 }
 0x178   : > { %v789_v18 = vadd.f32 %v777_v14, %v753_v16  ;;  %v796_v19 = vld [vmem:[%s1373_s22 + $0x2a] sm:$0x3f]  ;;  %838 = vst.msk [vmem:[%s1373_s22] sm:$0xff] %vm372_vm1, %v832_v17 }
 0x179   : > { %v800_v21 = vadd.f32 %v798_v20, %v796_v19  ;;  %v803_v22 = vld [vmem:[%s1373_s22 + $0x8] sm:$0xff]  ;;  %v804_v25 = vld [vmem:[%s1373_s22 + $0x10] sm:$0xff] }
 0x17a   : > { %795 = vst.msk [vmem:[%s1373_s22 + $0x28] sm:$0x3] %vm746_vm11, %v789_v18  ;;  %v833_v23 = vadd.f32 %v1416_v39, %v803_v22  ;;  %v834_v27 = vadd.f32 %v1432_v48, %v804_v25 }
 0x17b   : > { %801 = vst.msk [vmem:[%s1373_s22 + $0x2a] sm:$0x3f] %vm739_vm10, %v800_v21  ;;  %v853_v31 = vpop.permute.xlu1 %852  ;;  %v855_v28 = vpop.permute.xlu0 %854 }
 0x17c   : > { %839 = vst.msk [vmem:[%s1373_s22 + $0x8] sm:$0xff] %vm372_vm1, %v833_v23  ;;  %840 = vst.msk [vmem:[%s1373_s22 + $0x10] sm:$0xff] %vm372_vm1, %v834_v27 }
 0x17d   : > { %v805_v29 = vld [vmem:[%s1373_s22 + $0x18] sm:$0xff]  ;;  %v806_v39 = vld [vmem:[%s1373_s22 + $0x20] sm:$0xff] }
 0x17e   : > { %v835_v30 = vadd.f32 %v1445_v57, %v805_v29  ;;  %v836_v33 = vadd.f32 %v1460_v1, %v806_v39 }
 0x17f   : > { %v857_v32 = vpop.permute.xlu1 %856  ;;  %v847_v35 = vld [vmem:[%s1373_s22] sm:$0xff]  ;;  %v859_v48 = vpop.permute.xlu0 %858 }
 0x180   : > { %841 = vst.msk [vmem:[%s1373_s22 + $0x18] sm:$0xff] %vm372_vm1, %v835_v30  ;;  %v867_v37 = vadd.f32 %v853_v31, %v847_v35  ;;  %842 = vst.msk [vmem:[%s1373_s22 + $0x20] sm:$0xff] %vm372_vm1, %v836_v33 }
 0x181   : > { %v807_v36 = vld [vmem:[%s1373_s22 + $0x28] sm:$0x1] }
 0x182   : > { %v837_v57 = vadd.f32 %v824_v61, %v807_v36  ;;  %v844_v38 = vld [vmem:[%s1373_s22 + $0x29] sm:$0x7f]  ;;  %872 = vst.msk [vmem:[%s1373_s22] sm:$0xff] %vm372_vm1, %v867_v37 }
 0x183   : > { %v848_v1 = vld [vmem:[%s1373_s22 + $0x8] sm:$0xff]  ;;  %v861_v40 = vpop.permute.xlu1 %860  ;;  %v845_v43 = vadd.f32 %v844_v38, %v1463_v2  ;;  %v849_v46 = vld [vmem:[%s1373_s22 + $0x10] sm:$0xff]  ;;  %v902_v49 = vpop.permute.xlu0 %901 }
 0x184   : > { %843 = vst.msk [vmem:[%s1373_s22 + $0x28] sm:$0x1] %vm690_vm9, %v837_v57  ;;  %v868_v45 = vadd.f32 %v855_v28, %v848_v1  ;;  %v869_v50 = vadd.f32 %v857_v32, %v849_v46 }
 0x185   : > { %846 = vst.msk [vmem:[%s1373_s22 + $0x29] sm:$0x7f] %vm682_vm8, %v845_v43 }
 0x186   : > { %873 = vst.msk [vmem:[%s1373_s22 + $0x8] sm:$0xff] %vm372_vm1, %v868_v45  ;;  %874 = vst.msk [vmem:[%s1373_s22 + $0x10] sm:$0xff] %vm372_vm1, %v869_v50 }
 0x187   : > { %v850_v60 = vld [vmem:[%s1373_s22 + $0x18] sm:$0xff]  ;;  %v900_v61 = vpop.permute.xlu1 %899  ;;  %v851_v52 = vld [vmem:[%s1373_s22 + $0x20] sm:$0xff]  ;;  %v906_v53 = vpop.permute.xlu0 %905 }
 0x188   : > { %v870_v2 = vadd.f32 %v859_v48, %v850_v60  ;;  %v871_v55 = vadd.f32 %v861_v40, %v851_v52 }
 0x189   : > { %v884_v34 = vld [vmem:[%s1373_s22] sm:$0xff] }
 0x18a   : > { %875 = vst.msk [vmem:[%s1373_s22 + $0x18] sm:$0xff] %vm372_vm1, %v870_v2  ;;  %876 = vst.msk [vmem:[%s1373_s22 + $0x20] sm:$0xff] %vm372_vm1, %v871_v55  ;;  %v914_v58 = vadd.f32 %v900_v61, %v884_v34 }
 0x18b   : > { %v904_v24 = vpop.permute.xlu1 %903  ;;  %v880_v62 = vpop.permute.xlu0 %879 }
 0x18c   : > { %v877_v63 = vld [vmem:[%s1373_s22 + $0x28] sm:$0xff]  ;;  %919 = vst.msk [vmem:[%s1373_s22] sm:$0xff] %vm372_vm1, %v914_v58 }
 0x18d   : > { %v885_v0 = vld [vmem:[%s1373_s22 + $0x8] sm:$0xff]  ;;  %v882_v3 = vadd.f32 %v880_v62, %v877_v63  ;;  %v886_v5 = vld [vmem:[%s1373_s22 + $0x10] sm:$0xff] }
 0x18e   : > { %v915_v4 = vadd.f32 %v902_v49, %v885_v0  ;;  %v916_v42 = vadd.f32 %v904_v24, %v886_v5 }
 0x18f   : > { %883 = vst.msk [vmem:[%s1373_s22 + $0x28] sm:$0xff] %vm372_vm1, %v882_v3  ;;  %v908_v51 = vpop.permute.xlu1 %907  ;;  %v954_v6 = vpop.permute.xlu0 %953 }
 0x190   : > { %920 = vst.msk [vmem:[%s1373_s22 + $0x8] sm:$0xff] %vm372_vm1, %v915_v4  ;;  %921 = vst.msk [vmem:[%s1373_s22 + $0x10] sm:$0xff] %vm372_vm1, %v916_v42 }
 0x191   : > { %v887_v7 = vld [vmem:[%s1373_s22 + $0x18] sm:$0xff]  ;;  %v888_v9 = vld [vmem:[%s1373_s22 + $0x20] sm:$0xf] }
 0x192   : > { %v917_v8 = vadd.f32 %v906_v53, %v887_v7  ;;  %v918_v10 = vadd.f32 %v908_v51, %v888_v9 }
 0x193   : > { %v931_v11 = vpop.permute.xlu1 %930  ;;  %v938_v12 = vld [vmem:[%s1373_s22] sm:$0xff]  ;;  %v929_v13 = vpop.permute.xlu0 %928 }
 0x194   : > { %922 = vst.msk [vmem:[%s1373_s22 + $0x18] sm:$0xff] %vm372_vm1, %v917_v8  ;;  %v968_v15 = vadd.f32 %v954_v6, %v938_v12 }
 0x195   : > { %924 = vst.msk [vmem:[%s1373_s22 + $0x20] sm:$0xf] %vm923_vm12, %v918_v10 }
 0x196   : > { %v925_v14 = vld [vmem:[%s1373_s22 + $0x24] sm:$0xff]  ;;  %v926_v16 = vld [vmem:[%s1373_s22 + $0x2c] sm:$0xf]  ;;  %973 = vst.msk [vmem:[%s1373_s22] sm:$0xff] %vm372_vm1, %v968_v15 }
 0x197   : > { %v934_v17 = vadd.f32 %v929_v13, %v925_v14  ;;  %v935_v18 = vadd.f32 %v931_v11, %v926_v16  ;;  %v939_v19 = vld [vmem:[%s1373_s22 + $0x8] sm:$0xff]  ;;  %v956_v20 = vpop.permute.xlu1 %955  ;;  %v940_v21 = vld [vmem:[%s1373_s22 + $0x10] sm:$0xff]  ;;  %v958_v22 = vpop.permute.xlu0 %957 }
 0x198   : > { %v969_v23 = vadd.f32 %v956_v20, %v939_v19  ;;  %v970_v25 = vadd.f32 %v958_v22, %v940_v21 }
 0x199   : > { %936 = vst.msk [vmem:[%s1373_s22 + $0x24] sm:$0xff] %vm372_vm1, %v934_v17 }
 0x19a   : > { %937 = vst.msk [vmem:[%s1373_s22 + $0x2c] sm:$0xf] %vm923_vm12, %v935_v18 }
 0x19b   : > { %974 = vst.msk [vmem:[%s1373_s22 + $0x8] sm:$0xff] %vm372_vm1, %v969_v23  ;;  %975 = vst.msk [vmem:[%s1373_s22 + $0x10] sm:$0xff] %vm372_vm1, %v970_v25  ;;  %v941_v31 = vld [vmem:[%s1373_s22 + $0x18] sm:$0xff]  ;;  %v960_v27 = vpop.permute.xlu1 %959  ;;  %v962_v29 = vpop.permute.xlu0 %961 }
 0x19c   : > { %v942_v28 = vld [vmem:[%s1373_s22 + $0x20] sm:$0x7]  ;;  %v971_v30 = vadd.f32 %v960_v27, %v941_v31 }
 0x19d   : > { %v972_v39 = vadd.f32 %v962_v29, %v942_v28  ;;  %v992_v32 = vld [vmem:[%s1373_s22] sm:$0xff] }
 0x19e   : > { %976 = vst.msk [vmem:[%s1373_s22 + $0x18] sm:$0xff] %vm372_vm1, %v971_v30  ;;  %v1016_v33 = vadd.f32 %v1498_v26, %v992_v32 }
 0x19f   : > { %978 = vst.msk [vmem:[%s1373_s22 + $0x20] sm:$0x7] %vm977_vm13, %v972_v39  ;;  %v982_v35 = vpop.permute.xlu1 %981  ;;  %v984_v48 = vpop.permute.xlu0 %983 }
 0x1a0   : > { %v979_v37 = vld [vmem:[%s1373_s22 + $0x23] sm:$0xff]  ;;  %1021 = vst.msk [vmem:[%s1373_s22] sm:$0xff] %vm372_vm1, %v1016_v33 }
 0x1a1   : > { %v980_v36 = vld [vmem:[%s1373_s22 + $0x2b] sm:$0x1f]  ;;  %v987_v1 = vadd.f32 %v982_v35, %v979_v37 }
 0x1a2   : > { %v993_v57 = vld [vmem:[%s1373_s22 + $0x8] sm:$0xff]  ;;  %v988_v38 = vadd.f32 %v984_v48, %v980_v36  ;;  %v994_v26 = vld [vmem:[%s1373_s22 + $0x10] sm:$0xff] }
 0x1a3   : > { %v1017_v40 = vadd.f32 %v1512_v41, %v993_v57  ;;  %v1018_v43 = vadd.f32 %v1515_v44, %v994_v26  ;;  %989 = vst.msk [vmem:[%s1373_s22 + $0x23] sm:$0xff] %vm372_vm1, %v987_v1  ;;  %v600_v44 = vpop.f32.mrf.mxu1 }
 0x1a4   : > { %991 = vst.msk [vmem:[%s1373_s22 + $0x2b] sm:$0x1f] %vm990_vm14, %v988_v38 }
 0x1a5   : > { %1022 = vst.msk [vmem:[%s1373_s22 + $0x8] sm:$0xff] %vm372_vm1, %v1017_v40  ;;  %1023 = vst.msk [vmem:[%s1373_s22 + $0x10] sm:$0xff] %vm372_vm1, %v1018_v43  ;;  %v995_v45 = vld [vmem:[%s1373_s22 + $0x18] sm:$0xff] }
 0x1a6   : > { %v996_v46 = vld [vmem:[%s1373_s22 + $0x20] sm:$0x3]  ;;  %v1019_v49 = vadd.f32 %v1532_v56, %v995_v45 }
 0x1a7   : > { %v1020_v50 = vadd.f32 %v1009_v54, %v996_v46 }
 0x1a8   : > { %1024 = vst.msk [vmem:[%s1373_s22 + $0x18] sm:$0xff] %vm372_vm1, %v1019_v49 }
 0x1a9   : > { %1025 = vst.msk [vmem:[%s1373_s22 + $0x20] sm:$0x3] %vm746_vm11, %v1020_v50 }
 0x1aa   : > { %v1026_v41 = vld [vmem:[%s1373_s22 + $0x22] sm:$0xff] }
 0x1ab   : > { %v1027_v60 = vld [vmem:[%s1373_s22 + $0x2a] sm:$0x3f]  ;;  %v1028_v61 = vadd.f32 %v1026_v41, %v1535_v59 }
 0x1ac   : > { %v1029_v2 = vadd.f32 %v1027_v60, %v600_v44 }
 0x1ad   : > { %1030 = vst.msk [vmem:[%s1373_s22 + $0x22] sm:$0xff] %vm372_vm1, %v1028_v61 }
 0x1ae   : > { %1031 = vst.msk [vmem:[%s1373_s22 + $0x2a] sm:$0x3f] %vm739_vm10, %v1029_v2 }
 0x1af PF: > { %s14_s17 = sadd.s32 1, %s1273_s17   ;;  %s1744_s15 = smov %s1269_s16 }
 0x1b0   : > { %p11_p5 = scmp.ge.s32.totalorder %s14_s17, 4   ;;  %s1745_s16 = smov %s1747_s18 }
 0x1b2   :  { %13 = sbr.rel (!%p11_p5) target bundleno = 2 (0x2), region = 69 }

// kernel: _lambda_.14
= control target key start
LH: loop header
LB: loop body
LE: loop exit
PB: predicated region body
PF: predicated region fallthrough
CT: control target
= control target key end

     0   :  { %v346_v1 = vmov 0.0   ;;  %vm347_vm0 = vmmov 0   ;;  %vm178_vm1 = vcmask 261120   ;;  %s436_s1 = inlined_call_operand.vmem [shape: bf16[288,32], index: 1, kind: input, shape index: {}]   ;;  %s437_s0 = inlined_call_operand.vmem [shape: bf16[8,288], index: 0, kind: input, shape index: {}]   ;;  %s438_s2 = inlined_call_operand.vmem [shape: f32[1,32], index: 2, kind: input, shape index: {}]   ;;  %s439_s3 = inlined_call_operand.vmem [shape: f32[8,32], index: 3, kind: output, shape index: {}]  }
   0x1   :  { %v325_v0 = vld [vmem:[%s436_s1 + $0x78] sm:$0xff]   ;;  %315 = vmatprep.subr.bf16.mxu1 %v346_v1  ;;  %319 = vmatprep.mubr.msk.bf16.mxu1 %vm347_vm0, %v346_v1  ;;  %v327_v3 = vld [vmem:[%s436_s1 + $0x70] sm:$0xff]   ;;  %v329_v5 = vld [vmem:[%s436_s1 + $0x68] sm:$0xff]  }
   0x2   :  { %v326_v2 = vld [vmem:[%s436_s1 + $0x38] sm:$0xff]   ;;  %290 = vmatprep.subr.bf16.mxu0 %v325_v0  ;;  %v328_v4 = vld [vmem:[%s436_s1 + $0x30] sm:$0xff]   ;;  %v330_v6 = vld [vmem:[%s436_s1 + $0x28] sm:$0xff]  }
   0x3   :  { %291 = vmatpush3.bf16.msra.mxu0 %v326_v2  ;;  %v331_v7 = vld [vmem:[%s436_s1 + $0x60] sm:$0xff]   ;;  %v333_v9 = vld [vmem:[%s436_s1 + $0x58] sm:$0xff]   ;;  %v337_v10 = vld [vmem:[%s436_s1 + $0x88] sm:$0xff]  }
   0x4   :  { %292 = vmatprep.subr.bf16.mxu0 %v327_v3  ;;  %v332_v8 = vld [vmem:[%s436_s1 + $0x20] sm:$0xff]   ;;  %v334_v11 = vld [vmem:[%s436_s1 + $0x18] sm:$0xff]   ;;  %316 = vmatpush3.bf16.msra.mxu1 %v337_v10  ;;  %v335_v13 = vld [vmem:[%s436_s1 + $0x50] sm:$0xff]  }
   0x5   :  { %317 = vmatprep.subr.bf16.mxu1 %v346_v1  ;;  %v340_v12 = vld [vmem:[%s436_s1 + $0x80] sm:$0xff]   ;;  %v343_v14 = vld [vmem:[%s437_s0 + $0x8] ss:$0 sps:$4 sm:$0xff]   ;;  %v336_v16 = vld [vmem:[%s436_s1 + $0x10] sm:$0xff]  }
   0x6   :  { %v15_v15 = vld [vmem:[%s437_s0] sm:$0xff]  ;;  %v338_v18 = vld [vmem:[%s436_s1 + $0x48] sm:$0xff]  }
   0x7   :  { %293 = vmatpush3.bf16.msra.mxu0 %v328_v4  ;;  %v269_v17 = vcombine.high %v15_v15, %v15_v15  ;;  %v339_v19 = vld [vmem:[%s436_s1 + $0x8] sm:$0xff]   ;;  %v341_v20 = vld [vmem:[%s436_s1 + $0x40] sm:$0xff]   ;;  %v268_v22 = vcombine.low %v15_v15, %v15_v15 }
   0x8   :  { %294 = vmatprep.subr.bf16.mxu0 %v329_v5  ;;  %318 = vmatpush3.bf16.msra.mxu1 %v340_v12  ;;  %v342_v21 = vld [vmem:[%s436_s1] sm:$0xff]  }
   0x9   :  { %214 = vmatprep.mubr.bf16.mxu0 %v269_v17  ;;  %v267_v28 = vld [vmem:[%s438_s2] ss:$0 sm:$0xff] }
   0xb   :  { %295 = vmatpush3.bf16.msra.mxu0 %v330_v6  ;;  %320 = vmatmul.mubr.msk.bf16.vlgmr.msra.gmra.mxu1 %vm178_vm1, %v343_v14 }
   0xc   :  { %296 = vmatprep.subr.bf16.mxu0 %v331_v7 }
   0xf   :  { %297 = vmatpush3.bf16.msra.mxu0 %v332_v8 }
  0x10   :  { %298 = vmatprep.subr.bf16.mxu0 %v333_v9 }
  0x13   :  { %299 = vmatpush3.bf16.msra.mxu0 %v334_v11 }
  0x14   :  { %300 = vmatprep.subr.bf16.mxu0 %v335_v13 }
  0x17   :  { %301 = vmatpush3.bf16.msra.mxu0 %v336_v16 }
  0x18   :  { %302 = vmatprep.subr.bf16.mxu0 %v338_v18 }
  0x1b   :  { %303 = vmatpush3.bf16.msra.mxu0 %v339_v19 }
  0x1c   :  { %304 = vmatprep.subr.bf16.mxu0 %v341_v20 }
  0x1f   :  { %305 = vmatpush3.bf16.msra.mxu0 %v342_v21 }
  0x22   :  { %215 = vmatmul.mubr.bf16.vlgmr.msra.gmra.mxu0 %v268_v22 }
  0xcb   :  { %v256_v23 = vpop.f32.mrf.mxu1 }
  0xcd   :  { %v321_v24 = vpop.f32.mrf.mxu1 }
  0xcf   :  { %v259_v25 = vpop.f32.mrf.mxu1 }
  0xd1   :  { %v322_v26 = vpop.f32.mrf.mxu1 }
  0xe2   :  { %v306_v27 = vpop.f32.mrf.mxu0 }
  0xe4   :  { %v307_v29 = vpop.f32.mrf.mxu0 }
  0xe5   :  { %v308_v30 = vadd.f32 %v307_v29, %v306_v27 }
  0xe6   :  { %v309_v31 = vpop.f32.mrf.mxu0 }
  0xe7   :  { %v217_v32 = vadd.f32 %v308_v30, %v267_v28 }
  0xe8   :  { %v310_v33 = vpop.f32.mrf.mxu0 }
  0xe9   :  { %v257_v34 = vadd.f32 %v256_v23, %v217_v32 }
  0xeb   :  { %262 = vst.msk [vmem:[%s439_s3] sm:$0xff] %vm178_vm1, %v257_v34 }

</bundles_post_ra>
